<compile_context>
chip_gen: v5e
topology: v5e:2x2
jax: 0.10.0
libtpu: 0.0.40
codegen_flags: <defaults>
</compile_context>

<pallas_src>
import functools

import jax
import jax.numpy as jnp
from jax.experimental import pallas as pl
from jax.experimental.pallas import tpu as pltpu

EPS = 1e-5          # nn.BatchNorm1d default eps
LANE = 128          # TPU vreg lane width; time is padded to a multiple of this


# ----------------------------------------------------------------------------
# Fused kernel: all conv+BN(+tanh) blocks + mask/residual for one batch elem.
# ----------------------------------------------------------------------------
def _postnet_kernel(*refs, n_layers, K, t_real):
    """refs = (x, mask, w0, b0, ..., w_{n-1}, b_{n-1}, out, buf_a, buf_b).

    x     : [1, C_mel, T_pad]      time zero-padded to T_pad (multiple of 128)
    mask  : [1, 1, T_pad]
    w_i   : [K, C_out_i, C_in_i]   bf16 conv weight with eval-mode BN folded in
    b_i   : [C_out_i, 1]           f32 conv bias + BN shift folded in
    out   : [1, C_mel, T_pad]
    buf_* : [C_max, T_pad + 2*LANE] bf16 ping-pong activation buffers; the
            activation lives at lane offset LANE (aligned centre stores) and
            only the pad-wide halo slivers next to it are kept at zero.
    """
    x_ref, mask_ref = refs[0], refs[1]
    w_refs = [refs[2 + 2 * i] for i in range(n_layers)]
    b_refs = [refs[3 + 2 * i] for i in range(n_layers)]
    o_ref = refs[2 + 2 * n_layers]
    bufs = (refs[3 + 2 * n_layers], refs[4 + 2 * n_layers])

    pad = K // 2
    t_pad = o_ref.shape[-1]
    c_mel = x_ref.shape[1]
    off = LANE                              # lane offset of the activation
    need_tail = t_real < t_pad

    # Zero ONLY the halo slivers the shifted conv windows read:
    # columns [off-pad, off) and [off+t_pad, off+t_pad+pad).  The centre is
    # always overwritten before it is read, and rows beyond a layer's C_in are
    # never read.  Re-done every grid step (scratch is per-core under megacore
    # sharding, so this must NOT be gated on program_id == 0).
    zero_halo = jnp.zeros((bufs[0].shape[0], pad), bufs[0].dtype)
    for buf in bufs:
        buf[:, off - pad:off] = zero_halo
        buf[:, off + t_pad:off + t_pad + pad] = zero_halo

    # Stage the (already zero-padded-in-time) input as bf16 for the conv path;
    # the residual add at the end re-reads x_ref in f32.
    bufs[0][0:c_mel, off:off + t_pad] = x_ref[0].astype(jnp.bfloat16)

    cur = 0
    for i in range(n_layers):                       # static unroll over layers
        src = bufs[cur]
        _, c_out, c_in = w_refs[i].shape

        # Conv1d as K accumulating MXU matmuls on time-shifted bf16 views
        # (no materialized im2col stack); accumulate in f32.
        y = jnp.dot(w_refs[i][0],
                    src[0:c_in, off - pad:off - pad + t_pad],
                    preferred_element_type=jnp.float32)
        for k in range(1, K):
            y += jnp.dot(w_refs[i][k],
                         src[0:c_in, off - pad + k:off - pad + k + t_pad],
                         preferred_element_type=jnp.float32)
        y = y + b_refs[i][...]                # conv bias + BN shift (f32)

        if i != n_layers - 1:
            y = jnp.tanh(y)                   # f32 tanh (keeps accuracy on all chips)
            nxt = 1 - cur
            bufs[nxt][0:c_out, off:off + t_pad] = y.astype(jnp.bfloat16)
            if need_tail:
                # Re-zero only the `pad` tail columns the next conv window can
                # reach, so every layer sees PyTorch's per-layer zero padding.
                bufs[nxt][0:c_out, off + t_real:off + t_real + pad] = (
                    jnp.zeros((c_out, pad), jnp.bfloat16))
            cur = nxt
        else:
            # Last block has no tanh; fuse Dropout (identity in eval), the
            # length mask and the residual add (all in f32).
            out = x_ref[0].astype(jnp.float32) + y * mask_ref[0]
            o_ref[0] = out.astype(o_ref.dtype)


# ----------------------------------------------------------------------------
# Host-side parameter folding + wrapper
# ----------------------------------------------------------------------------
def _fold_bn_into_conv(p):
    """Fold eval-mode BatchNorm1d into the conv weight/bias.  Weight is kept as
    K separate [C_out, C_in] taps (bf16, MXU-native); bias/shift stays f32."""
    scale = p["gamma"] * jax.lax.rsqrt(p["var"] + EPS)             # [c_out, 1]
    w = (p["w"] * scale[None, :, :]).astype(jnp.bfloat16)          # [K, c_out, c_in]
    b = (p["b"] - p["mean"]) * scale + p["beta"]                   # [c_out, 1]
    return w, b.astype(jnp.float32)


def postnet_forward(x, mask, params):
    """x: [B, 80, T], mask: [B, 1, T] -> [B, 80, T]  (inference semantics)."""
    B, c_mel, T = x.shape
    n_layers = len(params)
    K = params[0]["w"].shape[0]

    # Lane-dense time: pad T up to a multiple of 128; the kernel re-zeros the
    # pad-wide tail sliver between layers and the wrapper slices it off.
    t_pad = pl.cdiv(T, LANE) * LANE
    if t_pad != T:
        x_in = jnp.pad(x, ((0, 0), (0, 0), (0, t_pad - T)))
        m_in = jnp.pad(mask, ((0, 0), (0, 0), (0, t_pad - T)))
    else:
        x_in, m_in = x, mask
    m_in = m_in.astype(jnp.float32)

    folded = [_fold_bn_into_conv(p) for p in params]
    c_max = max([c_mel] + [w.shape[1] for w, _ in folded])
    buf_shape = (c_max, t_pad + 2 * LANE)

    in_specs = [
        pl.BlockSpec((1, c_mel, t_pad), lambda i: (i, 0, 0)),   # x
        pl.BlockSpec((1, 1, t_pad), lambda i: (i, 0, 0)),       # mask
    ]
    flat_params = []
    for w, b in folded:
        in_specs.append(pl.BlockSpec(w.shape, lambda i: (0, 0, 0)))
        in_specs.append(pl.BlockSpec(b.shape, lambda i: (0, 0)))
        flat_params += [w, b]

    # Explicit VMEM budget: 2 bf16 ping-pong buffers + double-buffered
    # x/mask/out blocks + double-buffered (constant-index) weights & biases,
    # with generous headroom for compiler temporaries.
    est = 2 * buf_shape[0] * buf_shape[1] * 2               # bf16 scratch
    est += 2 * (c_mel * t_pad * 4) * 2                      # x + out blocks
    est += 2 * (t_pad * 4)                                  # mask block
    est += 2 * sum(w.size * 2 + b.size * 4 for w, b in folded)
    vmem_limit = min(2 * est + (8 << 20), 100 << 20)

    kernel = functools.partial(_postnet_kernel, n_layers=n_layers, K=K,
                               t_real=T)

    out = pl.pallas_call(
        kernel,
        out_shape=jax.ShapeDtypeStruct((B, c_mel, t_pad), x.dtype),
        grid_spec=pltpu.PrefetchScalarGridSpec(
            num_scalar_prefetch=0,
            grid=(B,),
            in_specs=in_specs,
            out_specs=pl.BlockSpec((1, c_mel, t_pad), lambda i: (i, 0, 0)),
            scratch_shapes=[
                pltpu.VMEM(buf_shape, jnp.bfloat16),
                pltpu.VMEM(buf_shape, jnp.bfloat16),
            ],
        ),
        compiler_params=pltpu.CompilerParams(
            dimension_semantics=("parallel",),
            vmem_limit_bytes=vmem_limit),
    )(x_in, m_in, *flat_params)

    return out[:, :, :T] if t_pad != T else out


# ----------------------------------------------------------------------------
# Deterministic parameter init (synthetic, mirrors module __init__ shapes)
# ----------------------------------------------------------------------------
def init_params(key, n_blocks, in_out_channel, mid_channel, kernel_size):
    params = []
    for i in range(n_blocks):
        c_in = in_out_channel if i == 0 else mid_channel
        c_out = in_out_channel if i == n_blocks - 1 else mid_channel
        key, k1, k2, k3, k4, k5, k6 = jax.random.split(key, 7)
        params.append(dict(
            w=0.05 * jax.random.normal(k1, (kernel_size, c_out, c_in),
                                       jnp.float32),
            b=0.05 * jax.random.normal(k2, (c_out, 1), jnp.float32),
            gamma=1.0 + 0.1 * jax.random.normal(k3, (c_out, 1), jnp.float32),
            beta=0.1 * jax.random.normal(k4, (c_out, 1), jnp.float32),
            mean=0.1 * jax.random.normal(k5, (c_out, 1), jnp.float32),
            var=0.5 + 0.1 * jnp.abs(jax.random.normal(k6, (c_out, 1),
                                                      jnp.float32)),
        ))
    return params


# ----------------------------------------------------------------------------
# Pure-JAX f32 reference (for correctness check)
# ----------------------------------------------------------------------------
def ref_forward(x, mask, params):
    h = x
    n = len(params)
    for i, p in enumerate(params):
        w_oik = jnp.transpose(p["w"], (1, 2, 0))       # (C_out, C_in, K)
        pad = p["w"].shape[0] // 2
        h = jax.lax.conv_general_dilated(
            h, w_oik, window_strides=(1,), padding=((pad, pad),),
            dimension_numbers=("NCH", "OIH", "NCH"))
        h = h + p["b"][None]
        h = (h - p["mean"][None]) * (
            p["gamma"][None] * jax.lax.rsqrt(p["var"][None] + EPS)
        ) + p["beta"][None]
        if i != n - 1:
            h = jnp.tanh(h)
    return x + h * mask


# ----------------------------------------------------------------------------
if __name__ == "__main__":
    B, MEL, MID, K, NB = 2, 80, 128, 5, 5      # small but module-consistent

    key = jax.random.PRNGKey(0)
    key, kp = jax.random.split(key)
    params = init_params(kp, NB, MEL, MID, K)

    # T=256 exercises the lane-dense fast path; T=200 exercises the padded
    # (non-multiple-of-128) tail path.
    for T in (256, 200):
        key, kx = jax.random.split(key)
        x = jax.random.normal(kx, (B, MEL, T), jnp.float32)

        lengths = jnp.array([T, T // 2], dtype=jnp.int32)
        mask = (jnp.arange(T)[None, None, :] < lengths[:, None, None]
                ).astype(jnp.float32)

        out = jax.block_until_ready(postnet_forward(x, mask, params))
        ref = jax.block_until_ready(ref_forward(x, mask, params))

        assert out.shape == (B, MEL, T)
        max_err = float(jnp.max(jnp.abs(out - ref)))
        # bf16 MXU inputs / bf16 inter-layer activations vs. an f32 reference:
        # typical max abs error ~1e-2, so use a bf16-appropriate tolerance.
        assert jnp.allclose(out, ref, rtol=3e-2, atol=3e-2), max_err

    print("KERNEL_OK")
</pallas_src>

<mosaic_0001>
module attributes {stable_mosaic.version = 11 : i64} {
  func.func @_postnet_kernel(%arg0: i32, %arg1: memref<1x80x256xf32, #tpu.memory_space<vmem>>, %arg2: memref<1x1x256xf32, #tpu.memory_space<vmem>>, %arg3: memref<5x128x80xbf16, #tpu.memory_space<vmem>>, %arg4: memref<128x1xf32, #tpu.memory_space<vmem>>, %arg5: memref<5x128x128xbf16, #tpu.memory_space<vmem>>, %arg6: memref<128x1xf32, #tpu.memory_space<vmem>>, %arg7: memref<5x128x128xbf16, #tpu.memory_space<vmem>>, %arg8: memref<128x1xf32, #tpu.memory_space<vmem>>, %arg9: memref<5x128x128xbf16, #tpu.memory_space<vmem>>, %arg10: memref<128x1xf32, #tpu.memory_space<vmem>>, %arg11: memref<5x80x128xbf16, #tpu.memory_space<vmem>>, %arg12: memref<80x1xf32, #tpu.memory_space<vmem>>, %arg13: memref<1x80x256xf32, #tpu.memory_space<vmem>>, %arg14: memref<128x512xbf16, #tpu.memory_space<vmem>>, %arg15: memref<128x512xbf16, #tpu.memory_space<vmem>>) attributes {dimension_semantics = [#tpu.dimension_semantics<parallel>], iteration_bounds = array<i64: 2>, scalar_prefetch = 0 : i64, scratch_operands = 2 : i64, tpu.core_type = #tpu.core_type<tc>, window_params = [{transform_indices = @transform_0, window_bounds = array<i64: 1, 80, 256>}, {transform_indices = @transform_1, window_bounds = array<i64: 1, 1, 256>}, {pipeline_mode = #tpu.pipeline_mode<synchronous>, transform_indices = @transform_2, window_bounds = array<i64: 5, 128, 80>}, {pipeline_mode = #tpu.pipeline_mode<synchronous>, transform_indices = @transform_3, window_bounds = array<i64: 128, 1>}, {pipeline_mode = #tpu.pipeline_mode<synchronous>, transform_indices = @transform_4, window_bounds = array<i64: 5, 128, 128>}, {pipeline_mode = #tpu.pipeline_mode<synchronous>, transform_indices = @transform_5, window_bounds = array<i64: 128, 1>}, {pipeline_mode = #tpu.pipeline_mode<synchronous>, transform_indices = @transform_6, window_bounds = array<i64: 5, 128, 128>}, {pipeline_mode = #tpu.pipeline_mode<synchronous>, transform_indices = @transform_7, window_bounds = array<i64: 128, 1>}, {pipeline_mode = #tpu.pipeline_mode<synchronous>, transform_indices = @transform_8, window_bounds = array<i64: 5, 128, 128>}, {pipeline_mode = #tpu.pipeline_mode<synchronous>, transform_indices = @transform_9, window_bounds = array<i64: 128, 1>}, {pipeline_mode = #tpu.pipeline_mode<synchronous>, transform_indices = @transform_10, window_bounds = array<i64: 5, 80, 128>}, {pipeline_mode = #tpu.pipeline_mode<synchronous>, transform_indices = @transform_11, window_bounds = array<i64: 80, 1>}, {transform_indices = @transform_12, window_bounds = array<i64: 1, 80, 256>}]} {
    %cst = arith.constant 0.000000e+00 : bf16
    %0 = vector.broadcast %cst : bf16 to vector<128x2xbf16>
    %c0 = arith.constant 0 : index
    %c126 = arith.constant 126 : index
    %1 = vector.load %arg14[%c0, %c126] : memref<128x512xbf16, #tpu.memory_space<vmem>>, vector<128x2xbf16>
    tpu.vector_store %arg14[%c0, %c126], %0 {strides = array<i32>} : memref<128x512xbf16, #tpu.memory_space<vmem>>, vector<128x2xbf16>,
    %c0_0 = arith.constant 0 : index
    %c384 = arith.constant 384 : index
    %2 = vector.load %arg14[%c0_0, %c384] : memref<128x512xbf16, #tpu.memory_space<vmem>>, vector<128x2xbf16>
    tpu.vector_store %arg14[%c0_0, %c384], %0 {strides = array<i32>} : memref<128x512xbf16, #tpu.memory_space<vmem>>, vector<128x2xbf16>,
    %c0_1 = arith.constant 0 : index
    %c126_2 = arith.constant 126 : index
    %3 = vector.load %arg15[%c0_1, %c126_2] : memref<128x512xbf16, #tpu.memory_space<vmem>>, vector<128x2xbf16>
    tpu.vector_store %arg15[%c0_1, %c126_2], %0 {strides = array<i32>} : memref<128x512xbf16, #tpu.memory_space<vmem>>, vector<128x2xbf16>,
    %c0_3 = arith.constant 0 : index
    %c384_4 = arith.constant 384 : index
    %4 = vector.load %arg15[%c0_3, %c384_4] : memref<128x512xbf16, #tpu.memory_space<vmem>>, vector<128x2xbf16>
    tpu.vector_store %arg15[%c0_3, %c384_4], %0 {strides = array<i32>} : memref<128x512xbf16, #tpu.memory_space<vmem>>, vector<128x2xbf16>,
    %c0_5 = arith.constant 0 : index
    %c0_6 = arith.constant 0 : index
    %c0_7 = arith.constant 0 : index
    %5 = vector.load %arg1[%c0_5, %c0_6, %c0_7] : memref<1x80x256xf32, #tpu.memory_space<vmem>>, vector<1x80x256xf32>
    %6 = vector.shape_cast %5 : vector<1x80x256xf32> to vector<80x256xf32>
    %7 = arith.truncf %6 : vector<80x256xf32> to vector<80x256xbf16>
    %c0_8 = arith.constant 0 : index
    %c128 = arith.constant 128 : index
    %8 = vector.load %arg14[%c0_8, %c128] : memref<128x512xbf16, #tpu.memory_space<vmem>>, vector<80x256xbf16>
    tpu.vector_store %arg14[%c0_8, %c128], %7 {strides = array<i32>} : memref<128x512xbf16, #tpu.memory_space<vmem>>, vector<80x256xbf16>,
    %c0_9 = arith.constant 0 : index
    %c0_10 = arith.constant 0 : index
    %c0_11 = arith.constant 0 : index
    %9 = vector.load %arg3[%c0_9, %c0_10, %c0_11] : memref<5x128x80xbf16, #tpu.memory_space<vmem>>, vector<1x128x80xbf16>
    %10 = vector.shape_cast %9 : vector<1x128x80xbf16> to vector<128x80xbf16>
    %c0_12 = arith.constant 0 : index
    %c126_13 = arith.constant 126 : index
    %11 = vector.load %arg14[%c0_12, %c126_13] : memref<128x512xbf16, #tpu.memory_space<vmem>>, vector<80x256xbf16>
    %cst_14 = arith.constant dense<0.000000e+00> : vector<128x256xf32>
    %12 = tpu.matmul %10, %11, %cst_14 {dimension_numbers = #tpu.dot_dimension_numbers<[1], [0], [0], [1], [0, 0, 1, 1], [], []>} : vector<128x80xbf16>, vector<80x256xbf16>, vector<128x256xf32> -> vector<128x256xf32>
    %c1 = arith.constant 1 : index
    %c0_15 = arith.constant 0 : index
    %c0_16 = arith.constant 0 : index
    %13 = vector.load %arg3[%c1, %c0_15, %c0_16] : memref<5x128x80xbf16, #tpu.memory_space<vmem>>, vector<1x128x80xbf16>
    %14 = vector.shape_cast %13 : vector<1x128x80xbf16> to vector<128x80xbf16>
    %c0_17 = arith.constant 0 : index
    %c127 = arith.constant 127 : index
    %15 = vector.load %arg14[%c0_17, %c127] : memref<128x512xbf16, #tpu.memory_space<vmem>>, vector<80x256xbf16>
    %cst_18 = arith.constant dense<0.000000e+00> : vector<128x256xf32>
    %16 = tpu.matmul %14, %15, %cst_18 {dimension_numbers = #tpu.dot_dimension_numbers<[1], [0], [0], [1], [0, 0, 1, 1], [], []>} : vector<128x80xbf16>, vector<80x256xbf16>, vector<128x256xf32> -> vector<128x256xf32>
    %17 = arith.addf %12, %16 : vector<128x256xf32>
    %c2 = arith.constant 2 : index
    %c0_19 = arith.constant 0 : index
    %c0_20 = arith.constant 0 : index
    %18 = vector.load %arg3[%c2, %c0_19, %c0_20] : memref<5x128x80xbf16, #tpu.memory_space<vmem>>, vector<1x128x80xbf16>
    %19 = vector.shape_cast %18 : vector<1x128x80xbf16> to vector<128x80xbf16>
    %c0_21 = arith.constant 0 : index
    %c128_22 = arith.constant 128 : index
    %20 = vector.load %arg14[%c0_21, %c128_22] : memref<128x512xbf16, #tpu.memory_space<vmem>>, vector<80x256xbf16>
    %cst_23 = arith.constant dense<0.000000e+00> : vector<128x256xf32>
    %21 = tpu.matmul %19, %20, %cst_23 {dimension_numbers = #tpu.dot_dimension_numbers<[1], [0], [0], [1], [0, 0, 1, 1], [], []>} : vector<128x80xbf16>, vector<80x256xbf16>, vector<128x256xf32> -> vector<128x256xf32>
    %22 = arith.addf %17, %21 : vector<128x256xf32>
    %c3 = arith.constant 3 : index
    %c0_24 = arith.constant 0 : index
    %c0_25 = arith.constant 0 : index
    %23 = vector.load %arg3[%c3, %c0_24, %c0_25] : memref<5x128x80xbf16, #tpu.memory_space<vmem>>, vector<1x128x80xbf16>
    %24 = vector.shape_cast %23 : vector<1x128x80xbf16> to vector<128x80xbf16>
    %c0_26 = arith.constant 0 : index
    %c129 = arith.constant 129 : index
    %25 = vector.load %arg14[%c0_26, %c129] : memref<128x512xbf16, #tpu.memory_space<vmem>>, vector<80x256xbf16>
    %cst_27 = arith.constant dense<0.000000e+00> : vector<128x256xf32>
    %26 = tpu.matmul %24, %25, %cst_27 {dimension_numbers = #tpu.dot_dimension_numbers<[1], [0], [0], [1], [0, 0, 1, 1], [], []>} : vector<128x80xbf16>, vector<80x256xbf16>, vector<128x256xf32> -> vector<128x256xf32>
    %27 = arith.addf %22, %26 : vector<128x256xf32>
    %c4 = arith.constant 4 : index
    %c0_28 = arith.constant 0 : index
    %c0_29 = arith.constant 0 : index
    %28 = vector.load %arg3[%c4, %c0_28, %c0_29] : memref<5x128x80xbf16, #tpu.memory_space<vmem>>, vector<1x128x80xbf16>
    %29 = vector.shape_cast %28 : vector<1x128x80xbf16> to vector<128x80xbf16>
    %c0_30 = arith.constant 0 : index
    %c130 = arith.constant 130 : index
    %30 = vector.load %arg14[%c0_30, %c130] : memref<128x512xbf16, #tpu.memory_space<vmem>>, vector<80x256xbf16>
    %cst_31 = arith.constant dense<0.000000e+00> : vector<128x256xf32>
    %31 = tpu.matmul %29, %30, %cst_31 {dimension_numbers = #tpu.dot_dimension_numbers<[1], [0], [0], [1], [0, 0, 1, 1], [], []>} : vector<128x80xbf16>, vector<80x256xbf16>, vector<128x256xf32> -> vector<128x256xf32>
    %32 = arith.addf %27, %31 : vector<128x256xf32>
    %c0_32 = arith.constant 0 : index
    %c0_33 = arith.constant 0 : index
    %33 = vector.load %arg4[%c0_32, %c0_33] : memref<128x1xf32, #tpu.memory_space<vmem>>, vector<128x1xf32>
    %34 = vector.broadcast %33 : vector<128x1xf32> to vector<128x256xf32>
    %35 = arith.addf %32, %34 : vector<128x256xf32>
    %36 = math.tanh %35 : vector<128x256xf32>
    %37 = arith.truncf %36 : vector<128x256xf32> to vector<128x256xbf16>
    %c0_34 = arith.constant 0 : index
    %c128_35 = arith.constant 128 : index
    %38 = vector.load %arg15[%c0_34, %c128_35] : memref<128x512xbf16, #tpu.memory_space<vmem>>, vector<128x256xbf16>
    tpu.vector_store %arg15[%c0_34, %c128_35], %37 {strides = array<i32>} : memref<128x512xbf16, #tpu.memory_space<vmem>>, vector<128x256xbf16>,
    %c0_36 = arith.constant 0 : index
    %c0_37 = arith.constant 0 : index
    %c0_38 = arith.constant 0 : index
    %39 = vector.load %arg5[%c0_36, %c0_37, %c0_38] : memref<5x128x128xbf16, #tpu.memory_space<vmem>>, vector<1x128x128xbf16>
    %40 = vector.shape_cast %39 : vector<1x128x128xbf16> to vector<128x128xbf16>
    %c0_39 = arith.constant 0 : index
    %c126_40 = arith.constant 126 : index
    %41 = vector.load %arg15[%c0_39, %c126_40] : memref<128x512xbf16, #tpu.memory_space<vmem>>, vector<128x256xbf16>
    %cst_41 = arith.constant dense<0.000000e+00> : vector<128x256xf32>
    %42 = tpu.matmul %40, %41, %cst_41 {dimension_numbers = #tpu.dot_dimension_numbers<[1], [0], [0], [1], [0, 0, 1, 1], [], []>} : vector<128x128xbf16>, vector<128x256xbf16>, vector<128x256xf32> -> vector<128x256xf32>
    %c1_42 = arith.constant 1 : index
    %c0_43 = arith.constant 0 : index
    %c0_44 = arith.constant 0 : index
    %43 = vector.load %arg5[%c1_42, %c0_43, %c0_44] : memref<5x128x128xbf16, #tpu.memory_space<vmem>>, vector<1x128x128xbf16>
    %44 = vector.shape_cast %43 : vector<1x128x128xbf16> to vector<128x128xbf16>
    %c0_45 = arith.constant 0 : index
    %c127_46 = arith.constant 127 : index
    %45 = vector.load %arg15[%c0_45, %c127_46] : memref<128x512xbf16, #tpu.memory_space<vmem>>, vector<128x256xbf16>
    %cst_47 = arith.constant dense<0.000000e+00> : vector<128x256xf32>
    %46 = tpu.matmul %44, %45, %cst_47 {dimension_numbers = #tpu.dot_dimension_numbers<[1], [0], [0], [1], [0, 0, 1, 1], [], []>} : vector<128x128xbf16>, vector<128x256xbf16>, vector<128x256xf32> -> vector<128x256xf32>
    %47 = arith.addf %42, %46 : vector<128x256xf32>
    %c2_48 = arith.constant 2 : index
    %c0_49 = arith.constant 0 : index
    %c0_50 = arith.constant 0 : index
    %48 = vector.load %arg5[%c2_48, %c0_49, %c0_50] : memref<5x128x128xbf16, #tpu.memory_space<vmem>>, vector<1x128x128xbf16>
    %49 = vector.shape_cast %48 : vector<1x128x128xbf16> to vector<128x128xbf16>
    %c0_51 = arith.constant 0 : index
    %c128_52 = arith.constant 128 : index
    %50 = vector.load %arg15[%c0_51, %c128_52] : memref<128x512xbf16, #tpu.memory_space<vmem>>, vector<128x256xbf16>
    %cst_53 = arith.constant dense<0.000000e+00> : vector<128x256xf32>
    %51 = tpu.matmul %49, %50, %cst_53 {dimension_numbers = #tpu.dot_dimension_numbers<[1], [0], [0], [1], [0, 0, 1, 1], [], []>} : vector<128x128xbf16>, vector<128x256xbf16>, vector<128x256xf32> -> vector<128x256xf32>
    %52 = arith.addf %47, %51 : vector<128x256xf32>
    %c3_54 = arith.constant 3 : index
    %c0_55 = arith.constant 0 : index
    %c0_56 = arith.constant 0 : index
    %53 = vector.load %arg5[%c3_54, %c0_55, %c0_56] : memref<5x128x128xbf16, #tpu.memory_space<vmem>>, vector<1x128x128xbf16>
    %54 = vector.shape_cast %53 : vector<1x128x128xbf16> to vector<128x128xbf16>
    %c0_57 = arith.constant 0 : index
    %c129_58 = arith.constant 129 : index
    %55 = vector.load %arg15[%c0_57, %c129_58] : memref<128x512xbf16, #tpu.memory_space<vmem>>, vector<128x256xbf16>
    %cst_59 = arith.constant dense<0.000000e+00> : vector<128x256xf32>
    %56 = tpu.matmul %54, %55, %cst_59 {dimension_numbers = #tpu.dot_dimension_numbers<[1], [0], [0], [1], [0, 0, 1, 1], [], []>} : vector<128x128xbf16>, vector<128x256xbf16>, vector<128x256xf32> -> vector<128x256xf32>
    %57 = arith.addf %52, %56 : vector<128x256xf32>
    %c4_60 = arith.constant 4 : index
    %c0_61 = arith.constant 0 : index
    %c0_62 = arith.constant 0 : index
    %58 = vector.load %arg5[%c4_60, %c0_61, %c0_62] : memref<5x128x128xbf16, #tpu.memory_space<vmem>>, vector<1x128x128xbf16>
    %59 = vector.shape_cast %58 : vector<1x128x128xbf16> to vector<128x128xbf16>
    %c0_63 = arith.constant 0 : index
    %c130_64 = arith.constant 130 : index
    %60 = vector.load %arg15[%c0_63, %c130_64] : memref<128x512xbf16, #tpu.memory_space<vmem>>, vector<128x256xbf16>
    %cst_65 = arith.constant dense<0.000000e+00> : vector<128x256xf32>
    %61 = tpu.matmul %59, %60, %cst_65 {dimension_numbers = #tpu.dot_dimension_numbers<[1], [0], [0], [1], [0, 0, 1, 1], [], []>} : vector<128x128xbf16>, vector<128x256xbf16>, vector<128x256xf32> -> vector<128x256xf32>
    %62 = arith.addf %57, %61 : vector<128x256xf32>
    %c0_66 = arith.constant 0 : index
    %c0_67 = arith.constant 0 : index
    %63 = vector.load %arg6[%c0_66, %c0_67] : memref<128x1xf32, #tpu.memory_space<vmem>>, vector<128x1xf32>
    %64 = vector.broadcast %63 : vector<128x1xf32> to vector<128x256xf32>
    %65 = arith.addf %62, %64 : vector<128x256xf32>
    %66 = math.tanh %65 : vector<128x256xf32>
    %67 = arith.truncf %66 : vector<128x256xf32> to vector<128x256xbf16>
    %c0_68 = arith.constant 0 : index
    %c128_69 = arith.constant 128 : index
    %68 = vector.load %arg14[%c0_68, %c128_69] : memref<128x512xbf16, #tpu.memory_space<vmem>>, vector<128x256xbf16>
    tpu.vector_store %arg14[%c0_68, %c128_69], %67 {strides = array<i32>} : memref<128x512xbf16, #tpu.memory_space<vmem>>, vector<128x256xbf16>,
    %c0_70 = arith.constant 0 : index
    %c0_71 = arith.constant 0 : index
    %c0_72 = arith.constant 0 : index
    %69 = vector.load %arg7[%c0_70, %c0_71, %c0_72] : memref<5x128x128xbf16, #tpu.memory_space<vmem>>, vector<1x128x128xbf16>
    %70 = vector.shape_cast %69 : vector<1x128x128xbf16> to vector<128x128xbf16>
    %c0_73 = arith.constant 0 : index
    %c126_74 = arith.constant 126 : index
    %71 = vector.load %arg14[%c0_73, %c126_74] : memref<128x512xbf16, #tpu.memory_space<vmem>>, vector<128x256xbf16>
    %cst_75 = arith.constant dense<0.000000e+00> : vector<128x256xf32>
    %72 = tpu.matmul %70, %71, %cst_75 {dimension_numbers = #tpu.dot_dimension_numbers<[1], [0], [0], [1], [0, 0, 1, 1], [], []>} : vector<128x128xbf16>, vector<128x256xbf16>, vector<128x256xf32> -> vector<128x256xf32>
    %c1_76 = arith.constant 1 : index
    %c0_77 = arith.constant 0 : index
    %c0_78 = arith.constant 0 : index
    %73 = vector.load %arg7[%c1_76, %c0_77, %c0_78] : memref<5x128x128xbf16, #tpu.memory_space<vmem>>, vector<1x128x128xbf16>
    %74 = vector.shape_cast %73 : vector<1x128x128xbf16> to vector<128x128xbf16>
    %c0_79 = arith.constant 0 : index
    %c127_80 = arith.constant 127 : index
    %75 = vector.load %arg14[%c0_79, %c127_80] : memref<128x512xbf16, #tpu.memory_space<vmem>>, vector<128x256xbf16>
    %cst_81 = arith.constant dense<0.000000e+00> : vector<128x256xf32>
    %76 = tpu.matmul %74, %75, %cst_81 {dimension_numbers = #tpu.dot_dimension_numbers<[1], [0], [0], [1], [0, 0, 1, 1], [], []>} : vector<128x128xbf16>, vector<128x256xbf16>, vector<128x256xf32> -> vector<128x256xf32>
    %77 = arith.addf %72, %76 : vector<128x256xf32>
    %c2_82 = arith.constant 2 : index
    %c0_83 = arith.constant 0 : index
    %c0_84 = arith.constant 0 : index
    %78 = vector.load %arg7[%c2_82, %c0_83, %c0_84] : memref<5x128x128xbf16, #tpu.memory_space<vmem>>, vector<1x128x128xbf16>
    %79 = vector.shape_cast %78 : vector<1x128x128xbf16> to vector<128x128xbf16>
    %c0_85 = arith.constant 0 : index
    %c128_86 = arith.constant 128 : index
    %80 = vector.load %arg14[%c0_85, %c128_86] : memref<128x512xbf16, #tpu.memory_space<vmem>>, vector<128x256xbf16>
    %cst_87 = arith.constant dense<0.000000e+00> : vector<128x256xf32>
    %81 = tpu.matmul %79, %80, %cst_87 {dimension_numbers = #tpu.dot_dimension_numbers<[1], [0], [0], [1], [0, 0, 1, 1], [], []>} : vector<128x128xbf16>, vector<128x256xbf16>, vector<128x256xf32> -> vector<128x256xf32>
    %82 = arith.addf %77, %81 : vector<128x256xf32>
    %c3_88 = arith.constant 3 : index
    %c0_89 = arith.constant 0 : index
    %c0_90 = arith.constant 0 : index
    %83 = vector.load %arg7[%c3_88, %c0_89, %c0_90] : memref<5x128x128xbf16, #tpu.memory_space<vmem>>, vector<1x128x128xbf16>
    %84 = vector.shape_cast %83 : vector<1x128x128xbf16> to vector<128x128xbf16>
    %c0_91 = arith.constant 0 : index
    %c129_92 = arith.constant 129 : index
    %85 = vector.load %arg14[%c0_91, %c129_92] : memref<128x512xbf16, #tpu.memory_space<vmem>>, vector<128x256xbf16>
    %cst_93 = arith.constant dense<0.000000e+00> : vector<128x256xf32>
    %86 = tpu.matmul %84, %85, %cst_93 {dimension_numbers = #tpu.dot_dimension_numbers<[1], [0], [0], [1], [0, 0, 1, 1], [], []>} : vector<128x128xbf16>, vector<128x256xbf16>, vector<128x256xf32> -> vector<128x256xf32>
    %87 = arith.addf %82, %86 : vector<128x256xf32>
    %c4_94 = arith.constant 4 : index
    %c0_95 = arith.constant 0 : index
    %c0_96 = arith.constant 0 : index
    %88 = vector.load %arg7[%c4_94, %c0_95, %c0_96] : memref<5x128x128xbf16, #tpu.memory_space<vmem>>, vector<1x128x128xbf16>
    %89 = vector.shape_cast %88 : vector<1x128x128xbf16> to vector<128x128xbf16>
    %c0_97 = arith.constant 0 : index
    %c130_98 = arith.constant 130 : index
    %90 = vector.load %arg14[%c0_97, %c130_98] : memref<128x512xbf16, #tpu.memory_space<vmem>>, vector<128x256xbf16>
    %cst_99 = arith.constant dense<0.000000e+00> : vector<128x256xf32>
    %91 = tpu.matmul %89, %90, %cst_99 {dimension_numbers = #tpu.dot_dimension_numbers<[1], [0], [0], [1], [0, 0, 1, 1], [], []>} : vector<128x128xbf16>, vector<128x256xbf16>, vector<128x256xf32> -> vector<128x256xf32>
    %92 = arith.addf %87, %91 : vector<128x256xf32>
    %c0_100 = arith.constant 0 : index
    %c0_101 = arith.constant 0 : index
    %93 = vector.load %arg8[%c0_100, %c0_101] : memref<128x1xf32, #tpu.memory_space<vmem>>, vector<128x1xf32>
    %94 = vector.broadcast %93 : vector<128x1xf32> to vector<128x256xf32>
    %95 = arith.addf %92, %94 : vector<128x256xf32>
    %96 = math.tanh %95 : vector<128x256xf32>
    %97 = arith.truncf %96 : vector<128x256xf32> to vector<128x256xbf16>
    %c0_102 = arith.constant 0 : index
    %c128_103 = arith.constant 128 : index
    %98 = vector.load %arg15[%c0_102, %c128_103] : memref<128x512xbf16, #tpu.memory_space<vmem>>, vector<128x256xbf16>
    tpu.vector_store %arg15[%c0_102, %c128_103], %97 {strides = array<i32>} : memref<128x512xbf16, #tpu.memory_space<vmem>>, vector<128x256xbf16>,
    %c0_104 = arith.constant 0 : index
    %c0_105 = arith.constant 0 : index
    %c0_106 = arith.constant 0 : index
    %99 = vector.load %arg9[%c0_104, %c0_105, %c0_106] : memref<5x128x128xbf16, #tpu.memory_space<vmem>>, vector<1x128x128xbf16>
    %100 = vector.shape_cast %99 : vector<1x128x128xbf16> to vector<128x128xbf16>
    %c0_107 = arith.constant 0 : index
    %c126_108 = arith.constant 126 : index
    %101 = vector.load %arg15[%c0_107, %c126_108] : memref<128x512xbf16, #tpu.memory_space<vmem>>, vector<128x256xbf16>
    %cst_109 = arith.constant dense<0.000000e+00> : vector<128x256xf32>
    %102 = tpu.matmul %100, %101, %cst_109 {dimension_numbers = #tpu.dot_dimension_numbers<[1], [0], [0], [1], [0, 0, 1, 1], [], []>} : vector<128x128xbf16>, vector<128x256xbf16>, vector<128x256xf32> -> vector<128x256xf32>
    %c1_110 = arith.constant 1 : index
    %c0_111 = arith.constant 0 : index
    %c0_112 = arith.constant 0 : index
    %103 = vector.load %arg9[%c1_110, %c0_111, %c0_112] : memref<5x128x128xbf16, #tpu.memory_space<vmem>>, vector<1x128x128xbf16>
    %104 = vector.shape_cast %103 : vector<1x128x128xbf16> to vector<128x128xbf16>
    %c0_113 = arith.constant 0 : index
    %c127_114 = arith.constant 127 : index
    %105 = vector.load %arg15[%c0_113, %c127_114] : memref<128x512xbf16, #tpu.memory_space<vmem>>, vector<128x256xbf16>
    %cst_115 = arith.constant dense<0.000000e+00> : vector<128x256xf32>
    %106 = tpu.matmul %104, %105, %cst_115 {dimension_numbers = #tpu.dot_dimension_numbers<[1], [0], [0], [1], [0, 0, 1, 1], [], []>} : vector<128x128xbf16>, vector<128x256xbf16>, vector<128x256xf32> -> vector<128x256xf32>
    %107 = arith.addf %102, %106 : vector<128x256xf32>
    %c2_116 = arith.constant 2 : index
    %c0_117 = arith.constant 0 : index
    %c0_118 = arith.constant 0 : index
    %108 = vector.load %arg9[%c2_116, %c0_117, %c0_118] : memref<5x128x128xbf16, #tpu.memory_space<vmem>>, vector<1x128x128xbf16>
    %109 = vector.shape_cast %108 : vector<1x128x128xbf16> to vector<128x128xbf16>
    %c0_119 = arith.constant 0 : index
    %c128_120 = arith.constant 128 : index
    %110 = vector.load %arg15[%c0_119, %c128_120] : memref<128x512xbf16, #tpu.memory_space<vmem>>, vector<128x256xbf16>
    %cst_121 = arith.constant dense<0.000000e+00> : vector<128x256xf32>
    %111 = tpu.matmul %109, %110, %cst_121 {dimension_numbers = #tpu.dot_dimension_numbers<[1], [0], [0], [1], [0, 0, 1, 1], [], []>} : vector<128x128xbf16>, vector<128x256xbf16>, vector<128x256xf32> -> vector<128x256xf32>
    %112 = arith.addf %107, %111 : vector<128x256xf32>
    %c3_122 = arith.constant 3 : index
    %c0_123 = arith.constant 0 : index
    %c0_124 = arith.constant 0 : index
    %113 = vector.load %arg9[%c3_122, %c0_123, %c0_124] : memref<5x128x128xbf16, #tpu.memory_space<vmem>>, vector<1x128x128xbf16>
    %114 = vector.shape_cast %113 : vector<1x128x128xbf16> to vector<128x128xbf16>
    %c0_125 = arith.constant 0 : index
    %c129_126 = arith.constant 129 : index
    %115 = vector.load %arg15[%c0_125, %c129_126] : memref<128x512xbf16, #tpu.memory_space<vmem>>, vector<128x256xbf16>
    %cst_127 = arith.constant dense<0.000000e+00> : vector<128x256xf32>
    %116 = tpu.matmul %114, %115, %cst_127 {dimension_numbers = #tpu.dot_dimension_numbers<[1], [0], [0], [1], [0, 0, 1, 1], [], []>} : vector<128x128xbf16>, vector<128x256xbf16>, vector<128x256xf32> -> vector<128x256xf32>
    %117 = arith.addf %112, %116 : vector<128x256xf32>
    %c4_128 = arith.constant 4 : index
    %c0_129 = arith.constant 0 : index
    %c0_130 = arith.constant 0 : index
    %118 = vector.load %arg9[%c4_128, %c0_129, %c0_130] : memref<5x128x128xbf16, #tpu.memory_space<vmem>>, vector<1x128x128xbf16>
    %119 = vector.shape_cast %118 : vector<1x128x128xbf16> to vector<128x128xbf16>
    %c0_131 = arith.constant 0 : index
    %c130_132 = arith.constant 130 : index
    %120 = vector.load %arg15[%c0_131, %c130_132] : memref<128x512xbf16, #tpu.memory_space<vmem>>, vector<128x256xbf16>
    %cst_133 = arith.constant dense<0.000000e+00> : vector<128x256xf32>
    %121 = tpu.matmul %119, %120, %cst_133 {dimension_numbers = #tpu.dot_dimension_numbers<[1], [0], [0], [1], [0, 0, 1, 1], [], []>} : vector<128x128xbf16>, vector<128x256xbf16>, vector<128x256xf32> -> vector<128x256xf32>
    %122 = arith.addf %117, %121 : vector<128x256xf32>
    %c0_134 = arith.constant 0 : index
    %c0_135 = arith.constant 0 : index
    %123 = vector.load %arg10[%c0_134, %c0_135] : memref<128x1xf32, #tpu.memory_space<vmem>>, vector<128x1xf32>
    %124 = vector.broadcast %123 : vector<128x1xf32> to vector<128x256xf32>
    %125 = arith.addf %122, %124 : vector<128x256xf32>
    %126 = math.tanh %125 : vector<128x256xf32>
    %127 = arith.truncf %126 : vector<128x256xf32> to vector<128x256xbf16>
    %c0_136 = arith.constant 0 : index
    %c128_137 = arith.constant 128 : index
    %128 = vector.load %arg14[%c0_136, %c128_137] : memref<128x512xbf16, #tpu.memory_space<vmem>>, vector<128x256xbf16>
    tpu.vector_store %arg14[%c0_136, %c128_137], %127 {strides = array<i32>} : memref<128x512xbf16, #tpu.memory_space<vmem>>, vector<128x256xbf16>,
    %c0_138 = arith.constant 0 : index
    %c0_139 = arith.constant 0 : index
    %c0_140 = arith.constant 0 : index
    %129 = vector.load %arg11[%c0_138, %c0_139, %c0_140] : memref<5x80x128xbf16, #tpu.memory_space<vmem>>, vector<1x80x128xbf16>
    %130 = vector.shape_cast %129 : vector<1x80x128xbf16> to vector<80x128xbf16>
    %c0_141 = arith.constant 0 : index
    %c126_142 = arith.constant 126 : index
    %131 = vector.load %arg14[%c0_141, %c126_142] : memref<128x512xbf16, #tpu.memory_space<vmem>>, vector<128x256xbf16>
    %cst_143 = arith.constant dense<0.000000e+00> : vector<80x256xf32>
    %132 = tpu.matmul %130, %131, %cst_143 {dimension_numbers = #tpu.dot_dimension_numbers<[1], [0], [0], [1], [0, 0, 1, 1], [], []>} : vector<80x128xbf16>, vector<128x256xbf16>, vector<80x256xf32> -> vector<80x256xf32>
    %c1_144 = arith.constant 1 : index
    %c0_145 = arith.constant 0 : index
    %c0_146 = arith.constant 0 : index
    %133 = vector.load %arg11[%c1_144, %c0_145, %c0_146] : memref<5x80x128xbf16, #tpu.memory_space<vmem>>, vector<1x80x128xbf16>
    %134 = vector.shape_cast %133 : vector<1x80x128xbf16> to vector<80x128xbf16>
    %c0_147 = arith.constant 0 : index
    %c127_148 = arith.constant 127 : index
    %135 = vector.load %arg14[%c0_147, %c127_148] : memref<128x512xbf16, #tpu.memory_space<vmem>>, vector<128x256xbf16>
    %cst_149 = arith.constant dense<0.000000e+00> : vector<80x256xf32>
    %136 = tpu.matmul %134, %135, %cst_149 {dimension_numbers = #tpu.dot_dimension_numbers<[1], [0], [0], [1], [0, 0, 1, 1], [], []>} : vector<80x128xbf16>, vector<128x256xbf16>, vector<80x256xf32> -> vector<80x256xf32>
    %137 = arith.addf %132, %136 : vector<80x256xf32>
    %c2_150 = arith.constant 2 : index
    %c0_151 = arith.constant 0 : index
    %c0_152 = arith.constant 0 : index
    %138 = vector.load %arg11[%c2_150, %c0_151, %c0_152] : memref<5x80x128xbf16, #tpu.memory_space<vmem>>, vector<1x80x128xbf16>
    %139 = vector.shape_cast %138 : vector<1x80x128xbf16> to vector<80x128xbf16>
    %c0_153 = arith.constant 0 : index
    %c128_154 = arith.constant 128 : index
    %140 = vector.load %arg14[%c0_153, %c128_154] : memref<128x512xbf16, #tpu.memory_space<vmem>>, vector<128x256xbf16>
    %cst_155 = arith.constant dense<0.000000e+00> : vector<80x256xf32>
    %141 = tpu.matmul %139, %140, %cst_155 {dimension_numbers = #tpu.dot_dimension_numbers<[1], [0], [0], [1], [0, 0, 1, 1], [], []>} : vector<80x128xbf16>, vector<128x256xbf16>, vector<80x256xf32> -> vector<80x256xf32>
    %142 = arith.addf %137, %141 : vector<80x256xf32>
    %c3_156 = arith.constant 3 : index
    %c0_157 = arith.constant 0 : index
    %c0_158 = arith.constant 0 : index
    %143 = vector.load %arg11[%c3_156, %c0_157, %c0_158] : memref<5x80x128xbf16, #tpu.memory_space<vmem>>, vector<1x80x128xbf16>
    %144 = vector.shape_cast %143 : vector<1x80x128xbf16> to vector<80x128xbf16>
    %c0_159 = arith.constant 0 : index
    %c129_160 = arith.constant 129 : index
    %145 = vector.load %arg14[%c0_159, %c129_160] : memref<128x512xbf16, #tpu.memory_space<vmem>>, vector<128x256xbf16>
    %cst_161 = arith.constant dense<0.000000e+00> : vector<80x256xf32>
    %146 = tpu.matmul %144, %145, %cst_161 {dimension_numbers = #tpu.dot_dimension_numbers<[1], [0], [0], [1], [0, 0, 1, 1], [], []>} : vector<80x128xbf16>, vector<128x256xbf16>, vector<80x256xf32> -> vector<80x256xf32>
    %147 = arith.addf %142, %146 : vector<80x256xf32>
    %c4_162 = arith.constant 4 : index
    %c0_163 = arith.constant 0 : index
    %c0_164 = arith.constant 0 : index
    %148 = vector.load %arg11[%c4_162, %c0_163, %c0_164] : memref<5x80x128xbf16, #tpu.memory_space<vmem>>, vector<1x80x128xbf16>
    %149 = vector.shape_cast %148 : vector<1x80x128xbf16> to vector<80x128xbf16>
    %c0_165 = arith.constant 0 : index
    %c130_166 = arith.constant 130 : index
    %150 = vector.load %arg14[%c0_165, %c130_166] : memref<128x512xbf16, #tpu.memory_space<vmem>>, vector<128x256xbf16>
    %cst_167 = arith.constant dense<0.000000e+00> : vector<80x256xf32>
    %151 = tpu.matmul %149, %150, %cst_167 {dimension_numbers = #tpu.dot_dimension_numbers<[1], [0], [0], [1], [0, 0, 1, 1], [], []>} : vector<80x128xbf16>, vector<128x256xbf16>, vector<80x256xf32> -> vector<80x256xf32>
    %152 = arith.addf %147, %151 : vector<80x256xf32>
    %c0_168 = arith.constant 0 : index
    %c0_169 = arith.constant 0 : index
    %153 = vector.load %arg12[%c0_168, %c0_169] : memref<80x1xf32, #tpu.memory_space<vmem>>, vector<80x1xf32>
    %154 = vector.broadcast %153 : vector<80x1xf32> to vector<80x256xf32>
    %155 = arith.addf %152, %154 : vector<80x256xf32>
    %c0_170 = arith.constant 0 : index
    %c0_171 = arith.constant 0 : index
    %c0_172 = arith.constant 0 : index
    %156 = vector.load %arg1[%c0_170, %c0_171, %c0_172] : memref<1x80x256xf32, #tpu.memory_space<vmem>>, vector<1x80x256xf32>
    %157 = vector.shape_cast %156 : vector<1x80x256xf32> to vector<80x256xf32>
    %c0_173 = arith.constant 0 : index
    %c0_174 = arith.constant 0 : index
    %c0_175 = arith.constant 0 : index
    %158 = vector.load %arg2[%c0_173, %c0_174, %c0_175] : memref<1x1x256xf32, #tpu.memory_space<vmem>>, vector<1x1x256xf32>
    %159 = vector.shape_cast %158 : vector<1x1x256xf32> to vector<1x256xf32>
    %160 = vector.broadcast %159 : vector<1x256xf32> to vector<80x256xf32>
    %161 = arith.mulf %155, %160 : vector<80x256xf32>
    %162 = arith.addf %157, %161 : vector<80x256xf32>
    %c0_176 = arith.constant 0 : index
    %c0_177 = arith.constant 0 : index
    %c0_178 = arith.constant 0 : index
    %163 = vector.load %arg13[%c0_176, %c0_177, %c0_178] : memref<1x80x256xf32, #tpu.memory_space<vmem>>, vector<1x80x256xf32>
    %164 = vector.shape_cast %163 : vector<1x80x256xf32> to vector<80x256xf32>
    %165 = vector.shape_cast %162 : vector<80x256xf32> to vector<1x80x256xf32>
    tpu.vector_store %arg13[%c0_176, %c0_177, %c0_178], %165 {strides = array<i32>} : memref<1x80x256xf32, #tpu.memory_space<vmem>>, vector<1x80x256xf32>,
    return
  }
  func.func @transform_0(%arg0: i32) -> (i32, i32, i32) {
    %c0_i32 = arith.constant 0 : i32
    %c0_i32_0 = arith.constant 0 : i32
    %c0_i32_1 = arith.constant 0 : i32
    return %arg0, %c0_i32, %c0_i32_0 : i32, i32, i32
  }
  func.func @transform_1(%arg0: i32) -> (i32, i32, i32) {
    %c0_i32 = arith.constant 0 : i32
    %c0_i32_0 = arith.constant 0 : i32
    %c0_i32_1 = arith.constant 0 : i32
    return %arg0, %c0_i32, %c0_i32_0 : i32, i32, i32
  }
  func.func @transform_2(%arg0: i32) -> (i32, i32, i32) {
    %c0_i32 = arith.constant 0 : i32
    %c0_i32_0 = arith.constant 0 : i32
    %c0_i32_1 = arith.constant 0 : i32
    %c0_i32_2 = arith.constant 0 : i32
    return %c0_i32, %c0_i32_0, %c0_i32_1 : i32, i32, i32
  }
  func.func @transform_3(%arg0: i32) -> (i32, i32) {
    %c0_i32 = arith.constant 0 : i32
    %c0_i32_0 = arith.constant 0 : i32
    %c0_i32_1 = arith.constant 0 : i32
    return %c0_i32, %c0_i32_0 : i32, i32
  }
  func.func @transform_4(%arg0: i32) -> (i32, i32, i32) {
    %c0_i32 = arith.constant 0 : i32
    %c0_i32_0 = arith.constant 0 : i32
    %c0_i32_1 = arith.constant 0 : i32
    %c0_i32_2 = arith.constant 0 : i32
    return %c0_i32, %c0_i32_0, %c0_i32_1 : i32, i32, i32
  }
  func.func @transform_5(%arg0: i32) -> (i32, i32) {
    %c0_i32 = arith.constant 0 : i32
    %c0_i32_0 = arith.constant 0 : i32
    %c0_i32_1 = arith.constant 0 : i32
    return %c0_i32, %c0_i32_0 : i32, i32
  }
  func.func @transform_6(%arg0: i32) -> (i32, i32, i32) {
    %c0_i32 = arith.constant 0 : i32
    %c0_i32_0 = arith.constant 0 : i32
    %c0_i32_1 = arith.constant 0 : i32
    %c0_i32_2 = arith.constant 0 : i32
    return %c0_i32, %c0_i32_0, %c0_i32_1 : i32, i32, i32
  }
  func.func @transform_7(%arg0: i32) -> (i32, i32) {
    %c0_i32 = arith.constant 0 : i32
    %c0_i32_0 = arith.constant 0 : i32
    %c0_i32_1 = arith.constant 0 : i32
    return %c0_i32, %c0_i32_0 : i32, i32
  }
  func.func @transform_8(%arg0: i32) -> (i32, i32, i32) {
    %c0_i32 = arith.constant 0 : i32
    %c0_i32_0 = arith.constant 0 : i32
    %c0_i32_1 = arith.constant 0 : i32
    %c0_i32_2 = arith.constant 0 : i32
    return %c0_i32, %c0_i32_0, %c0_i32_1 : i32, i32, i32
  }
  func.func @transform_9(%arg0: i32) -> (i32, i32) {
    %c0_i32 = arith.constant 0 : i32
    %c0_i32_0 = arith.constant 0 : i32
    %c0_i32_1 = arith.constant 0 : i32
    return %c0_i32, %c0_i32_0 : i32, i32
  }
  func.func @transform_10(%arg0: i32) -> (i32, i32, i32) {
    %c0_i32 = arith.constant 0 : i32
    %c0_i32_0 = arith.constant 0 : i32
    %c0_i32_1 = arith.constant 0 : i32
    %c0_i32_2 = arith.constant 0 : i32
    return %c0_i32, %c0_i32_0, %c0_i32_1 : i32, i32, i32
  }
  func.func @transform_11(%arg0: i32) -> (i32, i32) {
    %c0_i32 = arith.constant 0 : i32
    %c0_i32_0 = arith.constant 0 : i32
    %c0_i32_1 = arith.constant 0 : i32
    return %c0_i32, %c0_i32_0 : i32, i32
  }
  func.func @transform_12(%arg0: i32) -> (i32, i32, i32) {
    %c0_i32 = arith.constant 0 : i32
    %c0_i32_0 = arith.constant 0 : i32
    %c0_i32_1 = arith.constant 0 : i32
    return %arg0, %c0_i32, %c0_i32_0 : i32, i32, i32
  }
}

</mosaic_0001>

<bundles_post_ra>
// kernel: tpu_custom_call.1
= control target key start
LH: loop header
LB: loop body
LE: loop exit
PB: predicated region body
PF: predicated region fallthrough
CT: control target
= control target key end

     0   :  { %s16683_s0 = inlined_call_operand.vmem [shape: f32[2,80,256], index: 0, kind: input, shape index: {}]   ;;  %s16684_s1 = inlined_call_operand.vmem [shape: f32[2,1,256], index: 1, kind: input, shape index: {}]   ;;  %s16685_s2 = inlined_call_operand.vmem [shape: bf16[5,128,80], index: 2, kind: input, shape index: {}]   ;;  %s16686_s3 = inlined_call_operand.vmem [shape: f32[128,1], index: 3, kind: input, shape index: {}]   ;;  %s16687_s4 = inlined_call_operand.vmem [shape: bf16[5,128,128], index: 4, kind: input, shape index: {}]   ;;  %s16688_s5 = inlined_call_operand.vmem [shape: f32[128,1], index: 5, kind: input, shape index: {}]   ;;  %s16689_s6 = inlined_call_operand.hbm [shape: bf16[5,128,128], index: 6, kind: input, shape index: {}]   ;;  %s16690_s7 = inlined_call_operand.vmem [shape: f32[128,1], index: 7, kind: input, shape index: {}]   ;;  %s16691_s8 = inlined_call_operand.hbm [shape: bf16[5,128,128], index: 8, kind: input, shape index: {}]   ;;  %s16692_s9 = inlined_call_operand.vmem [shape: f32[128,1], index: 9, kind: input, shape index: {}]   ;;  %s16693_s10 = inlined_call_operand.vmem [shape: bf16[5,80,128], index: 10, kind: input, shape index: {}]   ;;  %s16694_s11 = inlined_call_operand.vmem [shape: f32[80,1], index: 11, kind: input, shape index: {}]   ;;  %s16695_s12 = inlined_call_operand.hbm [shape: f32[2,80,256], index: 12, kind: output, shape index: {}]  }
   0x1   :  { %16728 = sst [smem:[#allocation41_spill]] %s16683_s0 }
   0x2   :  { %17 = vsyncpa [#allocation5], 0 }
   0x3   :  { %18 = vsyncpa [#allocation8], 0 }
   0x4   :  { %19 = vsyncpa [#allocation6], 0 }
   0x5   :  { %21 = vsyncpa [#allocation6 + $0x1], 0  ;;  %s12342_s21 = smov 0   ;;  %s12344_s22 = smov 0  }
   0x6   :  { %s12346_s23 = smov 0   ;;  %s12348_s24 = smov 0  }
   0x7 LB: > { %16729 = sst [smem:[#allocation13_spill]] %s12260_s23  ;;  %s12363_s25 = sadd.s32 4294967295, %s12264_s24   ;;  %s12264_s24 = sphi %s12348_s24, %s16926_s24   ;;  %s12260_s23 = sphi %s12346_s23, %s16928_s23   ;;  %s12256_s22 = sphi %s12344_s22, %s16930_s22   ;;  %s12252_s21 = sphi %s12342_s21, %s16929_s21  }
   0x8   : > { %s9127_s26 = sadd.s32 4294967294, %s12264_s24   ;;  %s12367_s27 = sadd.s32 1, %s12264_s24  }
   0x9   : > { %16730 = sst [smem:[#allocation14_spill]] %s12367_s27  ;;  %s296_s28 = sadd.s32 1, %s12260_s23 }
   0xa   : > { %s293_s29 = ssub.s32 %s12264_s24, %s12367_s27  ;;  %p306_p0 = scmp.ne.s32.totalorder %s12260_s23, %s12256_s22 }
   0xb   : > { %p294_p1 = scmp.eq.s32.totalorder %s293_s29, 0  ;;  %p307_p2 = scmp.eq.s32.totalorder %s12363_s25, 1 }
   0xc   : > { %p312_p3 = scmp.ne.s32.totalorder %s12256_s22, %s12252_s21  ;;  %p313_p4 = scmp.eq.s32.totalorder %s9127_s26, 1 }
   0xd   : > { %s12378_s30 = scalar_select %p294_p1, %s12260_s23, %s296_s28  }
   0xe   : > { %p12380_p5 = por %p307_p2, %p306_p0  ;;  %p12384_p6 = por %p313_p4, %p312_p3 }
   0xf   : > { %16731 = sst [smem:[#allocation15_spill]] %s12378_s30  ;;  %p9128_p7 = scmp.ge.s32.totalorder %s12264_s24, 1 }
  0x10   : > { %p320_p8 = scmp.lt.s32.totalorder %s12264_s24, 3  ;;  %p11827_p9 = scmp.eq.s32.totalorder %s12363_s25, 0 }
  0x11   : > { %s343_s18 = sshll.u32 %s16689_s6, 4  ;;  %s12266_s19 = smov [#allocation4]   ;;  %s344_s18 = int_to_ptr.hbm [resolvable:$true] %s343_s18 }
  0x12   : > { %p12391_p10 = pnand %p9128_p7, %p320_p8  ;;  %s345_s20 = sshll.u32 %s12266_s19, 4  ;;  %s346_s20 = int_to_ptr.vmem [resolvable:$true] %s345_s20 }
  0x13   : > { %s360_s29 = sshll.u32 %s16691_s8, 4  ;;  %s12267_s30 = smov 64   ;;  %s361_s29 = int_to_ptr.hbm [resolvable:$true] %s360_s29 }
  0x14   : > { %p11816_p11 = pneg %p12391_p10  ;;  %s12268_s23 = smov 4  }
  0x15   : > { %s12269_s27 = smov [#allocation7]   ;;  %402 = sbr.rel (%p12391_p10) target bundleno = 3280 (0xcd0), region = 68 }
  0x16   : > { %p11817_p12 = pnand %p11827_p9, %p11816_p11  ;;  %s362_s16 = sshll.u32 %s12269_s27, 4  ;;  %s363_s16 = int_to_ptr.vmem [resolvable:$true] %s362_s16 }
  0x18   : > { %11819 = dma.hbm_to_vmem [thread:$0]  (!%p11817_p12), %s344_s18, 5120, %s346_s20, [#allocation5], %s12267_s30, %s12267_s30, %s12268_s23  }
  0x19   : > { %11822 = dma.hbm_to_vmem [thread:$0]  (!%p11817_p12), %s361_s29, 5120, %s363_s16, [#allocation8], %s12267_s30, %s12267_s30, %s12268_s23  }
  0x1a   : > { %12239 = dma.done.wait (%p11827_p9), [#allocation5], 5120  }
  0x1b   : > { %12241 = vsyncadd (%p11827_p9), [#allocation5], 4294962176 }
  0x1c   : > { %12243 = dma.done.wait (%p11827_p9), [#allocation8], 5120  }
  0x1d   : > { %12245 = vsyncadd (%p11827_p9), [#allocation8], 4294962176  ;;  %vm464_vm0 = vcmask 1044464   ;;  %v12270_v0 = vmov 0   ;;  %p454_p13 = scmp.lt.s32.totalorder %s12363_s25, 1  ;;  %s16715_s23 = smov 1  }
  0x1e   : > { %473 = vst.msk [vmem:[#allocation2 + $0x80] sm:$0xf] %vm464_vm0, %v12270_v0  ;;  %11876 = vset.pattern.permute.xlu1 %v12270_v0  ;;  %11875 = vset.pattern.permute.xlu0 %v12270_v0  ;;  %s16735_s0 = sld [smem:[#allocation41_spill]]  ;;  %s16713_s19 = smov 2   ;;  %vm758_vm1 = vcmask 7168   ;;  %vm481_vm2 = vcmask 11264  }
  0x1f   : > { %474 = vst.msk [vmem:[#allocation2 + $0x90] sm:$0xf] %vm464_vm0, %v12270_v0  ;;  %11877 = vset.pattern.permute.xlu2 %v12270_v0  ;;  %s12454_s27 = scalar_select %p454_p13, %s12363_s25, 1  ;;  %vm779_vm3 = vcmask 654336   ;;  %vm972_vm4 = vcmask 15360   ;;  %vm1558_vm5 = vcmask 1039360  }
  0x20   : > { %465 = vst.msk [vmem:[#allocation2] sm:$0xf] %vm464_vm0, %v12270_v0  ;;  %s16706_s20 = smov 127   ;;  %s16704_s26 = smov 126   ;;  %vm1820_vm6 = vcmask 1031168  }
  0x21   : > { %466 = vst.msk [vmem:[#allocation2 + $0x10] sm:$0xf] %vm464_vm0, %v12270_v0  ;;  %s11804_s30 = smul.u32 160, %s12454_s27  ;;  %s16826_s15 = smov 127  }
  0x22   : > { %467 = vst.msk [vmem:[#allocation2 + $0x20] sm:$0xf] %vm464_vm0, %v12270_v0  ;;  %s16827_s17 = smov 126   ;;  %s16843_s16 = smov 1  }
  0x23   : > { %468 = vst.msk [vmem:[#allocation2 + $0x30] sm:$0xf] %vm464_vm0, %v12270_v0  ;;  %s451_s28 = sand.u32 1, %s12256_s22  }
  0x24   : > { %469 = vst.msk [vmem:[#allocation2 + $0x40] sm:$0xf] %vm464_vm0, %v12270_v0  ;;  %s12484_s18 = scalar_lea.vmem %s16735_s0, %s11804_s30  ;;  %s16852_s30 = smov 2  }
  0x25   : > { %v9235_v1 = vld [vmem:[#allocation2 + $0x80] sm:$0xf]  ;;  %470 = vst.msk [vmem:[#allocation2 + $0x50] sm:$0xf] %vm464_vm0, %v12270_v0  ;;  %v547_v11 = vld [vmem:[%s12484_s18 + $0x88] sm:$0xff]  ;;  %v548_v12 = vld [vmem:[%s12484_s18 + $0x90] sm:$0xff] }
  0x26   : > { %v11333_v2 = vld [vmem:[#allocation2 + $0x8c] sm:$0xf0]  ;;  %471 = vst.msk [vmem:[#allocation2 + $0x60] sm:$0xf] %vm464_vm0, %v12270_v0  ;;  %v546_v10 = vld [vmem:[%s12484_s18 + $0x80] sm:$0xff]  ;;  %v549_v13 = vld [vmem:[%s12484_s18 + $0x98] sm:$0xff] }
  0x27   : > { %v12436_v3 = vor.u32 %v11333_v2, %v9235_v1  ;;  %472 = vst.msk [vmem:[#allocation2 + $0x70] sm:$0xf] %vm464_vm0, %v12270_v0  ;;  %v542_v14 = vld [vmem:[%s12484_s18 + $0x60] sm:$0xff]  ;;  %v543_v15 = vld [vmem:[%s12484_s18 + $0x68] sm:$0xff]  ;;  %v558_v16 = vpack.c.bf16 %v547_v11, %v546_v10  ;;  %v544_v17 = vld [vmem:[%s12484_s18 + $0x70] sm:$0xff]  ;;  %v559_v19 = vpack.c.bf16 %v549_v13, %v548_v12 }
  0x28   : > { %475 = vst.msk [vmem:[#allocation2 + $0xa0] sm:$0xf] %vm464_vm0, %v12270_v0  ;;  %v545_v18 = vld [vmem:[%s12484_s18 + $0x78] sm:$0xff]  ;;  %v538_v20 = vld [vmem:[%s12484_s18 + $0x40] sm:$0xff]  ;;  %v539_v21 = vld [vmem:[%s12484_s18 + $0x48] sm:$0xff]  ;;  %v556_v22 = vpack.c.bf16 %v543_v15, %v542_v14 }
  0x29   : > { %752 = vrot.lane.b32.xlu0 %v12436_v3, %s16715_s23  ;;  %476 = vst.msk [vmem:[#allocation2 + $0xb0] sm:$0xf] %vm464_vm0, %v12270_v0  ;;  %v540_v23 = vld [vmem:[%s12484_s18 + $0x50] sm:$0xff]  ;;  %v541_v24 = vld [vmem:[%s12484_s18 + $0x58] sm:$0xff]  ;;  %v557_v25 = vpack.c.bf16 %v545_v18, %v544_v17  ;;  %v534_v26 = vld [vmem:[%s12484_s18 + $0x20] sm:$0xff]  ;;  %v554_v28 = vpack.c.bf16 %v539_v21, %v538_v20 }
  0x2a   : > { %477 = vst.msk [vmem:[#allocation2 + $0xc0] sm:$0xf] %vm464_vm0, %v12270_v0  ;;  %v535_v27 = vld [vmem:[%s12484_s18 + $0x28] sm:$0xff]  ;;  %v536_v29 = vld [vmem:[%s12484_s18 + $0x30] sm:$0xff]  ;;  %v537_v30 = vld [vmem:[%s12484_s18 + $0x38] sm:$0xff]  ;;  %v555_v31 = vpack.c.bf16 %v541_v24, %v540_v23 }
  0x2b   : > { %478 = vst.msk [vmem:[#allocation2 + $0xd0] sm:$0xf] %vm464_vm0, %v12270_v0  ;;  %v9211_v4 = vld [vmem:[#allocation2 + $0x40] sm:$0xf]  ;;  %v531_v33 = vld [vmem:[%s12484_s18 + $0x8] sm:$0xff]  ;;  %v552_v34 = vpack.c.bf16 %v535_v27, %v534_v26  ;;  %v532_v35 = vld [vmem:[%s12484_s18 + $0x10] sm:$0xff]  ;;  %v553_v37 = vpack.c.bf16 %v537_v30, %v536_v29 }
  0x2c   : > { %479 = vst.msk [vmem:[#allocation2 + $0xe0] sm:$0xf] %vm464_vm0, %v12270_v0  ;;  %v11327_v5 = vld [vmem:[#allocation2 + $0x4c] sm:$0xf0]  ;;  %v530_v32 = vld [vmem:[%s12484_s18] sm:$0xff]  ;;  %v533_v36 = vld [vmem:[%s12484_s18 + $0x18] sm:$0xff] }
  0x2d   : > { %480 = vst.msk [vmem:[#allocation2 + $0xf0] sm:$0xf] %vm464_vm0, %v12270_v0  ;;  %v9223_v6 = vld [vmem:[#allocation2 + $0x60] sm:$0xf]  ;;  %v12458_v7 = vor.u32 %v11327_v5, %v9211_v4  ;;  %v550_v38 = vpack.c.bf16 %v531_v33, %v530_v32  ;;  %v551_v39 = vpack.c.bf16 %v533_v36, %v532_v35  ;;  %v11324_v52 = vld [vmem:[#allocation2 + $0x2c] sm:$0xf0] }
  0x2e   : > { %498 = vst.msk [vmem:[#allocation3] sm:$0xf] %vm464_vm0, %v12270_v0  ;;  %v11330_v8 = vld [vmem:[#allocation2 + $0x6c] sm:$0xf0]  ;;  %v9199_v49 = vld [vmem:[#allocation2 + $0x20] sm:$0xf] }
  0x2f   : > { %499 = vst.msk [vmem:[#allocation3 + $0x10] sm:$0xf] %vm464_vm0, %v12270_v0  ;;  %v12464_v9 = vor.u32 %v11330_v8, %v9223_v6  ;;  %v9200_v56 = vor.u32 %v11324_v52, %v9199_v49  ;;  %v9187_v58 = vld [vmem:[#allocation2] sm:$0xf]  ;;  %v11321_v61 = vld [vmem:[#allocation2 + $0xc] sm:$0xf0] }
  0x30   : > { %500 = vst.msk [vmem:[#allocation3 + $0x20] sm:$0xf] %vm464_vm0, %v12270_v0  ;;  %v9188_v2 = vor.u32 %v11321_v61, %v9187_v58  ;;  %v11335_v61 = vld [vmem:[%s16685_s2 + $0x40] sm:$0xff] }
  0x31   : > { %501 = vst.msk [vmem:[#allocation3 + $0x30] sm:$0xf] %vm464_vm0, %v12270_v0  ;;  %746 = vrot.lane.b32.xlu1 %v12464_v9, %s16715_s23  ;;  %740 = vrot.lane.b32.xlu0 %v12458_v7, %s16715_s23 }
  0x32   : > { %502 = vst.msk [vmem:[#allocation3 + $0x40] sm:$0xf] %vm464_vm0, %v12270_v0 }
  0x33   : > { %503 = vst.msk [vmem:[#allocation3 + $0x50] sm:$0xf] %vm464_vm0, %v12270_v0 }
  0x34   : > { %504 = vst.msk [vmem:[#allocation3 + $0x60] sm:$0xf] %vm464_vm0, %v12270_v0 }
  0x35   : > { %505 = vst.msk [vmem:[#allocation3 + $0x70] sm:$0xf] %vm464_vm0, %v12270_v0 }
  0x36   : > { %506 = vst.msk [vmem:[#allocation3 + $0x80] sm:$0xf] %vm464_vm0, %v12270_v0 }
  0x37   : > { %507 = vst.msk [vmem:[#allocation3 + $0x90] sm:$0xf] %vm464_vm0, %v12270_v0 }
  0x38   : > { %508 = vst.msk [vmem:[#allocation3 + $0xa0] sm:$0xf] %vm464_vm0, %v12270_v0 }
  0x39   : > { %509 = vst.msk [vmem:[#allocation3 + $0xb0] sm:$0xf] %vm464_vm0, %v12270_v0 }
  0x3a   : > { %510 = vst.msk [vmem:[#allocation3 + $0xc0] sm:$0xf] %vm464_vm0, %v12270_v0 }
  0x3b   : > { %511 = vst.msk [vmem:[#allocation3 + $0xd0] sm:$0xf] %vm464_vm0, %v12270_v0 }
  0x3c   : > { %512 = vst.msk [vmem:[#allocation3 + $0xe0] sm:$0xf] %vm464_vm0, %v12270_v0 }
  0x3d   : > { %513 = vst.msk [vmem:[#allocation3 + $0xf0] sm:$0xf] %vm464_vm0, %v12270_v0 }
  0x3e   : > { %568 = vst [vmem:[#allocation2 + $0x84] sm:$0xff] %v558_v16 }
  0x3f   : > { %569 = vst [vmem:[#allocation2 + $0x94] sm:$0xff] %v559_v19 }
  0x40   : > { %566 = vst [vmem:[#allocation2 + $0x64] sm:$0xff] %v556_v22 }
  0x41   : > { %567 = vst [vmem:[#allocation2 + $0x74] sm:$0xff] %v557_v25 }
  0x42   : > { %564 = vst [vmem:[#allocation2 + $0x44] sm:$0xff] %v554_v28 }
  0x43   : > { %565 = vst [vmem:[#allocation2 + $0x54] sm:$0xff] %v555_v31 }
  0x44   : > { %562 = vst [vmem:[#allocation2 + $0x24] sm:$0xff] %v552_v34 }
  0x45   : > { %v9243_v40 = vld [vmem:[#allocation2 + $0x88] sm:$0xf]  ;;  %v11332_v41 = vld [vmem:[#allocation2 + $0x84] sm:$0xf]  ;;  %563 = vst [vmem:[#allocation2 + $0x34] sm:$0xff] %v553_v37 }
  0x46   : > { %v11334_v42 = vld [vmem:[#allocation2 + $0x94] sm:$0xf0]  ;;  %v9237_v43 = vld [vmem:[#allocation2 + $0x90] sm:$0xf0]  ;;  %560 = vst [vmem:[#allocation2 + $0x4] sm:$0xff] %v550_v38 }
  0x47   : > { %v9244_v44 = vor.u32 %v11334_v42, %v9243_v40  ;;  %v9240_v45 = vor.u32 %v11332_v41, %v9237_v43  ;;  %v11329_v46 = vld [vmem:[#allocation2 + $0x64] sm:$0xf]  ;;  %561 = vst [vmem:[#allocation2 + $0x14] sm:$0xff] %v551_v39  ;;  %v9231_v53 = vld [vmem:[#allocation2 + $0x68] sm:$0xf] }
  0x48   : > { %v9225_v47 = vld [vmem:[#allocation2 + $0x70] sm:$0xf0]  ;;  %v11331_v54 = vld [vmem:[#allocation2 + $0x74] sm:$0xf0]  ;;  %v11381_v19 = vld [vmem:[#allocation2 + $0x88] sm:$0xf] }
  0x49   : > { %756 = vrot.lane.b32.xlu1 %v9244_v44, %s16715_s23  ;;  %754 = vrot.lane.b32.xlu0 %v9240_v45, %s16715_s23  ;;  %v9228_v48 = vor.u32 %v11329_v46, %v9225_v47  ;;  %v11326_v50 = vld [vmem:[#allocation2 + $0x44] sm:$0xf]  ;;  %v9232_v57 = vor.u32 %v11331_v54, %v9231_v53  ;;  %v9219_v62 = vld [vmem:[#allocation2 + $0x48] sm:$0xf]  ;;  %v9513_v20 = vld [vmem:[#allocation2 + $0x94] sm:$0xf0] }
  0x4a   : > { %v9213_v51 = vld [vmem:[#allocation2 + $0x50] sm:$0xf0]  ;;  %v11328_v63 = vld [vmem:[#allocation2 + $0x54] sm:$0xf0]  ;;  %v9511_v21 = vld [vmem:[#allocation2 + $0x84] sm:$0xf]  ;;  %v12554_v22 = vor.u32 %v11381_v19, %v9513_v20 }
  0x4b   : > { %748 = vrot.lane.b32.xlu2 %v9228_v48, %s16715_s23  ;;  %v9216_v55 = vor.u32 %v11326_v50, %v9213_v51  ;;  %v11323_v59 = vld [vmem:[#allocation2 + $0x24] sm:$0xf]  ;;  %v9220_v4 = vor.u32 %v11328_v63, %v9219_v62  ;;  %v9207_v8 = vld [vmem:[#allocation2 + $0x28] sm:$0xf]  ;;  %v11382_v23 = vld [vmem:[#allocation2 + $0x90] sm:$0xf0] }
  0x4c   : > { %v9201_v60 = vld [vmem:[#allocation2 + $0x30] sm:$0xf0]  ;;  %v11325_v10 = vld [vmem:[#allocation2 + $0x34] sm:$0xf0]  ;;  %v12556_v24 = vor.u32 %v11382_v23, %v9511_v21  ;;  %v11378_v27 = vld [vmem:[#allocation2 + $0x68] sm:$0xf] }
  0x4d   : > { %v9204_v1 = vor.u32 %v11323_v59, %v9201_v60  ;;  %v11320_v5 = vld [vmem:[#allocation2 + $0x4] sm:$0xf]  ;;  %v9208_v12 = vor.u32 %v11325_v10, %v9207_v8  ;;  %v9195_v13 = vld [vmem:[#allocation2 + $0x8] sm:$0xf]  ;;  %v9501_v30 = vld [vmem:[#allocation2 + $0x74] sm:$0xf0] }
  0x4e   : > { %v9189_v6 = vld [vmem:[#allocation2 + $0x10] sm:$0xf0]  ;;  %v11322_v14 = vld [vmem:[#allocation2 + $0x14] sm:$0xf0]  ;;  %v9499_v31 = vld [vmem:[#allocation2 + $0x64] sm:$0xf]  ;;  %v12564_v34 = vor.u32 %v11378_v27, %v9501_v30 }
  0x4f   : > { %v9192_v11 = vor.u32 %v11320_v5, %v9189_v6  ;;  %v9196_v15 = vor.u32 %v11322_v14, %v9195_v13  ;;  %v11379_v32 = vld [vmem:[#allocation2 + $0x70] sm:$0xf0]  ;;  %v11375_v43 = vld [vmem:[#allocation2 + $0x48] sm:$0xf]  ;;  %490 = vst.msk [vmem:[#allocation2 + $0x8c] sm:$0xf] %vm481_vm2, %v12270_v0 }
  0x50   : > { %v12566_v35 = vor.u32 %v11379_v32, %v9499_v31  ;;  %v11376_v47 = vld [vmem:[#allocation2 + $0x50] sm:$0xf0]  ;;  %491 = vst.msk [vmem:[#allocation2 + $0x9c] sm:$0xf] %vm481_vm2, %v12270_v0  ;;  %v11372_v63 = vld [vmem:[#allocation2 + $0x28] sm:$0xf] }
  0x51   : > { %742 = vrot.lane.b32.xlu1 %v9216_v55, %s16715_s23  ;;  %734 = vrot.lane.b32.xlu0 %v9200_v56, %s16715_s23  ;;  %482 = vst.msk [vmem:[#allocation2 + $0xc] sm:$0xf] %vm481_vm2, %v12270_v0  ;;  %v11341_v62 = vld [vmem:[%s16685_s2 + $0x70] sm:$0xff]  ;;  %v9475_v5 = vld [vmem:[#allocation2 + $0x24] sm:$0xf]  ;;  %v11342_v19 = vld [vmem:[%s16685_s2 + $0x78] sm:$0xff] }
  0x52   : > { %483 = vst.msk [vmem:[#allocation2 + $0x1c] sm:$0xf] %vm481_vm2, %v12270_v0  ;;  %v11373_v8 = vld [vmem:[#allocation2 + $0x30] sm:$0xf0]  ;;  %v9463_v27 = vld [vmem:[#allocation2 + $0x4] sm:$0xf] }
  0x53   : > { %750 = vrot.lane.b32.xlu2 %v9232_v57, %s16715_s23  ;;  %484 = vst.msk [vmem:[#allocation2 + $0x2c] sm:$0xf] %vm481_vm2, %v12270_v0 }
  0x54   : > { %485 = vst.msk [vmem:[#allocation2 + $0x3c] sm:$0xf] %vm481_vm2, %v12270_v0 }
  0x55   : > { %486 = vst.msk [vmem:[#allocation2 + $0x4c] sm:$0xf] %vm481_vm2, %v12270_v0 }
  0x56   : > { %v9519_v54 = vld [vmem:[#allocation2 + $0x8c] sm:$0xf]  ;;  %487 = vst.msk [vmem:[#allocation2 + $0x5c] sm:$0xf] %vm481_vm2, %v12270_v0 }
  0x57   : > { %488 = vst.msk [vmem:[#allocation2 + $0x6c] sm:$0xf] %vm481_vm2, %v12270_v0 }
  0x58   : > { %489 = vst.msk [vmem:[#allocation2 + $0x7c] sm:$0xf] %vm481_vm2, %v12270_v0 }
  0x59   : > { %736 = vrot.lane.b32.xlu1 %v9204_v1, %s16715_s23  ;;  %728 = vrot.lane.b32.xlu0 %v9188_v2, %s16715_s23  ;;  %492 = vst.msk [vmem:[#allocation2 + $0xac] sm:$0xf] %vm481_vm2, %v12270_v0 }
  0x5a   : > { %493 = vst.msk [vmem:[#allocation2 + $0xbc] sm:$0xf] %vm481_vm2, %v12270_v0 }
  0x5b   : > { %744 = vrot.lane.b32.xlu2 %v9220_v4, %s16715_s23  ;;  %494 = vst.msk [vmem:[#allocation2 + $0xcc] sm:$0xf] %vm481_vm2, %v12270_v0 }
  0x5c   : > { %495 = vst.msk [vmem:[#allocation2 + $0xdc] sm:$0xf] %vm481_vm2, %v12270_v0 }
  0x5d   : > { %496 = vst.msk [vmem:[#allocation2 + $0xec] sm:$0xf] %vm481_vm2, %v12270_v0 }
  0x5e   : > { %497 = vst.msk [vmem:[#allocation2 + $0xfc] sm:$0xf] %vm481_vm2, %v12270_v0 }
  0x5f   : > { %514 = vst.msk [vmem:[#allocation3 + $0xc] sm:$0xf] %vm481_vm2, %v12270_v0  ;;  %v11380_v6 = vld [vmem:[#allocation2 + $0x78] sm:$0xf0] }
  0x60   : > { %515 = vst.msk [vmem:[#allocation3 + $0x1c] sm:$0xf] %vm481_vm2, %v12270_v0 }
  0x61   : > { %730 = vrot.lane.b32.xlu1 %v9192_v11, %s16715_s23  ;;  %966 = vrot.lane.b32.xlu0 %v12436_v3, %s16713_s19  ;;  %516 = vst.msk [vmem:[#allocation3 + $0x2c] sm:$0xf] %vm481_vm2, %v12270_v0 }
  0x62   : > { %517 = vst.msk [vmem:[#allocation3 + $0x3c] sm:$0xf] %vm481_vm2, %v12270_v0 }
  0x63   : > { %738 = vrot.lane.b32.xlu2 %v9208_v12, %s16715_s23  ;;  %518 = vst.msk [vmem:[#allocation3 + $0x4c] sm:$0xf] %vm481_vm2, %v12270_v0 }
  0x64   : > { %519 = vst.msk [vmem:[#allocation3 + $0x5c] sm:$0xf] %vm481_vm2, %v12270_v0 }
  0x65   : > { %520 = vst.msk [vmem:[#allocation3 + $0x6c] sm:$0xf] %vm481_vm2, %v12270_v0 }
  0x66   : > { %521 = vst.msk [vmem:[#allocation3 + $0x7c] sm:$0xf] %vm481_vm2, %v12270_v0 }
  0x67   : > { %522 = vst.msk [vmem:[#allocation3 + $0x8c] sm:$0xf] %vm481_vm2, %v12270_v0 }
  0x68   : > { %523 = vst.msk [vmem:[#allocation3 + $0x9c] sm:$0xf] %vm481_vm2, %v12270_v0 }
  0x69   : > { %968 = vrot.lane.b32.xlu1 %v9240_v45, %s16713_s19  ;;  %960 = vrot.lane.b32.xlu0 %v12464_v9, %s16713_s19  ;;  %v9487_v45 = vld [vmem:[#allocation2 + $0x44] sm:$0xf]  ;;  %524 = vst.msk [vmem:[#allocation3 + $0xac] sm:$0xf] %vm481_vm2, %v12270_v0 }
  0x6a   : > { %525 = vst.msk [vmem:[#allocation3 + $0xbc] sm:$0xf] %vm481_vm2, %v12270_v0 }
  0x6b   : > { %732 = vrot.lane.b32.xlu2 %v9196_v15, %s16715_s23  ;;  %526 = vst.msk [vmem:[#allocation3 + $0xcc] sm:$0xf] %vm481_vm2, %v12270_v0 }
  0x6c   : > { %527 = vst.msk [vmem:[#allocation3 + $0xdc] sm:$0xf] %vm481_vm2, %v12270_v0 }
  0x6d   : > { %528 = vst.msk [vmem:[#allocation3 + $0xec] sm:$0xf] %vm481_vm2, %v12270_v0 }
  0x6e   : > { %529 = vst.msk [vmem:[#allocation3 + $0xfc] sm:$0xf] %vm481_vm2, %v12270_v0 }
  0x71   : > { %962 = vrot.lane.b32.xlu1 %v9228_v48, %s16713_s19  ;;  %954 = vrot.lane.b32.xlu0 %v12458_v7, %s16713_s19  ;;  %v12578_v48 = vor.u32 %v11376_v47, %v9487_v45  ;;  %v9471_v47 = vld [vmem:[#allocation2 + $0xc] sm:$0xf] }
  0x73   : > { %970 = vrot.lane.b32.xlu2 %v9244_v44, %s16713_s19  ;;  %v9489_v44 = vld [vmem:[#allocation2 + $0x54] sm:$0xf0] }
  0x74   : > { %v12576_v46 = vor.u32 %v11375_v43, %v9489_v44 }
  0x79   : > { %956 = vrot.lane.b32.xlu1 %v9216_v55, %s16713_s19  ;;  %948 = vrot.lane.b32.xlu0 %v9200_v56, %s16713_s19  ;;  %v11383_v55 = vld [vmem:[#allocation2 + $0x98] sm:$0xf0] }
  0x7a   : > { %v12604_v56 = vor.u32 %v11383_v55, %v9519_v54  ;;  %v9393_v54 = vld [vmem:[#allocation2 + $0x94] sm:$0xf0] }
  0x7b   : > { %964 = vrot.lane.b32.xlu2 %v9232_v57, %s16713_s19 }
  0x81   : > { %950 = vrot.lane.b32.xlu1 %v9204_v1, %s16713_s19  ;;  %942 = vrot.lane.b32.xlu0 %v9188_v2, %s16713_s19  ;;  %v9477_v1 = vld [vmem:[#allocation2 + $0x34] sm:$0xf0]  ;;  %v9507_v2 = vld [vmem:[#allocation2 + $0x6c] sm:$0xf] }
  0x83   : > { %958 = vrot.lane.b32.xlu2 %v9220_v4, %s16713_s19  ;;  %v12636_v4 = vor.u32 %v11372_v63, %v9477_v1  ;;  %v9375_v63 = vld [vmem:[#allocation2 + $0x44] sm:$0xf]  ;;  %v11356_v1 = vld [vmem:[#allocation2 + $0x50] sm:$0xf0] }
  0x89   : > { %944 = vrot.lane.b32.xlu1 %v9192_v11, %s16713_s19  ;;  %1552 = vrot.lane.b32.xlu0 %v12556_v24, %s16706_s20  ;;  %v12644_v11 = vor.u32 %v11380_v6, %v9507_v2  ;;  %v11355_v2 = vld [vmem:[#allocation2 + $0x48] sm:$0xf] }
  0x8b   : > { %952 = vrot.lane.b32.xlu2 %v9208_v12, %s16713_s19  ;;  %v12646_v12 = vor.u32 %v11373_v8, %v9475_v5  ;;  %v9377_v5 = vld [vmem:[#allocation2 + $0x54] sm:$0xf0]  ;;  %v11313_v8 = vld [vmem:[%s16685_s2 + $0x8] sm:$0xff] }
  0x8c   : > { %v9380_v6 = vor.u32 %v11355_v2, %v9377_v5 }
  0x91   : > { %1554 = vrot.lane.b32.xlu1 %v12554_v22, %s16706_s20  ;;  %1546 = vrot.lane.b32.xlu0 %v12566_v35, %s16706_s20 }
  0x93   : > { %946 = vrot.lane.b32.xlu2 %v9196_v15, %s16713_s19 }
  0x99   : > { %1548 = vrot.lane.b32.xlu1 %v12564_v34, %s16706_s20  ;;  %1540 = vrot.lane.b32.xlu0 %v12578_v48, %s16706_s20 }
  0x9b   : > { %v753_v7 = vpop.permute.xlu0 %752  ;;  %1556 = vrot.lane.b32.xlu2 %v12604_v56, %s16706_s20 }
  0xa1   : > { %1542 = vrot.lane.b32.xlu1 %v12576_v46, %s16706_s20  ;;  %1814 = vrot.lane.b32.xlu0 %v12556_v24, %s16704_s26  ;;  %v11369_v24 = vld [vmem:[#allocation2 + $0x8] sm:$0xf] }
  0xa3   : > { %v747_v16 = vpop.permute.xlu1 %746  ;;  %v741_v17 = vpop.permute.xlu0 %740  ;;  %1550 = vrot.lane.b32.xlu2 %v12644_v11, %s16706_s20 }
  0xa5   : > { %v749_v3 = vpop.permute.xlu2 %748 }
  0xa6   : > { %v765_v36 = vsel %vm758_vm1, %v747_v16, %v749_v3 }
  0xa9   : > { %1816 = vrot.lane.b32.xlu1 %v12554_v22, %s16704_s26  ;;  %1534 = vrot.lane.b32.xlu0 %v12646_v12, %s16706_s20 }
  0xad   : > { %v751_v9 = vpop.permute.xlu2 %750 }
  0xae   : > { %v766_v37 = vsel %vm758_vm1, %v749_v3, %v751_v9  ;;  %v11377_v9 = vld [vmem:[#allocation2 + $0x58] sm:$0xf0] }
  0xb1   : > { %1536 = vrot.lane.b32.xlu1 %v12636_v4, %s16706_s20  ;;  %1808 = vrot.lane.b32.xlu0 %v12566_v35, %s16704_s26  ;;  %v11374_v35 = vld [vmem:[#allocation2 + $0x38] sm:$0xf0] }
  0xb5   : > { %v745_v18 = vpop.permute.xlu2 %744 }
  0xb9   : > { %1810 = vrot.lane.b32.xlu1 %v12564_v34, %s16704_s26  ;;  %v9483_v34 = vld [vmem:[#allocation2 + $0x2c] sm:$0xf] }
  0xbb   : > { %v757_v25 = vpop.permute.xlu1 %756  ;;  %v755_v26 = vpop.permute.xlu0 %754 }
  0xbc   : > { %v767_v28 = vsel %vm758_vm1, %v753_v7, %v755_v26  ;;  %v768_v29 = vsel %vm758_vm1, %v755_v26, %v757_v25  ;;  %v9495_v7 = vld [vmem:[#allocation2 + $0x4c] sm:$0xf]  ;;  %v9465_v25 = vld [vmem:[#allocation2 + $0x14] sm:$0xf0] }
  0xbd   : > { %807 = vmatpush.bf16.msra.mxu0 %v767_v28  ;;  %11793 = vmatpush.bf16.msra.mxu2 %v767_v28  ;;  %v739_v33 = vpop.permute.xlu2 %738  ;;  %v12668_v16 = vor.u32 %v11377_v9, %v9495_v7  ;;  %v9468_v26 = vor.u32 %v11369_v24, %v9465_v25  ;;  %v11370_v28 = vld [vmem:[#allocation2 + $0x10] sm:$0xf0]  ;;  %v11351_v9 = vld [vmem:[#allocation2 + $0x8] sm:$0xf] }
  0xbe   : > { %856 = vmatpush.bf16.msra.mxu1 %v768_v29  ;;  %11798 = vmatpush.bf16.msra.mxu3 %v768_v29  ;;  %v9464_v29 = vor.u32 %v11370_v28, %v9463_v27  ;;  %v11343_v27 = vld [vmem:[%s16685_s2 + $0x80] sm:$0xff] }
  0xbf   : > { %1544 = vrot.lane.b32.xlu2 %v12668_v16, %s16706_s20 }
  0xc0   : > { %1528 = vrot.lane.b32.xlu0 %v9464_v29, %s16706_s20 }
  0xc1   : > { %808 = vmatpush.bf16.msra.mxu0 %v765_v36  ;;  %11794 = vmatpush.bf16.msra.mxu2 %v765_v36  ;;  %v12710_v36 = vor.u32 %v11374_v35, %v9483_v34  ;;  %v11344_v34 = vld [vmem:[%s16685_s2 + $0x88] sm:$0xff] }
  0xc2   : > { %857 = vmatpush.bf16.msra.mxu1 %v766_v37  ;;  %11799 = vmatpush.bf16.msra.mxu3 %v766_v37 }
  0xc3   : > { %v743_v38 = vpop.permute.xlu1 %742  ;;  %v735_v39 = vpop.permute.xlu0 %734  ;;  %1530 = vrot.lane.b32.xlu1 %v9468_v26, %s16706_s20 }
  0xc4   : > { %v763_v40 = vsel %vm758_vm1, %v741_v17, %v743_v38  ;;  %v764_v41 = vsel %vm758_vm1, %v743_v38, %v745_v18  ;;  %v11336_v18 = vld [vmem:[%s16685_s2 + $0x48] sm:$0xff]  ;;  %v11337_v38 = vld [vmem:[%s16685_s2 + $0x50] sm:$0xff] }
  0xc5   : > { %809 = vmatpush.bf16.msra.mxu0 %v763_v40  ;;  %11795 = vmatpush.bf16.msra.mxu2 %v763_v40  ;;  %v733_v42 = vpop.permute.xlu2 %732 }
  0xc6   : > { %858 = vmatpush.bf16.msra.mxu1 %v764_v41  ;;  %11800 = vmatpush.bf16.msra.mxu3 %v764_v41 }
  0xc7   : > { %1818 = vrot.lane.b32.xlu2 %v12604_v56, %s16704_s26  ;;  %v11338_v56 = vld [vmem:[%s16685_s2 + $0x58] sm:$0xff] }
  0xc8   : > { %1802 = vrot.lane.b32.xlu0 %v12578_v48, %s16704_s26  ;;  %v11371_v48 = vld [vmem:[#allocation2 + $0x18] sm:$0xf0] }
  0xcb   : > { %v737_v49 = vpop.permute.xlu1 %736  ;;  %v729_v50 = vpop.permute.xlu0 %728  ;;  %1804 = vrot.lane.b32.xlu1 %v12576_v46, %s16704_s26  ;;  %v11312_v46 = vld [vmem:[%s16685_s2] sm:$0xff] }
  0xcc   : > { %v761_v51 = vsel %vm758_vm1, %v735_v39, %v737_v49  ;;  %v762_v52 = vsel %vm758_vm1, %v737_v49, %v739_v33  ;;  %v9472_v49 = vor.u32 %v11371_v48, %v9471_v47 }
  0xcd   : > { %810 = vmatpush.bf16.msra.mxu0 %v761_v51  ;;  %11796 = vmatpush.bf16.msra.mxu2 %v761_v51  ;;  %v971_v53 = vpop.permute.xlu2 %970  ;;  %v11360_v51 = vld [vmem:[#allocation2 + $0x90] sm:$0xf0] }
  0xce   : > { %859 = vmatpush.bf16.msra.mxu1 %v762_v52  ;;  %11801 = vmatpush.bf16.msra.mxu3 %v762_v52  ;;  %v11359_v52 = vld [vmem:[#allocation2 + $0x88] sm:$0xf] }
  0xcf   : > { %1538 = vrot.lane.b32.xlu2 %v12710_v36, %s16706_s20  ;;  %v9396_v55 = vor.u32 %v11359_v52, %v9393_v54 }
  0xd0   : > { %1796 = vrot.lane.b32.xlu0 %v12646_v12, %s16704_s26  ;;  %v9367_v12 = vld [vmem:[#allocation2 + $0x24] sm:$0xf] }
  0xd3   : > { %v731_v57 = vpop.permute.xlu1 %730  ;;  %v967_v58 = vpop.permute.xlu0 %966  ;;  %1798 = vrot.lane.b32.xlu1 %v12636_v4, %s16704_s26  ;;  %v9376_v4 = vor.u32 %v11356_v1, %v9375_v63 }
  0xd4   : > { %v759_v59 = vsel %vm758_vm1, %v729_v50, %v731_v57  ;;  %v760_v60 = vsel %vm758_vm1, %v731_v57, %v733_v42  ;;  %v9391_v50 = vld [vmem:[#allocation2 + $0x84] sm:$0xf] }
  0xd5   : > { %811 = vmatpush.bf16.msra.mxu0 %v759_v59  ;;  %11797 = vmatpush.bf16.msra.mxu2 %v759_v59  ;;  %v965_v10 = vpop.permute.xlu2 %964  ;;  %v9383_v57 = vld [vmem:[#allocation2 + $0x64] sm:$0xf]  ;;  %v11357_v59 = vld [vmem:[#allocation2 + $0x68] sm:$0xf] }
  0xd6   : > { %860 = vmatpush.bf16.msra.mxu1 %v760_v60  ;;  %11802 = vmatpush.bf16.msra.mxu3 %v760_v60 }
  0xd7   : > { %1812 = vrot.lane.b32.xlu2 %v12644_v11, %s16704_s26  ;;  %v9369_v11 = vld [vmem:[#allocation2 + $0x34] sm:$0xf0] }
  0xd8   : > { %9245 = vmatmul.msk.bf16.vlgmr.msra.gmra.mxu0 %vm779_vm3, %v11335_v61  ;;  %9251 = vmatmul.msk.bf16.vlgmr.msra.gmra.mxu2 %vm779_vm3, %v11341_v62 }
  0xd9   : > { %9253 = vmatmul.msk.bf16.vlgmr.msra.gmra.mxu1 %vm779_vm3, %v11335_v61  ;;  %9259 = vmatmul.msk.bf16.vlgmr.msra.gmra.mxu3 %vm779_vm3, %v11341_v62  ;;  %v9385_v61 = vld [vmem:[#allocation2 + $0x74] sm:$0xf0] }
  0xda   : > { %1308 = vmatpush.bf16.msrb.mxu1 %v9396_v55  ;;  %1790 = vrot.lane.b32.xlu0 %v9464_v29, %s16704_s26  ;;  %v9388_v62 = vor.u32 %v11357_v59, %v9385_v61 }
  0xdb   : > { %v969_v13 = vpop.permute.xlu1 %968  ;;  %v961_v14 = vpop.permute.xlu0 %960  ;;  %1792 = vrot.lane.b32.xlu1 %v9468_v26, %s16704_s26 }
  0xdc   : > { %v981_v15 = vsel %vm972_vm4, %v967_v58, %v969_v13  ;;  %v982_v3 = vsel %vm972_vm4, %v969_v13, %v971_v53  ;;  %v9392_v53 = vor.u32 %v11360_v51, %v9391_v50  ;;  %v11358_v58 = vld [vmem:[#allocation2 + $0x70] sm:$0xf0] }
  0xdd   : > { %1020 = vmatpush.bf16.msrb.mxu2 %v981_v15  ;;  %1069 = vmatpush.bf16.msrb.mxu3 %v982_v3  ;;  %v959_v22 = vpop.permute.xlu2 %958  ;;  %v9384_v60 = vor.u32 %v11358_v58, %v9383_v57  ;;  %v9359_v15 = vld [vmem:[#allocation2 + $0x4] sm:$0xf]  ;;  %v11352_v3 = vld [vmem:[#allocation2 + $0x10] sm:$0xf0] }
  0xde   : > { %1259 = vmatpush.bf16.msrb.mxu0 %v9392_v53  ;;  %1309 = vmatpush.bf16.msrb.mxu1 %v9388_v62  ;;  %v11318_v57 = vld [vmem:[%s16685_s2 + $0x30] sm:$0xff] }
  0xdf   : > { %1532 = vrot.lane.b32.xlu2 %v9472_v49, %s16706_s20 }
  0xe2   : > { %1260 = vmatpush.bf16.msrb.mxu0 %v9384_v60  ;;  %1310 = vmatpush.bf16.msrb.mxu1 %v9380_v6 }
  0xe3   : > { %v963_v17 = vpop.permute.xlu1 %962  ;;  %v955_v23 = vpop.permute.xlu0 %954 }
  0xe4   : > { %v980_v20 = vsel %vm972_vm4, %v963_v17, %v965_v10  ;;  %v979_v21 = vsel %vm972_vm4, %v961_v14, %v963_v17  ;;  %v11353_v10 = vld [vmem:[#allocation2 + $0x28] sm:$0xf]  ;;  %v11354_v14 = vld [vmem:[#allocation2 + $0x30] sm:$0xf0]  ;;  %v9361_v17 = vld [vmem:[#allocation2 + $0x14] sm:$0xf0] }
  0xe5   : > { %1070 = vmatpush.bf16.msrb.mxu3 %v980_v20  ;;  %1021 = vmatpush.bf16.msrb.mxu2 %v979_v21  ;;  %v953_v0 = vpop.permute.xlu2 %952  ;;  %v9372_v13 = vor.u32 %v11353_v10, %v9369_v11  ;;  %v9368_v7 = vor.u32 %v11354_v14, %v9367_v12  ;;  %v11314_v20 = vld [vmem:[%s16685_s2 + $0x10] sm:$0xff]  ;;  %v11340_v21 = vld [vmem:[%s16685_s2 + $0x68] sm:$0xff]  ;;  %v11319_v12 = vld [vmem:[%s16685_s2 + $0x38] sm:$0xff] }
  0xe6   : > { %1261 = vmatpush.bf16.msrb.mxu0 %v9376_v4  ;;  %v11346_v4 = vld [vmem:[%s16685_s2 + $0x98] sm:$0xff] }
  0xe7   : > { %1806 = vrot.lane.b32.xlu2 %v12668_v16, %s16704_s26  ;;  %1311 = vmatpush.bf16.msrb.mxu1 %v9372_v13  ;;  %v9364_v16 = vor.u32 %v11351_v9, %v9361_v17 }
  0xe8   : > { %9246 = vmatmul.msk.bf16.gmra.mxu0 %vm779_vm3, %v11336_v18  ;;  %9252 = vmatmul.msk.bf16.gmra.mxu2 %vm779_vm3, %v11342_v19 }
  0xe9   : > { %9254 = vmatmul.msk.bf16.gmra.mxu1 %vm779_vm3, %v11336_v18  ;;  %9260 = vmatmul.msk.bf16.gmra.mxu3 %vm779_vm3, %v11342_v19  ;;  %v9360_v18 = vor.u32 %v11352_v3, %v9359_v15  ;;  %v11339_v19 = vld [vmem:[%s16685_s2 + $0x60] sm:$0xff] }
  0xea   : > { %1262 = vmatpush.bf16.msrb.mxu0 %v9368_v7  ;;  %v11347_v7 = vld [vmem:[%s16685_s2 + $0xa0] sm:$0xff] }
  0xeb   : > { %v957_v30 = vpop.permute.xlu1 %956  ;;  %v949_v33 = vpop.permute.xlu0 %948  ;;  %1312 = vmatpush.bf16.msrb.mxu1 %v9364_v16 }
  0xec   : > { %v977_v31 = vsel %vm972_vm4, %v955_v23, %v957_v30  ;;  %v978_v32 = vsel %vm972_vm4, %v957_v30, %v959_v22  ;;  %v11315_v22 = vld [vmem:[%s16685_s2 + $0x18] sm:$0xff] }
  0xed   : > { %1022 = vmatpush.bf16.msrb.mxu2 %v977_v31  ;;  %1071 = vmatpush.bf16.msrb.mxu3 %v978_v32  ;;  %v947_v41 = vpop.permute.xlu2 %946  ;;  %v11316_v31 = vld [vmem:[%s16685_s2 + $0x20] sm:$0xff] }
  0xee   : > { %1263 = vmatpush.bf16.msrb.mxu0 %v9360_v18 }
  0xef   : > { %1800 = vrot.lane.b32.xlu2 %v12710_v36, %s16704_s26 }
  0xf3   : > { %v951_v37 = vpop.permute.xlu1 %950  ;;  %v943_v42 = vpop.permute.xlu0 %942 }
  0xf4   : > { %v976_v39 = vsel %vm972_vm4, %v951_v37, %v953_v0  ;;  %v975_v40 = vsel %vm972_vm4, %v949_v33, %v951_v37 }
  0xf5   : > { %1072 = vmatpush.bf16.msrb.mxu3 %v976_v39  ;;  %1023 = vmatpush.bf16.msrb.mxu2 %v975_v40  ;;  %v1557_v25 = vpop.permute.xlu2 %1556  ;;  %v11317_v39 = vld [vmem:[%s16685_s2 + $0x28] sm:$0xff] }
  0xf7   : > { %1794 = vrot.lane.b32.xlu2 %v9472_v49, %s16704_s26 }
  0xf8   : > { %9247 = vmatmul.msk.bf16.gmra.mxu0 %vm779_vm3, %v11337_v38 }
  0xf9   : > { %9255 = vmatmul.msk.bf16.gmra.mxu1 %vm779_vm3, %v11337_v38 }
  0xfb   : > { %v945_v43 = vpop.permute.xlu1 %944  ;;  %v1553_v24 = vpop.permute.xlu0 %1552 }
  0xfc   : > { %v973_v44 = vsel %vm972_vm4, %v943_v42, %v945_v43  ;;  %v974_v45 = vsel %vm972_vm4, %v945_v43, %v947_v41 }
  0xfd   : > { %1024 = vmatpush.bf16.msrb.mxu2 %v973_v44  ;;  %1073 = vmatpush.bf16.msrb.mxu3 %v974_v45  ;;  %v1551_v30 = vpop.permute.xlu2 %1550 }
 0x100   : > { %9293 = vmatmul.msk.bf16.vlgmr.msrb.gmra.mxu2 %vm779_vm3, %v11312_v46  ;;  %9301 = vmatmul.msk.bf16.vlgmr.msrb.gmra.mxu3 %vm779_vm3, %v11312_v46  ;;  %v11345_v46 = vld [vmem:[%s16685_s2 + $0x90] sm:$0xff] }
 0x103   : > { %v1555_v23 = vpop.permute.xlu1 %1554  ;;  %v1547_v29 = vpop.permute.xlu0 %1546 }
 0x104   : > { %v1567_v26 = vsel %vm1558_vm5, %v1553_v24, %v1555_v23  ;;  %v1568_v41 = vsel %vm1558_vm5, %v1555_v23, %v1557_v25 }
 0x105   : > { %1606 = vmatpush.bf16.msra.mxu2 %v1567_v26  ;;  %1655 = vmatpush.bf16.msra.mxu3 %v1568_v41 }
 0x108   : > { %9248 = vmatmul.msk.bf16.gmra.mxu0 %vm779_vm3, %v11338_v56 }
 0x109   : > { %9256 = vmatmul.msk.bf16.gmra.mxu1 %vm779_vm3, %v11338_v56 }
 0x10b   : > { %v1549_v28 = vpop.permute.xlu1 %1548  ;;  %v1541_v0 = vpop.permute.xlu0 %1540 }
 0x10c   : > { %v1565_v44 = vsel %vm1558_vm5, %v1547_v29, %v1549_v28  ;;  %v1566_v45 = vsel %vm1558_vm5, %v1549_v28, %v1551_v30  ;;  %v11348_v30 = vld [vmem:[%s16685_s2 + $0xa8] sm:$0xff] }
 0x10d   : > { %1607 = vmatpush.bf16.msra.mxu2 %v1565_v44  ;;  %1656 = vmatpush.bf16.msra.mxu3 %v1566_v45  ;;  %v2008_v45 = vld [vmem:[%s16686_s3 + $0x68] sm:$0xff] }
 0x110   : > { %9294 = vmatmul.msk.bf16.gmra.mxu2 %vm779_vm3, %v11313_v8  ;;  %9302 = vmatmul.msk.bf16.gmra.mxu3 %vm779_vm3, %v11313_v8 }
 0x113   : > { %v1543_v32 = vpop.permute.xlu1 %1542  ;;  %v1815_v36 = vpop.permute.xlu0 %1814 }
 0x114   : > { %v1563_v49 = vsel %vm1558_vm5, %v1541_v0, %v1543_v32 }
 0x115   : > { %1608 = vmatpush.bf16.msra.mxu2 %v1563_v49 }
 0x118   : > { %9249 = vmatmul.msk.bf16.gmra.mxu0 %vm779_vm3, %v11339_v19 }
 0x119   : > { %9257 = vmatmul.msk.bf16.gmra.mxu1 %vm779_vm3, %v11339_v19  ;;  %v1545_v33 = vpop.permute.xlu2 %1544 }
 0x11a   : > { %v1564_v50 = vsel %vm1558_vm5, %v1543_v32, %v1545_v33  ;;  %v2010_v32 = vld [vmem:[%s16686_s3 + $0x78] sm:$0xff] }
 0x11b   : > { %v1817_v35 = vpop.permute.xlu1 %1816  ;;  %v1535_v43 = vpop.permute.xlu0 %1534  ;;  %1657 = vmatpush.bf16.msra.mxu3 %v1564_v50  ;;  %2088 = vperm.xlu1 %11876, %v2010_v32   ;;  %v1995_v32 = vld [vmem:[%s16686_s3] sm:$0xff] }
 0x11c   : > { %v1829_v38 = vsel %vm1820_vm6, %v1815_v36, %v1817_v35 }
 0x11d   : > { %1868 = vmatpush.bf16.msra.mxu0 %v1829_v38 }
 0x120   : > { %9295 = vmatmul.msk.bf16.gmra.mxu2 %vm779_vm3, %v11314_v20  ;;  %9303 = vmatmul.msk.bf16.gmra.mxu3 %vm779_vm3, %v11314_v20 }
 0x121   : > { %v1819_v37 = vpop.permute.xlu2 %1818 }
 0x122   : > { %v1830_v10 = vsel %vm1820_vm6, %v1817_v35, %v1819_v37 }
 0x123   : > { %v1537_v40 = vpop.permute.xlu1 %1536  ;;  %v1809_v53 = vpop.permute.xlu0 %1808  ;;  %1917 = vmatpush.bf16.msra.mxu1 %v1830_v10  ;;  %2078 = vperm.xlu1 %11876, %v2008_v45   ;;  %v11384_v45 = vld [vmem:[%s16685_s2 + $0x100] sm:$0xff] }
 0x124   : > { %v1561_v54 = vsel %vm1558_vm5, %v1535_v43, %v1537_v40  ;;  %v11362_v43 = vld [vmem:[%s16685_s2 + $0xc8] sm:$0xff] }
 0x125   : > { %1609 = vmatpush.bf16.msra.mxu2 %v1561_v54 }
 0x128   : > { %9250 = vmatmul.msk.bf16.gmra.mxu0 %vm779_vm3, %v11340_v21 }
 0x129   : > { %9258 = vmatmul.msk.bf16.gmra.mxu1 %vm779_vm3, %v11340_v21  ;;  %v1539_v42 = vpop.permute.xlu2 %1538  ;;  %v11361_v21 = vld [vmem:[%s16685_s2 + $0xc0] sm:$0xff] }
 0x12a   : > { %v1562_v55 = vsel %vm1558_vm5, %v1537_v40, %v1539_v42 }
 0x12b   : > { %v1811_v48 = vpop.permute.xlu1 %1810  ;;  %1658 = vmatpush.bf16.msra.mxu3 %v1562_v55 }
 0x12c   : > { %v1827_v17 = vsel %vm1820_vm6, %v1809_v53, %v1811_v48 }
 0x12d   : > { %1869 = vmatpush.bf16.msra.mxu0 %v1827_v17  ;;  %v2002_v17 = vld [vmem:[%s16686_s3 + $0x38] sm:$0xff] }
 0x130   : > { %9296 = vmatmul.msk.bf16.gmra.mxu2 %vm779_vm3, %v11315_v22  ;;  %9304 = vmatmul.msk.bf16.gmra.mxu3 %vm779_vm3, %v11315_v22 }
 0x131   : > { %v1813_v52 = vpop.permute.xlu2 %1812 }
 0x132   : > { %v1529_v63 = vpop.permute.xlu0 %1528  ;;  %v1828_v18 = vsel %vm1820_vm6, %v1811_v48, %v1813_v52  ;;  %v2006_v48 = vld [vmem:[%s16686_s3 + $0x58] sm:$0xff] }
 0x133   : > { %1918 = vmatpush.bf16.msra.mxu1 %v1828_v18 }
 0x135   : > { %v1531_v60 = vpop.permute.xlu1 %1530 }
 0x136   : > { %v1559_v2 = vsel %vm1558_vm5, %v1529_v63, %v1531_v60 }
 0x137   : > { %1610 = vmatpush.bf16.msra.mxu2 %v1559_v2 }
 0x138   : > { %9397 = vmatmul.msk.bf16.vlgmr.msrb.gmra.mxu0 %vm779_vm3, %v11343_v27 }
 0x139   : > { %9405 = vmatmul.msk.bf16.vlgmr.msrb.gmra.mxu1 %vm779_vm3, %v11343_v27  ;;  %v1533_v62 = vpop.permute.xlu2 %1532 }
 0x13a   : > { %v1560_v1 = vsel %vm1558_vm5, %v1531_v60, %v1533_v62 }
 0x13b   : > { %1659 = vmatpush.bf16.msra.mxu3 %v1560_v1  ;;  %v2001_v1 = vld [vmem:[%s16686_s3 + $0x30] sm:$0xff] }
 0x13d   : > { %v1805_v25 = vpop.permute.xlu1 %1804 }
 0x140   : > { %9297 = vmatmul.msk.bf16.gmra.mxu2 %vm779_vm3, %v11316_v31  ;;  %9305 = vmatmul.msk.bf16.gmra.mxu3 %vm779_vm3, %v11316_v31  ;;  %v1803_v31 = vpop.permute.xlu0 %1802 }
 0x141   : > { %v1807_v24 = vpop.permute.xlu2 %1806  ;;  %v1825_v35 = vsel %vm1820_vm6, %v1803_v31, %v1805_v25 }
 0x142   : > { %v1826_v33 = vsel %vm1820_vm6, %v1805_v25, %v1807_v24  ;;  %1870 = vmatpush.bf16.msra.mxu0 %v1825_v35 }
 0x143   : > { %1919 = vmatpush.bf16.msra.mxu1 %v1826_v33 }
 0x145   : > { %v1799_v38 = vpop.permute.xlu1 %1798 }
 0x148   : > { %9398 = vmatmul.msk.bf16.gmra.mxu0 %vm779_vm3, %v11344_v34  ;;  %v1797_v44 = vpop.permute.xlu0 %1796 }
 0x149   : > { %9406 = vmatmul.msk.bf16.gmra.mxu1 %vm779_vm3, %v11344_v34  ;;  %v2009_v34 = vld [vmem:[%s16686_s3 + $0x70] sm:$0xff]  ;;  %v1801_v37 = vpop.permute.xlu2 %1800  ;;  %v1823_v49 = vsel %vm1820_vm6, %v1797_v44, %v1799_v38 }
 0x14a   : > { %2083 = vperm.xlu0 %11875, %v2009_v34   ;;  %1871 = vmatpush.bf16.msra.mxu0 %v1823_v49 }
 0x14d   : > { %v1793_v52 = vpop.permute.xlu1 %1792 }
 0x150   : > { %9298 = vmatmul.msk.bf16.gmra.mxu2 %vm779_vm3, %v11317_v39  ;;  %9306 = vmatmul.msk.bf16.gmra.mxu3 %vm779_vm3, %v11317_v39  ;;  %v1791_v60 = vpop.permute.xlu0 %1790 }
 0x151   : > { %v1821_v2 = vsel %vm1820_vm6, %v1791_v60, %v1793_v52 }
 0x152   : > { %2068 = vperm.xlu0 %11875, %v2006_v48   ;;  %1872 = vmatpush.bf16.msra.mxu0 %v1821_v2 }
 0x155   : > { %v12804_v47 = vpop.f32.mrf.mxu0 }
 0x156   : > { %v862_v51 = vpop.f32.mrf.mxu1 }
 0x158   : > { %9399 = vmatmul.msk.bf16.gmra.mxu0 %vm779_vm3, %v11345_v46 }
 0x159   : > { %9407 = vmatmul.msk.bf16.gmra.mxu1 %vm779_vm3, %v11345_v46 }
 0x15a   : > { %2043 = vperm.xlu0 %11875, %v2001_v1  }
 0x15b   : > { %v12812_v56 = vpop.f32.mrf.mxu2 }
 0x15c   : > { %v12817_v58 = vpop.f32.mrf.mxu3 }
 0x15d   : > { %v12819_v59 = vpop.f32.mrf.mxu0 }
 0x15e   : > { %v12821_v61 = vpop.f32.mrf.mxu1 }
 0x160   : > { %9299 = vmatmul.msk.bf16.gmra.mxu2 %vm779_vm3, %v11318_v57  ;;  %9307 = vmatmul.msk.bf16.gmra.mxu3 %vm779_vm3, %v11318_v57 }
 0x163   : > { %v12830_v5 = vpop.f32.mrf.mxu2 }
 0x164   : > { %16736 = vst [vmem:[#allocation16_spill] sm:$0xff] %v12830_v5  ;;  %v12834_v8 = vpop.f32.mrf.mxu3 }
 0x165   : > { %v12832_v6 = vpop.f32.mrf.mxu0  ;;  %16737 = vst [vmem:[#allocation17_spill] sm:$0xff] %v12834_v8 }
 0x166   : > { %v12837_v11 = vpop.f32.mrf.mxu1 }
 0x168   : > { %9400 = vmatmul.msk.bf16.gmra.mxu0 %vm779_vm3, %v11346_v4 }
 0x169   : > { %9408 = vmatmul.msk.bf16.gmra.mxu1 %vm779_vm3, %v11346_v4 }
 0x16b   : > { %v12848_v15 = vpop.f32.mrf.mxu2 }
 0x16c   : > { %v12850_v3 = vpop.f32.mrf.mxu3 }
 0x16d   : > { %v12844_v13 = vpop.f32.mrf.mxu0 }
 0x16e   : > { %v12846_v14 = vpop.f32.mrf.mxu1 }
 0x170   : > { %9300 = vmatmul.msk.bf16.gmra.mxu2 %vm779_vm3, %v11319_v12  ;;  %9308 = vmatmul.msk.bf16.gmra.mxu3 %vm779_vm3, %v11319_v12 }
 0x173   : > { %v12865_v19 = vpop.f32.mrf.mxu2 }
 0x174   : > { %16738 = vst [vmem:[#allocation18_spill] sm:$0xff] %v12865_v19  ;;  %v12867_v20 = vpop.f32.mrf.mxu3 }
 0x175   : > { %v12857_v9 = vpop.f32.mrf.mxu0  ;;  %16739 = vst [vmem:[#allocation19_spill] sm:$0xff] %v12867_v20 }
 0x176   : > { %v12861_v16 = vpop.f32.mrf.mxu1 }
 0x178   : > { %9401 = vmatmul.msk.bf16.gmra.mxu0 %vm779_vm3, %v11347_v7 }
 0x179   : > { %9409 = vmatmul.msk.bf16.gmra.mxu1 %vm779_vm3, %v11347_v7  ;;  %v11363_v7 = vld [vmem:[%s16685_s2 + $0xd0] sm:$0xff] }
 0x17d   : > { %v12872_v22 = vpop.f32.mrf.mxu0 }
 0x17e   : > { %v12874_v23 = vpop.f32.mrf.mxu1 }
 0x180   : > { %9521 = vmatmul.msk.bf16.vlgmr.msra.gmra.mxu2 %vm779_vm3, %v11361_v21  ;;  %9529 = vmatmul.msk.bf16.vlgmr.msra.gmra.mxu3 %vm779_vm3, %v11361_v21  ;;  %v2000_v21 = vld [vmem:[%s16686_s3 + $0x28] sm:$0xff] }
 0x181   : > { %2038 = vperm.xlu0 %11875, %v2000_v21   ;;  %v11366_v21 = vld [vmem:[%s16685_s2 + $0xe8] sm:$0xff] }
 0x183   : > { %v1026_v26 = vpop.f32.mrf.mxu2  ;;  %v1075_v27 = vpop.f32.mrf.mxu3 }
 0x184   : > { %v12879_v28 = vadd.f32 %v1026_v26, %v12804_v47  ;;  %v12881_v29 = vadd.f32 %v1075_v27, %v862_v51  ;;  %v1824_v47 = vsel %vm1820_vm6, %v1799_v38, %v1801_v37  ;;  %v1795_v51 = vpop.permute.xlu2 %1794  ;;  %v11350_v27 = vld [vmem:[%s16685_s2 + $0xb8] sm:$0xff]  ;;  %v1996_v38 = vld [vmem:[%s16686_s3 + $0x8] sm:$0xff] }
 0x185   : > { %v12889_v0 = vpop.f32.mrf.mxu0  ;;  %1920 = vmatpush.bf16.msra.mxu1 %v1824_v47  ;;  %v1822_v63 = vsel %vm1820_vm6, %v1793_v52, %v1795_v51  ;;  %v11364_v37 = vld [vmem:[%s16685_s2 + $0xd8] sm:$0xff]  ;;  %v2007_v47 = vld [vmem:[%s16686_s3 + $0x60] sm:$0xff] }
 0x186   : > { %v12896_v36 = vpop.f32.mrf.mxu1  ;;  %2073 = vperm.xlu2 %11877, %v2007_v47  }
 0x188   : > { %9402 = vmatmul.msk.bf16.gmra.mxu0 %vm779_vm3, %v11348_v30 }
 0x189   : > { %9410 = vmatmul.msk.bf16.gmra.mxu1 %vm779_vm3, %v11348_v30  ;;  %v1997_v30 = vld [vmem:[%s16686_s3 + $0x10] sm:$0xff]  ;;  %2013 = vperm.xlu0 %11875, %v1995_v32  }
 0x18a   : > { %1921 = vmatpush.bf16.msra.mxu1 %v1822_v63 }
 0x18b   : > { %v1028_v39 = vpop.f32.mrf.mxu2  ;;  %v1077_v40 = vpop.f32.mrf.mxu3 }
 0x18c   : > { %v12901_v41 = vadd.f32 %v1028_v39, %v12819_v59  ;;  %v12904_v42 = vadd.f32 %v1077_v40, %v12821_v61  ;;  %v11349_v59 = vld [vmem:[%s16685_s2 + $0xb0] sm:$0xff]  ;;  %v2003_v61 = vld [vmem:[%s16686_s3 + $0x40] sm:$0xff] }
 0x18d   : > { %v12912_v46 = vpop.f32.mrf.mxu0  ;;  %2053 = vperm.xlu1 %11876, %v2003_v61  }
 0x18e   : > { %v12919_v50 = vpop.f32.mrf.mxu1 }
 0x190   : > { %9522 = vmatmul.msk.bf16.gmra.mxu2 %vm779_vm3, %v11362_v43  ;;  %9530 = vmatmul.msk.bf16.gmra.mxu3 %vm779_vm3, %v11362_v43 }
 0x193   : > { %v1031_v53 = vpop.f32.mrf.mxu2  ;;  %v1080_v54 = vpop.f32.mrf.mxu3 }
 0x194   : > { %v12924_v55 = vadd.f32 %v1031_v53, %v12832_v6  ;;  %v12927_v57 = vadd.f32 %v1080_v54, %v12837_v11 }
 0x195   : > { %v12935_v62 = vpop.f32.mrf.mxu0  ;;  %2048 = vperm.xlu1 %11876, %v2002_v17  }
 0x196   : > { %v12942_v4 = vpop.f32.mrf.mxu1 }
 0x198   : > { %9403 = vmatmul.msk.bf16.gmra.mxu0 %vm779_vm3, %v11349_v59 }
 0x199   : > { %9411 = vmatmul.msk.bf16.gmra.mxu1 %vm779_vm3, %v11349_v59 }
 0x19b   : > { %v1033_v6 = vpop.f32.mrf.mxu2  ;;  %v1082_v10 = vpop.f32.mrf.mxu3 }
 0x19c   : > { %v12947_v11 = vadd.f32 %v1033_v6, %v12844_v13  ;;  %v12950_v12 = vadd.f32 %v1082_v10, %v12846_v14 }
 0x19d   : > { %v12958_v18 = vpop.f32.mrf.mxu0  ;;  %2023 = vperm.xlu1 %11876, %v1997_v30  }
 0x19e   : > { %v12963_v13 = vpop.f32.mrf.mxu1 }
 0x1a0   : > { %9523 = vmatmul.msk.bf16.gmra.mxu2 %vm779_vm3, %v11363_v7  ;;  %9531 = vmatmul.msk.bf16.gmra.mxu3 %vm779_vm3, %v11363_v7 }
 0x1a3   : > { %v1036_v14 = vpop.f32.mrf.mxu2  ;;  %v1085_v24 = vpop.f32.mrf.mxu3 }
 0x1a4   : > { %v12968_v25 = vadd.f32 %v1036_v14, %v12857_v9  ;;  %v12971_v26 = vadd.f32 %v1085_v24, %v12861_v16 }
 0x1a5   : > { %v12979_v31 = vpop.f32.mrf.mxu0  ;;  %2018 = vperm.xlu1 %11876, %v1996_v38  }
 0x1a6   : > { %v12984_v9 = vpop.f32.mrf.mxu1 }
 0x1a8   : > { %9404 = vmatmul.msk.bf16.gmra.mxu0 %vm779_vm3, %v11350_v27 }
 0x1a9   : > { %9412 = vmatmul.msk.bf16.gmra.mxu1 %vm779_vm3, %v11350_v27 }
 0x1ab   : > { %v1038_v16 = vpop.f32.mrf.mxu2  ;;  %v1087_v33 = vpop.f32.mrf.mxu3 }
 0x1ac   : > { %v12989_v34 = vadd.f32 %v1038_v16, %v12872_v22  ;;  %v12992_v35 = vadd.f32 %v1087_v33, %v12874_v23 }
 0x1ad   : > { %v13000_v39 = vpop.f32.mrf.mxu0 }
 0x1ae   : > { %v13002_v40 = vpop.f32.mrf.mxu1 }
 0x1b0   : > { %9524 = vmatmul.msk.bf16.gmra.mxu2 %vm779_vm3, %v11364_v37  ;;  %9532 = vmatmul.msk.bf16.gmra.mxu3 %vm779_vm3, %v11364_v37  ;;  %v11386_v37 = vld [vmem:[%s16685_s2 + $0x110] sm:$0xff] }
 0x1b3   : > { %v1041_v22 = vpop.f32.mrf.mxu2  ;;  %v1090_v23 = vpop.f32.mrf.mxu3 }
 0x1b4   : > { %v13007_v43 = vadd.f32 %v1041_v22, %v12889_v0  ;;  %v13010_v44 = vadd.f32 %v1090_v23, %v12896_v36 }
 0x1b5   : > { %v1265_v48 = vpop.f32.mrf.mxu0 }
 0x1b6   : > { %v1314_v49 = vpop.f32.mrf.mxu1  ;;  %v13019_v51 = vadd.f32 %v1265_v48, %v12879_v28  ;;  %v11365_v28 = vld [vmem:[%s16685_s2 + $0xe0] sm:$0xff] }
 0x1b7   : > { %v13022_v0 = vadd.f32 %v1314_v49, %v12881_v29  ;;  %v2005_v29 = vld [vmem:[%s16686_s3 + $0x50] sm:$0xff]  ;;  %v11387_v49 = vld [vmem:[%s16685_s2 + $0x118] sm:$0xff] }
 0x1b8   : > { %9585 = vmatmul.msk.bf16.vlgmr.msra.gmra.mxu0 %vm779_vm3, %v11384_v45  ;;  %2063 = vperm.xlu2 %11877, %v2005_v29  }
 0x1b9   : > { %9593 = vmatmul.msk.bf16.vlgmr.msra.gmra.mxu1 %vm779_vm3, %v11384_v45 }
 0x1bb   : > { %v1043_v36 = vpop.f32.mrf.mxu2  ;;  %v1092_v52 = vpop.f32.mrf.mxu3 }
 0x1bc   : > { %v13027_v53 = vadd.f32 %v1043_v36, %v12912_v46  ;;  %v13030_v54 = vadd.f32 %v1092_v52, %v12919_v50 }
 0x1bd   : > { %v1267_v59 = vpop.f32.mrf.mxu0 }
 0x1be   : > { %v1316_v60 = vpop.f32.mrf.mxu1  ;;  %v13039_v61 = vadd.f32 %v1267_v59, %v12901_v41  ;;  %v11385_v41 = vld [vmem:[%s16685_s2 + $0x108] sm:$0xff]  ;;  %v11368_v59 = vld [vmem:[%s16685_s2 + $0xf8] sm:$0xff] }
 0x1bf   : > { %v13042_v46 = vadd.f32 %v1316_v60, %v12904_v42  ;;  %v2004_v42 = vld [vmem:[%s16686_s3 + $0x48] sm:$0xff] }
 0x1c0   : > { %9525 = vmatmul.msk.bf16.gmra.mxu2 %vm779_vm3, %v11365_v28  ;;  %9533 = vmatmul.msk.bf16.gmra.mxu3 %vm779_vm3, %v11365_v28 }
 0x1c1   : > { %2058 = vperm.xlu2 %11877, %v2004_v42  }
 0x1c3   : > { %v1046_v50 = vpop.f32.mrf.mxu2  ;;  %v1095_v63 = vpop.f32.mrf.mxu3 }
 0x1c4   : > { %v13047_v1 = vadd.f32 %v1046_v50, %v12935_v62  ;;  %v13050_v2 = vadd.f32 %v1095_v63, %v12942_v4 }
 0x1c5   : > { %v1270_v6 = vpop.f32.mrf.mxu0 }
 0x1c6   : > { %v1319_v10 = vpop.f32.mrf.mxu1  ;;  %v13059_v7 = vadd.f32 %v1270_v6, %v12924_v55  ;;  %v1999_v55 = vld [vmem:[%s16686_s3 + $0x20] sm:$0xff] }
 0x1c7   : > { %v13062_v62 = vadd.f32 %v1319_v10, %v12927_v57 }
 0x1c8   : > { %9586 = vmatmul.msk.bf16.gmra.mxu0 %vm779_vm3, %v11385_v41 }
 0x1c9   : > { %9594 = vmatmul.msk.bf16.gmra.mxu1 %vm779_vm3, %v11385_v41  ;;  %2033 = vperm.xlu2 %11877, %v1999_v55  }
 0x1cb   : > { %v13066_v4 = vpop.f32.mrf.mxu2  ;;  %v13068_v17 = vpop.f32.mrf.mxu3 }
 0x1cd   : > { %v1272_v14 = vpop.f32.mrf.mxu0 }
 0x1ce   : > { %v13077_v57 = vadd.f32 %v1272_v14, %v12947_v11  ;;  %v1321_v24 = vpop.f32.mrf.mxu1  ;;  %v1998_v11 = vld [vmem:[%s16686_s3 + $0x18] sm:$0xff] }
 0x1cf   : > { %v13080_v27 = vadd.f32 %v1321_v24, %v12950_v12 }
 0x1d0   : > { %9526 = vmatmul.msk.bf16.gmra.mxu2 %vm779_vm3, %v11366_v21  ;;  %9534 = vmatmul.msk.bf16.gmra.mxu3 %vm779_vm3, %v11366_v21 }
 0x1d1   : > { %2028 = vperm.xlu2 %11877, %v1998_v11  }
 0x1d3   : > { %v1051_v30 = vpop.f32.mrf.mxu2  ;;  %v1100_v32 = vpop.f32.mrf.mxu3 }
 0x1d4   : > { %v1052_v16 = vadd.f32 %v1051_v30, %v12979_v31  ;;  %v1101_v33 = vadd.f32 %v1100_v32, %v12984_v9  ;;  %v11367_v31 = vld [vmem:[%s16685_s2 + $0xf0] sm:$0xff]  ;;  %v11389_v30 = vld [vmem:[%s16685_s2 + $0x128] sm:$0xff] }
 0x1d5   : > { %v1275_v12 = vpop.f32.mrf.mxu0 }
 0x1d6   : > { %v13093_v38 = vadd.f32 %v1275_v12, %v12968_v25  ;;  %v1324_v22 = vpop.f32.mrf.mxu1 }
 0x1d7   : > { %v13096_v23 = vadd.f32 %v1324_v22, %v12971_v26  ;;  %v13169_v22 = vpop.permute.xlu1 %2088 }
 0x1d8   : > { %9587 = vmatmul.msk.bf16.gmra.mxu0 %vm779_vm3, %v11386_v37  ;;  %16744 = vst [vmem:[#allocation24_spill] sm:$0xff] %v13169_v22  ;;  %v11416_v22 = vld [vmem:[#allocation3 + $0xac] sm:$0xf0] }
 0x1d9   : > { %9595 = vmatmul.msk.bf16.gmra.mxu1 %vm779_vm3, %v11386_v37 }
 0x1db   : > { %v13111_v26 = vpop.f32.mrf.mxu2  ;;  %v13113_v48 = vpop.f32.mrf.mxu3 }
 0x1dd   : > { %v1277_v9 = vpop.f32.mrf.mxu0 }
 0x1de   : > { %v13104_v45 = vadd.f32 %v1277_v9, %v12989_v34  ;;  %v1326_v47 = vpop.f32.mrf.mxu1  ;;  %v13173_v9 = vpop.permute.xlu0 %2083 }
 0x1df   : > { %v13107_v25 = vadd.f32 %v1326_v47, %v12992_v35  ;;  %16745 = vst [vmem:[#allocation25_spill] sm:$0xff] %v13173_v9 }
 0x1e0   : > { %9527 = vmatmul.msk.bf16.gmra.mxu2 %vm779_vm3, %v11367_v31  ;;  %9535 = vmatmul.msk.bf16.gmra.mxu3 %vm779_vm3, %v11367_v31  ;;  %v13215_v9 = vpop.permute.xlu2 %2073 }
 0x1e1   : > { %16753 = vst [vmem:[#allocation33_spill] sm:$0xff] %v13215_v9 }
 0x1e3   : > { %v1056_v28 = vpop.f32.mrf.mxu2  ;;  %v1105_v29 = vpop.f32.mrf.mxu3 }
 0x1e5   : > { %v1280_v36 = vpop.f32.mrf.mxu0 }
 0x1e6   : > { %v13119_v34 = vadd.f32 %v1280_v36, %v13007_v43  ;;  %v1329_v52 = vpop.f32.mrf.mxu1  ;;  %v1057_v36 = vadd.f32 %v1056_v28, %v12812_v56  ;;  %v13192_v56 = vpop.permute.xlu0 %2068  ;;  %v9723_v28 = vld [vmem:[#allocation3 + $0xc0] sm:$0xf] }
 0x1e7   : > { %v13122_v35 = vadd.f32 %v1329_v52, %v13010_v44  ;;  %v11388_v44 = vld [vmem:[%s16685_s2 + $0x120] sm:$0xff]  ;;  %16750 = vst [vmem:[#allocation30_spill] sm:$0xff] %v13192_v56 }
 0x1e8   : > { %9588 = vmatmul.msk.bf16.gmra.mxu0 %vm779_vm3, %v11387_v49 }
 0x1e9   : > { %9596 = vmatmul.msk.bf16.gmra.mxu1 %vm779_vm3, %v11387_v49  ;;  %v9735_v49 = vld [vmem:[#allocation3 + $0xe0] sm:$0xf] }
 0x1eb   : > { %v13140_v41 = vpop.f32.mrf.mxu2  ;;  %v13142_v6 = vpop.f32.mrf.mxu3 }
 0x1ec   : > { %16740 = vst [vmem:[#allocation20_spill] sm:$0xff] %v13140_v41 }
 0x1ed   : > { %v1282_v60 = vpop.f32.mrf.mxu0  ;;  %16741 = vst [vmem:[#allocation21_spill] sm:$0xff] %v13142_v6 }
 0x1ee   : > { %v13130_v50 = vadd.f32 %v1282_v60, %v13027_v53  ;;  %v1331_v43 = vpop.f32.mrf.mxu1 }
 0x1ef   : > { %v13133_v63 = vadd.f32 %v1331_v43, %v13030_v54  ;;  %v1106_v43 = vadd.f32 %v1105_v29, %v12817_v58 }
 0x1f0   : > { %9528 = vmatmul.msk.bf16.gmra.mxu2 %vm779_vm3, %v11368_v59  ;;  %9536 = vmatmul.msk.bf16.gmra.mxu3 %vm779_vm3, %v11368_v59  ;;  %v11390_v59 = vld [vmem:[%s16685_s2 + $0x130] sm:$0xff] }
 0x1f3   : > { %v1061_v14 = vpop.f32.mrf.mxu2  ;;  %v1110_v24 = vpop.f32.mrf.mxu3 }
 0x1f5   : > { %v1285_v42 = vpop.f32.mrf.mxu0 }
 0x1f6   : > { %v13145_v53 = vadd.f32 %v1285_v42, %v13047_v1  ;;  %v1334_v10 = vpop.f32.mrf.mxu1  ;;  %v13184_v42 = vpop.permute.xlu1 %2078 }
 0x1f7   : > { %v13148_v54 = vadd.f32 %v1334_v10, %v13050_v2  ;;  %16747 = vst [vmem:[#allocation27_spill] sm:$0xff] %v13184_v42 }
 0x1f8   : > { %9589 = vmatmul.msk.bf16.gmra.mxu0 %vm779_vm3, %v11388_v44 }
 0x1f9   : > { %9597 = vmatmul.msk.bf16.gmra.mxu1 %vm779_vm3, %v11388_v44 }
 0x1fb   : > { %v13164_v11 = vpop.f32.mrf.mxu2  ;;  %v13167_v12 = vpop.f32.mrf.mxu3 }
 0x1fc   : > { %16742 = vst [vmem:[#allocation22_spill] sm:$0xff] %v13164_v11 }
 0x1fd   : > { %v13152_v21 = vpop.f32.mrf.mxu0  ;;  %16743 = vst [vmem:[#allocation23_spill] sm:$0xff] %v13167_v12  ;;  %v1111_v12 = vadd.f32 %v1110_v24, %v12850_v3  ;;  %v9699_v24 = vld [vmem:[#allocation3 + $0x80] sm:$0xf] }
 0x1fe   : > { %v13154_v55 = vpop.f32.mrf.mxu1 }
 0x203   : > { %v1661_v52 = vpop.f32.mrf.mxu3 }
 0x205   : > { %v1290_v1 = vpop.f32.mrf.mxu0 }
 0x206   : > { %v13159_v32 = vadd.f32 %v1290_v1, %v1052_v16  ;;  %v1339_v37 = vpop.f32.mrf.mxu1  ;;  %v1612_v16 = vpop.f32.mrf.mxu2 }
 0x207   : > { %v13161_v2 = vadd.f32 %v1339_v37, %v1101_v33  ;;  %v11422_v33 = vld [vmem:[#allocation3 + $0xec] sm:$0xf0]  ;;  %v1701_v6 = vadd.f32 %v1612_v16, %v13019_v51  ;;  %v9675_v51 = vld [vmem:[#allocation3 + $0x40] sm:$0xf] }
 0x208   : > { %9590 = vmatmul.msk.bf16.gmra.mxu0 %vm779_vm3, %v11389_v30  ;;  %v13181_v60 = vor.u32 %v11422_v33, %v9735_v49  ;;  %v11419_v37 = vld [vmem:[#allocation3 + $0xcc] sm:$0xf0] }
 0x209   : > { %9598 = vmatmul.msk.bf16.gmra.mxu1 %vm779_vm3, %v11389_v30  ;;  %v13196_v58 = vor.u32 %v11419_v37, %v9723_v28  ;;  %v11391_v28 = vld [vmem:[%s16685_s2 + $0x138] sm:$0xff] }
 0x20a   : > { %2446 = vrot.lane.b32.xlu2 %v13181_v60, %s16715_s23 }
 0x20b   : > { %v1663_v33 = vpop.f32.mrf.mxu3 }
 0x20d   : > { %v13171_v31 = vpop.f32.mrf.mxu0 }
 0x20e   : > { %v13175_v47 = vpop.f32.mrf.mxu1  ;;  %v1614_v29 = vpop.f32.mrf.mxu2 }
 0x20f   : > { %16746 = vst [vmem:[#allocation26_spill] sm:$0xff] %v13175_v47 }
 0x212   : > { %2440 = vrot.lane.b32.xlu2 %v13196_v58, %s16715_s23 }
 0x215   : > { %v1295_v44 = vpop.f32.mrf.mxu0 }
 0x216   : > { %v13186_v10 = vadd.f32 %v1295_v44, %v1057_v36  ;;  %v1344_v30 = vpop.f32.mrf.mxu1  ;;  %v13206_v44 = vpop.permute.xlu0 %2043 }
 0x217   : > { %v13190_v1 = vadd.f32 %v1344_v30, %v1106_v43  ;;  %v13204_v43 = vpop.permute.xlu1 %2053  ;;  %v9711_v30 = vld [vmem:[#allocation3 + $0xa0] sm:$0xf]  ;;  %v1617_v42 = vpop.f32.mrf.mxu2 }
 0x218   : > { %16748 = vst [vmem:[#allocation28_spill] sm:$0xff] %v13186_v10  ;;  %9591 = vmatmul.msk.bf16.gmra.mxu0 %vm779_vm3, %v11390_v59  ;;  %v13212_v37 = vor.u32 %v11416_v22, %v9711_v30  ;;  %v11413_v22 = vld [vmem:[#allocation3 + $0x8c] sm:$0xf0] }
 0x219   : > { %16749 = vst [vmem:[#allocation29_spill] sm:$0xff] %v13190_v1  ;;  %9599 = vmatmul.msk.bf16.gmra.mxu1 %vm779_vm3, %v11390_v59  ;;  %v1062_v59 = vadd.f32 %v1061_v14, %v12848_v15  ;;  %v1666_v15 = vpop.f32.mrf.mxu3 }
 0x21a   : > { %2434 = vrot.lane.b32.xlu2 %v13212_v37, %s16715_s23 }
 0x21d   : > { %v13198_v49 = vpop.f32.mrf.mxu0 }
 0x21e   : > { %16751 = vst [vmem:[#allocation31_spill] sm:$0xff] %v13198_v49  ;;  %v13200_v36 = vpop.f32.mrf.mxu1  ;;  %v13227_v3 = vpop.permute.xlu0 %2038  ;;  %v11410_v49 = vld [vmem:[#allocation3 + $0x6c] sm:$0xf0] }
 0x21f   : > { %16752 = vst [vmem:[#allocation32_spill] sm:$0xff] %v13200_v36  ;;  %v13225_v14 = vpop.permute.xlu1 %2048 }
 0x225   : > { %v1300_v20 = vpop.f32.mrf.mxu0 }
 0x226   : > { %v13217_v11 = vadd.f32 %v1300_v20, %v1062_v59  ;;  %v1349_v19 = vpop.f32.mrf.mxu1  ;;  %v13229_v20 = vor.u32 %v11413_v22, %v9699_v24  ;;  %v1702_v24 = vadd.f32 %v1661_v52, %v13022_v0  ;;  %v1703_v0 = vadd.f32 %v1614_v29, %v13039_v61  ;;  %v9663_v29 = vld [vmem:[#allocation3 + $0x20] sm:$0xf] }
 0x227   : > { %v13221_v36 = vadd.f32 %v1349_v19, %v1111_v12  ;;  %v13237_v19 = vpop.permute.xlu2 %2063  ;;  %v1619_v12 = vpop.f32.mrf.mxu2 }
 0x228   : > { %16754 = vst [vmem:[#allocation34_spill] sm:$0xff] %v13217_v11  ;;  %9592 = vmatmul.msk.bf16.gmra.mxu0 %vm779_vm3, %v11391_v28  ;;  %2428 = vrot.lane.b32.xlu2 %v13229_v20, %s16715_s23  ;;  %v9687_v11 = vld [vmem:[#allocation3 + $0x60] sm:$0xf] }
 0x229   : > { %16755 = vst [vmem:[#allocation35_spill] sm:$0xff] %v13221_v36  ;;  %9600 = vmatmul.msk.bf16.gmra.mxu1 %vm779_vm3, %v11391_v28  ;;  %v13239_v36 = vpop.f32.mrf.mxu3  ;;  %v2024_v28 = vpop.permute.xlu1 %2023  ;;  %v13242_v8 = vor.u32 %v11410_v49, %v9687_v11  ;;  %v11407_v11 = vld [vmem:[#allocation3 + $0x4c] sm:$0xf0] }
 0x22a   : > { %v13252_v52 = vor.u32 %v11407_v11, %v9675_v51  ;;  %v11404_v51 = vld [vmem:[#allocation3 + $0x2c] sm:$0xf0]  ;;  %v1706_v11 = vadd.f32 %v1666_v15, %v13062_v62  ;;  %v1707_v62 = vadd.f32 %v1619_v12, %v13077_v57  ;;  %v1708_v15 = vadd.f32 %v13239_v36, %v13080_v27 }
 0x22d   : > { %v13231_v30 = vpop.f32.mrf.mxu0 }
 0x22e   : > { %16756 = vst [vmem:[#allocation36_spill] sm:$0xff] %v13231_v30  ;;  %v13233_v59 = vpop.f32.mrf.mxu1  ;;  %v2014_v30 = vpop.permute.xlu0 %2013 }
 0x22f   : > { %16757 = vst [vmem:[#allocation37_spill] sm:$0xff] %v13233_v59  ;;  %v13247_v10 = vpop.permute.xlu2 %2058  ;;  %v13249_v56 = vpop.f32.mrf.mxu2 }
 0x230   : > { %2422 = vrot.lane.b32.xlu2 %v13242_v8, %s16715_s23  ;;  %v1709_v27 = vadd.f32 %v13249_v56, %v13093_v38 }
 0x231   : > { %v1671_v16 = vpop.f32.mrf.mxu3 }
 0x232   : > { %v1710_v36 = vadd.f32 %v1671_v16, %v13096_v23 }
 0x235   : > { %v1874_v22 = vpop.f32.mrf.mxu0 }
 0x236   : > { %v1963_v59 = vadd.f32 %v1874_v22, %v1701_v6  ;;  %v1923_v9 = vpop.f32.mrf.mxu1  ;;  %v1704_v6 = vadd.f32 %v1663_v33, %v13042_v46  ;;  %v2019_v22 = vpop.permute.xlu1 %2018  ;;  %v1705_v46 = vadd.f32 %v1617_v42, %v13059_v7  ;;  %v13258_v33 = vor.u32 %v11404_v51, %v9663_v29  ;;  %v9651_v7 = vld [vmem:[#allocation3] sm:$0xf] }
 0x237   : > { %v1964_v41 = vadd.f32 %v1923_v9, %v1702_v24  ;;  %v2034_v61 = vpop.permute.xlu2 %2033 }
 0x238   : > { %v2091_v5 = vadd.f32 %v2014_v30, %v1963_v59  ;;  %2416 = vrot.lane.b32.xlu2 %v13252_v52, %s16715_s23 }
 0x239   : > { %v2092_v1 = vadd.f32 %v2014_v30, %v1964_v41 }
 0x23a   : > { %11878 = vtanh.f32 %v2091_v5 }
 0x23b   : > { %11880 = vtanh.f32 %v2092_v1 }
 0x23d   : > { %v1876_v49 = vpop.f32.mrf.mxu0 }
 0x23e   : > { %v1965_v9 = vadd.f32 %v1876_v49, %v1703_v0  ;;  %v1925_v59 = vpop.f32.mrf.mxu1  ;;  %v1624_v0 = vpop.f32.mrf.mxu2 }
 0x23f   : > { %v1966_v5 = vadd.f32 %v1925_v59, %v1704_v6  ;;  %v1673_v6 = vpop.f32.mrf.mxu3  ;;  %v2029_v51 = vpop.permute.xlu2 %2028  ;;  %v1711_v38 = vadd.f32 %v1624_v0, %v13104_v45 }
 0x240   : > { %v11879_v41 = vpop.eup %11878  ;;  %v2093_v30 = vadd.f32 %v2019_v22, %v1965_v9  ;;  %2410 = vrot.lane.b32.xlu2 %v13258_v33, %s16715_s23  ;;  %v1712_v23 = vadd.f32 %v1673_v6, %v13107_v25 }
 0x241   : > { %v11881_v1 = vpop.eup %11880  ;;  %v2094_v24 = vadd.f32 %v2019_v22, %v1966_v5 }
 0x242   : > { %v2155_v47 = vpack.c.bf16 %v11881_v1, %v11879_v41  ;;  %11882 = vtanh.f32 %v2093_v30 }
 0x243   : > { %11884 = vtanh.f32 %v2094_v24 }
 0x244   : > { %2171 = vst [vmem:[#allocation3 + $0x4] sm:$0xff] %v2155_v47  ;;  %v11401_v47 = vld [vmem:[#allocation3 + $0xc] sm:$0xf0] }
 0x245   : > { %v1879_v49 = vpop.f32.mrf.mxu0  ;;  %v13264_v42 = vor.u32 %v11401_v47, %v9651_v7 }
 0x246   : > { %v1967_v59 = vadd.f32 %v1879_v49, %v1705_v46  ;;  %v1928_v9 = vpop.f32.mrf.mxu1 }
 0x247   : > { %v1968_v22 = vadd.f32 %v1928_v9, %v1706_v11  ;;  %v1676_v9 = vpop.f32.mrf.mxu3 }
 0x248   : > { %v11883_v5 = vpop.eup %11882  ;;  %v2095_v41 = vadd.f32 %v2024_v28, %v1967_v59  ;;  %2404 = vrot.lane.b32.xlu2 %v13264_v42, %s16715_s23  ;;  %v1714_v0 = vadd.f32 %v1676_v9, %v13122_v35 }
 0x249   : > { %v11885_v30 = vpop.eup %11884  ;;  %v2096_v1 = vadd.f32 %v2024_v28, %v1968_v22  ;;  %v1627_v28 = vpop.f32.mrf.mxu2 }
 0x24a   : > { %v2156_v24 = vpack.c.bf16 %v11885_v30, %v11883_v5  ;;  %11886 = vtanh.f32 %v2095_v41  ;;  %v1713_v45 = vadd.f32 %v1627_v28, %v13119_v34 }
 0x24b   : > { %11888 = vtanh.f32 %v2096_v1 }
 0x24c   : > { %2172 = vst [vmem:[#allocation3 + $0x14] sm:$0xff] %v2156_v24 }
 0x24d   : > { %v1881_v29 = vpop.f32.mrf.mxu0 }
 0x24e   : > { %v1969_v46 = vadd.f32 %v1881_v29, %v1707_v62  ;;  %v1930_v11 = vpop.f32.mrf.mxu1 }
 0x24f   : > { %v1970_v49 = vadd.f32 %v1930_v11, %v1708_v15 }
 0x250   : > { %v11887_v59 = vpop.eup %11886  ;;  %v2097_v22 = vadd.f32 %v2029_v51, %v1969_v46  ;;  %2672 = vrot.lane.b32.xlu2 %v13181_v60, %s16713_s19 }
 0x251   : > { %v11889_v5 = vpop.eup %11888  ;;  %v2098_v57 = vadd.f32 %v2029_v51, %v1970_v49  ;;  %v1629_v15 = vpop.f32.mrf.mxu2 }
 0x252   : > { %v2157_v12 = vpack.c.bf16 %v11889_v5, %v11887_v59  ;;  %11890 = vtanh.f32 %v2097_v22  ;;  %v1678_v51 = vpop.f32.mrf.mxu3  ;;  %v1715_v34 = vadd.f32 %v1629_v15, %v13130_v50 }
 0x253   : > { %11892 = vtanh.f32 %v2098_v57  ;;  %v1716_v35 = vadd.f32 %v1678_v51, %v13133_v63 }
 0x254   : > { %2173 = vst [vmem:[#allocation3 + $0x24] sm:$0xff] %v2157_v12 }
 0x255   : > { %v1884_v41 = vpop.f32.mrf.mxu0 }
 0x256   : > { %v1971_v30 = vadd.f32 %v1884_v41, %v1709_v27  ;;  %v1933_v1 = vpop.f32.mrf.mxu1 }
 0x257   : > { %v1972_v24 = vadd.f32 %v1933_v1, %v1710_v36 }
 0x258   : > { %v11891_v7 = vpop.eup %11890  ;;  %v2099_v47 = vadd.f32 %v2034_v61, %v1971_v30  ;;  %2666 = vrot.lane.b32.xlu2 %v13196_v58, %s16713_s19 }
 0x259   : > { %v11893_v62 = vpop.eup %11892  ;;  %v2100_v29 = vadd.f32 %v2034_v61, %v1972_v24  ;;  %v1632_v57 = vpop.f32.mrf.mxu2 }
 0x25a   : > { %v2158_v46 = vpack.c.bf16 %v11893_v62, %v11891_v7  ;;  %11894 = vtanh.f32 %v2099_v47  ;;  %v1681_v25 = vpop.f32.mrf.mxu3  ;;  %v1717_v50 = vadd.f32 %v1632_v57, %v13145_v53  ;;  %v1098_v53 = vadd.f32 %v13068_v17, %v12963_v13 }
 0x25b   : > { %11896 = vtanh.f32 %v2100_v29  ;;  %v1718_v63 = vadd.f32 %v1681_v25, %v13148_v54 }
 0x25c   : > { %2174 = vst [vmem:[#allocation3 + $0x34] sm:$0xff] %v2158_v46 }
 0x25d   : > { %v1886_v56 = vpop.f32.mrf.mxu0 }
 0x25e   : > { %v1973_v16 = vadd.f32 %v1886_v56, %v1711_v38  ;;  %v1935_v11 = vpop.f32.mrf.mxu1 }
 0x25f   : > { %v1974_v60 = vadd.f32 %v1935_v11, %v1712_v23 }
 0x260   : > { %v11895_v49 = vpop.eup %11894  ;;  %v2101_v59 = vadd.f32 %v13227_v3, %v1973_v16  ;;  %2660 = vrot.lane.b32.xlu2 %v13212_v37, %s16713_s19 }
 0x261   : > { %v11897_v61 = vpop.eup %11896  ;;  %v2102_v22 = vadd.f32 %v13227_v3, %v1974_v60  ;;  %v1634_v28 = vpop.f32.mrf.mxu2 }
 0x262   : > { %v2159_v5 = vpack.c.bf16 %v11897_v61, %v11895_v49  ;;  %11898 = vtanh.f32 %v2101_v59  ;;  %v1683_v24 = vpop.f32.mrf.mxu3 }
 0x263   : > { %11900 = vtanh.f32 %v2102_v22 }
 0x264   : > { %2175 = vst [vmem:[#allocation3 + $0x44] sm:$0xff] %v2159_v5 }
 0x265   : > { %v1889_v6 = vpop.f32.mrf.mxu0 }
 0x266   : > { %v1975_v12 = vadd.f32 %v1889_v6, %v1713_v45  ;;  %v1938_v58 = vpop.f32.mrf.mxu1 }
 0x267   : > { %v1976_v27 = vadd.f32 %v1938_v58, %v1714_v0 }
 0x268   : > { %v11899_v36 = vpop.eup %11898  ;;  %v2103_v3 = vadd.f32 %v13206_v44, %v1975_v12  ;;  %2654 = vrot.lane.b32.xlu2 %v13229_v20, %s16713_s19 }
 0x269   : > { %v11901_v41 = vpop.eup %11900  ;;  %v2104_v30 = vadd.f32 %v13206_v44, %v1976_v27  ;;  %v1637_v20 = vpop.f32.mrf.mxu2 }
 0x26a   : > { %v2160_v1 = vpack.c.bf16 %v11901_v41, %v11899_v36  ;;  %11902 = vtanh.f32 %v2103_v3  ;;  %v1686_v11 = vpop.f32.mrf.mxu3  ;;  %v1721_v6 = vadd.f32 %v1637_v20, %v13159_v32  ;;  %v1103_v32 = vadd.f32 %v13113_v48, %v13002_v40 }
 0x26b   : > { %11904 = vtanh.f32 %v2104_v30  ;;  %v1722_v12 = vadd.f32 %v1686_v11, %v13161_v2 }
 0x26c   : > { %2176 = vst [vmem:[#allocation3 + $0x54] sm:$0xff] %v2160_v1 }
 0x26d   : > { %v1891_v9 = vpop.f32.mrf.mxu0 }
 0x26e   : > { %v1977_v7 = vadd.f32 %v1891_v9, %v1715_v34  ;;  %v1940_v37 = vpop.f32.mrf.mxu1 }
 0x26f   : > { %v1978_v47 = vadd.f32 %v1940_v37, %v1716_v35  ;;  %v16758_v35 = vld [vmem:[#allocation26_spill] sm:$0xff] }
 0x270   : > { %v11903_v62 = vpop.eup %11902  ;;  %v2105_v44 = vadd.f32 %v13225_v14, %v1977_v7  ;;  %2648 = vrot.lane.b32.xlu2 %v13242_v8, %s16713_s19  ;;  %v1373_v8 = vadd.f32 %v13154_v55, %v1098_v53 }
 0x271   : > { %v11905_v29 = vpop.eup %11904  ;;  %v2106_v46 = vadd.f32 %v13225_v14, %v1978_v47  ;;  %v1049_v14 = vadd.f32 %v13066_v4, %v12958_v18 }
 0x272   : > { %v2161_v38 = vpack.c.bf16 %v11905_v29, %v11903_v62  ;;  %11906 = vtanh.f32 %v2105_v44  ;;  %v1720_v5 = vadd.f32 %v1683_v24, %v1373_v8  ;;  %v1688_v0 = vpop.f32.mrf.mxu3  ;;  %v16764_v8 = vld [vmem:[#allocation33_spill] sm:$0xff] }
 0x273   : > { %11908 = vtanh.f32 %v2106_v46  ;;  %v1372_v59 = vadd.f32 %v13152_v21, %v1049_v14  ;;  %v1639_v21 = vpop.f32.mrf.mxu2 }
 0x274   : > { %2177 = vst [vmem:[#allocation3 + $0x64] sm:$0xff] %v2161_v38 }
 0x275   : > { %v1894_v15 = vpop.f32.mrf.mxu0  ;;  %v1719_v22 = vadd.f32 %v1634_v28, %v1372_v59  ;;  %v1377_v28 = vadd.f32 %v16758_v35, %v1103_v32  ;;  %v16763_v59 = vld [vmem:[#allocation20_spill] sm:$0xff] }
 0x276   : > { %v1979_v51 = vadd.f32 %v1894_v15, %v1717_v50  ;;  %v1943_v23 = vpop.f32.mrf.mxu1 }
 0x277   : > { %v1980_v56 = vadd.f32 %v1943_v23, %v1718_v63  ;;  %v16760_v63 = vld [vmem:[#allocation28_spill] sm:$0xff]  ;;  %v16761_v23 = vld [vmem:[#allocation29_spill] sm:$0xff] }
 0x278   : > { %v11907_v16 = vpop.eup %11906  ;;  %v2107_v60 = vadd.f32 %v13204_v43, %v1979_v51  ;;  %2642 = vrot.lane.b32.xlu2 %v13252_v52, %s16713_s19 }
 0x279   : > { %v11909_v49 = vpop.eup %11908  ;;  %v2108_v54 = vadd.f32 %v13204_v43, %v1980_v56 }
 0x27a   : > { %v2162_v61 = vpack.c.bf16 %v11909_v49, %v11907_v16  ;;  %11910 = vtanh.f32 %v2107_v60  ;;  %v1691_v24 = vpop.f32.mrf.mxu3 }
 0x27b   : > { %11912 = vtanh.f32 %v2108_v54  ;;  %v1726_v20 = vadd.f32 %v1691_v24, %v16761_v23  ;;  %v16762_v54 = vld [vmem:[#allocation16_spill] sm:$0xff] }
 0x27c   : > { %2178 = vst [vmem:[#allocation3 + $0x74] sm:$0xff] %v2162_v61  ;;  %v1059_v61 = vadd.f32 %v16763_v59, %v16762_v54 }
 0x27d   : > { %v1896_v18 = vpop.f32.mrf.mxu0 }
 0x27e   : > { %v1981_v4 = vadd.f32 %v1896_v18, %v1719_v22  ;;  %v1945_v57 = vpop.f32.mrf.mxu1  ;;  %v16765_v18 = vld [vmem:[#allocation17_spill] sm:$0xff] }
 0x27f   : > { %v1982_v45 = vadd.f32 %v1945_v57, %v1720_v5 }
 0x280   : > { %v11911_v13 = vpop.eup %11910  ;;  %v2109_v17 = vadd.f32 %v13247_v10, %v1981_v4  ;;  %2636 = vrot.lane.b32.xlu2 %v13258_v33, %s16713_s19  ;;  %v1642_v33 = vpop.f32.mrf.mxu2  ;;  %v16766_v4 = vld [vmem:[#allocation21_spill] sm:$0xff] }
 0x281   : > { %v11913_v43 = vpop.eup %11912  ;;  %v2110_v25 = vadd.f32 %v13247_v10, %v1982_v45  ;;  %v1054_v10 = vadd.f32 %v13111_v26, %v13000_v39  ;;  %v1724_v39 = vadd.f32 %v1688_v0, %v1377_v28  ;;  %v1725_v15 = vadd.f32 %v1642_v33, %v16760_v63  ;;  %v16770_v33 = vld [vmem:[#allocation34_spill] sm:$0xff]  ;;  %v16776_v63 = vld [vmem:[#allocation23_spill] sm:$0xff] }
 0x282   : > { %v2163_v55 = vpack.c.bf16 %v11913_v43, %v11911_v13  ;;  %11914 = vtanh.f32 %v2109_v17  ;;  %v1693_v14 = vpop.f32.mrf.mxu3  ;;  %v1108_v57 = vadd.f32 %v16766_v4, %v16765_v18  ;;  %v16767_v13 = vld [vmem:[#allocation31_spill] sm:$0xff]  ;;  %v16779_v18 = vld [vmem:[#allocation24_spill] sm:$0xff] }
 0x283   : > { %11916 = vtanh.f32 %v2110_v25  ;;  %v1376_v2 = vadd.f32 %v13171_v31, %v1054_v10  ;;  %v1380_v17 = vadd.f32 %v16767_v13, %v1059_v61  ;;  %v16769_v10 = vld [vmem:[#allocation27_spill] sm:$0xff] }
 0x284   : > { %2179 = vst [vmem:[#allocation3 + $0x84] sm:$0xff] %v2163_v55 }
 0x285   : > { %v1899_v58 = vpop.f32.mrf.mxu0  ;;  %v1723_v9 = vadd.f32 %v1639_v21, %v1376_v2  ;;  %v16768_v21 = vld [vmem:[#allocation32_spill] sm:$0xff] }
 0x286   : > { %v1983_v27 = vadd.f32 %v1899_v58, %v1721_v6  ;;  %v1948_v52 = vpop.f32.mrf.mxu1  ;;  %v1381_v25 = vadd.f32 %v16768_v21, %v1108_v57 }
 0x287   : > { %v1984_v36 = vadd.f32 %v1948_v52, %v1722_v12 }
 0x288   : > { %v11915_v3 = vpop.eup %11914  ;;  %v2111_v41 = vadd.f32 %v13237_v19, %v1983_v27  ;;  %2630 = vrot.lane.b32.xlu2 %v13264_v42, %s16713_s19  ;;  %v1644_v56 = vpop.f32.mrf.mxu2  ;;  %v1728_v55 = vadd.f32 %v1693_v14, %v1381_v25 }
 0x289   : > { %v11917_v30 = vpop.eup %11916  ;;  %v2112_v1 = vadd.f32 %v13237_v19, %v1984_v36  ;;  %v16759_v19 = vld [vmem:[#allocation30_spill] sm:$0xff]  ;;  %v1727_v0 = vadd.f32 %v1644_v56, %v1380_v17  ;;  %v16777_v56 = vld [vmem:[#allocation36_spill] sm:$0xff] }
 0x28a   : > { %v2164_v34 = vpack.c.bf16 %v11917_v30, %v11915_v3  ;;  %11918 = vtanh.f32 %v2111_v41  ;;  %v1696_v3 = vpop.f32.mrf.mxu3 }
 0x28b   : > { %11920 = vtanh.f32 %v2112_v1  ;;  %v9707_v29 = vld [vmem:[#allocation3 + $0x88] sm:$0xf]  ;;  %v11412_v38 = vld [vmem:[#allocation3 + $0x84] sm:$0xf] }
 0x28c   : > { %2180 = vst [vmem:[#allocation3 + $0x94] sm:$0xff] %v2164_v34 }
 0x28d   : > { %v1901_v26 = vpop.f32.mrf.mxu0 }
 0x28e   : > { %v1985_v7 = vadd.f32 %v1901_v26, %v1723_v9  ;;  %v1950_v37 = vpop.f32.mrf.mxu1  ;;  %v16771_v26 = vld [vmem:[#allocation35_spill] sm:$0xff] }
 0x28f   : > { %v1986_v40 = vadd.f32 %v1950_v37, %v1724_v39 }
 0x290   : > { %v11919_v48 = vpop.eup %11918  ;;  %v2113_v31 = vadd.f32 %v16759_v19, %v1985_v7  ;;  %v1647_v27 = vpop.f32.mrf.mxu2  ;;  %v1730_v7 = vadd.f32 %v1696_v3, %v16771_v26 }
 0x291   : > { %v11921_v47 = vpop.eup %11920  ;;  %v2114_v62 = vadd.f32 %v16759_v19, %v1986_v40  ;;  %v1729_v9 = vadd.f32 %v1647_v27, %v16770_v33  ;;  %v9689_v33 = vld [vmem:[#allocation3 + $0x70] sm:$0xf0] }
 0x292   : > { %v2165_v44 = vpack.c.bf16 %v11921_v47, %v11919_v48  ;;  %11922 = vtanh.f32 %v2113_v31  ;;  %v16772_v47 = vld [vmem:[#allocation18_spill] sm:$0xff]  ;;  %v1698_v14 = vpop.f32.mrf.mxu3 }
 0x293   : > { %11924 = vtanh.f32 %v2114_v62  ;;  %v11414_v46 = vld [vmem:[#allocation3 + $0x94] sm:$0xf0]  ;;  %v9701_v50 = vld [vmem:[#allocation3 + $0x90] sm:$0xf0] }
 0x294   : > { %2181 = vst [vmem:[#allocation3 + $0xa4] sm:$0xff] %v2165_v44  ;;  %v13326_v51 = vor.u32 %v11414_v46, %v9707_v29  ;;  %v13328_v42 = vor.u32 %v11412_v38, %v9701_v50  ;;  %v16773_v62 = vld [vmem:[#allocation22_spill] sm:$0xff]  ;;  %v16774_v29 = vld [vmem:[#allocation25_spill] sm:$0xff]  ;;  %v16775_v50 = vld [vmem:[#allocation19_spill] sm:$0xff] }
 0x295   : > { %v1904_v16 = vpop.f32.mrf.mxu0  ;;  %v1064_v44 = vadd.f32 %v16773_v62, %v16772_v47  ;;  %v9683_v47 = vld [vmem:[#allocation3 + $0x48] sm:$0xf] }
 0x296   : > { %v1953_v11 = vpop.f32.mrf.mxu1  ;;  %2432 = vrot.lane.b32.xlu1 %v13326_v51, %s16715_s23  ;;  %2430 = vrot.lane.b32.xlu0 %v13328_v42, %s16715_s23  ;;  %v1987_v60 = vadd.f32 %v1904_v16, %v1725_v15  ;;  %v1113_v15 = vadd.f32 %v16776_v63, %v16775_v50  ;;  %v9665_v50 = vld [vmem:[#allocation3 + $0x30] sm:$0xf0]  ;;  %v9671_v63 = vld [vmem:[#allocation3 + $0x28] sm:$0xf] }
 0x297   : > { %v1988_v49 = vadd.f32 %v1953_v11, %v1726_v20  ;;  %v1384_v16 = vadd.f32 %v16777_v56, %v1064_v44  ;;  %v11474_v56 = vld [vmem:[#allocation3 + $0x70] sm:$0xf0] }
 0x298   : > { %v11923_v53 = vpop.eup %11922  ;;  %v2115_v22 = vadd.f32 %v16764_v8, %v1987_v60  ;;  %v1649_v23 = vpop.f32.mrf.mxu2  ;;  %v16778_v60 = vld [vmem:[#allocation37_spill] sm:$0xff] }
 0x299   : > { %v11925_v5 = vpop.eup %11924  ;;  %v2116_v45 = vadd.f32 %v16764_v8, %v1988_v49  ;;  %v1385_v49 = vadd.f32 %v16778_v60, %v1113_v15  ;;  %v9659_v60 = vld [vmem:[#allocation3 + $0x8] sm:$0xf] }
 0x29a   : > { %v2166_v43 = vpack.c.bf16 %v11925_v5, %v11923_v53  ;;  %11926 = vtanh.f32 %v2115_v22  ;;  %v1731_v53 = vadd.f32 %v1649_v23, %v1384_v16  ;;  %v11403_v23 = vld [vmem:[#allocation3 + $0x24] sm:$0xf]  ;;  %v11402_v16 = vld [vmem:[#allocation3 + $0x14] sm:$0xf0] }
 0x29b   : > { %11928 = vtanh.f32 %v2116_v45  ;;  %v9719_v2 = vld [vmem:[#allocation3 + $0xa8] sm:$0xf]  ;;  %v11415_v35 = vld [vmem:[#allocation3 + $0xa4] sm:$0xf]  ;;  %v1732_v54 = vadd.f32 %v1698_v14, %v1385_v49  ;;  %v9653_v14 = vld [vmem:[#allocation3 + $0x10] sm:$0xf0]  ;;  %v13393_v49 = vpop.permute.xlu2 %2446 }
 0x29c   : > { %2182 = vst [vmem:[#allocation3 + $0xb4] sm:$0xff] %v2166_v43 }
 0x29d   : > { %v1906_v6 = vpop.f32.mrf.mxu0 }
 0x29e   : > { %v1989_v12 = vadd.f32 %v1906_v6, %v1727_v0  ;;  %v1955_v58 = vpop.f32.mrf.mxu1 }
 0x29f   : > { %v1990_v52 = vadd.f32 %v1955_v58, %v1728_v55 }
 0x2a0   : > { %v11927_v36 = vpop.eup %11926  ;;  %v2117_v41 = vadd.f32 %v16769_v10, %v1989_v12 }
 0x2a1   : > { %v11929_v30 = vpop.eup %11928  ;;  %v2118_v32 = vadd.f32 %v16769_v10, %v1990_v52  ;;  %v9999_v10 = vld [vmem:[#allocation3 + $0xa4] sm:$0xf] }
 0x2a2   : > { %v2167_v1 = vpack.c.bf16 %v11929_v30, %v11927_v36  ;;  %11930 = vtanh.f32 %v2117_v41 }
 0x2a3   : > { %11932 = vtanh.f32 %v2118_v32  ;;  %v11417_v34 = vld [vmem:[#allocation3 + $0xb4] sm:$0xf0]  ;;  %v9713_v28 = vld [vmem:[#allocation3 + $0xb0] sm:$0xf0] }
 0x2a4   : > { %2183 = vst [vmem:[#allocation3 + $0xc4] sm:$0xff] %v2167_v1  ;;  %v13346_v24 = vor.u32 %v11417_v34, %v9719_v2  ;;  %v13348_v39 = vor.u32 %v11415_v35, %v9713_v28  ;;  %v11480_v3 = vld [vmem:[#allocation3 + $0xb0] sm:$0xf0]  ;;  %v11411_v28 = vld [vmem:[#allocation3 + $0x74] sm:$0xf0] }
 0x2a5   : > { %v1909_v37 = vpop.f32.mrf.mxu0  ;;  %v10000_v2 = vor.u32 %v11480_v3, %v9999_v10 }
 0x2a6   : > { %v1991_v40 = vadd.f32 %v1909_v37, %v1729_v9  ;;  %v1958_v48 = vpop.f32.mrf.mxu1  ;;  %2438 = vrot.lane.b32.xlu1 %v13346_v24, %s16715_s23  ;;  %2436 = vrot.lane.b32.xlu0 %v13348_v39, %s16715_s23  ;;  %v9695_v9 = vld [vmem:[#allocation3 + $0x68] sm:$0xf] }
 0x2a7   : > { %v1992_v19 = vadd.f32 %v1958_v48, %v1730_v7  ;;  %v9696_v26 = vor.u32 %v11411_v28, %v9695_v9  ;;  %v11409_v7 = vld [vmem:[#allocation3 + $0x64] sm:$0xf]  ;;  %v11408_v48 = vld [vmem:[#allocation3 + $0x54] sm:$0xf0]  ;;  %v10019_v28 = vld [vmem:[#allocation3 + $0xcc] sm:$0xf] }
 0x2a8   : > { %v11931_v31 = vpop.eup %11930  ;;  %v2119_v46 = vadd.f32 %v16774_v29, %v1991_v40  ;;  %v9692_v37 = vor.u32 %v11409_v7, %v9689_v33  ;;  %v11477_v40 = vld [vmem:[#allocation3 + $0x90] sm:$0xf0]  ;;  %v9684_v44 = vor.u32 %v11408_v48, %v9683_v47  ;;  %v11484_v33 = vld [vmem:[#allocation3 + $0xd8] sm:$0xf0]  ;;  %v10001_v48 = vld [vmem:[#allocation3 + $0xb4] sm:$0xf0] }
 0x2a9   : > { %v11933_v38 = vpop.eup %11932  ;;  %v2120_v20 = vadd.f32 %v16774_v29, %v1992_v19  ;;  %v9677_v19 = vld [vmem:[#allocation3 + $0x50] sm:$0xf0]  ;;  %v11406_v29 = vld [vmem:[#allocation3 + $0x44] sm:$0xf] }
 0x2aa   : > { %v2168_v11 = vpack.c.bf16 %v11933_v38, %v11931_v31  ;;  %11934 = vtanh.f32 %v2119_v46  ;;  %v9987_v31 = vld [vmem:[#allocation3 + $0x84] sm:$0xf]  ;;  %v9680_v46 = vor.u32 %v11406_v29, %v9677_v19  ;;  %v11405_v38 = vld [vmem:[#allocation3 + $0x34] sm:$0xf0]  ;;  %v3798_v19 = vld [vmem:[%s16688_s5 + $0x68] sm:$0xff] }
 0x2ab   : > { %11936 = vtanh.f32 %v2120_v20  ;;  %v10011_v17 = vld [vmem:[#allocation3 + $0xc4] sm:$0xf]  ;;  %v9731_v43 = vld [vmem:[#allocation3 + $0xc8] sm:$0xf]  ;;  %v9988_v62 = vor.u32 %v11477_v40, %v9987_v31  ;;  %v9672_v15 = vor.u32 %v11405_v38, %v9671_v63  ;;  %v9668_v20 = vor.u32 %v11403_v23, %v9665_v50 }
 0x2ac   : > { %2184 = vst [vmem:[#allocation3 + $0xd4] sm:$0xff] %v2168_v11  ;;  %v11418_v21 = vld [vmem:[#allocation3 + $0xc4] sm:$0xf]  ;;  %v10020_v40 = vor.u32 %v11484_v33, %v10019_v28  ;;  %v11479_v31 = vld [vmem:[#allocation3 + $0xa8] sm:$0xf] }
 0x2ad   : > { %v1911_v59 = vpop.f32.mrf.mxu0  ;;  %v9975_v11 = vld [vmem:[#allocation3 + $0x64] sm:$0xf]  ;;  %v10004_v47 = vor.u32 %v11479_v31, %v10001_v48  ;;  %v11452_v33 = vld [vmem:[#allocation3 + $0xc8] sm:$0xf] }
 0x2ae   : > { %v1993_v61 = vadd.f32 %v1911_v59, %v1731_v53  ;;  %v1960_v8 = vpop.f32.mrf.mxu1  ;;  %v9976_v53 = vor.u32 %v11474_v56, %v9975_v11  ;;  %v11400_v59 = vld [vmem:[#allocation3 + $0x4] sm:$0xf]  ;;  %v10007_v56 = vld [vmem:[#allocation3 + $0xac] sm:$0xf]  ;;  %v11450_v31 = vld [vmem:[#allocation3 + $0xa8] sm:$0xf] }
 0x2af   : > { %v1994_v22 = vadd.f32 %v1960_v8, %v1732_v54  ;;  %v9660_v54 = vor.u32 %v11402_v16, %v9659_v60  ;;  %v13398_v8 = vpop.permute.xlu2 %2440  ;;  %v11481_v16 = vld [vmem:[#allocation3 + $0xb8] sm:$0xf0]  ;;  %v9867_v48 = vld [vmem:[#allocation3 + $0xa4] sm:$0xf] }
 0x2b0   : > { %v11935_v5 = vpop.eup %11934  ;;  %v2121_v4 = vadd.f32 %v16779_v18, %v1993_v61  ;;  %v9656_v61 = vor.u32 %v11400_v59, %v9653_v14 }
 0x2b1   : > { %v11937_v57 = vpop.eup %11936  ;;  %v2122_v45 = vadd.f32 %v16779_v18, %v1994_v22  ;;  %v11471_v22 = vld [vmem:[#allocation3 + $0x50] sm:$0xf0] }
 0x2b2   : > { %v2169_v13 = vpack.c.bf16 %v11937_v57, %v11935_v5  ;;  %11938 = vtanh.f32 %v2121_v4  ;;  %v9963_v5 = vld [vmem:[#allocation3 + $0x44] sm:$0xf] }
 0x2b3   : > { %11940 = vtanh.f32 %v2122_v45  ;;  %v11483_v25 = vld [vmem:[#allocation3 + $0xd0] sm:$0xf0]  ;;  %v11420_v0 = vld [vmem:[#allocation3 + $0xd4] sm:$0xf0]  ;;  %v9964_v18 = vor.u32 %v11471_v22, %v9963_v5 }
 0x2b4   : > { %v9725_v55 = vld [vmem:[#allocation3 + $0xd0] sm:$0xf0]  ;;  %2185 = vst [vmem:[#allocation3 + $0xe4] sm:$0xff] %v2169_v13  ;;  %v10012_v6 = vor.u32 %v11483_v25, %v10011_v17  ;;  %v13365_v12 = vor.u32 %v11420_v0, %v9731_v43 }
 0x2b5   : > { %v13367_v58 = vor.u32 %v11418_v21, %v9725_v55  ;;  %v11465_v55 = vld [vmem:[#allocation3 + $0x10] sm:$0xf0] }
 0x2b6   : > { %3611 = vrot.lane.b32.xlu2 %v10012_v6, %s16704_s26  ;;  %2444 = vrot.lane.b32.xlu1 %v13365_v12, %s16715_s23 }
 0x2b7   : > { %2442 = vrot.lane.b32.xlu0 %v13367_v58, %s16715_s23  ;;  %v13410_v4 = vpop.permute.xlu2 %2434 }
 0x2b8   : > { %v11939_v27 = vpop.eup %11938 }
 0x2b9   : > { %v11941_v52 = vpop.eup %11940 }
 0x2ba   : > { %v2170_v36 = vpack.c.bf16 %v11941_v52, %v11939_v27  ;;  %v11487_v27 = vld [vmem:[#allocation3 + $0xf8] sm:$0xf0] }
 0x2bb   : > { %v9743_v41 = vld [vmem:[#allocation3 + $0xe8] sm:$0xf]  ;;  %v11421_v32 = vld [vmem:[#allocation3 + $0xe4] sm:$0xf] }
 0x2bc   : > { %2186 = vst [vmem:[#allocation3 + $0xf4] sm:$0xff] %v2170_v36  ;;  %v10023_v13 = vld [vmem:[#allocation3 + $0xe4] sm:$0xf] }
 0x2be   : > { %3336 = vrot.lane.b32.xlu2 %v10012_v6, %s16706_s20  ;;  %v9939_v6 = vld [vmem:[#allocation3 + $0x4] sm:$0xf] }
 0x2bf   : > { %v13417_v45 = vpop.permute.xlu2 %2428 }
 0x2c3   : > { %v11423_v30 = vld [vmem:[#allocation3 + $0xf4] sm:$0xf0]  ;;  %v9737_v1 = vld [vmem:[#allocation3 + $0xf0] sm:$0xf0] }
 0x2c4   : > { %v13375_v34 = vor.u32 %v11423_v30, %v9743_v41  ;;  %v13377_v35 = vor.u32 %v11421_v32, %v9737_v1  ;;  %v11486_v57 = vld [vmem:[#allocation3 + $0xf0] sm:$0xf0]  ;;  %v10013_v41 = vld [vmem:[#allocation3 + $0xd4] sm:$0xf0]  ;;  %v11482_v30 = vld [vmem:[#allocation3 + $0xc8] sm:$0xf] }
 0x2c5   : > { %v10024_v17 = vor.u32 %v11486_v57, %v10023_v13  ;;  %v10016_v32 = vor.u32 %v11482_v30, %v10013_v41  ;;  %v11453_v41 = vld [vmem:[#allocation3 + $0xd0] sm:$0xf0] }
 0x2c6   : > { %3605 = vrot.lane.b32.xlu2 %v10000_v2, %s16704_s26  ;;  %2450 = vrot.lane.b32.xlu1 %v13375_v34, %s16715_s23 }
 0x2c7   : > { %2448 = vrot.lane.b32.xlu0 %v13377_v35, %s16715_s23 }
 0x2ce   : > { %3330 = vrot.lane.b32.xlu2 %v10000_v2, %s16706_s20  ;;  %2426 = vrot.lane.b32.xlu1 %v9696_v26, %s16715_s23 }
 0x2cf   : > { %2424 = vrot.lane.b32.xlu0 %v9692_v37, %s16715_s23 }
 0x2d6   : > { %3599 = vrot.lane.b32.xlu2 %v9988_v62, %s16704_s26  ;;  %2420 = vrot.lane.b32.xlu1 %v9684_v44, %s16715_s23 }
 0x2d7   : > { %2418 = vrot.lane.b32.xlu0 %v9680_v46, %s16715_s23 }
 0x2de   : > { %3324 = vrot.lane.b32.xlu2 %v9988_v62, %s16706_s20  ;;  %2414 = vrot.lane.b32.xlu1 %v9672_v15, %s16715_s23 }
 0x2df   : > { %2412 = vrot.lane.b32.xlu0 %v9668_v20, %s16715_s23 }
 0x2e6   : > { %3593 = vrot.lane.b32.xlu2 %v9976_v53, %s16704_s26  ;;  %2408 = vrot.lane.b32.xlu1 %v9660_v54, %s16715_s23 }
 0x2e7   : > { %2406 = vrot.lane.b32.xlu0 %v9656_v61, %s16715_s23 }
 0x2ee   : > { %3318 = vrot.lane.b32.xlu2 %v9976_v53, %s16706_s20  ;;  %2670 = vrot.lane.b32.xlu1 %v13365_v12, %s16713_s19  ;;  %v9940_v12 = vor.u32 %v11465_v55, %v9939_v6  ;;  %v10008_v53 = vor.u32 %v11481_v16, %v10007_v56  ;;  %v11454_v55 = vld [vmem:[#allocation3 + $0xe8] sm:$0xf]  ;;  %v9853_v56 = vld [vmem:[#allocation3 + $0x74] sm:$0xf0]  ;;  %v9983_v16 = vld [vmem:[#allocation3 + $0x6c] sm:$0xf] }
 0x2ef   : > { %2668 = vrot.lane.b32.xlu0 %v13367_v58, %s16713_s19  ;;  %v10031_v58 = vld [vmem:[#allocation3 + $0xec] sm:$0xf] }
 0x2f0   : > { %v10032_v10 = vor.u32 %v11487_v27, %v10031_v58 }
 0x2f6   : > { %3587 = vrot.lane.b32.xlu2 %v9964_v18, %s16704_s26  ;;  %2664 = vrot.lane.b32.xlu1 %v13346_v24, %s16713_s19  ;;  %v13424_v24 = vpop.permute.xlu2 %2422 }
 0x2f7   : > { %2662 = vrot.lane.b32.xlu0 %v13348_v39, %s16713_s19 }
 0x2fe   : > { %3312 = vrot.lane.b32.xlu2 %v9964_v18, %s16706_s20  ;;  %2658 = vrot.lane.b32.xlu1 %v13326_v51, %s16713_s19  ;;  %v11468_v51 = vld [vmem:[#allocation3 + $0x30] sm:$0xf0]  ;;  %v13429_v43 = vpop.permute.xlu2 %2416 }
 0x2ff   : > { %2656 = vrot.lane.b32.xlu0 %v13328_v42, %s16713_s19  ;;  %v9951_v42 = vld [vmem:[#allocation3 + $0x24] sm:$0xf] }
 0x300   : > { %v9952_v39 = vor.u32 %v11468_v51, %v9951_v42  ;;  %v11455_v51 = vld [vmem:[#allocation3 + $0xf0] sm:$0xf0]  ;;  %v9885_v42 = vld [vmem:[#allocation3 + $0xf4] sm:$0xf0] }
 0x301   : > { %v9888_v27 = vor.u32 %v11454_v55, %v9885_v42  ;;  %v11443_v42 = vld [vmem:[#allocation3 + $0x30] sm:$0xf0] }
 0x306   : > { %3617 = vrot.lane.b32.xlu2 %v10024_v17, %s16704_s26  ;;  %2676 = vrot.lane.b32.xlu1 %v13375_v34, %s16713_s19  ;;  %v13437_v21 = vpop.permute.xlu2 %2410  ;;  %v3799_v34 = vld [vmem:[%s16688_s5 + $0x70] sm:$0xff] }
 0x307   : > { %2674 = vrot.lane.b32.xlu0 %v13377_v35, %s16713_s19 }
 0x308   : > { %v2433_v25 = vpop.permute.xlu1 %2432  ;;  %v2431_v0 = vpop.permute.xlu0 %2430 }
 0x309   : > { %v2460_v23 = vsel %vm758_vm1, %v13417_v45, %v2431_v0 }
 0x30e   : > { %3342 = vrot.lane.b32.xlu2 %v10024_v17, %s16706_s20  ;;  %2652 = vrot.lane.b32.xlu1 %v9696_v26, %s16713_s19  ;;  %v13442_v3 = vpop.permute.xlu2 %2404 }
 0x30f   : > { %2650 = vrot.lane.b32.xlu0 %v9692_v37, %s16713_s19 }
 0x316   : > { %3581 = vrot.lane.b32.xlu2 %v9952_v39, %s16704_s26  ;;  %2646 = vrot.lane.b32.xlu1 %v9684_v44, %s16713_s19  ;;  %v13450_v35 = vpop.permute.xlu2 %2672 }
 0x317   : > { %2644 = vrot.lane.b32.xlu0 %v9680_v46, %s16713_s19 }
 0x318   : > { %v2439_v52 = vpop.permute.xlu1 %2438  ;;  %v2437_v36 = vpop.permute.xlu0 %2436 }
 0x319   : > { %v2462_v50 = vsel %vm758_vm1, %v13410_v4, %v2437_v36  ;;  %v2463_v63 = vsel %vm758_vm1, %v2437_v36, %v2439_v52  ;;  %v11424_v52 = vld [vmem:[%s16687_s4 + $0x40] sm:$0xff] }
 0x31e   : > { %3306 = vrot.lane.b32.xlu2 %v9952_v39, %s16706_s20  ;;  %2640 = vrot.lane.b32.xlu1 %v9672_v15, %s16713_s19  ;;  %v13460_v62 = vpop.permute.xlu2 %2666  ;;  %v3793_v15 = vld [vmem:[%s16688_s5 + $0x40] sm:$0xff] }
 0x31f   : > { %2638 = vrot.lane.b32.xlu0 %v9668_v20, %s16713_s19  ;;  %v2461_v20 = vsel %vm758_vm1, %v2431_v0, %v2433_v25  ;;  %v11478_v25 = vld [vmem:[#allocation3 + $0x98] sm:$0xf0] }
 0x326   : > { %3575 = vrot.lane.b32.xlu2 %v9940_v12, %s16704_s26  ;;  %2634 = vrot.lane.b32.xlu1 %v9660_v54, %s16713_s19  ;;  %v13478_v14 = vpop.permute.xlu2 %2660  ;;  %v9989_v54 = vld [vmem:[#allocation3 + $0x94] sm:$0xf0] }
 0x327   : > { %2632 = vrot.lane.b32.xlu0 %v9656_v61, %s16713_s19  ;;  %v3792_v61 = vld [vmem:[%s16688_s5 + $0x38] sm:$0xff] }
 0x328   : > { %v2445_v1 = vpop.permute.xlu1 %2444 }
 0x329   : > { %v2443_v2 = vpop.permute.xlu0 %2442 }
 0x32a   : > { %v2464_v44 = vsel %vm758_vm1, %v13398_v8, %v2443_v2  ;;  %v2465_v29 = vsel %vm758_vm1, %v2443_v2, %v2445_v1  ;;  %v11476_v8 = vld [vmem:[#allocation3 + $0x88] sm:$0xf]  ;;  %v9875_v2 = vld [vmem:[#allocation3 + $0xc4] sm:$0xf] }
 0x32b   : > { %v9992_v22 = vor.u32 %v11476_v8, %v9989_v54  ;;  %v11473_v1 = vld [vmem:[#allocation3 + $0x68] sm:$0xf]  ;;  %v9876_v28 = vor.u32 %v11453_v41, %v9875_v2 }
 0x32c   : > { %v11446_v54 = vld [vmem:[#allocation3 + $0x68] sm:$0xf] }
 0x32e   : > { %3300 = vrot.lane.b32.xlu2 %v9940_v12, %s16706_s20  ;;  %3621 = vrot.lane.b32.xlu1 %v10032_v10, %s16704_s26  ;;  %v13491_v45 = vpop.permute.xlu2 %2654 }
 0x32f   : > { %3613 = vrot.lane.b32.xlu0 %v10016_v32, %s16704_s26 }
 0x336   : > { %3873 = vperm.xlu2 %11877, %v3799_v34   ;;  %3346 = vrot.lane.b32.xlu1 %v10032_v10, %s16706_s20  ;;  %v9977_v10 = vld [vmem:[#allocation3 + $0x74] sm:$0xf0]  ;;  %v13507_v30 = vpop.permute.xlu2 %2648 }
 0x337   : > { %3338 = vrot.lane.b32.xlu0 %v10016_v32, %s16706_s20  ;;  %v9877_v32 = vld [vmem:[#allocation3 + $0xd4] sm:$0xf0]  ;;  %v9980_v34 = vor.u32 %v11473_v1, %v9977_v10  ;;  %v11440_v10 = vld [vmem:[#allocation3 + $0x8] sm:$0xf]  ;;  %v11472_v1 = vld [vmem:[#allocation3 + $0x58] sm:$0xf0] }
 0x338   : > { %v2451_v9 = vpop.permute.xlu1 %2450 }
 0x339   : > { %v2449_v26 = vpop.permute.xlu0 %2448 }
 0x33a   : > { %v2466_v7 = vsel %vm758_vm1, %v13393_v49, %v2449_v26  ;;  %v2467_v37 = vsel %vm758_vm1, %v2449_v26, %v2451_v9  ;;  %v9880_v9 = vor.u32 %v11452_v33, %v9877_v32  ;;  %v11451_v26 = vld [vmem:[#allocation3 + $0xb0] sm:$0xf0]  ;;  %v9971_v32 = vld [vmem:[#allocation3 + $0x4c] sm:$0xf] }
 0x33b   : > { %2484 = vmatpush.bf16.msrb.mxu2 %v2466_v7  ;;  %2533 = vmatpush.bf16.msrb.mxu3 %v2467_v37  ;;  %v9869_v37 = vld [vmem:[#allocation3 + $0xb4] sm:$0xf0] }
 0x33e   : > { %3868 = vperm.xlu2 %11877, %v3798_v19   ;;  %3615 = vrot.lane.b32.xlu1 %v10020_v40, %s16704_s26  ;;  %v9868_v19 = vor.u32 %v11451_v26, %v9867_v48  ;;  %v9972_v26 = vor.u32 %v11472_v1, %v9971_v32  ;;  %v11485_v48 = vld [vmem:[#allocation3 + $0xe8] sm:$0xf]  ;;  %v3795_v32 = vld [vmem:[%s16688_s5 + $0x50] sm:$0xff] }
 0x33f   : > { %3607 = vrot.lane.b32.xlu0 %v10004_v47, %s16704_s26  ;;  %2485 = vmatpush.bf16.msrb.mxu2 %v2464_v44  ;;  %v11449_v44 = vld [vmem:[#allocation3 + $0x90] sm:$0xf0] }
 0x340   : > { %2534 = vmatpush.bf16.msrb.mxu3 %v2465_v29  ;;  %v2427_v46 = vpop.permute.xlu1 %2426  ;;  %v9861_v29 = vld [vmem:[#allocation3 + $0x94] sm:$0xf0] }
 0x341   : > { %v2425_v38 = vpop.permute.xlu0 %2424 }
 0x342   : > { %v2458_v49 = vsel %vm758_vm1, %v13424_v24, %v2425_v38  ;;  %v2459_v59 = vsel %vm758_vm1, %v2425_v38, %v2427_v46  ;;  %v3787_v24 = vld [vmem:[%s16688_s5 + $0x10] sm:$0xff]  ;;  %v9859_v46 = vld [vmem:[#allocation3 + $0x84] sm:$0xf]  ;;  %v13518_v38 = vpop.permute.xlu2 %2642 }
 0x343   : > { %2486 = vmatpush.bf16.msrb.mxu2 %v2462_v50  ;;  %v9860_v50 = vor.u32 %v11449_v44, %v9859_v46 }
 0x344   : > { %2535 = vmatpush.bf16.msrb.mxu3 %v2463_v63  ;;  %v11448_v63 = vld [vmem:[#allocation3 + $0x88] sm:$0xf] }
 0x346   : > { %3843 = vperm.xlu2 %11877, %v3793_v15   ;;  %3340 = vrot.lane.b32.xlu1 %v10020_v40, %s16706_s20  ;;  %v9864_v15 = vor.u32 %v11448_v63, %v9861_v29  ;;  %v11469_v63 = vld [vmem:[#allocation3 + $0x38] sm:$0xf0] }
 0x347   : > { %3332 = vrot.lane.b32.xlu0 %v10004_v47, %s16706_s20  ;;  %2487 = vmatpush.bf16.msrb.mxu2 %v2460_v23  ;;  %v9872_v47 = vor.u32 %v11450_v31, %v9869_v37  ;;  %v11447_v23 = vld [vmem:[#allocation3 + $0x70] sm:$0xf0]  ;;  %v10025_v37 = vld [vmem:[#allocation3 + $0xf4] sm:$0xf0] }
 0x348   : > { %2536 = vmatpush.bf16.msrb.mxu3 %v2461_v20  ;;  %v2421_v11 = vpop.permute.xlu1 %2420 }
 0x349   : > { %v2419_v60 = vpop.permute.xlu0 %2418 }
 0x34a   : > { %v2456_v5 = vsel %vm758_vm1, %v13429_v43, %v2419_v60  ;;  %v2457_v18 = vsel %vm758_vm1, %v2419_v60, %v2421_v11  ;;  %v9995_v43 = vld [vmem:[#allocation3 + $0x8c] sm:$0xf]  ;;  %v11475_v11 = vld [vmem:[#allocation3 + $0x78] sm:$0xf0] }
 0x34b   : > { %2488 = vmatpush.bf16.msrb.mxu2 %v2458_v49  ;;  %v9996_v36 = vor.u32 %v11478_v25, %v9995_v43  ;;  %v9851_v49 = vld [vmem:[#allocation3 + $0x64] sm:$0xf]  ;;  %v9984_v8 = vor.u32 %v11475_v11, %v9983_v16  ;;  %v9837_v25 = vld [vmem:[#allocation3 + $0x34] sm:$0xf0]  ;;  %v11467_v11 = vld [vmem:[#allocation3 + $0x28] sm:$0xf] }
 0x34c   : > { %2537 = vmatpush.bf16.msrb.mxu3 %v2459_v59  ;;  %v11425_v59 = vld [vmem:[%s16687_s4 + $0x48] sm:$0xff]  ;;  %v9953_v16 = vld [vmem:[#allocation3 + $0x34] sm:$0xf0] }
 0x34e   : > { %3838 = vperm.xlu2 %11877, %v3792_v61   ;;  %3609 = vrot.lane.b32.xlu1 %v10008_v53, %s16704_s26  ;;  %v9856_v61 = vor.u32 %v11446_v54, %v9853_v56 }
 0x34f   : > { %3601 = vrot.lane.b32.xlu0 %v9992_v22, %s16704_s26  ;;  %2489 = vmatpush.bf16.msrb.mxu2 %v2456_v5  ;;  %v11445_v5 = vld [vmem:[#allocation3 + $0x50] sm:$0xf0] }
 0x350   : > { %2538 = vmatpush.bf16.msrb.mxu3 %v2457_v18  ;;  %v2415_v4 = vpop.permute.xlu1 %2414  ;;  %v9845_v18 = vld [vmem:[#allocation3 + $0x54] sm:$0xf0] }
 0x351   : > { %v2413_v57 = vpop.permute.xlu0 %2412 }
 0x352   : > { %v2454_v13 = vsel %vm758_vm1, %v13437_v21, %v2413_v57  ;;  %v2455_v17 = vsel %vm758_vm1, %v2413_v57, %v2415_v4  ;;  %v9883_v21 = vld [vmem:[#allocation3 + $0xe4] sm:$0xf]  ;;  %v11470_v4 = vld [vmem:[#allocation3 + $0x48] sm:$0xf] }
 0x353   : > { %2490 = vmatpush.bf16.msrb.mxu2 %v2454_v13  ;;  %v9884_v58 = vor.u32 %v11455_v51, %v9883_v21  ;;  %v9843_v57 = vld [vmem:[#allocation3 + $0x44] sm:$0xf] }
 0x354   : > { %2539 = vmatpush.bf16.msrb.mxu3 %v2455_v17  ;;  %v9844_v17 = vor.u32 %v11445_v5, %v9843_v57  ;;  %v9835_v21 = vld [vmem:[#allocation3 + $0x24] sm:$0xf] }
 0x355   : > { %v9836_v55 = vor.u32 %v11443_v42, %v9835_v21 }
 0x356   : > { %3813 = vperm.xlu2 %11877, %v3787_v24   ;;  %3334 = vrot.lane.b32.xlu1 %v10008_v53, %s16706_s20  ;;  %v9852_v53 = vor.u32 %v11447_v23, %v9851_v49  ;;  %v11444_v24 = vld [vmem:[#allocation3 + $0x48] sm:$0xf]  ;;  %v9956_v49 = vor.u32 %v11467_v11, %v9953_v16 }
 0x357   : > { %3326 = vrot.lane.b32.xlu0 %v9992_v22, %s16706_s20  ;;  %v9965_v22 = vld [vmem:[#allocation3 + $0x54] sm:$0xf0]  ;;  %v9848_v51 = vor.u32 %v11444_v24, %v9845_v18  ;;  %v9947_v18 = vld [vmem:[#allocation3 + $0xc] sm:$0xf]  ;;  %v11392_v24 = vld [vmem:[%s16687_s4] sm:$0xff] }
 0x358   : > { %v2409_v39 = vpop.permute.xlu1 %2408  ;;  %v9968_v13 = vor.u32 %v11470_v4, %v9965_v22  ;;  %v11466_v4 = vld [vmem:[#allocation3 + $0x18] sm:$0xf0] }
 0x359   : > { %v2407_v0 = vpop.permute.xlu0 %2406  ;;  %v9948_v42 = vor.u32 %v11466_v4, %v9947_v18  ;;  %v11397_v18 = vld [vmem:[%s16687_s4 + $0x28] sm:$0xff] }
 0x35a   : > { %v2452_v6 = vsel %vm758_vm1, %v13442_v3, %v2407_v0  ;;  %v2453_v12 = vsel %vm758_vm1, %v2407_v0, %v2409_v39  ;;  %v3786_v3 = vld [vmem:[%s16688_s5 + $0x8] sm:$0xff]  ;;  %v13530_v39 = vpop.permute.xlu2 %2636 }
 0x35b   : > { %2491 = vmatpush.bf16.msrb.mxu2 %v2452_v6  ;;  %2540 = vmatpush.bf16.msrb.mxu3 %v2453_v12  ;;  %v11442_v6 = vld [vmem:[#allocation3 + $0x28] sm:$0xf] }
 0x35c   : > { %v9840_v12 = vor.u32 %v11442_v6, %v9837_v25 }
 0x35e   : > { %2492 = vmatmul.bf16.vlgmr.msrb.gmra.mxu2 %v11424_v52  ;;  %2541 = vmatmul.bf16.vlgmr.msrb.gmra.mxu3 %v11424_v52  ;;  %v9827_v52 = vld [vmem:[#allocation3 + $0x4] sm:$0xf] }
 0x35f   : > { %2969 = vmatpush.bf16.msra.mxu2 %v9884_v58  ;;  %3018 = vmatpush.bf16.msra.mxu3 %v9888_v27  ;;  %v11441_v58 = vld [vmem:[#allocation3 + $0x10] sm:$0xf0]  ;;  %v9829_v27 = vld [vmem:[#allocation3 + $0x14] sm:$0xf0] }
 0x360   : > { %3808 = vperm.xlu2 %11877, %v3786_v3   ;;  %3603 = vrot.lane.b32.xlu1 %v9996_v36, %s16704_s26  ;;  %v13514_v7 = vpop.permute.xlu1 %2670  ;;  %v9832_v41 = vor.u32 %v11440_v10, %v9829_v27 }
 0x361   : > { %3595 = vrot.lane.b32.xlu0 %v9980_v34, %s16704_s26  ;;  %v13516_v40 = vpop.permute.xlu0 %2668 }
 0x362   : > { %v2690_v31 = vsel %vm972_vm4, %v13460_v62, %v13516_v40 }
 0x363   : > { %2970 = vmatpush.bf16.msra.mxu2 %v9876_v28  ;;  %3019 = vmatpush.bf16.msra.mxu3 %v9880_v9  ;;  %v11426_v9 = vld [vmem:[%s16687_s4 + $0x50] sm:$0xff] }
 0x367   : > { %2971 = vmatpush.bf16.msra.mxu2 %v9868_v19  ;;  %3020 = vmatpush.bf16.msra.mxu3 %v9872_v47  ;;  %v10028_v19 = vor.u32 %v11485_v48, %v10025_v37 }
 0x368   : > { %3328 = vrot.lane.b32.xlu1 %v9996_v36, %s16706_s20  ;;  %v13522_v20 = vpop.permute.xlu1 %2664  ;;  %v9828_v36 = vor.u32 %v11441_v58, %v9827_v52  ;;  %v11393_v58 = vld [vmem:[%s16687_s4 + $0x8] sm:$0xff]  ;;  %v3797_v52 = vld [vmem:[%s16688_s5 + $0x60] sm:$0xff] }
 0x369   : > { %3320 = vrot.lane.b32.xlu0 %v9980_v34, %s16706_s20  ;;  %v13524_v60 = vpop.permute.xlu0 %2662  ;;  %v13535_v34 = vpop.permute.xlu2 %2630 }
 0x36a   : > { %v2688_v29 = vsel %vm972_vm4, %v13478_v14, %v13524_v60  ;;  %v2689_v62 = vsel %vm972_vm4, %v13524_v60, %v13522_v20  ;;  %v11427_v20 = vld [vmem:[%s16687_s4 + $0x58] sm:$0xff] }
 0x36b   : > { %2972 = vmatpush.bf16.msra.mxu2 %v9860_v50  ;;  %3021 = vmatpush.bf16.msra.mxu3 %v9864_v15  ;;  %v9959_v50 = vld [vmem:[#allocation3 + $0x2c] sm:$0xf] }
 0x36c   : > { %v9960_v56 = vor.u32 %v11469_v63, %v9959_v50 }
 0x36e   : > { %2497 = vmatmul.bf16.gmra.mxu2 %v11425_v59  ;;  %2546 = vmatmul.bf16.gmra.mxu3 %v11425_v59 }
 0x36f   : > { %2973 = vmatpush.bf16.msra.mxu2 %v9852_v53  ;;  %3022 = vmatpush.bf16.msra.mxu3 %v9856_v61 }
 0x370   : > { %3597 = vrot.lane.b32.xlu1 %v9984_v8, %s16704_s26  ;;  %v2659_v43 = vpop.permute.xlu1 %2658 }
 0x371   : > { %3589 = vrot.lane.b32.xlu0 %v9968_v13, %s16704_s26  ;;  %v2657_v0 = vpop.permute.xlu0 %2656  ;;  %v13557_v46 = vpop.permute.xlu2 %3611 }
 0x373   : > { %2974 = vmatpush.bf16.msra.mxu2 %v9844_v17  ;;  %3023 = vmatpush.bf16.msra.mxu3 %v9848_v51  ;;  %v11428_v17 = vld [vmem:[%s16687_s4 + $0x60] sm:$0xff]  ;;  %v9941_v51 = vld [vmem:[#allocation3 + $0x14] sm:$0xf0] }
 0x377   : > { %2975 = vmatpush.bf16.msra.mxu2 %v9836_v55  ;;  %3024 = vmatpush.bf16.msra.mxu3 %v9840_v12  ;;  %v11429_v12 = vld [vmem:[%s16687_s4 + $0x68] sm:$0xff] }
 0x378   : > { %3322 = vrot.lane.b32.xlu1 %v9984_v8, %s16706_s20  ;;  %v2677_v3 = vpop.permute.xlu1 %2676 }
 0x379   : > { %3314 = vrot.lane.b32.xlu0 %v9968_v13, %s16706_s20  ;;  %v2675_v2 = vpop.permute.xlu0 %2674  ;;  %v13570_v60 = vpop.permute.xlu2 %3336 }
 0x37a   : > { %v2692_v28 = vsel %vm972_vm4, %v13450_v35, %v2675_v2  ;;  %v2693_v33 = vsel %vm972_vm4, %v2675_v2, %v2677_v3  ;;  %v2691_v35 = vsel %vm972_vm4, %v13516_v40, %v13514_v7  ;;  %v2686_v7 = vsel %vm972_vm4, %v13491_v45, %v2657_v0  ;;  %v3796_v3 = vld [vmem:[%s16688_s5 + $0x58] sm:$0xff] }
 0x37b   : > { %2976 = vmatpush.bf16.msra.mxu2 %v9828_v36  ;;  %3025 = vmatpush.bf16.msra.mxu3 %v9832_v41  ;;  %v2687_v40 = vsel %vm972_vm4, %v2657_v0, %v2659_v43  ;;  %v3800_v36 = vld [vmem:[%s16688_s5 + $0x78] sm:$0xff] }
 0x37c   : > { %2710 = vmatpush.bf16.msrb.mxu0 %v2692_v28  ;;  %2759 = vmatpush.bf16.msrb.mxu1 %v2693_v33  ;;  %v11430_v28 = vld [vmem:[%s16687_s4 + $0x70] sm:$0xff] }
 0x37d   : > { %v11394_v33 = vld [vmem:[%s16687_s4 + $0x10] sm:$0xff] }
 0x37e   : > { %2502 = vmatmul.bf16.gmra.mxu2 %v11426_v9  ;;  %2551 = vmatmul.bf16.gmra.mxu3 %v11426_v9  ;;  %v3791_v9 = vld [vmem:[%s16688_s5 + $0x30] sm:$0xff] }
 0x380   : > { %3591 = vrot.lane.b32.xlu1 %v9972_v26, %s16704_s26  ;;  %2711 = vmatpush.bf16.msrb.mxu0 %v2690_v31  ;;  %v2653_v47 = vpop.permute.xlu1 %2652  ;;  %v3790_v31 = vld [vmem:[%s16688_s5 + $0x28] sm:$0xff] }
 0x381   : > { %3619 = vrot.lane.b32.xlu0 %v10028_v19, %s16704_s26  ;;  %2760 = vmatpush.bf16.msrb.mxu1 %v2691_v35  ;;  %v2651_v44 = vpop.permute.xlu0 %2650  ;;  %v3789_v35 = vld [vmem:[%s16688_s5 + $0x20] sm:$0xff] }
 0x382   : > { %v2684_v23 = vsel %vm972_vm4, %v13507_v30, %v2651_v44  ;;  %v2685_v45 = vsel %vm972_vm4, %v2651_v44, %v2653_v47 }
 0x384   : > { %2712 = vmatpush.bf16.msrb.mxu0 %v2688_v29 }
 0x385   : > { %2761 = vmatpush.bf16.msrb.mxu1 %v2689_v62  ;;  %v11431_v62 = vld [vmem:[%s16687_s4 + $0x78] sm:$0xff] }
 0x388   : > { %3316 = vrot.lane.b32.xlu1 %v9972_v26, %s16706_s20  ;;  %2713 = vmatpush.bf16.msrb.mxu0 %v2686_v7  ;;  %v2647_v14 = vpop.permute.xlu1 %2646  ;;  %v3794_v26 = vld [vmem:[%s16688_s5 + $0x48] sm:$0xff]  ;;  %v11395_v7 = vld [vmem:[%s16687_s4 + $0x18] sm:$0xff] }
 0x389   : > { %3344 = vrot.lane.b32.xlu0 %v10028_v19, %s16706_s20  ;;  %2762 = vmatpush.bf16.msrb.mxu1 %v2687_v40  ;;  %v2645_v15 = vpop.permute.xlu0 %2644  ;;  %v3785_v40 = vld [vmem:[%s16688_s5] sm:$0xff] }
 0x38a   : > { %v2682_v53 = vsel %vm972_vm4, %v13518_v38, %v2645_v15  ;;  %v2683_v30 = vsel %vm972_vm4, %v2645_v15, %v2647_v14  ;;  %v13581_v38 = vpop.permute.xlu2 %3605  ;;  %v3788_v14 = vld [vmem:[%s16688_s5 + $0x18] sm:$0xff] }
 0x38c   : > { %2714 = vmatpush.bf16.msrb.mxu0 %v2684_v23 }
 0x38d   : > { %2763 = vmatpush.bf16.msrb.mxu1 %v2685_v45  ;;  %v11432_v45 = vld [vmem:[%s16687_s4 + $0x80] sm:$0xff] }
 0x38e   : > { %2507 = vmatmul.bf16.gmra.mxu2 %v11427_v20  ;;  %2556 = vmatmul.bf16.gmra.mxu3 %v11427_v20 }
 0x390   : > { %3585 = vrot.lane.b32.xlu1 %v9960_v56, %s16704_s26  ;;  %2715 = vmatpush.bf16.msrb.mxu0 %v2682_v53  ;;  %v2641_v54 = vpop.permute.xlu1 %2640 }
 0x391   : > { %3583 = vrot.lane.b32.xlu0 %v9956_v49, %s16704_s26  ;;  %2764 = vmatpush.bf16.msrb.mxu1 %v2683_v30  ;;  %v2639_v59 = vpop.permute.xlu0 %2638 }
 0x392   : > { %v2680_v61 = vsel %vm972_vm4, %v13530_v39, %v2639_v59  ;;  %v2681_v8 = vsel %vm972_vm4, %v2639_v59, %v2641_v54  ;;  %v11464_v39 = vld [vmem:[#allocation3 + $0x8] sm:$0xf]  ;;  %v13599_v21 = vpop.permute.xlu2 %3330 }
 0x393   : > { %v9944_v43 = vor.u32 %v11464_v39, %v9941_v51 }
 0x394   : > { %2716 = vmatpush.bf16.msrb.mxu0 %v2680_v61 }
 0x395   : > { %2765 = vmatpush.bf16.msrb.mxu1 %v2681_v8 }
 0x398   : > { %3310 = vrot.lane.b32.xlu1 %v9960_v56, %s16706_s20  ;;  %v2635_v22 = vpop.permute.xlu1 %2634  ;;  %v11396_v56 = vld [vmem:[%s16687_s4 + $0x20] sm:$0xff] }
 0x399   : > { %3308 = vrot.lane.b32.xlu0 %v9956_v49, %s16706_s20  ;;  %v2633_v5 = vpop.permute.xlu0 %2632 }
 0x39a   : > { %v2678_v57 = vsel %vm972_vm4, %v13535_v34, %v2633_v5  ;;  %v2679_v13 = vsel %vm972_vm4, %v2633_v5, %v2635_v22  ;;  %v13613_v27 = vpop.permute.xlu2 %3599  ;;  %v11433_v5 = vld [vmem:[%s16687_s4 + $0x88] sm:$0xff] }
 0x39b   : > { %2717 = vmatpush.bf16.msrb.mxu0 %v2678_v57  ;;  %2766 = vmatpush.bf16.msrb.mxu1 %v2679_v13 }
 0x39e   : > { %2512 = vmatmul.bf16.gmra.mxu2 %v11428_v17  ;;  %2561 = vmatmul.bf16.gmra.mxu3 %v11428_v17 }
 0x39f   : > { %2718 = vmatmul.bf16.vlgmr.msrb.gmra.mxu0 %v11392_v24  ;;  %2767 = vmatmul.bf16.vlgmr.msrb.gmra.mxu1 %v11392_v24 }
 0x3a0   : > { %3579 = vrot.lane.b32.xlu1 %v9948_v42, %s16704_s26  ;;  %v13595_v25 = vpop.permute.xlu1 %3621 }
 0x3a1   : > { %3577 = vrot.lane.b32.xlu0 %v9944_v43, %s16704_s26  ;;  %v13597_v0 = vpop.permute.xlu0 %3613 }
 0x3a2   : > { %v13631_v1 = vpop.permute.xlu2 %3324  ;;  %v3635_v39 = vsel %vm1820_vm6, %v13557_v46, %v13597_v0 }
 0x3a8   : > { %3304 = vrot.lane.b32.xlu1 %v9948_v42, %s16706_s20  ;;  %v13603_v55 = vpop.permute.xlu1 %3346 }
 0x3a9   : > { %3302 = vrot.lane.b32.xlu0 %v9944_v43, %s16706_s20  ;;  %v13605_v6 = vpop.permute.xlu0 %3338 }
 0x3aa   : > { %v13649_v37 = vpop.permute.xlu2 %3593 }
 0x3ae   : > { %2517 = vmatmul.bf16.gmra.mxu2 %v11429_v12  ;;  %2566 = vmatmul.bf16.gmra.mxu3 %v11429_v12 }
 0x3af   : > { %2723 = vmatmul.bf16.gmra.mxu0 %v11393_v58  ;;  %2772 = vmatmul.bf16.gmra.mxu1 %v11393_v58 }
 0x3b0   : > { %3863 = vperm.xlu1 %11876, %v3797_v52   ;;  %v13621_v10 = vpop.permute.xlu1 %3615 }
 0x3b1   : > { %3878 = vperm.xlu0 %11875, %v3800_v36   ;;  %v13623_v41 = vpop.permute.xlu0 %3607  ;;  %v3636_v43 = vsel %vm1820_vm6, %v13597_v0, %v13621_v10  ;;  %v11398_v0 = vld [vmem:[%s16687_s4 + $0x30] sm:$0xff] }
 0x3b2   : > { %v13665_v29 = vpop.permute.xlu2 %3318  ;;  %v3633_v10 = vsel %vm1820_vm6, %v13581_v38, %v13623_v41 }
 0x3b8   : > { %3858 = vperm.xlu1 %11876, %v3796_v3   ;;  %v13633_v2 = vpop.permute.xlu1 %3340 }
 0x3b9   : > { %3853 = vperm.xlu0 %11875, %v3795_v32   ;;  %v13635_v34 = vpop.permute.xlu0 %3332 }
 0x3ba   : > { %v13683_v15 = vpop.permute.xlu2 %3587 }
 0x3be   : > { %2522 = vmatmul.bf16.gmra.mxu2 %v11430_v28  ;;  %2571 = vmatmul.bf16.gmra.mxu3 %v11430_v28 }
 0x3bf   : > { %2728 = vmatmul.bf16.gmra.mxu0 %v11394_v33  ;;  %2777 = vmatmul.bf16.gmra.mxu1 %v11394_v33  ;;  %v3361_v33 = vsel %vm1558_vm5, %v13605_v6, %v13633_v2 }
 0x3c0   : > { %3833 = vperm.xlu1 %11876, %v3791_v9   ;;  %v13651_v48 = vpop.permute.xlu1 %3609 }
 0x3c1   : > { %3848 = vperm.xlu0 %11875, %v3794_v26   ;;  %v13653_v19 = vpop.permute.xlu0 %3601  ;;  %v3634_v32 = vsel %vm1820_vm6, %v13623_v41, %v13651_v48 }
 0x3c2   : > { %v13695_v16 = vpop.permute.xlu2 %3312  ;;  %v3631_v38 = vsel %vm1820_vm6, %v13613_v27, %v13653_v19 }
 0x3c8   : > { %3828 = vperm.xlu1 %11876, %v3790_v31   ;;  %v13661_v47 = vpop.permute.xlu1 %3334 }
 0x3c9   : > { %3823 = vperm.xlu0 %11875, %v3789_v35   ;;  %v13663_v44 = vpop.permute.xlu0 %3326  ;;  %v3359_v27 = vsel %vm1558_vm5, %v13635_v34, %v13661_v47 }
 0x3ca   : > { %v3618_v54 = vpop.permute.xlu2 %3617 }
 0x3ce   : > { %2527 = vmatmul.bf16.gmra.mxu2 %v11431_v62  ;;  %2576 = vmatmul.bf16.gmra.mxu3 %v11431_v62 }
 0x3cf   : > { %2733 = vmatmul.bf16.gmra.mxu0 %v11395_v7  ;;  %2782 = vmatmul.bf16.gmra.mxu1 %v11395_v7 }
 0x3d0   : > { %3803 = vperm.xlu1 %11876, %v3785_v40  }
 0x3d1   : > { %3818 = vperm.xlu0 %11875, %v3788_v14  }
 0x3d2   : > { %v13679_v50 = vpop.permute.xlu1 %3603  ;;  %v3343_v24 = vpop.permute.xlu2 %3342 }
 0x3d3   : > { %v13681_v63 = vpop.permute.xlu0 %3595  ;;  %v3632_v41 = vsel %vm1820_vm6, %v13653_v19, %v13679_v50  ;;  %v11399_v50 = vld [vmem:[%s16687_s4 + $0x38] sm:$0xff] }
 0x3d4   : > { %v3629_v2 = vsel %vm1820_vm6, %v13649_v37, %v13681_v63 }
 0x3da   : > { %v13685_v23 = vpop.permute.xlu1 %3328  ;;  %v3582_v28 = vpop.permute.xlu2 %3581 }
 0x3db   : > { %v13687_v20 = vpop.permute.xlu0 %3320 }
 0x3dc   : > { %v3354_v40 = vsel %vm1558_vm5, %v13665_v29, %v13687_v20 }
 0x3de   : > { %2977 = vmatmul.bf16.vlgmr.msra.gmra.mxu2 %v11432_v45  ;;  %3026 = vmatmul.bf16.vlgmr.msra.gmra.mxu3 %v11432_v45 }
 0x3df   : > { %2738 = vmatmul.bf16.gmra.mxu0 %v11396_v56  ;;  %2787 = vmatmul.bf16.gmra.mxu1 %v11396_v56 }
 0x3e1   : > { %v13699_v49 = vpop.f32.mrf.mxu2  ;;  %v13701_v53 = vpop.f32.mrf.mxu3 }
 0x3e2   : > { %v13697_v11 = vpop.permute.xlu1 %3597  ;;  %v3307_v31 = vpop.permute.xlu2 %3306 }
 0x3e3   : > { %v13703_v30 = vpop.permute.xlu0 %3589  ;;  %v3630_v19 = vsel %vm1820_vm6, %v13681_v63, %v13697_v11 }
 0x3e4   : > { %v3627_v37 = vsel %vm1820_vm6, %v13683_v15, %v13703_v30 }
 0x3e9   : > { %v13707_v61 = vpop.f32.mrf.mxu2  ;;  %v13709_v8 = vpop.f32.mrf.mxu3 }
 0x3ea   : > { %v13705_v59 = vpop.permute.xlu1 %3322 }
 0x3eb   : > { %v13711_v22 = vpop.permute.xlu0 %3314  ;;  %v3355_v14 = vsel %vm1558_vm5, %v13687_v20, %v13705_v59  ;;  %v3576_v20 = vpop.permute.xlu2 %3575 }
 0x3ec   : > { %v3352_v29 = vsel %vm1558_vm5, %v13695_v16, %v13711_v22 }
 0x3ee   : > { %2982 = vmatmul.bf16.gmra.mxu2 %v11433_v5  ;;  %3031 = vmatmul.bf16.gmra.mxu3 %v11433_v5 }
 0x3ef   : > { %2743 = vmatmul.bf16.gmra.mxu0 %v11397_v18  ;;  %2792 = vmatmul.bf16.gmra.mxu1 %v11397_v18 }
 0x3f1   : > { %v13719_v57 = vpop.f32.mrf.mxu2  ;;  %v13721_v13 = vpop.f32.mrf.mxu3 }
 0x3f2   : > { %v3592_v4 = vpop.permute.xlu1 %3591 }
 0x3f3   : > { %v3620_v17 = vpop.permute.xlu0 %3619  ;;  %v3628_v35 = vsel %vm1820_vm6, %v13703_v30, %v3592_v4 }
 0x3f4   : > { %v3637_v51 = vsel %vm1820_vm6, %v3618_v54, %v3620_v17  ;;  %v3638_v42 = vsel %vm1820_vm6, %v3620_v17, %v13595_v25  ;;  %v11434_v25 = vld [vmem:[%s16687_s4 + $0x90] sm:$0xff]  ;;  %v11436_v17 = vld [vmem:[%s16687_s4 + $0xa0] sm:$0xff] }
 0x3f5   : > { %3655 = vmatpush.bf16.msrb.mxu2 %v3637_v51  ;;  %3704 = vmatpush.bf16.msrb.mxu3 %v3638_v42 }
 0x3f9   : > { %3656 = vmatpush.bf16.msrb.mxu2 %v3635_v39  ;;  %3705 = vmatpush.bf16.msrb.mxu3 %v3636_v43  ;;  %v13734_v58 = vpop.f32.mrf.mxu2  ;;  %v13736_v52 = vpop.f32.mrf.mxu3 }
 0x3fa   : > { %v13732_v12 = vpop.permute.xlu1 %3316 }
 0x3fb   : > { %v3345_v36 = vpop.permute.xlu0 %3344 }
 0x3fc   : > { %v3362_v3 = vsel %vm1558_vm5, %v3343_v24, %v3345_v36  ;;  %v3363_v46 = vsel %vm1558_vm5, %v3345_v36, %v13603_v55  ;;  %v3360_v55 = vsel %vm1558_vm5, %v13570_v60, %v13605_v6  ;;  %v3358_v6 = vsel %vm1558_vm5, %v13599_v21, %v13635_v34  ;;  %v3301_v24 = vpop.permute.xlu2 %3300  ;;  %v11456_v36 = vld [vmem:[%s16687_s4 + $0xc0] sm:$0xff] }
 0x3fd   : > { %3380 = vmatpush.bf16.msra.mxu0 %v3362_v3  ;;  %3429 = vmatpush.bf16.msra.mxu1 %v3363_v46  ;;  %v3356_v21 = vsel %vm1558_vm5, %v13631_v1, %v13663_v44  ;;  %v3357_v34 = vsel %vm1558_vm5, %v13663_v44, %v13685_v23  ;;  %v11435_v44 = vld [vmem:[%s16687_s4 + $0x98] sm:$0xff]  ;;  %v3353_v23 = vsel %vm1558_vm5, %v13711_v22, %v13732_v12 }
 0x3fe   : > { %3657 = vmatpush.bf16.msrb.mxu2 %v3633_v10  ;;  %3706 = vmatpush.bf16.msrb.mxu3 %v3634_v32 }
 0x3ff   : > { %2987 = vmatmul.bf16.gmra.mxu2 %v11434_v25  ;;  %3036 = vmatmul.bf16.gmra.mxu3 %v11434_v25 }
 0x400   : > { %2748 = vmatmul.bf16.gmra.mxu0 %v11398_v0  ;;  %2797 = vmatmul.bf16.gmra.mxu1 %v11398_v0 }
 0x401   : > { %3381 = vmatpush.bf16.msra.mxu0 %v3360_v55  ;;  %3430 = vmatpush.bf16.msra.mxu1 %v3361_v33  ;;  %v13765_v26 = vpop.f32.mrf.mxu2  ;;  %v13767_v60 = vpop.f32.mrf.mxu3  ;;  %v11437_v33 = vld [vmem:[%s16687_s4 + $0xa8] sm:$0xff] }
 0x402   : > { %3658 = vmatpush.bf16.msrb.mxu2 %v3631_v38  ;;  %3707 = vmatpush.bf16.msrb.mxu3 %v3632_v41  ;;  %v3586_v9 = vpop.permute.xlu1 %3585 }
 0x403   : > { %v3584_v48 = vpop.permute.xlu0 %3583 }
 0x404   : > { %v3625_v63 = vsel %vm1820_vm6, %v3582_v28, %v3584_v48  ;;  %v3626_v15 = vsel %vm1820_vm6, %v3584_v48, %v3586_v9  ;;  %v11457_v9 = vld [vmem:[%s16687_s4 + $0xc8] sm:$0xff] }
 0x405   : > { %3382 = vmatpush.bf16.msra.mxu0 %v3358_v6  ;;  %3431 = vmatpush.bf16.msra.mxu1 %v3359_v27 }
 0x406   : > { %3659 = vmatpush.bf16.msrb.mxu2 %v3629_v2  ;;  %3708 = vmatpush.bf16.msrb.mxu3 %v3630_v19 }
 0x409   : > { %3383 = vmatpush.bf16.msra.mxu0 %v3356_v21  ;;  %3432 = vmatpush.bf16.msra.mxu1 %v3357_v34  ;;  %v13792_v62 = vpop.f32.mrf.mxu2  ;;  %v13794_v7 = vpop.f32.mrf.mxu3  ;;  %v11438_v21 = vld [vmem:[%s16687_s4 + $0xb0] sm:$0xff] }
 0x40a   : > { %3660 = vmatpush.bf16.msrb.mxu2 %v3627_v37  ;;  %3709 = vmatpush.bf16.msrb.mxu3 %v3628_v35  ;;  %v3311_v47 = vpop.permute.xlu1 %3310  ;;  %v11458_v35 = vld [vmem:[%s16687_s4 + $0xd0] sm:$0xff] }
 0x40b   : > { %v3309_v1 = vpop.permute.xlu0 %3308 }
 0x40c   : > { %v3350_v54 = vsel %vm1558_vm5, %v3307_v31, %v3309_v1  ;;  %v3351_v59 = vsel %vm1558_vm5, %v3309_v1, %v3311_v47 }
 0x40d   : > { %3384 = vmatpush.bf16.msra.mxu0 %v3354_v40  ;;  %3433 = vmatpush.bf16.msra.mxu1 %v3355_v14 }
 0x40e   : > { %3661 = vmatpush.bf16.msrb.mxu2 %v3625_v63  ;;  %3710 = vmatpush.bf16.msrb.mxu3 %v3626_v15  ;;  %v11439_v63 = vld [vmem:[%s16687_s4 + $0xb8] sm:$0xff] }
 0x40f   : > { %2992 = vmatmul.bf16.gmra.mxu2 %v11435_v44  ;;  %3041 = vmatmul.bf16.gmra.mxu3 %v11435_v44 }
 0x410   : > { %2753 = vmatmul.bf16.gmra.mxu0 %v11399_v50  ;;  %2802 = vmatmul.bf16.gmra.mxu1 %v11399_v50 }
 0x411   : > { %3385 = vmatpush.bf16.msra.mxu0 %v3352_v29  ;;  %3434 = vmatpush.bf16.msra.mxu1 %v3353_v23  ;;  %v13816_v45 = vpop.f32.mrf.mxu2  ;;  %v13818_v11 = vpop.f32.mrf.mxu3  ;;  %v11459_v23 = vld [vmem:[%s16687_s4 + $0xd8] sm:$0xff] }
 0x412   : > { %v3580_v56 = vpop.permute.xlu1 %3579 }
 0x413   : > { %v3578_v30 = vpop.permute.xlu0 %3577 }
 0x414   : > { %v3623_v16 = vsel %vm1820_vm6, %v3576_v20, %v3578_v30  ;;  %v3624_v5 = vsel %vm1820_vm6, %v3578_v30, %v3580_v56 }
 0x415   : > { %3386 = vmatpush.bf16.msra.mxu0 %v3350_v54  ;;  %3435 = vmatpush.bf16.msra.mxu1 %v3351_v59 }
 0x416   : > { %3662 = vmatpush.bf16.msrb.mxu2 %v3623_v16  ;;  %3711 = vmatpush.bf16.msrb.mxu3 %v3624_v5  ;;  %v11488_v5 = vld [vmem:[%s16687_s4 + $0x100] sm:$0xff] }
 0x419   : > { %v13824_v22 = vpop.f32.mrf.mxu2  ;;  %v13826_v4 = vpop.f32.mrf.mxu3 }
 0x41a   : > { %v3305_v18 = vpop.permute.xlu1 %3304 }
 0x41b   : > { %v3303_v51 = vpop.permute.xlu0 %3302 }
 0x41c   : > { %v2719_v42 = vpop.f32.mrf.mxu0  ;;  %v2768_v39 = vpop.f32.mrf.mxu1  ;;  %v3348_v43 = vsel %vm1558_vm5, %v3301_v24, %v3303_v51  ;;  %v3349_v12 = vsel %vm1558_vm5, %v3303_v51, %v3305_v18  ;;  %v11460_v24 = vld [vmem:[%s16687_s4 + $0xe0] sm:$0xff] }
 0x41d   : > { %v13837_v25 = vadd.f32 %v2719_v42, %v13699_v49  ;;  %v13840_v3 = vadd.f32 %v2768_v39, %v13701_v53  ;;  %3387 = vmatpush.bf16.msra.mxu0 %v3348_v43  ;;  %3436 = vmatpush.bf16.msra.mxu1 %v3349_v12 }
 0x41f   : > { %2997 = vmatmul.bf16.gmra.mxu2 %v11436_v17  ;;  %3046 = vmatmul.bf16.gmra.mxu3 %v11436_v17 }
 0x420   : > { %3388 = vmatmul.bf16.vlgmr.msra.gmra.mxu0 %v11456_v36  ;;  %3437 = vmatmul.bf16.vlgmr.msra.gmra.mxu1 %v11456_v36 }
 0x421   : > { %v13842_v46 = vpop.f32.mrf.mxu2  ;;  %v13844_v0 = vpop.f32.mrf.mxu3 }
 0x424   : > { %v2721_v10 = vpop.f32.mrf.mxu0  ;;  %v2770_v32 = vpop.f32.mrf.mxu1 }
 0x425   : > { %v13847_v28 = vadd.f32 %v2721_v10, %v13707_v61  ;;  %v13850_v49 = vadd.f32 %v2770_v32, %v13709_v8  ;;  %v11489_v32 = vld [vmem:[%s16687_s4 + $0x108] sm:$0xff] }
 0x429   : > { %v13852_v53 = vpop.f32.mrf.mxu2  ;;  %v13854_v55 = vpop.f32.mrf.mxu3 }
 0x42c   : > { %v2724_v38 = vpop.f32.mrf.mxu0  ;;  %v2773_v41 = vpop.f32.mrf.mxu1 }
 0x42d   : > { %v13863_v61 = vadd.f32 %v2724_v38, %v13719_v57  ;;  %v13866_v8 = vadd.f32 %v2773_v41, %v13721_v13 }
 0x42f   : > { %3002 = vmatmul.bf16.gmra.mxu2 %v11437_v33  ;;  %3051 = vmatmul.bf16.gmra.mxu3 %v11437_v33 }
 0x430   : > { %3393 = vmatmul.bf16.gmra.mxu0 %v11457_v9  ;;  %3442 = vmatmul.bf16.gmra.mxu1 %v11457_v9 }
 0x431   : > { %v13868_v48 = vpop.f32.mrf.mxu2  ;;  %v13870_v6 = vpop.f32.mrf.mxu3 }
 0x434   : > { %v2726_v27 = vpop.f32.mrf.mxu0  ;;  %v2775_v2 = vpop.f32.mrf.mxu1 }
 0x435   : > { %v13873_v19 = vadd.f32 %v2726_v27, %v13734_v58  ;;  %v13876_v31 = vadd.f32 %v2775_v2, %v13736_v52 }
 0x439   : > { %v13878_v57 = vpop.f32.mrf.mxu2  ;;  %v13880_v13 = vpop.f32.mrf.mxu3 }
 0x43c   : > { %v2729_v34 = vpop.f32.mrf.mxu0  ;;  %v2778_v37 = vpop.f32.mrf.mxu1 }
 0x43d   : > { %v13889_v58 = vadd.f32 %v2729_v34, %v13765_v26  ;;  %v13892_v52 = vadd.f32 %v2778_v37, %v13767_v60 }
 0x43f   : > { %3007 = vmatmul.bf16.gmra.mxu2 %v11438_v21  ;;  %3056 = vmatmul.bf16.gmra.mxu3 %v11438_v21 }
 0x440   : > { %3398 = vmatmul.bf16.gmra.mxu0 %v11458_v35  ;;  %3447 = vmatmul.bf16.gmra.mxu1 %v11458_v35  ;;  %v11490_v35 = vld [vmem:[%s16687_s4 + $0x110] sm:$0xff] }
 0x441   : > { %v13894_v47 = vpop.f32.mrf.mxu2  ;;  %v13896_v1 = vpop.f32.mrf.mxu3 }
 0x444   : > { %v2731_v44 = vpop.f32.mrf.mxu0  ;;  %v2780_v40 = vpop.f32.mrf.mxu1 }
 0x445   : > { %v13899_v14 = vadd.f32 %v2731_v44, %v13792_v62  ;;  %v13902_v50 = vadd.f32 %v2780_v40, %v13794_v7 }
 0x449   : > { %v13904_v26 = vpop.f32.mrf.mxu2  ;;  %v13906_v60 = vpop.f32.mrf.mxu3 }
 0x44a   : > { %16780 = vst [vmem:[#allocation26_spill] sm:$0xff] %v13904_v26 }
 0x44b   : > { %16781 = vst [vmem:[#allocation30_spill] sm:$0xff] %v13906_v60 }
 0x44c   : > { %v2734_v15 = vpop.f32.mrf.mxu0  ;;  %v2783_v29 = vpop.f32.mrf.mxu1 }
 0x44d   : > { %v13915_v62 = vadd.f32 %v2734_v15, %v13816_v45  ;;  %v13918_v7 = vadd.f32 %v2783_v29, %v13818_v11 }
 0x44f   : > { %3012 = vmatmul.bf16.gmra.mxu2 %v11439_v63  ;;  %3061 = vmatmul.bf16.gmra.mxu3 %v11439_v63 }
 0x450   : > { %3403 = vmatmul.bf16.gmra.mxu0 %v11459_v23  ;;  %3452 = vmatmul.bf16.gmra.mxu1 %v11459_v23 }
 0x451   : > { %v13920_v20 = vpop.f32.mrf.mxu2  ;;  %v13922_v56 = vpop.f32.mrf.mxu3 }
 0x454   : > { %v2736_v30 = vpop.f32.mrf.mxu0  ;;  %v2785_v54 = vpop.f32.mrf.mxu1 }
 0x455   : > { %v13925_v59 = vadd.f32 %v2736_v30, %v13824_v22  ;;  %v13928_v16 = vadd.f32 %v2785_v54, %v13826_v4 }
 0x459   : > { %v13930_v45 = vpop.f32.mrf.mxu2  ;;  %v13932_v11 = vpop.f32.mrf.mxu3 }
 0x45a   : > { %16782 = vst [vmem:[#allocation28_spill] sm:$0xff] %v13930_v45 }
 0x45b   : > { %16783 = vst [vmem:[#allocation29_spill] sm:$0xff] %v13932_v11 }
 0x45c   : > { %v2739_v18 = vpop.f32.mrf.mxu0  ;;  %v2788_v17 = vpop.f32.mrf.mxu1 }
 0x45d   : > { %v13941_v22 = vadd.f32 %v2739_v18, %v13842_v46  ;;  %v13944_v4 = vadd.f32 %v2788_v17, %v13844_v0  ;;  %v11491_v18 = vld [vmem:[%s16687_s4 + $0x118] sm:$0xff] }
 0x45f   : > { %3663 = vmatmul.bf16.vlgmr.msrb.gmra.mxu2 %v11488_v5  ;;  %3712 = vmatmul.bf16.vlgmr.msrb.gmra.mxu3 %v11488_v5 }
 0x460   : > { %3408 = vmatmul.bf16.gmra.mxu0 %v11460_v24  ;;  %3457 = vmatmul.bf16.gmra.mxu1 %v11460_v24 }
 0x461   : > { %v2978_v51 = vpop.f32.mrf.mxu2  ;;  %v3027_v39 = vpop.f32.mrf.mxu3 }
 0x462   : > { %v13947_v42 = vadd.f32 %v2978_v51, %v13837_v25  ;;  %v13950_v43 = vadd.f32 %v3027_v39, %v13840_v3  ;;  %v11461_v3 = vld [vmem:[%s16687_s4 + $0xe8] sm:$0xff] }
 0x464   : > { %v13952_v12 = vpop.f32.mrf.mxu0  ;;  %v13954_v36 = vpop.f32.mrf.mxu1 }
 0x469   : > { %v2980_v46 = vpop.f32.mrf.mxu2  ;;  %v3029_v10 = vpop.f32.mrf.mxu3 }
 0x46a   : > { %v13957_v0 = vadd.f32 %v2980_v46, %v13847_v28  ;;  %v13963_v25 = vadd.f32 %v3029_v10, %v13850_v49 }
 0x46c   : > { %v2744_v33 = vpop.f32.mrf.mxu0  ;;  %v2793_v38 = vpop.f32.mrf.mxu1 }
 0x46d   : > { %v13969_v41 = vadd.f32 %v2744_v33, %v13868_v48  ;;  %v13972_v28 = vadd.f32 %v2793_v38, %v13870_v6 }
 0x46f   : > { %3668 = vmatmul.bf16.gmra.mxu2 %v11489_v32  ;;  %3717 = vmatmul.bf16.gmra.mxu3 %v11489_v32 }
 0x470   : > { %3413 = vmatmul.bf16.gmra.mxu0 %v11461_v3  ;;  %3462 = vmatmul.bf16.gmra.mxu1 %v11461_v3 }
 0x471   : > { %v2983_v9 = vpop.f32.mrf.mxu2  ;;  %v3032_v27 = vpop.f32.mrf.mxu3 }
 0x472   : > { %v13975_v49 = vadd.f32 %v2983_v9, %v13863_v61  ;;  %v13978_v2 = vadd.f32 %v3032_v27, %v13866_v8  ;;  %v11462_v8 = vld [vmem:[%s16687_s4 + $0xf0] sm:$0xff] }
 0x474   : > { %v13980_v21 = vpop.f32.mrf.mxu0  ;;  %v13982_v34 = vpop.f32.mrf.mxu1 }
 0x479   : > { %v2985_v48 = vpop.f32.mrf.mxu2  ;;  %v3034_v37 = vpop.f32.mrf.mxu3 }
 0x47a   : > { %v13985_v6 = vadd.f32 %v2985_v48, %v13873_v19  ;;  %v13991_v61 = vadd.f32 %v3034_v37, %v13876_v31  ;;  %v11493_v48 = vld [vmem:[%s16687_s4 + $0x128] sm:$0xff] }
 0x47d   : > { %v2749_v44 = vpop.f32.mrf.mxu0  ;;  %v2798_v40 = vpop.f32.mrf.mxu1 }
 0x47e   : > { %v13997_v63 = vadd.f32 %v2749_v44, %v13894_v47  ;;  %v14000_v19 = vadd.f32 %v2798_v40, %v13896_v1  ;;  %v14068_v40 = vpop.permute.xlu2 %3873 }
 0x47f   : > { %3673 = vmatmul.bf16.gmra.mxu2 %v11490_v35  ;;  %3722 = vmatmul.bf16.gmra.mxu3 %v11490_v35  ;;  %16788 = vst [vmem:[#allocation21_spill] sm:$0xff] %v14068_v40 }
 0x480   : > { %3418 = vmatmul.bf16.gmra.mxu0 %v11462_v8  ;;  %3467 = vmatmul.bf16.gmra.mxu1 %v11462_v8 }
 0x482   : > { %v2988_v15 = vpop.f32.mrf.mxu2  ;;  %v3037_v29 = vpop.f32.mrf.mxu3 }
 0x483   : > { %v14003_v31 = vadd.f32 %v2988_v15, %v13889_v58  ;;  %v14006_v23 = vadd.f32 %v3037_v29, %v13892_v52  ;;  %v11463_v52 = vld [vmem:[%s16687_s4 + $0xf8] sm:$0xff]  ;;  %v11494_v29 = vld [vmem:[%s16687_s4 + $0x130] sm:$0xff] }
 0x485   : > { %v14008_v30 = vpop.f32.mrf.mxu0  ;;  %v14010_v54 = vpop.f32.mrf.mxu1 }
 0x486   : > { %16784 = vst [vmem:[#allocation16_spill] sm:$0xff] %v14008_v30 }
 0x487   : > { %16785 = vst [vmem:[#allocation20_spill] sm:$0xff] %v14010_v54 }
 0x48a   : > { %v2990_v47 = vpop.f32.mrf.mxu2  ;;  %v3039_v5 = vpop.f32.mrf.mxu3 }
 0x48b   : > { %v14013_v1 = vadd.f32 %v2990_v47, %v13899_v14  ;;  %v14019_v58 = vadd.f32 %v3039_v5, %v13902_v50  ;;  %v11526_v47 = vld [vmem:[#allocation2 + $0xec] sm:$0xf0] }
 0x48d   : > { %v2754_v17 = vpop.f32.mrf.mxu0  ;;  %v2803_v24 = vpop.f32.mrf.mxu1 }
 0x48e   : > { %v14025_v51 = vadd.f32 %v2754_v17, %v13920_v20  ;;  %v14028_v14 = vadd.f32 %v2803_v24, %v13922_v56  ;;  %v11492_v56 = vld [vmem:[%s16687_s4 + $0x120] sm:$0xff] }
 0x48f   : > { %3678 = vmatmul.bf16.gmra.mxu2 %v11491_v18  ;;  %3727 = vmatmul.bf16.gmra.mxu3 %v11491_v18 }
 0x490   : > { %3423 = vmatmul.bf16.gmra.mxu0 %v11463_v52  ;;  %3472 = vmatmul.bf16.gmra.mxu1 %v11463_v52 }
 0x492   : > { %v2993_v39 = vpop.f32.mrf.mxu2  ;;  %v3042_v46 = vpop.f32.mrf.mxu3 }
 0x493   : > { %v14031_v50 = vadd.f32 %v2993_v39, %v13915_v62  ;;  %v14034_v10 = vadd.f32 %v3042_v46, %v13918_v7  ;;  %v14086_v46 = vpop.permute.xlu2 %3868 }
 0x494   : > { %16793 = vst [vmem:[#allocation35_spill] sm:$0xff] %v14086_v46  ;;  %v10163_v46 = vld [vmem:[#allocation2 + $0x80] sm:$0xf] }
 0x495   : > { %v14066_v44 = vpop.f32.mrf.mxu1 }
 0x496   : > { %16787 = vst [vmem:[#allocation17_spill] sm:$0xff] %v14066_v44 }
 0x49a   : > { %v2995_v32 = vpop.f32.mrf.mxu2  ;;  %v3044_v20 = vpop.f32.mrf.mxu3 }
 0x49b   : > { %v14037_v33 = vadd.f32 %v2995_v32, %v13925_v59  ;;  %v14043_v38 = vadd.f32 %v3044_v20, %v13928_v16 }
 0x49d   : > { %v3438_v17 = vpop.f32.mrf.mxu1 }
 0x49e   : > { %v3479_v60 = vadd.f32 %v3438_v17, %v13950_v43  ;;  %v11511_v17 = vld [vmem:[#allocation2 + $0x4c] sm:$0xf0] }
 0x49f   : > { %3683 = vmatmul.bf16.gmra.mxu2 %v11492_v56  ;;  %3732 = vmatmul.bf16.gmra.mxu3 %v11492_v56  ;;  %v10187_v56 = vld [vmem:[#allocation2 + $0xc0] sm:$0xf] }
 0x4a2   : > { %v2998_v62 = vpop.f32.mrf.mxu2  ;;  %v3047_v7 = vpop.f32.mrf.mxu3 }
 0x4a3   : > { %v14046_v3 = vadd.f32 %v2998_v62, %v13941_v22  ;;  %v14049_v9 = vadd.f32 %v3047_v7, %v13944_v4  ;;  %v14064_v4 = vpop.f32.mrf.mxu0  ;;  %v11523_v62 = vld [vmem:[#allocation2 + $0xcc] sm:$0xf0] }
 0x4a4   : > { %16786 = vst [vmem:[#allocation33_spill] sm:$0xff] %v14064_v4 }
 0x4aa   : > { %v14051_v59 = vpop.f32.mrf.mxu2  ;;  %v14053_v27 = vpop.f32.mrf.mxu3 }
 0x4ab   : > { %v3389_v5 = vpop.f32.mrf.mxu0 }
 0x4af   : > { %3688 = vmatmul.bf16.gmra.mxu2 %v11493_v48  ;;  %3737 = vmatmul.bf16.gmra.mxu3 %v11493_v48 }
 0x4b2   : > { %v3003_v16 = vpop.f32.mrf.mxu2  ;;  %v3052_v22 = vpop.f32.mrf.mxu3 }
 0x4b3   : > { %v14059_v37 = vadd.f32 %v3003_v16, %v13969_v41  ;;  %v14062_v35 = vadd.f32 %v3052_v22, %v13972_v28  ;;  %v14077_v41 = vpop.permute.xlu1 %3863  ;;  %v10199_v28 = vld [vmem:[#allocation2 + $0xe0] sm:$0xf]  ;;  %v3391_v7 = vpop.f32.mrf.mxu0  ;;  %v14095_v16 = vor.u32 %v11523_v62, %v10187_v56 }
 0x4b4   : > { %16791 = vst [vmem:[#allocation27_spill] sm:$0xff] %v14077_v41  ;;  %v14079_v18 = vor.u32 %v11526_v47, %v10199_v28  ;;  %v3440_v22 = vpop.f32.mrf.mxu1  ;;  %v10175_v47 = vld [vmem:[#allocation2 + $0xa0] sm:$0xf]  ;;  %v14110_v62 = vpop.permute.xlu0 %3878  ;;  %v3480_v43 = vadd.f32 %v3391_v7, %v13957_v0 }
 0x4b5   : > { %16798 = vst [vmem:[#allocation23_spill] sm:$0xff] %v14110_v62 }
 0x4b6   : > { %4236 = vrot.lane.b32.xlu0 %v14079_v18, %s16715_s23 }
 0x4ba   : > { %v14070_v8 = vpop.f32.mrf.mxu2  ;;  %v14072_v15 = vpop.f32.mrf.mxu3 }
 0x4bb   : > { %16789 = vst [vmem:[#allocation31_spill] sm:$0xff] %v14070_v8  ;;  %v14091_v20 = vpop.permute.xlu1 %3858  ;;  %v3394_v40 = vpop.f32.mrf.mxu0 }
 0x4bc   : > { %16790 = vst [vmem:[#allocation32_spill] sm:$0xff] %v14072_v15 }
 0x4bd   : > { %16795 = vst [vmem:[#allocation22_spill] sm:$0xff] %v14091_v20 }
 0x4be   : > { %4230 = vrot.lane.b32.xlu0 %v14095_v16, %s16715_s23 }
 0x4bf   : > { %3693 = vmatmul.bf16.gmra.mxu2 %v11494_v29  ;;  %3742 = vmatmul.bf16.gmra.mxu3 %v11494_v29 }
 0x4c2   : > { %v3008_v24 = vpop.f32.mrf.mxu2  ;;  %v3057_v39 = vpop.f32.mrf.mxu3 }
 0x4c3   : > { %v14084_v52 = vadd.f32 %v3008_v24, %v13997_v63  ;;  %v14089_v32 = vadd.f32 %v3057_v39, %v14000_v19  ;;  %v11495_v63 = vld [vmem:[%s16687_s4 + $0x138] sm:$0xff]  ;;  %v14104_v19 = vpop.permute.xlu2 %3843  ;;  %v14106_v28 = vpop.permute.xlu1 %3833  ;;  %v11520_v24 = vld [vmem:[#allocation2 + $0xac] sm:$0xf0] }
 0x4c4   : > { %v14108_v56 = vor.u32 %v11520_v24, %v10175_v47 }
 0x4c5   : > { %16792 = vst [vmem:[#allocation34_spill] sm:$0xff] %v14084_v52 }
 0x4c6   : > { %16794 = vst [vmem:[#allocation18_spill] sm:$0xff] %v14089_v32  ;;  %4224 = vrot.lane.b32.xlu0 %v14108_v56, %s16715_s23 }
 0x4ca   : > { %v14093_v48 = vpop.f32.mrf.mxu2  ;;  %v14097_v29 = vpop.f32.mrf.mxu3 }
 0x4cb   : > { %16796 = vst [vmem:[#allocation25_spill] sm:$0xff] %v14093_v48  ;;  %v14120_v45 = vpop.permute.xlu2 %3838  ;;  %v14122_v47 = vpop.permute.xlu1 %3828  ;;  %v11514_v48 = vld [vmem:[#allocation2 + $0x6c] sm:$0xf0] }
 0x4cc   : > { %16797 = vst [vmem:[#allocation19_spill] sm:$0xff] %v14097_v29  ;;  %v11517_v29 = vld [vmem:[#allocation2 + $0x8c] sm:$0xf0] }
 0x4cd   : > { %v14126_v62 = vor.u32 %v11517_v29, %v10163_v46 }
 0x4cf   : > { %3698 = vmatmul.bf16.gmra.mxu2 %v11495_v63  ;;  %3747 = vmatmul.bf16.gmra.mxu3 %v11495_v63  ;;  %v3443_v63 = vpop.f32.mrf.mxu1 }
 0x4d0   : > { %4218 = vrot.lane.b32.xlu0 %v14126_v62, %s16715_s23 }
 0x4d2   : > { %v3013_v39 = vpop.f32.mrf.mxu2  ;;  %v3062_v11 = vpop.f32.mrf.mxu3 }
 0x4d3   : > { %v14113_v44 = vadd.f32 %v3013_v39, %v14025_v51  ;;  %v14116_v4 = vadd.f32 %v3062_v11, %v14028_v14  ;;  %v14132_v11 = vpop.permute.xlu0 %3853  ;;  %v3396_v14 = vpop.f32.mrf.mxu0 }
 0x4d4   : > { %v3814_v54 = vpop.permute.xlu2 %3813  ;;  %v3804_v41 = vpop.permute.xlu1 %3803 }
 0x4d5   : > { %16799 = vst [vmem:[#allocation36_spill] sm:$0xff] %v14113_v44  ;;  %v10151_v44 = vld [vmem:[#allocation2 + $0x60] sm:$0xf] }
 0x4d6   : > { %16800 = vst [vmem:[#allocation37_spill] sm:$0xff] %v14116_v4  ;;  %v3478_v4 = vadd.f32 %v3389_v5, %v13947_v42  ;;  %v14138_v46 = vor.u32 %v11514_v48, %v10151_v44  ;;  %v10139_v44 = vld [vmem:[#allocation2 + $0x40] sm:$0xf] }
 0x4d7   : > { %v14134_v39 = vpop.f32.mrf.mxu1 }
 0x4d8   : > { %4212 = vrot.lane.b32.xlu0 %v14138_v46, %s16715_s23 }
 0x4da   : > { %v14124_v24 = vpop.f32.mrf.mxu2  ;;  %v14128_v51 = vpop.f32.mrf.mxu3 }
 0x4db   : > { %16801 = vst [vmem:[#allocation24_spill] sm:$0xff] %v14124_v24  ;;  %v14142_v52 = vpop.permute.xlu0 %3848  ;;  %v14144_v42 = vpop.f32.mrf.mxu0 }
 0x4dc   : > { %16802 = vst [vmem:[#allocation38_spill] sm:$0xff] %v14128_v51 }
 0x4df   : > { %v3448_v5 = vpop.f32.mrf.mxu1 }
 0x4e2   : > { %v3664_v24 = vpop.f32.mrf.mxu2  ;;  %v3713_v51 = vpop.f32.mrf.mxu3 }
 0x4e3   : > { %v3753_v29 = vadd.f32 %v3664_v24, %v3478_v4  ;;  %v3754_v30 = vadd.f32 %v3713_v51, %v3479_v60  ;;  %v3481_v4 = vadd.f32 %v3440_v22, %v13963_v25  ;;  %v14148_v60 = vor.u32 %v11511_v17, %v10139_v44  ;;  %v3824_v7 = vpop.permute.xlu0 %3823  ;;  %v10127_v22 = vld [vmem:[#allocation2 + $0x20] sm:$0xf]  ;;  %v11508_v44 = vld [vmem:[#allocation2 + $0x2c] sm:$0xf0]  ;;  %v3401_v17 = vpop.f32.mrf.mxu0 }
 0x4e4   : > { %v3482_v25 = vadd.f32 %v3394_v40, %v13975_v49 }
 0x4e5   : > { %v3881_v26 = vadd.f32 %v3804_v41, %v3753_v29  ;;  %v3882_v32 = vadd.f32 %v3804_v41, %v3754_v30  ;;  %v3809_v29 = vpop.permute.xlu2 %3808  ;;  %4206 = vrot.lane.b32.xlu0 %v14148_v60, %s16715_s23 }
 0x4e7   : > { %11942 = vtanh.f32 %v3881_v26 }
 0x4e8   : > { %11944 = vtanh.f32 %v3882_v32 }
 0x4ea   : > { %v3666_v48 = vpop.f32.mrf.mxu2  ;;  %v3715_v51 = vpop.f32.mrf.mxu3 }
 0x4eb   : > { %v3755_v24 = vadd.f32 %v3666_v48, %v3480_v43  ;;  %v3756_v30 = vadd.f32 %v3715_v51, %v3481_v4  ;;  %v3483_v43 = vadd.f32 %v3443_v63, %v13978_v2  ;;  %v14154_v48 = vor.u32 %v11508_v44, %v10127_v22  ;;  %v3450_v51 = vpop.f32.mrf.mxu1  ;;  %v10115_v63 = vld [vmem:[#allocation2] sm:$0xf]  ;;  %v3819_v44 = vpop.permute.xlu0 %3818 }
 0x4ec   : > { %v3484_v2 = vadd.f32 %v3396_v14, %v13985_v6 }
 0x4ed   : > { %v11943_v26 = vpop.eup %11942  ;;  %v3883_v41 = vadd.f32 %v3809_v29, %v3755_v24  ;;  %v3884_v20 = vadd.f32 %v3809_v29, %v3756_v30  ;;  %4200 = vrot.lane.b32.xlu0 %v14154_v48, %s16715_s23 }
 0x4ee   : > { %v11945_v32 = vpop.eup %11944 }
 0x4ef   : > { %v3945_v0 = vpack.c.bf16 %v11945_v32, %v11943_v26  ;;  %11946 = vtanh.f32 %v3883_v41  ;;  %v11505_v26 = vld [vmem:[#allocation2 + $0xc] sm:$0xf0]  ;;  %v3485_v41 = vadd.f32 %v14134_v39, %v13991_v61  ;;  %v3486_v61 = vadd.f32 %v14144_v42, %v14003_v31 }
 0x4f0   : > { %11948 = vtanh.f32 %v3884_v20  ;;  %v3487_v39 = vadd.f32 %v3448_v5, %v14006_v23  ;;  %v3488_v31 = vadd.f32 %v3401_v17, %v14013_v1  ;;  %v3489_v23 = vadd.f32 %v3450_v51, %v14019_v58 }
 0x4f1   : > { %3961 = vst [vmem:[#allocation2 + $0x4] sm:$0xff] %v3945_v0  ;;  %v14161_v0 = vor.u32 %v11505_v26, %v10115_v63 }
 0x4f2   : > { %v3669_v4 = vpop.f32.mrf.mxu2  ;;  %v3718_v24 = vpop.f32.mrf.mxu3 }
 0x4f3   : > { %v3757_v15 = vadd.f32 %v3669_v4, %v3482_v25  ;;  %v3758_v8 = vadd.f32 %v3718_v24, %v3483_v43 }
 0x4f5   : > { %v11947_v20 = vpop.eup %11946  ;;  %v3885_v29 = vadd.f32 %v3814_v54, %v3757_v15  ;;  %v3886_v49 = vadd.f32 %v3814_v54, %v3758_v8  ;;  %v3404_v15 = vpop.f32.mrf.mxu0  ;;  %4194 = vrot.lane.b32.xlu0 %v14161_v0, %s16715_s23 }
 0x4f6   : > { %v11949_v30 = vpop.eup %11948  ;;  %v3453_v8 = vpop.f32.mrf.mxu1  ;;  %v3490_v1 = vadd.f32 %v3404_v15, %v14031_v50 }
 0x4f7   : > { %v3946_v40 = vpack.c.bf16 %v11949_v30, %v11947_v20  ;;  %11950 = vtanh.f32 %v3885_v29  ;;  %v3491_v17 = vadd.f32 %v3453_v8, %v14034_v10 }
 0x4f8   : > { %11952 = vtanh.f32 %v3886_v49 }
 0x4f9   : > { %3962 = vst [vmem:[#allocation2 + $0x14] sm:$0xff] %v3946_v40 }
 0x4fa   : > { %v3671_v32 = vpop.f32.mrf.mxu2  ;;  %v3720_v22 = vpop.f32.mrf.mxu3 }
 0x4fb   : > { %v3759_v25 = vadd.f32 %v3671_v32, %v3484_v2  ;;  %v3760_v43 = vadd.f32 %v3720_v22, %v3485_v41 }
 0x4fd   : > { %v11951_v54 = vpop.eup %11950  ;;  %v3887_v6 = vadd.f32 %v3819_v44, %v3759_v25  ;;  %v3888_v4 = vadd.f32 %v3819_v44, %v3760_v43  ;;  %4462 = vrot.lane.b32.xlu0 %v14079_v18, %s16713_s19  ;;  %v3406_v26 = vpop.f32.mrf.mxu0 }
 0x4fe   : > { %v11953_v14 = vpop.eup %11952  ;;  %v3455_v32 = vpop.f32.mrf.mxu1  ;;  %v3492_v50 = vadd.f32 %v3406_v26, %v14037_v33 }
 0x4ff   : > { %v3947_v24 = vpack.c.bf16 %v11953_v14, %v11951_v54  ;;  %11954 = vtanh.f32 %v3887_v6  ;;  %v3493_v10 = vadd.f32 %v3455_v32, %v14043_v38 }
 0x500   : > { %11956 = vtanh.f32 %v3888_v4 }
 0x501   : > { %3963 = vst [vmem:[#allocation2 + $0x24] sm:$0xff] %v3947_v24 }
 0x502   : > { %v3674_v20 = vpop.f32.mrf.mxu2  ;;  %v3723_v30 = vpop.f32.mrf.mxu3 }
 0x503   : > { %v3761_v29 = vadd.f32 %v3674_v20, %v3486_v61  ;;  %v3762_v49 = vadd.f32 %v3723_v30, %v3487_v39 }
 0x505   : > { %v11955_v40 = vpop.eup %11954  ;;  %v3889_v2 = vadd.f32 %v3824_v7, %v3761_v29  ;;  %v3890_v41 = vadd.f32 %v3824_v7, %v3762_v49  ;;  %4456 = vrot.lane.b32.xlu0 %v14095_v16, %s16713_s19  ;;  %v3409_v14 = vpop.f32.mrf.mxu0 }
 0x506   : > { %v11957_v63 = vpop.eup %11956  ;;  %v3458_v58 = vpop.f32.mrf.mxu1  ;;  %v3494_v33 = vadd.f32 %v3409_v14, %v14046_v3  ;;  %v2791_v3 = vadd.f32 %v13954_v36, %v13854_v55 }
 0x507   : > { %v3948_v25 = vpack.c.bf16 %v11957_v63, %v11955_v40  ;;  %11958 = vtanh.f32 %v3889_v2  ;;  %v3495_v38 = vadd.f32 %v3458_v58, %v14049_v9 }
 0x508   : > { %11960 = vtanh.f32 %v3890_v41 }
 0x509   : > { %3964 = vst [vmem:[#allocation2 + $0x34] sm:$0xff] %v3948_v25 }
 0x50a   : > { %v3676_v42 = vpop.f32.mrf.mxu2  ;;  %v3725_v22 = vpop.f32.mrf.mxu3 }
 0x50b   : > { %v3763_v5 = vadd.f32 %v3676_v42, %v3488_v31  ;;  %v3764_v44 = vadd.f32 %v3725_v22, %v3489_v23 }
 0x50d   : > { %v11959_v18 = vpop.eup %11958  ;;  %v3891_v43 = vadd.f32 %v14122_v47, %v3763_v5  ;;  %v3892_v54 = vadd.f32 %v14122_v47, %v3764_v44  ;;  %4450 = vrot.lane.b32.xlu0 %v14108_v56, %s16713_s19  ;;  %v3411_v15 = vpop.f32.mrf.mxu0 }
 0x50e   : > { %v11961_v7 = vpop.eup %11960  ;;  %v3460_v30 = vpop.f32.mrf.mxu1 }
 0x50f   : > { %v3949_v6 = vpack.c.bf16 %v11961_v7, %v11959_v18  ;;  %11962 = vtanh.f32 %v3891_v43  ;;  %v3086_v7 = vadd.f32 %v14053_v27, %v2791_v3 }
 0x510   : > { %11964 = vtanh.f32 %v3892_v54 }
 0x511   : > { %3965 = vst [vmem:[#allocation2 + $0x44] sm:$0xff] %v3949_v6  ;;  %v3497_v54 = vadd.f32 %v3460_v30, %v3086_v7 }
 0x512   : > { %v3679_v51 = vpop.f32.mrf.mxu2  ;;  %v3728_v24 = vpop.f32.mrf.mxu3 }
 0x513   : > { %v3765_v4 = vadd.f32 %v3679_v51, %v3490_v1  ;;  %v3766_v16 = vadd.f32 %v3728_v24, %v3491_v17 }
 0x515   : > { %v11963_v61 = vpop.eup %11962  ;;  %v3893_v47 = vadd.f32 %v14106_v28, %v3765_v4  ;;  %v3894_v20 = vadd.f32 %v14106_v28, %v3766_v16  ;;  %4444 = vrot.lane.b32.xlu0 %v14126_v62, %s16713_s19  ;;  %v3414_v23 = vpop.f32.mrf.mxu0 }
 0x516   : > { %v11965_v39 = vpop.eup %11964  ;;  %v3463_v5 = vpop.f32.mrf.mxu1  ;;  %v3498_v17 = vadd.f32 %v3414_v23, %v14059_v37  ;;  %v2796_v37 = vadd.f32 %v13982_v34, %v13880_v13  ;;  %v16805_v34 = vld [vmem:[#allocation22_spill] sm:$0xff] }
 0x517   : > { %v3950_v29 = vpack.c.bf16 %v11965_v39, %v11963_v61  ;;  %11966 = vtanh.f32 %v3893_v47  ;;  %v3499_v51 = vadd.f32 %v3463_v5, %v14062_v35  ;;  %v16803_v35 = vld [vmem:[#allocation31_spill] sm:$0xff] }
 0x518   : > { %11968 = vtanh.f32 %v3894_v20 }
 0x519   : > { %3966 = vst [vmem:[#allocation2 + $0x54] sm:$0xff] %v3950_v29 }
 0x51a   : > { %v3681_v8 = vpop.f32.mrf.mxu2  ;;  %v3730_v40 = vpop.f32.mrf.mxu3 }
 0x51b   : > { %v3767_v49 = vadd.f32 %v3681_v8, %v3492_v50  ;;  %v3768_v56 = vadd.f32 %v3730_v40, %v3493_v10  ;;  %v16804_v10 = vld [vmem:[#allocation32_spill] sm:$0xff] }
 0x51d   : > { %v11967_v2 = vpop.eup %11966  ;;  %v3895_v28 = vadd.f32 %v14120_v45, %v3767_v49  ;;  %v3896_v41 = vadd.f32 %v14120_v45, %v3768_v56  ;;  %4438 = vrot.lane.b32.xlu0 %v14138_v46, %s16713_s19  ;;  %v2742_v45 = vadd.f32 %v13952_v12, %v13852_v53 }
 0x51e   : > { %v11969_v63 = vpop.eup %11968  ;;  %v3465_v58 = vpop.f32.mrf.mxu1 }
 0x51f   : > { %v3951_v25 = vpack.c.bf16 %v11969_v63, %v11967_v2  ;;  %11970 = vtanh.f32 %v3895_v28  ;;  %v3085_v18 = vadd.f32 %v14051_v59, %v2742_v45  ;;  %v3416_v59 = vpop.f32.mrf.mxu0 }
 0x520   : > { %11972 = vtanh.f32 %v3896_v41 }
 0x521   : > { %3967 = vst [vmem:[#allocation2 + $0x64] sm:$0xff] %v3951_v25  ;;  %v3496_v46 = vadd.f32 %v3411_v15, %v3085_v18  ;;  %v3090_v15 = vadd.f32 %v16804_v10, %v2796_v37  ;;  %v16808_v18 = vld [vmem:[#allocation26_spill] sm:$0xff] }
 0x522   : > { %v3684_v26 = vpop.f32.mrf.mxu2  ;;  %v3733_v31 = vpop.f32.mrf.mxu3 }
 0x523   : > { %v3769_v32 = vadd.f32 %v3684_v26, %v3494_v33  ;;  %v3770_v42 = vadd.f32 %v3733_v31, %v3495_v38  ;;  %v16806_v26 = vld [vmem:[#allocation34_spill] sm:$0xff] }
 0x525   : > { %v11971_v62 = vpop.eup %11970  ;;  %v3897_v22 = vadd.f32 %v14104_v19, %v3769_v32  ;;  %v3898_v9 = vadd.f32 %v14104_v19, %v3770_v42  ;;  %4432 = vrot.lane.b32.xlu0 %v14148_v60, %s16713_s19 }
 0x526   : > { %v11973_v44 = vpop.eup %11972  ;;  %v3468_v30 = vpop.f32.mrf.mxu1 }
 0x527   : > { %v3952_v43 = vpack.c.bf16 %v11973_v44, %v11971_v62  ;;  %11974 = vtanh.f32 %v3897_v22  ;;  %v3419_v8 = vpop.f32.mrf.mxu0 }
 0x528   : > { %11976 = vtanh.f32 %v3898_v9  ;;  %v3502_v32 = vadd.f32 %v3419_v8, %v16806_v26  ;;  %v16816_v8 = vld [vmem:[#allocation36_spill] sm:$0xff]  ;;  %v16822_v26 = vld [vmem:[#allocation17_spill] sm:$0xff] }
 0x529   : > { %3968 = vst [vmem:[#allocation2 + $0x74] sm:$0xff] %v3952_v43  ;;  %v16809_v43 = vld [vmem:[#allocation16_spill] sm:$0xff] }
 0x52a   : > { %v3686_v53 = vpop.f32.mrf.mxu2  ;;  %v3735_v6 = vpop.f32.mrf.mxu3  ;;  %v2752_v7 = vadd.f32 %v16809_v43, %v16808_v18 }
 0x52b   : > { %v3771_v12 = vadd.f32 %v3686_v53, %v3496_v46  ;;  %v3772_v14 = vadd.f32 %v3735_v6, %v3497_v54  ;;  %v16810_v46 = vld [vmem:[#allocation27_spill] sm:$0xff]  ;;  %v16812_v6 = vld [vmem:[#allocation20_spill] sm:$0xff] }
 0x52d   : > { %v11975_v55 = vpop.eup %11974  ;;  %v3899_v36 = vadd.f32 %v14142_v52, %v3771_v12  ;;  %v3900_v1 = vadd.f32 %v14142_v52, %v3772_v14  ;;  %4426 = vrot.lane.b32.xlu0 %v14154_v48, %s16713_s19  ;;  %v2747_v52 = vadd.f32 %v13980_v21, %v13878_v57  ;;  %v3501_v57 = vadd.f32 %v3465_v58, %v3090_v15  ;;  %v16811_v12 = vld [vmem:[#allocation30_spill] sm:$0xff] }
 0x52e   : > { %v11977_v19 = vpop.eup %11976  ;;  %v3470_v5 = vpop.f32.mrf.mxu1  ;;  %v2801_v14 = vadd.f32 %v16812_v6, %v16811_v12  ;;  %v16825_v12 = vld [vmem:[#allocation23_spill] sm:$0xff] }
 0x52f   : > { %v3953_v27 = vpack.c.bf16 %v11977_v19, %v11975_v55  ;;  %11978 = vtanh.f32 %v3899_v36  ;;  %v3089_v29 = vadd.f32 %v16803_v35, %v2747_v52  ;;  %v3421_v62 = vpop.f32.mrf.mxu0  ;;  %v16813_v36 = vld [vmem:[#allocation25_spill] sm:$0xff] }
 0x530   : > { %11980 = vtanh.f32 %v3900_v1  ;;  %v3093_v19 = vadd.f32 %v16813_v36, %v2752_v7  ;;  %v16814_v1 = vld [vmem:[#allocation19_spill] sm:$0xff] }
 0x531   : > { %3969 = vst [vmem:[#allocation2 + $0x84] sm:$0xff] %v3953_v27  ;;  %v3500_v48 = vadd.f32 %v3416_v59, %v3089_v29  ;;  %v3094_v58 = vadd.f32 %v16814_v1, %v2801_v14 }
 0x532   : > { %v3689_v4 = vpop.f32.mrf.mxu2  ;;  %v3738_v16 = vpop.f32.mrf.mxu3  ;;  %v3504_v27 = vadd.f32 %v3421_v62, %v3093_v19  ;;  %v16823_v62 = vld [vmem:[#allocation24_spill] sm:$0xff] }
 0x533   : > { %v3773_v24 = vadd.f32 %v3689_v4, %v3498_v17  ;;  %v3774_v60 = vadd.f32 %v3738_v16, %v3499_v51  ;;  %v3505_v17 = vadd.f32 %v3470_v5, %v3094_v58 }
 0x535   : > { %v11979_v61 = vpop.eup %11978  ;;  %v3901_v47 = vadd.f32 %v14132_v11, %v3773_v24  ;;  %v3902_v20 = vadd.f32 %v14132_v11, %v3774_v60  ;;  %4420 = vrot.lane.b32.xlu0 %v14161_v0, %s16713_s19  ;;  %v16807_v0 = vld [vmem:[#allocation18_spill] sm:$0xff] }
 0x536   : > { %v11981_v39 = vpop.eup %11980  ;;  %v3503_v42 = vadd.f32 %v3468_v30, %v16807_v0  ;;  %v3473_v52 = vpop.f32.mrf.mxu1 }
 0x537   : > { %v3954_v50 = vpack.c.bf16 %v11981_v39, %v11979_v61  ;;  %11982 = vtanh.f32 %v3901_v47  ;;  %v3424_v16 = vpop.f32.mrf.mxu0  ;;  %v16815_v47 = vld [vmem:[#allocation35_spill] sm:$0xff] }
 0x538   : > { %11984 = vtanh.f32 %v3902_v20  ;;  %v10171_v41 = vld [vmem:[#allocation2 + $0x88] sm:$0xf]  ;;  %v11516_v33 = vld [vmem:[#allocation2 + $0x84] sm:$0xf] }
 0x539   : > { %3970 = vst [vmem:[#allocation2 + $0x94] sm:$0xff] %v3954_v50 }
 0x53a   : > { %v3691_v21 = vpop.f32.mrf.mxu2  ;;  %v3740_v40 = vpop.f32.mrf.mxu3 }
 0x53b   : > { %v3775_v49 = vadd.f32 %v3691_v21, %v3500_v48  ;;  %v3776_v56 = vadd.f32 %v3740_v40, %v3501_v57  ;;  %v3506_v48 = vadd.f32 %v3424_v16, %v16816_v8  ;;  %v16817_v21 = vld [vmem:[#allocation37_spill] sm:$0xff] }
 0x53d   : > { %v11983_v13 = vpop.eup %11982  ;;  %v3903_v11 = vadd.f32 %v16805_v34, %v3775_v49  ;;  %v3904_v28 = vadd.f32 %v16805_v34, %v3776_v56  ;;  %v3507_v49 = vadd.f32 %v3473_v52, %v16817_v21  ;;  %v11515_v21 = vld [vmem:[#allocation2 + $0x74] sm:$0xf0] }
 0x53e   : > { %v11985_v2 = vpop.eup %11984  ;;  %v3475_v5 = vpop.f32.mrf.mxu1 }
 0x53f   : > { %v3955_v63 = vpack.c.bf16 %v11985_v2, %v11983_v13  ;;  %11986 = vtanh.f32 %v3903_v11  ;;  %v16818_v2 = vld [vmem:[#allocation28_spill] sm:$0xff]  ;;  %v3426_v0 = vpop.f32.mrf.mxu0 }
 0x540   : > { %11988 = vtanh.f32 %v3904_v28  ;;  %v11518_v25 = vld [vmem:[#allocation2 + $0x94] sm:$0xf0]  ;;  %v10165_v38 = vld [vmem:[#allocation2 + $0x90] sm:$0xf0]  ;;  %v16819_v28 = vld [vmem:[#allocation33_spill] sm:$0xff] }
 0x541   : > { %3971 = vst [vmem:[#allocation2 + $0xa4] sm:$0xff] %v3955_v63  ;;  %v14221_v31 = vor.u32 %v11518_v25, %v10171_v41  ;;  %v14223_v23 = vor.u32 %v11516_v33, %v10165_v38  ;;  %v2757_v63 = vadd.f32 %v16819_v28, %v16818_v2  ;;  %v16820_v41 = vld [vmem:[#allocation21_spill] sm:$0xff]  ;;  %v11512_v2 = vld [vmem:[#allocation2 + $0x54] sm:$0xf0]  ;;  %v10141_v28 = vld [vmem:[#allocation2 + $0x50] sm:$0xf0] }
 0x542   : > { %v3694_v45 = vpop.f32.mrf.mxu2  ;;  %v3743_v44 = vpop.f32.mrf.mxu3  ;;  %v16821_v38 = vld [vmem:[#allocation29_spill] sm:$0xff] }
 0x543   : > { %v3777_v22 = vadd.f32 %v3694_v45, %v3502_v32  ;;  %4222 = vrot.lane.b32.xlu2 %v14221_v31, %s16715_s23  ;;  %4220 = vrot.lane.b32.xlu1 %v14223_v23, %s16715_s23  ;;  %v3778_v3 = vadd.f32 %v3743_v44, %v3503_v42  ;;  %v2806_v32 = vadd.f32 %v16822_v26, %v16821_v38  ;;  %v16824_v44 = vld [vmem:[#allocation38_spill] sm:$0xff]  ;;  %v11510_v38 = vld [vmem:[#allocation2 + $0x44] sm:$0xf] }
 0x544   : > { %v3097_v45 = vadd.f32 %v16823_v62, %v2757_v63  ;;  %v10407_v63 = vld [vmem:[#allocation2 + $0x64] sm:$0xf]  ;;  %v10144_v26 = vor.u32 %v11510_v38, %v10141_v28  ;;  %v10421_v38 = vld [vmem:[#allocation2 + $0x94] sm:$0xf0] }
 0x545   : > { %v11987_v9 = vpop.eup %11986  ;;  %v3905_v54 = vadd.f32 %v16810_v46, %v3777_v22  ;;  %v3906_v55 = vadd.f32 %v16810_v46, %v3778_v3  ;;  %v3098_v3 = vadd.f32 %v16824_v44, %v2806_v32  ;;  %v11509_v32 = vld [vmem:[#allocation2 + $0x34] sm:$0xf0] }
 0x546   : > { %v11989_v53 = vpop.eup %11988  ;;  %v11506_v44 = vld [vmem:[#allocation2 + $0x14] sm:$0xf0] }
 0x547   : > { %v3956_v59 = vpack.c.bf16 %v11989_v53, %v11987_v9  ;;  %11990 = vtanh.f32 %v3905_v54  ;;  %v3508_v9 = vadd.f32 %v3426_v0, %v3097_v45  ;;  %v3509_v18 = vadd.f32 %v3475_v5, %v3098_v3  ;;  %v10129_v0 = vld [vmem:[#allocation2 + $0x30] sm:$0xf0]  ;;  %v11507_v45 = vld [vmem:[#allocation2 + $0x24] sm:$0xf]  ;;  %v14291_v3 = vpop.permute.xlu0 %4236 }
 0x548   : > { %11992 = vtanh.f32 %v3906_v55  ;;  %v10183_v29 = vld [vmem:[#allocation2 + $0xa8] sm:$0xf]  ;;  %v11519_v10 = vld [vmem:[#allocation2 + $0xa4] sm:$0xf]  ;;  %v10132_v5 = vor.u32 %v11507_v45, %v10129_v0 }
 0x549   : > { %3972 = vst [vmem:[#allocation2 + $0xb4] sm:$0xff] %v3956_v59  ;;  %v11580_v0 = vld [vmem:[#allocation2 + $0x88] sm:$0xf] }
 0x54a   : > { %v3696_v51 = vpop.f32.mrf.mxu2  ;;  %v3745_v24 = vpop.f32.mrf.mxu3 }
 0x54b   : > { %v3779_v4 = vadd.f32 %v3696_v51, %v3504_v27  ;;  %v3780_v60 = vadd.f32 %v3745_v24, %v3505_v17 }
 0x54d   : > { %v11991_v61 = vpop.eup %11990  ;;  %v3907_v39 = vadd.f32 %v16815_v47, %v3779_v4  ;;  %v3908_v20 = vadd.f32 %v16815_v47, %v3780_v60  ;;  %v10431_v47 = vld [vmem:[#allocation2 + $0xa4] sm:$0xf] }
 0x54e   : > { %v11993_v37 = vpop.eup %11992 }
 0x54f   : > { %v3957_v35 = vpack.c.bf16 %v11993_v37, %v11991_v61  ;;  %11994 = vtanh.f32 %v3907_v39  ;;  %v11581_v37 = vld [vmem:[#allocation2 + $0x90] sm:$0xf0] }
 0x550   : > { %11996 = vtanh.f32 %v3908_v20  ;;  %v11521_v50 = vld [vmem:[#allocation2 + $0xb4] sm:$0xf0]  ;;  %v10177_v15 = vld [vmem:[#allocation2 + $0xb0] sm:$0xf0]  ;;  %v10419_v20 = vld [vmem:[#allocation2 + $0x84] sm:$0xf] }
 0x551   : > { %3973 = vst [vmem:[#allocation2 + $0xc4] sm:$0xff] %v3957_v35  ;;  %v14241_v30 = vor.u32 %v11521_v50, %v10183_v29  ;;  %v14243_v57 = vor.u32 %v11519_v10, %v10177_v15  ;;  %v11584_v61 = vld [vmem:[#allocation2 + $0xb0] sm:$0xf0]  ;;  %v10420_v15 = vor.u32 %v11581_v37, %v10419_v20 }
 0x552   : > { %v3699_v40 = vpop.f32.mrf.mxu2  ;;  %v3748_v13 = vpop.f32.mrf.mxu3  ;;  %v10432_v39 = vor.u32 %v11584_v61, %v10431_v47  ;;  %v10463_v61 = vld [vmem:[#allocation2 + $0xec] sm:$0xf] }
 0x553   : > { %v3781_v56 = vadd.f32 %v3699_v40, %v3506_v48  ;;  %4228 = vrot.lane.b32.xlu2 %v14241_v30, %s16715_s23  ;;  %4226 = vrot.lane.b32.xlu1 %v14243_v57, %s16715_s23  ;;  %v3782_v34 = vadd.f32 %v3748_v13, %v3507_v49  ;;  %v10153_v49 = vld [vmem:[#allocation2 + $0x70] sm:$0xf0]  ;;  %v10159_v40 = vld [vmem:[#allocation2 + $0x68] sm:$0xf]  ;;  %v11513_v13 = vld [vmem:[#allocation2 + $0x64] sm:$0xf] }
 0x555   : > { %v11995_v11 = vpop.eup %11994  ;;  %v3909_v25 = vadd.f32 %v16820_v41, %v3781_v56  ;;  %v3910_v42 = vadd.f32 %v16820_v41, %v3782_v34  ;;  %v14279_v56 = vor.u32 %v11515_v21, %v10159_v40  ;;  %v10156_v34 = vor.u32 %v11513_v13, %v10153_v49  ;;  %v10147_v41 = vld [vmem:[#allocation2 + $0x48] sm:$0xf]  ;;  %v10433_v40 = vld [vmem:[#allocation2 + $0xb4] sm:$0xf0] }
 0x556   : > { %v11997_v33 = vpop.eup %11996  ;;  %v11583_v13 = vld [vmem:[#allocation2 + $0xa8] sm:$0xf] }
 0x557   : > { %v3958_v22 = vpack.c.bf16 %v11997_v33, %v11995_v11  ;;  %11998 = vtanh.f32 %v3909_v25  ;;  %v11578_v11 = vld [vmem:[#allocation2 + $0x70] sm:$0xf0]  ;;  %v10148_v33 = vor.u32 %v11512_v2, %v10147_v41  ;;  %v11585_v2 = vld [vmem:[#allocation2 + $0xb8] sm:$0xf0] }
 0x558   : > { %12000 = vtanh.f32 %v3910_v42  ;;  %v10443_v19 = vld [vmem:[#allocation2 + $0xc4] sm:$0xf]  ;;  %v10195_v59 = vld [vmem:[#allocation2 + $0xc8] sm:$0xf]  ;;  %v10408_v25 = vor.u32 %v11578_v11, %v10407_v63  ;;  %v10439_v11 = vld [vmem:[#allocation2 + $0xac] sm:$0xf] }
 0x559   : > { %3974 = vst [vmem:[#allocation2 + $0xd4] sm:$0xff] %v3958_v22  ;;  %v11522_v1 = vld [vmem:[#allocation2 + $0xc4] sm:$0xf]  ;;  %v10135_v42 = vld [vmem:[#allocation2 + $0x28] sm:$0xf] }
 0x55a   : > { %v3701_v43 = vpop.f32.mrf.mxu2  ;;  %v3750_v46 = vpop.f32.mrf.mxu3  ;;  %v10136_v62 = vor.u32 %v11509_v32, %v10135_v42  ;;  %v11575_v22 = vld [vmem:[#allocation2 + $0x50] sm:$0xf0]  ;;  %v14377_v42 = vor.u32 %v11580_v0, %v10421_v38 }
 0x55b   : > { %v3783_v7 = vadd.f32 %v3701_v43, %v3508_v9  ;;  %v3784_v54 = vadd.f32 %v3750_v46, %v3509_v18  ;;  %v10117_v9 = vld [vmem:[#allocation2 + $0x10] sm:$0xf0]  ;;  %v10395_v18 = vld [vmem:[#allocation2 + $0x44] sm:$0xf]  ;;  %v10123_v43 = vld [vmem:[#allocation2 + $0x8] sm:$0xf] }
 0x55c   : > { %v10124_v46 = vor.u32 %v11506_v44, %v10123_v43 }
 0x55d   : > { %v11999_v53 = vpop.eup %11998  ;;  %v3911_v6 = vadd.f32 %v16825_v12, %v3783_v7  ;;  %v3912_v55 = vadd.f32 %v16825_v12, %v3784_v54  ;;  %v10396_v7 = vor.u32 %v11575_v22, %v10395_v18  ;;  %v11504_v54 = vld [vmem:[#allocation2 + $0x4] sm:$0xf]  ;;  %v14296_v12 = vpop.permute.xlu0 %4230 }
 0x55e   : > { %v12001_v14 = vpop.eup %12000 }
 0x55f   : > { %v3959_v36 = vpack.c.bf16 %v12001_v14, %v11999_v53  ;;  %12002 = vtanh.f32 %v3911_v6  ;;  %v10120_v53 = vor.u32 %v11504_v54, %v10117_v9  ;;  %v11572_v6 = vld [vmem:[#allocation2 + $0x30] sm:$0xf0]  ;;  %v10383_v14 = vld [vmem:[#allocation2 + $0x24] sm:$0xf]  ;;  %v11582_v54 = vld [vmem:[#allocation2 + $0x98] sm:$0xf0] }
 0x560   : > { %12004 = vtanh.f32 %v3912_v55  ;;  %v11587_v58 = vld [vmem:[#allocation2 + $0xd0] sm:$0xf0]  ;;  %v11524_v27 = vld [vmem:[#allocation2 + $0xd4] sm:$0xf0]  ;;  %v10384_v55 = vor.u32 %v11572_v6, %v10383_v14  ;;  %v5583_v9 = vld [vmem:[%s16690_s7 + $0x40] sm:$0xff] }
 0x561   : > { %v10189_v17 = vld [vmem:[#allocation2 + $0xd0] sm:$0xf0]  ;;  %3975 = vst [vmem:[#allocation2 + $0xe4] sm:$0xff] %v3959_v36  ;;  %v10444_v51 = vor.u32 %v11587_v58, %v10443_v19  ;;  %v14260_v4 = vor.u32 %v11524_v27, %v10195_v59  ;;  %v10371_v27 = vld [vmem:[#allocation2 + $0x4] sm:$0xf] }
 0x562   : > { %v14262_v24 = vor.u32 %v11522_v1, %v10189_v17 }
 0x563   : > { %5126 = vrot.lane.b32.xlu0 %v10444_v51, %s16826_s15  ;;  %4234 = vrot.lane.b32.xlu2 %v14260_v4, %s16715_s23 }
 0x564   : > { %4232 = vrot.lane.b32.xlu1 %v14262_v24, %s16715_s23 }
 0x565   : > { %v12003_v16 = vpop.eup %12002  ;;  %v14303_v36 = vpop.permute.xlu0 %4224 }
 0x566   : > { %v12005_v60 = vpop.eup %12004 }
 0x567   : > { %v3960_v52 = vpack.c.bf16 %v12005_v60, %v12003_v16 }
 0x568   : > { %v10207_v35 = vld [vmem:[#allocation2 + $0xe8] sm:$0xf]  ;;  %v11525_v50 = vld [vmem:[#allocation2 + $0xe4] sm:$0xf] }
 0x569   : > { %3976 = vst [vmem:[#allocation2 + $0xf4] sm:$0xff] %v3960_v52  ;;  %v10455_v1 = vld [vmem:[#allocation2 + $0xe4] sm:$0xf]  ;;  %v11591_v52 = vld [vmem:[#allocation2 + $0xf8] sm:$0xf0] }
 0x56a   : > { %v10464_v20 = vor.u32 %v11591_v52, %v10463_v61  ;;  %v11579_v61 = vld [vmem:[#allocation2 + $0x78] sm:$0xf0] }
 0x56b   : > { %5120 = vrot.lane.b32.xlu0 %v10432_v39, %s16826_s15 }
 0x56d   : > { %v14315_v19 = vpop.permute.xlu0 %4218 }
 0x570   : > { %v11527_v29 = vld [vmem:[#allocation2 + $0xf4] sm:$0xf0]  ;;  %v10201_v10 = vld [vmem:[#allocation2 + $0xf0] sm:$0xf0] }
 0x571   : > { %v14270_v8 = vor.u32 %v11527_v29, %v10207_v35  ;;  %v14272_v48 = vor.u32 %v11525_v50, %v10201_v10  ;;  %v11590_v59 = vld [vmem:[#allocation2 + $0xf0] sm:$0xf0]  ;;  %v10445_v35 = vld [vmem:[#allocation2 + $0xd4] sm:$0xf0]  ;;  %v11586_v29 = vld [vmem:[#allocation2 + $0xc8] sm:$0xf] }
 0x572   : > { %v10456_v58 = vor.u32 %v11590_v59, %v10455_v1  ;;  %v10448_v50 = vor.u32 %v11586_v29, %v10445_v35  ;;  %v10451_v10 = vld [vmem:[#allocation2 + $0xcc] sm:$0xf]  ;;  %v11577_v59 = vld [vmem:[#allocation2 + $0x68] sm:$0xf] }
 0x573   : > { %5114 = vrot.lane.b32.xlu0 %v10420_v15, %s16826_s15  ;;  %4240 = vrot.lane.b32.xlu2 %v14270_v8, %s16715_s23 }
 0x574   : > { %4238 = vrot.lane.b32.xlu1 %v14272_v48, %s16715_s23 }
 0x57b   : > { %5401 = vrot.lane.b32.xlu0 %v10444_v51, %s16827_s17  ;;  %4216 = vrot.lane.b32.xlu2 %v14279_v56, %s16715_s23 }
 0x57c   : > { %4214 = vrot.lane.b32.xlu1 %v10156_v34, %s16715_s23 }
 0x583   : > { %5108 = vrot.lane.b32.xlu0 %v10408_v25, %s16826_s15  ;;  %4210 = vrot.lane.b32.xlu2 %v10148_v33, %s16715_s23 }
 0x584   : > { %4208 = vrot.lane.b32.xlu1 %v10144_v26, %s16715_s23 }
 0x58b   : > { %5395 = vrot.lane.b32.xlu0 %v10432_v39, %s16827_s17  ;;  %4204 = vrot.lane.b32.xlu2 %v10136_v62, %s16715_s23 }
 0x58c   : > { %4202 = vrot.lane.b32.xlu1 %v10132_v5, %s16715_s23 }
 0x593   : > { %5102 = vrot.lane.b32.xlu0 %v10396_v7, %s16826_s15  ;;  %4198 = vrot.lane.b32.xlu2 %v10124_v46, %s16715_s23 }
 0x594   : > { %4196 = vrot.lane.b32.xlu1 %v10120_v53, %s16715_s23 }
 0x59b   : > { %5389 = vrot.lane.b32.xlu0 %v10420_v15, %s16827_s17  ;;  %4460 = vrot.lane.b32.xlu2 %v14260_v4, %s16713_s19  ;;  %v11588_v15 = vld [vmem:[#allocation2 + $0xd8] sm:$0xf0] }
 0x59c   : > { %4458 = vrot.lane.b32.xlu1 %v14262_v24, %s16713_s19  ;;  %v14356_v49 = vor.u32 %v11588_v15, %v10451_v10  ;;  %v11528_v15 = vld [vmem:[#allocation4 + $0x40] sm:$0xff] }
 0x5a3   : > { %5096 = vrot.lane.b32.xlu0 %v10384_v55, %s16826_s15  ;;  %4454 = vrot.lane.b32.xlu2 %v14241_v30, %s16713_s19  ;;  %v14322_v30 = vpop.permute.xlu2 %4222 }
 0x5a4   : > { %4452 = vrot.lane.b32.xlu1 %v14243_v57, %s16713_s19  ;;  %v14324_v57 = vpop.permute.xlu0 %4212 }
 0x5ab   : > { %5383 = vrot.lane.b32.xlu0 %v10408_v25, %s16827_s17  ;;  %4448 = vrot.lane.b32.xlu2 %v14221_v31, %s16713_s19 }
 0x5ac   : > { %4446 = vrot.lane.b32.xlu1 %v14223_v23, %s16713_s19  ;;  %v11569_v23 = vld [vmem:[#allocation2 + $0x10] sm:$0xf0]  ;;  %v14332_v17 = vpop.permute.xlu0 %4206 }
 0x5ad   : > { %v14330_v31 = vpop.permute.xlu2 %4228  ;;  %v10372_v51 = vor.u32 %v11569_v23, %v10371_v27 }
 0x5b3   : > { %5132 = vrot.lane.b32.xlu0 %v10456_v58, %s16826_s15  ;;  %4466 = vrot.lane.b32.xlu2 %v14270_v8, %s16713_s19 }
 0x5b4   : > { %4464 = vrot.lane.b32.xlu1 %v14272_v48, %s16713_s19  ;;  %v14337_v24 = vpop.permute.xlu0 %4200 }
 0x5b5   : > { %v14342_v60 = vpop.permute.xlu1 %4220 }
 0x5b6   : > { %v4251_v43 = vsel %vm758_vm1, %v14342_v60, %v14322_v30 }
 0x5bb   : > { %5407 = vrot.lane.b32.xlu0 %v10456_v58, %s16827_s17  ;;  %4442 = vrot.lane.b32.xlu2 %v14279_v56, %s16713_s19  ;;  %v5589_v56 = vld [vmem:[%s16690_s7 + $0x70] sm:$0xff] }
 0x5bc   : > { %4440 = vrot.lane.b32.xlu1 %v10156_v34, %s16713_s19  ;;  %v14347_v47 = vpop.permute.xlu0 %4194  ;;  %v14361_v34 = vor.u32 %v11583_v13, %v10433_v40  ;;  %v5576_v40 = vld [vmem:[%s16690_s7 + $0x8] sm:$0xff] }
 0x5bd   : > { %v4235_v4 = vpop.permute.xlu2 %4234  ;;  %v11574_v13 = vld [vmem:[#allocation2 + $0x48] sm:$0xf] }
 0x5c3   : > { %5090 = vrot.lane.b32.xlu0 %v10372_v51, %s16826_s15  ;;  %4436 = vrot.lane.b32.xlu2 %v10148_v33, %s16713_s19  ;;  %v14370_v33 = vor.u32 %v11585_v2, %v10439_v11  ;;  %v11556_v2 = vld [vmem:[#allocation2 + $0xc8] sm:$0xf] }
 0x5c4   : > { %4434 = vrot.lane.b32.xlu1 %v10144_v26, %s16713_s19  ;;  %v14354_v21 = vpop.permute.xlu0 %4462  ;;  %v5588_v26 = vld [vmem:[%s16690_s7 + $0x68] sm:$0xff] }
 0x5c5   : > { %v4227_v37 = vpop.permute.xlu1 %4226 }
 0x5c6   : > { %v4253_v44 = vsel %vm758_vm1, %v4227_v37, %v14330_v31 }
 0x5cb   : > { %5377 = vrot.lane.b32.xlu0 %v10396_v7, %s16827_s17  ;;  %4430 = vrot.lane.b32.xlu2 %v10136_v62, %s16713_s19  ;;  %v4250_v7 = vsel %vm758_vm1, %v14315_v19, %v14342_v60  ;;  %v5582_v19 = vld [vmem:[%s16690_s7 + $0x38] sm:$0xff] }
 0x5cc   : > { %4428 = vrot.lane.b32.xlu1 %v10132_v5, %s16713_s19  ;;  %v14375_v32 = vpop.permute.xlu0 %4456 }
 0x5cd   : > { %v4241_v16 = vpop.permute.xlu2 %4240 }
 0x5d3   : > { %5371 = vrot.lane.b32.xlu0 %v10384_v55, %s16827_s17  ;;  %4424 = vrot.lane.b32.xlu2 %v10124_v46, %s16713_s19  ;;  %v10427_v46 = vld [vmem:[#allocation2 + $0x8c] sm:$0xf]  ;;  %v10409_v55 = vld [vmem:[#allocation2 + $0x74] sm:$0xf0] }
 0x5d4   : > { %4422 = vrot.lane.b32.xlu1 %v10120_v53, %s16713_s19  ;;  %v14393_v18 = vpop.permute.xlu0 %4450  ;;  %v14407_v14 = vor.u32 %v11582_v54, %v10427_v46  ;;  %v14414_v1 = vor.u32 %v11577_v59, %v10409_v55  ;;  %v11551_v46 = vld [vmem:[#allocation2 + $0x70] sm:$0xf0]  ;;  %v11576_v55 = vld [vmem:[#allocation2 + $0x58] sm:$0xf0]  ;;  %s9136_s19 = sshll.u32 %s12454_s27, 1  ;;  %s11803_s27 = smul.u32 160, %s451_s28 }
 0x5d5   : > { %v14349_v39 = vpop.permute.xlu2 %4216  ;;  %s462_s26 = scalar_lea.vmem %s16684_s1, %s9136_s19  ;;  %s9016_s19 = scalar_lea.sflag [#allocation6], %s451_s28 }
 0x5d6   : > { %v4233_v48 = vpop.permute.xlu1 %4232  ;;  %s16575_s0 = scalar_lea.vmem [#allocation9], %s11803_s27  ;;  %s12214_s27 = scalar_lea.hbm %s16695_s12, 320 }
 0x5d7   : > { %v4255_v62 = vsel %vm758_vm1, %v4233_v48, %v4235_v4  ;;  %v4254_v45 = vsel %vm758_vm1, %v14296_v12, %v4233_v48  ;;  %v5577_v4 = vld [vmem:[%s16690_s7 + $0x10] sm:$0xff]  ;;  %v10397_v48 = vld [vmem:[#allocation2 + $0x54] sm:$0xf0] }
 0x5db   : > { %5365 = vrot.lane.b32.xlu0 %v10372_v51, %s16827_s17  ;;  %5136 = vrot.lane.b32.xlu2 %v10464_v20, %s16826_s15 }
 0x5dc   : > { %5128 = vrot.lane.b32.xlu1 %v10448_v50, %s16826_s15 }
 0x5dd   : > { %v4211_v8 = vpop.permute.xlu2 %4210 }
 0x5e3   : > { %5663 = vperm.xlu0 %11875, %v5589_v56   ;;  %5130 = vrot.lane.b32.xlu2 %v14356_v49, %s16826_s15  ;;  %v10325_v56 = vld [vmem:[#allocation2 + $0xd4] sm:$0xf0] }
 0x5e4   : > { %5122 = vrot.lane.b32.xlu1 %v14361_v34, %s16826_s15 }
 0x5e5   : > { %v4205_v28 = vpop.permute.xlu2 %4204 }
 0x5e6   : > { %v4239_v63 = vpop.permute.xlu1 %4238 }
 0x5e7   : > { %v4256_v41 = vsel %vm758_vm1, %v14291_v3, %v4239_v63  ;;  %v4257_v25 = vsel %vm758_vm1, %v4239_v63, %v4241_v16  ;;  %v4252_v3 = vsel %vm758_vm1, %v14303_v36, %v4227_v37  ;;  %v10333_v16 = vld [vmem:[#allocation2 + $0xf4] sm:$0xf0]  ;;  %v11558_v37 = vld [vmem:[#allocation2 + $0xe8] sm:$0xf]  ;;  %v11555_v63 = vld [vmem:[#allocation2 + $0xb0] sm:$0xf0] }
 0x5e8   : > { %4274 = vmatpush.bf16.msrb.mxu0 %v4256_v41  ;;  %4323 = vmatpush.bf16.msrb.mxu1 %v4257_v25  ;;  %v10336_v10 = vor.u32 %v11558_v37, %v10333_v16  ;;  %v10317_v25 = vld [vmem:[#allocation2 + $0xb4] sm:$0xf0]  ;;  %v11547_v37 = vld [vmem:[#allocation2 + $0x30] sm:$0xf0] }
 0x5eb   : > { %5658 = vperm.xlu0 %11875, %v5588_v26   ;;  %5124 = vrot.lane.b32.xlu2 %v14370_v33, %s16826_s15  ;;  %v10315_v26 = vld [vmem:[#allocation2 + $0xa4] sm:$0xf] }
 0x5ec   : > { %4324 = vmatpush.bf16.msrb.mxu1 %v4255_v62  ;;  %5116 = vrot.lane.b32.xlu1 %v14377_v42, %s16826_s15  ;;  %v10316_v0 = vor.u32 %v11555_v63, %v10315_v26  ;;  %v11554_v62 = vld [vmem:[#allocation2 + $0xa8] sm:$0xf]  ;;  %v11573_v26 = vld [vmem:[#allocation2 + $0x38] sm:$0xf0] }
 0x5ed   : > { %4275 = vmatpush.bf16.msrb.mxu0 %v4254_v45  ;;  %v4199_v5 = vpop.permute.xlu2 %4198  ;;  %v10320_v45 = vor.u32 %v11554_v62, %v10317_v25  ;;  %v10391_v25 = vld [vmem:[#allocation2 + $0x2c] sm:$0xf] }
 0x5ee   : > { %v4215_v22 = vpop.permute.xlu1 %4214 }
 0x5ef   : > { %v4249_v6 = vsel %vm758_vm1, %v4215_v22, %v14349_v39  ;;  %v4248_v36 = vsel %vm758_vm1, %v14324_v57, %v4215_v22  ;;  %v14423_v57 = vpop.permute.xlu0 %4444  ;;  %v10331_v39 = vld [vmem:[#allocation2 + $0xe4] sm:$0xf] }
 0x5f0   : > { %4325 = vmatpush.bf16.msrb.mxu1 %v4253_v44  ;;  %v10309_v44 = vld [vmem:[#allocation2 + $0x94] sm:$0xf0] }
 0x5f1   : > { %4276 = vmatpush.bf16.msrb.mxu0 %v4252_v3  ;;  %v10307_v3 = vld [vmem:[#allocation2 + $0x84] sm:$0xf] }
 0x5f3   : > { %5633 = vperm.xlu0 %11875, %v5583_v9   ;;  %5411 = vrot.lane.b32.xlu2 %v10464_v20, %s16827_s17 }
 0x5f4   : > { %4326 = vmatpush.bf16.msrb.mxu1 %v4251_v43  ;;  %5403 = vrot.lane.b32.xlu1 %v10448_v50, %s16827_s17  ;;  %v11552_v43 = vld [vmem:[#allocation2 + $0x88] sm:$0xf] }
 0x5f5   : > { %4277 = vmatpush.bf16.msrb.mxu0 %v4250_v7  ;;  %v14403_v53 = vpop.permute.xlu2 %4460  ;;  %v10312_v7 = vor.u32 %v11552_v43, %v10309_v44  ;;  %v10457_v44 = vld [vmem:[#allocation2 + $0xf4] sm:$0xf0] }
 0x5f6   : > { %v4209_v12 = vpop.permute.xlu1 %4208 }
 0x5f7   : > { %v4247_v58 = vsel %vm758_vm1, %v4209_v12, %v4211_v8  ;;  %v4246_v30 = vsel %vm758_vm1, %v14332_v17, %v4209_v12  ;;  %v11559_v17 = vld [vmem:[#allocation2 + $0xf0] sm:$0xf0]  ;;  %v14439_v20 = vpop.permute.xlu0 %4438  ;;  %v10301_v12 = vld [vmem:[#allocation2 + $0x74] sm:$0xf0] }
 0x5f8   : > { %4327 = vmatpush.bf16.msrb.mxu1 %v4249_v6  ;;  %v10332_v50 = vor.u32 %v11559_v17, %v10331_v39  ;;  %v10403_v6 = vld [vmem:[#allocation2 + $0x4c] sm:$0xf]  ;;  %v10291_v17 = vld [vmem:[#allocation2 + $0x44] sm:$0xf] }
 0x5f9   : > { %4278 = vmatpush.bf16.msrb.mxu0 %v4248_v36 }
 0x5fb   : > { %5628 = vperm.xlu0 %11875, %v5582_v19   ;;  %5118 = vrot.lane.b32.xlu2 %v14407_v14, %s16826_s15  ;;  %v10299_v19 = vld [vmem:[#allocation2 + $0x64] sm:$0xf] }
 0x5fc   : > { %4328 = vmatpush.bf16.msrb.mxu1 %v4247_v58  ;;  %5110 = vrot.lane.b32.xlu1 %v14414_v1, %s16826_s15  ;;  %v10300_v59 = vor.u32 %v11551_v46, %v10299_v19  ;;  %v11550_v58 = vld [vmem:[#allocation2 + $0x68] sm:$0xf]  ;;  %v10373_v19 = vld [vmem:[#allocation2 + $0x14] sm:$0xf0] }
 0x5fd   : > { %4279 = vmatpush.bf16.msrb.mxu0 %v4246_v30  ;;  %v14425_v31 = vpop.permute.xlu2 %4454  ;;  %v11529_v30 = vld [vmem:[#allocation4 + $0x48] sm:$0xff] }
 0x5fe   : > { %v4203_v23 = vpop.permute.xlu1 %4202 }
 0x5ff   : > { %v4244_v27 = vsel %vm758_vm1, %v14337_v24, %v4203_v23  ;;  %v4245_v51 = vsel %vm758_vm1, %v4203_v23, %v4205_v28  ;;  %v10415_v24 = vld [vmem:[#allocation2 + $0x6c] sm:$0xf]  ;;  %v10328_v28 = vor.u32 %v11556_v2, %v10325_v56  ;;  %v14459_v22 = vpop.permute.xlu0 %4432  ;;  %v10304_v23 = vor.u32 %v11550_v58, %v10301_v12  ;;  %v10277_v56 = vld [vmem:[#allocation2 + $0x14] sm:$0xf0] }
 0x600   : > { %4329 = vmatpush.bf16.msrb.mxu1 %v4245_v51  ;;  %v14444_v8 = vor.u32 %v11579_v61, %v10415_v24  ;;  %v11549_v51 = vld [vmem:[#allocation2 + $0x50] sm:$0xf0]  ;;  %v10379_v12 = vld [vmem:[#allocation2 + $0xc] sm:$0xf] }
 0x601   : > { %4280 = vmatpush.bf16.msrb.mxu0 %v4244_v27  ;;  %v10385_v27 = vld [vmem:[#allocation2 + $0x34] sm:$0xf0]  ;;  %v10292_v61 = vor.u32 %v11549_v51, %v10291_v17 }
 0x603   : > { %5603 = vperm.xlu0 %11875, %v5577_v4   ;;  %5405 = vrot.lane.b32.xlu2 %v14356_v49, %s16827_s17  ;;  %v11557_v49 = vld [vmem:[#allocation2 + $0xd0] sm:$0xf0]  ;;  %v11571_v4 = vld [vmem:[#allocation2 + $0x28] sm:$0xf] }
 0x604   : > { %5397 = vrot.lane.b32.xlu1 %v14361_v34, %s16827_s17  ;;  %v14449_v34 = vor.u32 %v11574_v13, %v10397_v48  ;;  %v14473_v24 = vor.u32 %v11571_v4, %v10385_v27  ;;  %v11546_v48 = vld [vmem:[#allocation2 + $0x28] sm:$0xf]  ;;  %v10275_v13 = vld [vmem:[#allocation2 + $0x4] sm:$0xf] }
 0x605   : > { %v14437_v60 = vpop.permute.xlu2 %4448 }
 0x606   : > { %v4197_v52 = vpop.permute.xlu1 %4196 }
 0x607   : > { %v4242_v35 = vsel %vm758_vm1, %v14347_v47, %v4197_v52  ;;  %v4243_v29 = vsel %vm758_vm1, %v4197_v52, %v4199_v5  ;;  %v10323_v47 = vld [vmem:[#allocation2 + $0xc4] sm:$0xf]  ;;  %v11553_v5 = vld [vmem:[#allocation2 + $0x90] sm:$0xf0]  ;;  %v14471_v16 = vpop.permute.xlu0 %4426  ;;  %v11548_v52 = vld [vmem:[#allocation2 + $0x48] sm:$0xf] }
 0x608   : > { %4281 = vmatpush.bf16.msrb.mxu0 %v4242_v35  ;;  %4330 = vmatpush.bf16.msrb.mxu1 %v4243_v29  ;;  %v10324_v11 = vor.u32 %v11557_v49, %v10323_v47  ;;  %v10308_v9 = vor.u32 %v11553_v5, %v10307_v3  ;;  %v10285_v29 = vld [vmem:[#allocation2 + $0x34] sm:$0xf0]  ;;  %v11530_v5 = vld [vmem:[#allocation4 + $0x50] sm:$0xff]  ;;  %v11589_v3 = vld [vmem:[#allocation2 + $0xe8] sm:$0xf] }
 0x609   : > { %v10288_v49 = vor.u32 %v11546_v48, %v10285_v29  ;;  %v11533_v29 = vld [vmem:[#allocation4 + $0x68] sm:$0xff] }
 0x60b   : > { %4282 = vmatmul.bf16.vlgmr.msrb.gmra.mxu0 %v11528_v15  ;;  %4331 = vmatmul.bf16.vlgmr.msrb.gmra.mxu1 %v11528_v15 }
 0x60c   : > { %4759 = vmatpush.bf16.msra.mxu0 %v10332_v50  ;;  %4808 = vmatpush.bf16.msra.mxu1 %v10336_v10  ;;  %v10283_v10 = vld [vmem:[#allocation2 + $0x24] sm:$0xf] }
 0x60d   : > { %5598 = vperm.xlu0 %11875, %v5576_v40   ;;  %5112 = vrot.lane.b32.xlu2 %v14444_v8, %s16826_s15  ;;  %v14455_v41 = vpop.permute.xlu2 %4466  ;;  %v10284_v15 = vor.u32 %v11547_v37, %v10283_v10  ;;  %v11545_v40 = vld [vmem:[#allocation2 + $0x10] sm:$0xf0] }
 0x60e   : > { %5104 = vrot.lane.b32.xlu1 %v14449_v34, %s16826_s15  ;;  %v14457_v38 = vpop.permute.xlu1 %4458  ;;  %v10276_v47 = vor.u32 %v11545_v40, %v10275_v13  ;;  %v5586_v40 = vld [vmem:[%s16690_s7 + $0x58] sm:$0xff] }
 0x610   : > { %4760 = vmatpush.bf16.msra.mxu0 %v10324_v11  ;;  %4809 = vmatpush.bf16.msra.mxu1 %v10328_v28  ;;  %v11544_v11 = vld [vmem:[#allocation2 + $0x8] sm:$0xf]  ;;  %v14483_v28 = vpop.permute.xlu0 %4420 }
 0x611   : > { %v10280_v2 = vor.u32 %v11544_v11, %v10277_v56  ;;  %v5585_v56 = vld [vmem:[%s16690_s7 + $0x50] sm:$0xff] }
 0x612   : > { %v11534_v11 = vld [vmem:[#allocation4 + $0x70] sm:$0xff] }
 0x614   : > { %4761 = vmatpush.bf16.msra.mxu0 %v10316_v0  ;;  %4810 = vmatpush.bf16.msra.mxu1 %v10320_v45 }
 0x615   : > { %5399 = vrot.lane.b32.xlu2 %v14370_v33, %s16827_s17  ;;  %v14465_v54 = vpop.permute.xlu2 %4442  ;;  %v14469_v33 = vor.u32 %v11576_v55, %v10403_v6  ;;  %v11570_v6 = vld [vmem:[#allocation2 + $0x18] sm:$0xf0] }
 0x616   : > { %5391 = vrot.lane.b32.xlu1 %v14377_v42, %s16827_s17  ;;  %v14467_v36 = vpop.permute.xlu1 %4452  ;;  %v10293_v42 = vld [vmem:[#allocation2 + $0x54] sm:$0xf0] }
 0x617   : > { %v10296_v39 = vor.u32 %v11548_v52, %v10293_v42  ;;  %v4478_v46 = vsel %vm972_vm4, %v14393_v18, %v14467_v36  ;;  %v11496_v52 = vld [vmem:[#allocation4] sm:$0xff] }
 0x618   : > { %4762 = vmatpush.bf16.msra.mxu0 %v10308_v9  ;;  %4811 = vmatpush.bf16.msra.mxu1 %v10312_v7  ;;  %v4480_v9 = vsel %vm972_vm4, %v14375_v32, %v14457_v38  ;;  %v14502_v7 = vpop.permute.xlu0 %5126  ;;  %v4479_v32 = vsel %vm972_vm4, %v14467_v36, %v14425_v31  ;;  %v11531_v36 = vld [vmem:[#allocation4 + $0x58] sm:$0xff] }
 0x61b   : > { %4287 = vmatmul.bf16.gmra.mxu0 %v11529_v30  ;;  %4336 = vmatmul.bf16.gmra.mxu1 %v11529_v30 }
 0x61c   : > { %4763 = vmatpush.bf16.msra.mxu0 %v10300_v59  ;;  %4812 = vmatpush.bf16.msra.mxu1 %v10304_v23 }
 0x61d   : > { %5106 = vrot.lane.b32.xlu2 %v14469_v33, %s16826_s15  ;;  %v14479_v35 = vpop.permute.xlu2 %4436 }
 0x61e   : > { %5098 = vrot.lane.b32.xlu1 %v14473_v24, %s16826_s15  ;;  %v4447_v50 = vpop.permute.xlu1 %4446 }
 0x620   : > { %4764 = vmatpush.bf16.msra.mxu0 %v10292_v61  ;;  %4813 = vmatpush.bf16.msra.mxu1 %v10296_v39  ;;  %v14523_v59 = vpop.permute.xlu0 %5120  ;;  %v11532_v61 = vld [vmem:[#allocation4 + $0x60] sm:$0xff] }
 0x624   : > { %4765 = vmatpush.bf16.msra.mxu0 %v10284_v15  ;;  %4814 = vmatpush.bf16.msra.mxu1 %v10288_v49  ;;  %v5590_v15 = vld [vmem:[%s16690_s7 + $0x78] sm:$0xff] }
 0x625   : > { %5393 = vrot.lane.b32.xlu2 %v14407_v14, %s16827_s17  ;;  %v4431_v63 = vpop.permute.xlu2 %4430  ;;  %v14491_v14 = vor.u32 %v11573_v26, %v10391_v25 }
 0x626   : > { %5385 = vrot.lane.b32.xlu1 %v14414_v1, %s16827_s17  ;;  %v4465_v0 = vpop.permute.xlu1 %4464  ;;  %v10460_v1 = vor.u32 %v11589_v3, %v10457_v44  ;;  %v11535_v3 = vld [vmem:[#allocation4 + $0x78] sm:$0xff] }
 0x627   : > { %v4482_v62 = vsel %vm972_vm4, %v14354_v21, %v4465_v0  ;;  %v4483_v45 = vsel %vm972_vm4, %v4465_v0, %v14455_v41  ;;  %v4481_v21 = vsel %vm972_vm4, %v14457_v38, %v14403_v53  ;;  %v4476_v53 = vsel %vm972_vm4, %v14423_v57, %v4447_v50 }
 0x628   : > { %4766 = vmatpush.bf16.msra.mxu0 %v10276_v47  ;;  %4815 = vmatpush.bf16.msra.mxu1 %v10280_v2  ;;  %v4477_v38 = vsel %vm972_vm4, %v4447_v50, %v14437_v60  ;;  %v11568_v60 = vld [vmem:[#allocation2 + $0x8] sm:$0xf]  ;;  %v11498_v2 = vld [vmem:[#allocation4 + $0x10] sm:$0xff] }
 0x629   : > { %4500 = vmatpush.bf16.msra.mxu2 %v4482_v62  ;;  %4549 = vmatpush.bf16.msra.mxu3 %v4483_v45  ;;  %v10376_v58 = vor.u32 %v11568_v60, %v10373_v19  ;;  %v11497_v50 = vld [vmem:[#allocation4 + $0x8] sm:$0xff]  ;;  %v5579_v45 = vld [vmem:[%s16690_s7 + $0x20] sm:$0xff] }
 0x62a   : > { %v5580_v62 = vld [vmem:[%s16690_s7 + $0x28] sm:$0xff] }
 0x62b   : > { %4292 = vmatmul.bf16.gmra.mxu0 %v11530_v5  ;;  %4341 = vmatmul.bf16.gmra.mxu1 %v11530_v5 }
 0x62d   : > { %5100 = vrot.lane.b32.xlu2 %v14491_v14, %s16826_s15  ;;  %4501 = vmatpush.bf16.msra.mxu2 %v4480_v9  ;;  %v4425_v41 = vpop.permute.xlu2 %4424  ;;  %v5575_v9 = vld [vmem:[%s16690_s7] sm:$0xff] }
 0x62e   : > { %5134 = vrot.lane.b32.xlu1 %v10460_v1, %s16826_s15  ;;  %4550 = vmatpush.bf16.msra.mxu3 %v4481_v21  ;;  %v4441_v43 = vpop.permute.xlu1 %4440  ;;  %v5578_v21 = vld [vmem:[%s16690_s7 + $0x18] sm:$0xff] }
 0x62f   : > { %v4474_v31 = vsel %vm972_vm4, %v14439_v20, %v4441_v43  ;;  %v4475_v57 = vsel %vm972_vm4, %v4441_v43, %v14465_v54 }
 0x631   : > { %4502 = vmatpush.bf16.msra.mxu2 %v4478_v46 }
 0x632   : > { %4551 = vmatpush.bf16.msra.mxu3 %v4479_v32 }
 0x635   : > { %5387 = vrot.lane.b32.xlu2 %v14444_v8, %s16827_s17  ;;  %4503 = vmatpush.bf16.msra.mxu2 %v4476_v53  ;;  %v14517_v18 = vpop.permute.xlu2 %5136  ;;  %v10380_v8 = vor.u32 %v11570_v6, %v10379_v12  ;;  %v11536_v53 = vld [vmem:[#allocation4 + $0x80] sm:$0xff] }
 0x636   : > { %5409 = vrot.lane.b32.xlu1 %v10460_v1, %s16827_s17  ;;  %4552 = vmatpush.bf16.msra.mxu3 %v4477_v38  ;;  %v4435_v55 = vpop.permute.xlu1 %4434  ;;  %v11499_v1 = vld [vmem:[#allocation4 + $0x18] sm:$0xff]  ;;  %v11500_v6 = vld [vmem:[#allocation4 + $0x20] sm:$0xff] }
 0x637   : > { %v4472_v30 = vsel %vm972_vm4, %v14459_v22, %v4435_v55  ;;  %v4473_v20 = vsel %vm972_vm4, %v4435_v55, %v14479_v35  ;;  %v14536_v22 = vpop.permute.xlu0 %5114 }
 0x639   : > { %4504 = vmatpush.bf16.msra.mxu2 %v4474_v31 }
 0x63a   : > { %4553 = vmatpush.bf16.msra.mxu3 %v4475_v57 }
 0x63b   : > { %4297 = vmatmul.bf16.gmra.mxu0 %v11531_v36  ;;  %4346 = vmatmul.bf16.gmra.mxu1 %v11531_v36 }
 0x63d   : > { %5094 = vrot.lane.b32.xlu2 %v10380_v8, %s16826_s15  ;;  %4505 = vmatpush.bf16.msra.mxu2 %v4472_v30  ;;  %v14531_v54 = vpop.permute.xlu2 %5130  ;;  %v11537_v30 = vld [vmem:[#allocation4 + $0x88] sm:$0xff] }
 0x63e   : > { %5092 = vrot.lane.b32.xlu1 %v10376_v58, %s16826_s15  ;;  %4554 = vmatpush.bf16.msra.mxu3 %v4473_v20  ;;  %v4429_v23 = vpop.permute.xlu1 %4428 }
 0x63f   : > { %v4470_v27 = vsel %vm972_vm4, %v14471_v16, %v4429_v23  ;;  %v4471_v51 = vsel %vm972_vm4, %v4429_v23, %v4431_v63  ;;  %v5584_v63 = vld [vmem:[%s16690_s7 + $0x48] sm:$0xff] }
 0x641   : > { %4506 = vmatpush.bf16.msra.mxu2 %v4470_v27  ;;  %v11501_v27 = vld [vmem:[#allocation4 + $0x28] sm:$0xff] }
 0x642   : > { %4555 = vmatpush.bf16.msra.mxu3 %v4471_v51 }
 0x645   : > { %5381 = vrot.lane.b32.xlu2 %v14469_v33, %s16827_s17  ;;  %v14542_v42 = vpop.permute.xlu2 %5124  ;;  %v14547_v33 = vpop.permute.xlu0 %5401 }
 0x646   : > { %5379 = vrot.lane.b32.xlu1 %v14449_v34, %s16827_s17  ;;  %v4423_v4 = vpop.permute.xlu1 %4422 }
 0x647   : > { %v4468_v17 = vsel %vm972_vm4, %v14483_v28, %v4423_v4  ;;  %v4469_v16 = vsel %vm972_vm4, %v4423_v4, %v4425_v41  ;;  %v5581_v28 = vld [vmem:[%s16690_s7 + $0x30] sm:$0xff] }
 0x648   : > { %4507 = vmatpush.bf16.msra.mxu2 %v4468_v17  ;;  %4556 = vmatpush.bf16.msra.mxu3 %v4469_v16 }
 0x64b   : > { %4302 = vmatmul.bf16.gmra.mxu0 %v11532_v61  ;;  %4351 = vmatmul.bf16.gmra.mxu1 %v11532_v61 }
 0x64c   : > { %4508 = vmatmul.bf16.vlgmr.msra.gmra.mxu2 %v11496_v52  ;;  %4557 = vmatmul.bf16.vlgmr.msra.gmra.mxu3 %v11496_v52 }
 0x64d   : > { %5375 = vrot.lane.b32.xlu2 %v14491_v14, %s16827_s17  ;;  %v14555_v39 = vpop.permute.xlu2 %5411  ;;  %v14561_v35 = vpop.permute.xlu0 %5108 }
 0x64e   : > { %5373 = vrot.lane.b32.xlu1 %v14473_v24, %s16827_s17  ;;  %v14553_v34 = vpop.permute.xlu1 %5128  ;;  %v5587_v24 = vld [vmem:[%s16690_s7 + $0x60] sm:$0xff] }
 0x655   : > { %5369 = vrot.lane.b32.xlu2 %v10380_v8, %s16827_s17  ;;  %v14563_v10 = vpop.permute.xlu2 %5118  ;;  %v14573_v49 = vpop.permute.xlu0 %5395 }
 0x656   : > { %5367 = vrot.lane.b32.xlu1 %v10376_v58, %s16827_s17  ;;  %v14559_v37 = vpop.permute.xlu1 %5122 }
 0x65b   : > { %4307 = vmatmul.bf16.gmra.mxu0 %v11533_v29  ;;  %4356 = vmatmul.bf16.gmra.mxu1 %v11533_v29 }
 0x65c   : > { %4513 = vmatmul.bf16.gmra.mxu2 %v11497_v50  ;;  %4562 = vmatmul.bf16.gmra.mxu3 %v11497_v50  ;;  %v5150_v50 = vsel %vm1558_vm5, %v14502_v7, %v14553_v34  ;;  %v5149_v7 = vsel %vm1558_vm5, %v14559_v37, %v14542_v42 }
 0x65d   : > { %5653 = vperm.xlu2 %11877, %v5587_v24   ;;  %v14581_v13 = vpop.permute.xlu2 %5405  ;;  %v14591_v25 = vpop.permute.xlu0 %5102  ;;  %v5151_v24 = vsel %vm1558_vm5, %v14553_v34, %v14531_v54 }
 0x65e   : > { %5668 = vperm.xlu1 %11876, %v5590_v15   ;;  %v14571_v48 = vpop.permute.xlu1 %5116 }
 0x65f   : > { %v5147_v42 = vsel %vm1558_vm5, %v14571_v48, %v14563_v10 }
 0x665   : > { %5648 = vperm.xlu2 %11877, %v5586_v40   ;;  %v14603_v5 = vpop.permute.xlu0 %5389 }
 0x666   : > { %5643 = vperm.xlu1 %11876, %v5585_v56   ;;  %v14583_v47 = vpop.permute.xlu1 %5403  ;;  %v11538_v56 = vld [vmem:[#allocation4 + $0x90] sm:$0xff] }
 0x667   : > { %v14593_v26 = vpop.permute.xlu2 %5112 }
 0x66b   : > { %4312 = vmatmul.bf16.gmra.mxu0 %v11534_v11  ;;  %4361 = vmatmul.bf16.gmra.mxu1 %v11534_v11 }
 0x66c   : > { %4518 = vmatmul.bf16.gmra.mxu2 %v11498_v2  ;;  %4567 = vmatmul.bf16.gmra.mxu3 %v11498_v2 }
 0x66d   : > { %5623 = vperm.xlu2 %11877, %v5581_v28   ;;  %v14615_v41 = vpop.permute.xlu0 %5096  ;;  %v11502_v28 = vld [vmem:[#allocation4 + $0x30] sm:$0xff] }
 0x66e   : > { %5638 = vperm.xlu1 %11876, %v5584_v63   ;;  %v14595_v0 = vpop.permute.xlu1 %5110 }
 0x66f   : > { %v14607_v44 = vpop.permute.xlu2 %5399  ;;  %v5144_v10 = vsel %vm1558_vm5, %v14561_v35, %v14595_v0 }
 0x675   : > { %5618 = vperm.xlu2 %11877, %v5580_v62   ;;  %v14627_v55 = vpop.permute.xlu0 %5383 }
 0x676   : > { %5613 = vperm.xlu1 %11876, %v5579_v45   ;;  %v14605_v14 = vpop.permute.xlu1 %5397 }
 0x677   : > { %v14619_v46 = vpop.permute.xlu2 %5106 }
 0x67b   : > { %4317 = vmatmul.bf16.gmra.mxu0 %v11535_v3  ;;  %4366 = vmatmul.bf16.gmra.mxu1 %v11535_v3 }
 0x67c   : > { %4523 = vmatmul.bf16.gmra.mxu2 %v11499_v1  ;;  %4572 = vmatmul.bf16.gmra.mxu3 %v11499_v1 }
 0x67d   : > { %5593 = vperm.xlu2 %11877, %v5575_v9   ;;  %v5133_v19 = vpop.permute.xlu0 %5132 }
 0x67e   : > { %5608 = vperm.xlu1 %11876, %v5578_v21   ;;  %v11503_v21 = vld [vmem:[#allocation4 + $0x38] sm:$0xff] }
 0x67f   : > { %v14629_v31 = vpop.permute.xlu2 %5393 }
 0x680   : > { %v14617_v43 = vpop.permute.xlu1 %5104 }
 0x681   : > { %v5142_v35 = vsel %vm1558_vm5, %v14591_v25, %v14617_v43 }
 0x685   : > { %v5408_v51 = vpop.permute.xlu0 %5407 }
 0x687   : > { %v14637_v60 = vpop.permute.xlu2 %5100 }
 0x688   : > { %v14621_v32 = vpop.permute.xlu1 %5391  ;;  %v14623_v38 = vpop.f32.mrf.mxu0 }
 0x689   : > { %v14625_v12 = vpop.f32.mrf.mxu1 }
 0x68b   : > { %4767 = vmatmul.bf16.vlgmr.msra.gmra.mxu0 %v11536_v53  ;;  %4816 = vmatmul.bf16.vlgmr.msra.gmra.mxu1 %v11536_v53 }
 0x68c   : > { %4528 = vmatmul.bf16.gmra.mxu2 %v11500_v6  ;;  %4577 = vmatmul.bf16.gmra.mxu3 %v11500_v6 }
 0x68d   : > { %v14660_v15 = vpop.permute.xlu0 %5090 }
 0x68f   : > { %v14645_v4 = vpop.permute.xlu2 %5387 }
 0x690   : > { %v14631_v36 = vpop.permute.xlu1 %5098  ;;  %v14633_v57 = vpop.f32.mrf.mxu0 }
 0x691   : > { %v14635_v8 = vpop.f32.mrf.mxu1  ;;  %v5140_v9 = vsel %vm1558_vm5, %v14615_v41, %v14631_v36 }
 0x697   : > { %v5095_v63 = vpop.permute.xlu2 %5094 }
 0x698   : > { %v14639_v58 = vpop.permute.xlu1 %5385  ;;  %v14641_v20 = vpop.f32.mrf.mxu0 }
 0x699   : > { %v14643_v23 = vpop.f32.mrf.mxu1 }
 0x69b   : > { %4772 = vmatmul.bf16.gmra.mxu0 %v11537_v30  ;;  %4821 = vmatmul.bf16.gmra.mxu1 %v11537_v30 }
 0x69c   : > { %4533 = vmatmul.bf16.gmra.mxu2 %v11501_v27  ;;  %4582 = vmatmul.bf16.gmra.mxu3 %v11501_v27 }
 0x69f   : > { %v5382_v3 = vpop.permute.xlu2 %5381 }
 0x6a0   : > { %v5135_v17 = vpop.permute.xlu1 %5134  ;;  %v14647_v16 = vpop.f32.mrf.mxu0 }
 0x6a1   : > { %v14649_v61 = vpop.f32.mrf.mxu1  ;;  %v5152_v52 = vsel %vm1558_vm5, %v5133_v19, %v5135_v17  ;;  %v5153_v29 = vsel %vm1558_vm5, %v5135_v17, %v14517_v18  ;;  %v5148_v18 = vsel %vm1558_vm5, %v14523_v59, %v14559_v37  ;;  %v5146_v59 = vsel %vm1558_vm5, %v14536_v22, %v14571_v48  ;;  %v11540_v17 = vld [vmem:[#allocation4 + $0xa0] sm:$0xff] }
 0x6a2   : > { %5170 = vmatpush.bf16.msrb.mxu2 %v5152_v52  ;;  %5219 = vmatpush.bf16.msrb.mxu3 %v5153_v29  ;;  %v5426_v37 = vsel %vm1820_vm6, %v14583_v47, %v14581_v13  ;;  %v5145_v48 = vsel %vm1558_vm5, %v14595_v0, %v14593_v26  ;;  %v5424_v13 = vsel %vm1820_vm6, %v14605_v14, %v14607_v44  ;;  %v11539_v44 = vld [vmem:[#allocation4 + $0x98] sm:$0xff] }
 0x6a3   : > { %v5143_v26 = vsel %vm1558_vm5, %v14617_v43, %v14619_v46  ;;  %v5422_v0 = vsel %vm1820_vm6, %v14621_v32, %v14629_v31  ;;  %v5419_v43 = vsel %vm1820_vm6, %v14627_v55, %v14639_v58  ;;  %v5420_v46 = vsel %vm1820_vm6, %v14639_v58, %v14645_v4 }
 0x6a6   : > { %5171 = vmatpush.bf16.msrb.mxu2 %v5150_v50  ;;  %5220 = vmatpush.bf16.msrb.mxu3 %v5151_v24 }
 0x6a7   : > { %v5376_v6 = vpop.permute.xlu2 %5375 }
 0x6a8   : > { %v5410_v40 = vpop.permute.xlu1 %5409  ;;  %v14662_v11 = vpop.f32.mrf.mxu0 }
 0x6a9   : > { %v14664_v2 = vpop.f32.mrf.mxu1  ;;  %v5427_v54 = vsel %vm1820_vm6, %v5408_v51, %v5410_v40  ;;  %v5428_v34 = vsel %vm1820_vm6, %v5410_v40, %v14555_v39  ;;  %v5425_v39 = vsel %vm1820_vm6, %v14547_v33, %v14583_v47  ;;  %v5423_v33 = vsel %vm1820_vm6, %v14573_v49, %v14605_v14  ;;  %v5378_v47 = vpop.permute.xlu0 %5377 }
 0x6aa   : > { %5172 = vmatpush.bf16.msrb.mxu2 %v5148_v18  ;;  %5221 = vmatpush.bf16.msrb.mxu3 %v5149_v7  ;;  %v5421_v49 = vsel %vm1820_vm6, %v14603_v5, %v14621_v32  ;;  %v5141_v5 = vsel %vm1558_vm5, %v14631_v36, %v14637_v60 }
 0x6ab   : > { %5445 = vmatpush.bf16.msrb.mxu0 %v5427_v54  ;;  %5494 = vmatpush.bf16.msrb.mxu1 %v5428_v34 }
 0x6ac   : > { %4777 = vmatmul.bf16.gmra.mxu0 %v11538_v56  ;;  %4826 = vmatmul.bf16.gmra.mxu1 %v11538_v56 }
 0x6ad   : > { %4538 = vmatmul.bf16.gmra.mxu2 %v11502_v28  ;;  %4587 = vmatmul.bf16.gmra.mxu3 %v11502_v28  ;;  %v11541_v28 = vld [vmem:[#allocation4 + $0xa8] sm:$0xff] }
 0x6ae   : > { %5173 = vmatpush.bf16.msrb.mxu2 %v5146_v59  ;;  %5222 = vmatpush.bf16.msrb.mxu3 %v5147_v42  ;;  %v11561_v42 = vld [vmem:[#allocation4 + $0xc8] sm:$0xff] }
 0x6af   : > { %5446 = vmatpush.bf16.msrb.mxu0 %v5425_v39  ;;  %5495 = vmatpush.bf16.msrb.mxu1 %v5426_v37  ;;  %v5370_v51 = vpop.permute.xlu2 %5369 }
 0x6b0   : > { %v5093_v62 = vpop.permute.xlu1 %5092  ;;  %v14687_v45 = vpop.f32.mrf.mxu0 }
 0x6b1   : > { %v14689_v22 = vpop.f32.mrf.mxu1  ;;  %v5372_v41 = vpop.permute.xlu0 %5371  ;;  %v5138_v32 = vsel %vm1558_vm5, %v14660_v15, %v5093_v62  ;;  %v5139_v53 = vsel %vm1558_vm5, %v5093_v62, %v5095_v63  ;;  %v11560_v15 = vld [vmem:[#allocation4 + $0xc0] sm:$0xff] }
 0x6b2   : > { %5174 = vmatpush.bf16.msrb.mxu2 %v5144_v10  ;;  %5223 = vmatpush.bf16.msrb.mxu3 %v5145_v48 }
 0x6b3   : > { %5447 = vmatpush.bf16.msrb.mxu0 %v5423_v33  ;;  %5496 = vmatpush.bf16.msrb.mxu1 %v5424_v13  ;;  %v11542_v13 = vld [vmem:[#allocation4 + $0xb0] sm:$0xff] }
 0x6b6   : > { %5175 = vmatpush.bf16.msrb.mxu2 %v5142_v35  ;;  %5224 = vmatpush.bf16.msrb.mxu3 %v5143_v26  ;;  %v11562_v35 = vld [vmem:[#allocation4 + $0xd0] sm:$0xff] }
 0x6b7   : > { %5448 = vmatpush.bf16.msrb.mxu0 %v5421_v49  ;;  %5497 = vmatpush.bf16.msrb.mxu1 %v5422_v0 }
 0x6b8   : > { %v5380_v14 = vpop.permute.xlu1 %5379  ;;  %v14715_v1 = vpop.f32.mrf.mxu0 }
 0x6b9   : > { %v14717_v25 = vpop.f32.mrf.mxu1  ;;  %v5417_v55 = vsel %vm1820_vm6, %v5378_v47, %v5380_v14  ;;  %v5418_v31 = vsel %vm1820_vm6, %v5380_v14, %v5382_v3  ;;  %v5366_v27 = vpop.permute.xlu0 %5365 }
 0x6ba   : > { %5176 = vmatpush.bf16.msrb.mxu2 %v5140_v9  ;;  %5225 = vmatpush.bf16.msrb.mxu3 %v5141_v5  ;;  %v11543_v5 = vld [vmem:[#allocation4 + $0xb8] sm:$0xff] }
 0x6bb   : > { %5449 = vmatpush.bf16.msrb.mxu0 %v5419_v43  ;;  %5498 = vmatpush.bf16.msrb.mxu1 %v5420_v46  ;;  %v11563_v46 = vld [vmem:[#allocation4 + $0xd8] sm:$0xff] }
 0x6bc   : > { %4782 = vmatmul.bf16.gmra.mxu0 %v11539_v44  ;;  %4831 = vmatmul.bf16.gmra.mxu1 %v11539_v44 }
 0x6bd   : > { %4543 = vmatmul.bf16.gmra.mxu2 %v11503_v21  ;;  %4592 = vmatmul.bf16.gmra.mxu3 %v11503_v21 }
 0x6be   : > { %5177 = vmatpush.bf16.msrb.mxu2 %v5138_v32  ;;  %5226 = vmatpush.bf16.msrb.mxu3 %v5139_v53 }
 0x6bf   : > { %5450 = vmatpush.bf16.msrb.mxu0 %v5417_v55  ;;  %5499 = vmatpush.bf16.msrb.mxu1 %v5418_v31 }
 0x6c0   : > { %v5374_v36 = vpop.permute.xlu1 %5373  ;;  %v14736_v19 = vpop.f32.mrf.mxu0 }
 0x6c1   : > { %v14738_v60 = vpop.f32.mrf.mxu1  ;;  %v5415_v58 = vsel %vm1820_vm6, %v5372_v41, %v5374_v36  ;;  %v5416_v30 = vsel %vm1820_vm6, %v5374_v36, %v5376_v6  ;;  %v11592_v36 = vld [vmem:[#allocation4 + $0x100] sm:$0xff] }
 0x6c3   : > { %5451 = vmatpush.bf16.msrb.mxu0 %v5415_v58  ;;  %5500 = vmatpush.bf16.msrb.mxu1 %v5416_v30 }
 0x6c8   : > { %v5368_v4 = vpop.permute.xlu1 %5367  ;;  %v14742_v52 = vpop.f32.mrf.mxu0 }
 0x6c9   : > { %v14744_v29 = vpop.f32.mrf.mxu1  ;;  %v5413_v50 = vsel %vm1820_vm6, %v5366_v27, %v5368_v4  ;;  %v5414_v24 = vsel %vm1820_vm6, %v5368_v4, %v5370_v51  ;;  %v11564_v51 = vld [vmem:[#allocation4 + $0xe0] sm:$0xff] }
 0x6ca   : > { %5452 = vmatpush.bf16.msrb.mxu0 %v5413_v50  ;;  %5501 = vmatpush.bf16.msrb.mxu1 %v5414_v24 }
 0x6cc   : > { %4787 = vmatmul.bf16.gmra.mxu0 %v11540_v17  ;;  %4836 = vmatmul.bf16.gmra.mxu1 %v11540_v17 }
 0x6cd   : > { %5178 = vmatmul.bf16.vlgmr.msrb.gmra.mxu2 %v11560_v15  ;;  %5227 = vmatmul.bf16.vlgmr.msrb.gmra.mxu3 %v11560_v15 }
 0x6cf   : > { %v4558_v40 = vpop.f32.mrf.mxu3  ;;  %v4509_v18 = vpop.f32.mrf.mxu2 }
 0x6d0   : > { %v4559_v56 = vadd.f32 %v4558_v40, %v14625_v12  ;;  %v14749_v7 = vpop.f32.mrf.mxu0  ;;  %v4510_v58 = vadd.f32 %v4509_v18, %v14623_v38 }
 0x6d1   : > { %v14751_v54 = vpop.f32.mrf.mxu1 }
 0x6d7   : > { %v4560_v34 = vpop.f32.mrf.mxu3  ;;  %v4511_v59 = vpop.f32.mrf.mxu2 }
 0x6d8   : > { %v14754_v63 = vadd.f32 %v4560_v34, %v14635_v8  ;;  %v14756_v39 = vpop.f32.mrf.mxu0  ;;  %v4512_v15 = vadd.f32 %v4511_v59, %v14633_v57  ;;  %v11565_v59 = vld [vmem:[#allocation4 + $0xe8] sm:$0xff] }
 0x6d9   : > { %v14758_v37 = vpop.f32.mrf.mxu1 }
 0x6dc   : > { %4792 = vmatmul.bf16.gmra.mxu0 %v11541_v28  ;;  %4841 = vmatmul.bf16.gmra.mxu1 %v11541_v28 }
 0x6dd   : > { %5183 = vmatmul.bf16.gmra.mxu2 %v11561_v42  ;;  %5232 = vmatmul.bf16.gmra.mxu3 %v11561_v42 }
 0x6df   : > { %v4563_v12 = vpop.f32.mrf.mxu3  ;;  %v4514_v10 = vpop.f32.mrf.mxu2 }
 0x6e0   : > { %v14761_v62 = vadd.f32 %v4563_v12, %v14643_v23  ;;  %v14763_v48 = vpop.f32.mrf.mxu0  ;;  %v11593_v12 = vld [vmem:[#allocation4 + $0x108] sm:$0xff] }
 0x6e1   : > { %v14765_v33 = vpop.f32.mrf.mxu1 }
 0x6e7   : > { %v4565_v8 = vpop.f32.mrf.mxu3  ;;  %v14770_v3 = vpop.f32.mrf.mxu2 }
 0x6e8   : > { %v14768_v47 = vadd.f32 %v4565_v8, %v14649_v61  ;;  %v14772_v26 = vpop.f32.mrf.mxu0  ;;  %v4515_v8 = vadd.f32 %v4514_v10, %v14641_v20 }
 0x6e9   : > { %v14774_v49 = vpop.f32.mrf.mxu1 }
 0x6ec   : > { %4797 = vmatmul.bf16.gmra.mxu0 %v11542_v13  ;;  %4846 = vmatmul.bf16.gmra.mxu1 %v11542_v13 }
 0x6ed   : > { %5188 = vmatmul.bf16.gmra.mxu2 %v11562_v35  ;;  %5237 = vmatmul.bf16.gmra.mxu3 %v11562_v35 }
 0x6ef   : > { %v4568_v23 = vpop.f32.mrf.mxu3  ;;  %v14779_v14 = vpop.f32.mrf.mxu2 }
 0x6f0   : > { %v14777_v0 = vadd.f32 %v4568_v23, %v14664_v2  ;;  %v14781_v44 = vpop.f32.mrf.mxu0  ;;  %v4517_v23 = vadd.f32 %v14770_v3, %v14647_v16  ;;  %v11566_v3 = vld [vmem:[#allocation4 + $0xf0] sm:$0xff] }
 0x6f1   : > { %16828 = vst [vmem:[#allocation31_spill] sm:$0xff] %v14781_v44  ;;  %v14783_v61 = vpop.f32.mrf.mxu1 }
 0x6f2   : > { %16829 = vst [vmem:[#allocation32_spill] sm:$0xff] %v14783_v61 }
 0x6f7   : > { %v4570_v9 = vpop.f32.mrf.mxu3  ;;  %v14785_v21 = vpop.f32.mrf.mxu2 }
 0x6f8   : > { %v14788_v43 = vadd.f32 %v4570_v9, %v14689_v22  ;;  %v14790_v41 = vpop.f32.mrf.mxu0 }
 0x6f9   : > { %v14792_v32 = vpop.f32.mrf.mxu1 }
 0x6fc   : > { %4802 = vmatmul.bf16.gmra.mxu0 %v11543_v5  ;;  %4851 = vmatmul.bf16.gmra.mxu1 %v11543_v5 }
 0x6fd   : > { %5193 = vmatmul.bf16.gmra.mxu2 %v11563_v46  ;;  %5242 = vmatmul.bf16.gmra.mxu3 %v11563_v46 }
 0x6ff   : > { %v4573_v2 = vpop.f32.mrf.mxu3  ;;  %v14794_v53 = vpop.f32.mrf.mxu2 }
 0x700   : > { %v14797_v6 = vadd.f32 %v4573_v2, %v14717_v25  ;;  %v14799_v55 = vpop.f32.mrf.mxu0 }
 0x701   : > { %16830 = vst [vmem:[#allocation22_spill] sm:$0xff] %v14799_v55  ;;  %v14801_v31 = vpop.f32.mrf.mxu1 }
 0x702   : > { %16831 = vst [vmem:[#allocation34_spill] sm:$0xff] %v14801_v31 }
 0x707   : > { %v4575_v22 = vpop.f32.mrf.mxu3  ;;  %v14804_v30 = vpop.f32.mrf.mxu2 }
 0x708   : > { %v14807_v27 = vadd.f32 %v4575_v22, %v14738_v60  ;;  %v4768_v4 = vpop.f32.mrf.mxu0 }
 0x709   : > { %v4817_v17 = vpop.f32.mrf.mxu1  ;;  %v14809_v50 = vadd.f32 %v4768_v4, %v4510_v58  ;;  %v4520_v58 = vadd.f32 %v14779_v14, %v14662_v11 }
 0x70a   : > { %v14811_v25 = vadd.f32 %v4817_v17, %v4559_v56  ;;  %v4522_v17 = vadd.f32 %v14785_v21, %v14687_v45  ;;  %v11567_v45 = vld [vmem:[#allocation4 + $0xf8] sm:$0xff] }
 0x70c   : > { %5453 = vmatmul.bf16.vlgmr.msrb.gmra.mxu0 %v11592_v36  ;;  %5502 = vmatmul.bf16.vlgmr.msrb.gmra.mxu1 %v11592_v36  ;;  %v11594_v36 = vld [vmem:[#allocation4 + $0x110] sm:$0xff] }
 0x70d   : > { %5198 = vmatmul.bf16.gmra.mxu2 %v11564_v51  ;;  %5247 = vmatmul.bf16.gmra.mxu3 %v11564_v51 }
 0x70f   : > { %v4578_v24 = vpop.f32.mrf.mxu3  ;;  %v4529_v38 = vpop.f32.mrf.mxu2 }
 0x710   : > { %v14815_v40 = vadd.f32 %v4578_v24, %v14744_v29  ;;  %v14818_v60 = vadd.f32 %v4529_v38, %v14742_v52  ;;  %v4770_v18 = vpop.f32.mrf.mxu0 }
 0x711   : > { %v4819_v34 = vpop.f32.mrf.mxu1  ;;  %v14820_v28 = vadd.f32 %v4770_v18, %v4512_v15 }
 0x712   : > { %v14823_v56 = vadd.f32 %v4819_v34, %v14754_v63 }
 0x717   : > { %v14825_v42 = vpop.f32.mrf.mxu3  ;;  %v14828_v57 = vpop.f32.mrf.mxu2 }
 0x718   : > { %v4773_v29 = vpop.f32.mrf.mxu0 }
 0x719   : > { %v4822_v13 = vpop.f32.mrf.mxu1  ;;  %v14830_v35 = vadd.f32 %v4773_v29, %v4515_v8  ;;  %v4525_v8 = vadd.f32 %v14794_v53, %v14715_v1 }
 0x71a   : > { %v14833_v52 = vadd.f32 %v4822_v13, %v14761_v62  ;;  %v4527_v13 = vadd.f32 %v14804_v30, %v14736_v19  ;;  %v11597_v30 = vld [vmem:[#allocation4 + $0x128] sm:$0xff] }
 0x71c   : > { %5458 = vmatmul.bf16.gmra.mxu0 %v11593_v12  ;;  %5507 = vmatmul.bf16.gmra.mxu1 %v11593_v12  ;;  %v11595_v12 = vld [vmem:[#allocation4 + $0x118] sm:$0xff] }
 0x71d   : > { %5203 = vmatmul.bf16.gmra.mxu2 %v11565_v59  ;;  %5252 = vmatmul.bf16.gmra.mxu3 %v11565_v59 }
 0x71f   : > { %v4583_v63 = vpop.f32.mrf.mxu3  ;;  %v4534_v9 = vpop.f32.mrf.mxu2 }
 0x720   : > { %v14838_v20 = vadd.f32 %v4583_v63, %v14758_v37  ;;  %v4535_v10 = vadd.f32 %v4534_v9, %v14756_v39  ;;  %v4775_v5 = vpop.f32.mrf.mxu0 }
 0x721   : > { %v4824_v46 = vpop.f32.mrf.mxu1  ;;  %v14841_v2 = vadd.f32 %v4775_v5, %v4517_v23 }
 0x722   : > { %v14844_v62 = vadd.f32 %v4824_v46, %v14768_v47  ;;  %v11596_v46 = vld [vmem:[#allocation4 + $0x120] sm:$0xff] }
 0x727   : > { %v14846_v22 = vpop.f32.mrf.mxu3  ;;  %v14850_v16 = vpop.f32.mrf.mxu2 }
 0x729   : > { %v4778_v37 = vpop.f32.mrf.mxu0  ;;  %v4827_v51 = vpop.f32.mrf.mxu1 }
 0x72a   : > { %v14852_v4 = vadd.f32 %v4778_v37, %v4520_v58  ;;  %v14855_v39 = vadd.f32 %v4827_v51, %v14777_v0 }
 0x72c   : > { %5463 = vmatmul.bf16.gmra.mxu0 %v11594_v36  ;;  %5512 = vmatmul.bf16.gmra.mxu1 %v11594_v36 }
 0x72d   : > { %5208 = vmatmul.bf16.gmra.mxu2 %v11566_v3  ;;  %5257 = vmatmul.bf16.gmra.mxu3 %v11566_v3 }
 0x730   : > { %v4588_v47 = vpop.f32.mrf.mxu3  ;;  %v4539_v24 = vpop.f32.mrf.mxu2 }
 0x731   : > { %v4589_v11 = vadd.f32 %v4588_v47, %v14774_v49  ;;  %v4540_v14 = vadd.f32 %v4539_v24, %v14772_v26  ;;  %v4780_v15 = vpop.f32.mrf.mxu0  ;;  %v4829_v38 = vpop.f32.mrf.mxu1 }
 0x732   : > { %v14861_v18 = vadd.f32 %v4780_v15, %v4522_v17  ;;  %v14864_v0 = vadd.f32 %v4829_v38, %v14788_v43  ;;  %v14907_v17 = vpop.permute.xlu0 %5663  ;;  %v14913_v38 = vpop.permute.xlu2 %5653 }
 0x733   : > { %16836 = vst [vmem:[#allocation30_spill] sm:$0xff] %v14907_v17 }
 0x734   : > { %16839 = vst [vmem:[#allocation19_spill] sm:$0xff] %v14913_v38 }
 0x738   : > { %v14866_v34 = vpop.f32.mrf.mxu3  ;;  %v14870_v59 = vpop.f32.mrf.mxu2 }
 0x739   : > { %16832 = vst [vmem:[#allocation18_spill] sm:$0xff] %v14866_v34  ;;  %v4783_v21 = vpop.f32.mrf.mxu0  ;;  %v4832_v49 = vpop.f32.mrf.mxu1 }
 0x73a   : > { %16833 = vst [vmem:[#allocation26_spill] sm:$0xff] %v14870_v59  ;;  %v14872_v29 = vadd.f32 %v4783_v21, %v4525_v8  ;;  %v14875_v26 = vadd.f32 %v4832_v49, %v14797_v6  ;;  %v11598_v8 = vld [vmem:[#allocation4 + $0x130] sm:$0xff] }
 0x73c   : > { %5468 = vmatmul.bf16.gmra.mxu0 %v11595_v12  ;;  %5517 = vmatmul.bf16.gmra.mxu1 %v11595_v12 }
 0x73d   : > { %5213 = vmatmul.bf16.gmra.mxu2 %v11567_v45  ;;  %5262 = vmatmul.bf16.gmra.mxu3 %v11567_v45  ;;  %v10615_v45 = vld [vmem:[#allocation3 + $0xe0] sm:$0xf] }
 0x740   : > { %v4593_v43 = vpop.f32.mrf.mxu3  ;;  %v4544_v63 = vpop.f32.mrf.mxu2 }
 0x741   : > { %v14880_v1 = vadd.f32 %v4593_v43, %v14792_v32  ;;  %v4545_v53 = vadd.f32 %v4544_v63, %v14790_v41  ;;  %v4785_v23 = vpop.f32.mrf.mxu0  ;;  %v4834_v9 = vpop.f32.mrf.mxu1 }
 0x742   : > { %v14883_v5 = vadd.f32 %v4785_v23, %v4527_v13  ;;  %v14886_v6 = vadd.f32 %v4834_v9, %v14807_v27  ;;  %v14917_v13 = vpop.permute.xlu0 %5658  ;;  %v14925_v9 = vpop.permute.xlu2 %5648 }
 0x743   : > { %16840 = vst [vmem:[#allocation35_spill] sm:$0xff] %v14917_v13 }
 0x744   : > { %16844 = vst [vmem:[#allocation28_spill] sm:$0xff] %v14925_v9 }
 0x749   : > { %v4788_v36 = vpop.f32.mrf.mxu0  ;;  %v4837_v58 = vpop.f32.mrf.mxu1 }
 0x74a   : > { %v14889_v3 = vadd.f32 %v4788_v36, %v14818_v60  ;;  %v14892_v19 = vadd.f32 %v4837_v58, %v14815_v40  ;;  %v14903_v60 = vpop.f32.mrf.mxu2  ;;  %v14905_v40 = vpop.f32.mrf.mxu3  ;;  %v11627_v36 = vld [vmem:[#allocation3 + $0xcc] sm:$0xf0] }
 0x74b   : > { %16834 = vst [vmem:[#allocation16_spill] sm:$0xff] %v14903_v60 }
 0x74c   : > { %5473 = vmatmul.bf16.gmra.mxu0 %v11596_v46  ;;  %5522 = vmatmul.bf16.gmra.mxu1 %v11596_v46  ;;  %16835 = vst [vmem:[#allocation27_spill] sm:$0xff] %v14905_v40  ;;  %v10603_v46 = vld [vmem:[#allocation3 + $0xc0] sm:$0xf] }
 0x751   : > { %v14894_v32 = vpop.f32.mrf.mxu0  ;;  %v14896_v41 = vpop.f32.mrf.mxu1 }
 0x752   : > { %v5179_v12 = vpop.f32.mrf.mxu2 }
 0x753   : > { %v5268_v38 = vadd.f32 %v5179_v12, %v14809_v50  ;;  %v11615_v50 = vld [vmem:[#allocation3 + $0x4c] sm:$0xf0] }
 0x759   : > { %v4793_v37 = vpop.f32.mrf.mxu0  ;;  %v4842_v51 = vpop.f32.mrf.mxu1 }
 0x75a   : > { %v14898_v27 = vadd.f32 %v4793_v37, %v4535_v10  ;;  %v14901_v47 = vadd.f32 %v4842_v51, %v14838_v20  ;;  %v5228_v10 = vpop.f32.mrf.mxu3  ;;  %v11630_v20 = vld [vmem:[#allocation3 + $0xec] sm:$0xf0]  ;;  %v5181_v58 = vpop.f32.mrf.mxu2  ;;  %v14927_v37 = vor.u32 %v11627_v36, %v10603_v46 }
 0x75b   : > { %v14915_v21 = vor.u32 %v11630_v20, %v10615_v45  ;;  %v10591_v20 = vld [vmem:[#allocation3 + $0xa0] sm:$0xf]  ;;  %v5269_v34 = vadd.f32 %v5228_v10, %v14811_v25  ;;  %v5270_v25 = vadd.f32 %v5181_v58, %v14820_v28 }
 0x75c   : > { %5478 = vmatmul.bf16.gmra.mxu0 %v11597_v30  ;;  %5527 = vmatmul.bf16.gmra.mxu1 %v11597_v30  ;;  %v10543_v28 = vld [vmem:[#allocation3 + $0x20] sm:$0xf] }
 0x75d   : > { %6026 = vrot.lane.b32.xlu1 %v14915_v21, %s16843_s16 }
 0x761   : > { %v14909_v24 = vpop.f32.mrf.mxu0  ;;  %v14911_v15 = vpop.f32.mrf.mxu1 }
 0x762   : > { %16837 = vst [vmem:[#allocation20_spill] sm:$0xff] %v14909_v24  ;;  %v5230_v30 = vpop.f32.mrf.mxu3  ;;  %v5184_v40 = vpop.f32.mrf.mxu2 }
 0x763   : > { %16838 = vst [vmem:[#allocation25_spill] sm:$0xff] %v14911_v15  ;;  %v5272_v58 = vadd.f32 %v5184_v40, %v14830_v35  ;;  %v11609_v35 = vld [vmem:[#allocation3 + $0xc] sm:$0xf0] }
 0x765   : > { %6020 = vrot.lane.b32.xlu1 %v14927_v37, %s16843_s16 }
 0x769   : > { %v4798_v49 = vpop.f32.mrf.mxu0  ;;  %v4847_v43 = vpop.f32.mrf.mxu1 }
 0x76a   : > { %v14919_v63 = vadd.f32 %v4798_v49, %v4540_v14  ;;  %v14921_v23 = vadd.f32 %v4847_v43, %v4589_v11  ;;  %v14935_v11 = vpop.permute.xlu0 %5633  ;;  %v14937_v14 = vpop.permute.xlu2 %5623  ;;  %v11624_v49 = vld [vmem:[#allocation3 + $0xac] sm:$0xf0] }
 0x76b   : > { %v14939_v43 = vpop.permute.xlu1 %5668  ;;  %v14941_v17 = vor.u32 %v11624_v49, %v10591_v20  ;;  %v5233_v31 = vpop.f32.mrf.mxu3 }
 0x76c   : > { %16841 = vst [vmem:[#allocation36_spill] sm:$0xff] %v14919_v63  ;;  %5483 = vmatmul.bf16.gmra.mxu0 %v11598_v8  ;;  %5532 = vmatmul.bf16.gmra.mxu1 %v11598_v8  ;;  %v11599_v8 = vld [vmem:[#allocation4 + $0x138] sm:$0xff] }
 0x76d   : > { %16842 = vst [vmem:[#allocation37_spill] sm:$0xff] %v14921_v23  ;;  %6014 = vrot.lane.b32.xlu1 %v14941_v17, %s16843_s16 }
 0x76e   : > { %16847 = vst [vmem:[#allocation29_spill] sm:$0xff] %v14939_v43  ;;  %v11621_v43 = vld [vmem:[#allocation3 + $0x8c] sm:$0xf0] }
 0x771   : > { %v14929_v51 = vpop.f32.mrf.mxu0  ;;  %v14931_v45 = vpop.f32.mrf.mxu1 }
 0x772   : > { %16845 = vst [vmem:[#allocation33_spill] sm:$0xff] %v14929_v51  ;;  %v14950_v13 = vpop.permute.xlu0 %5628  ;;  %v14952_v20 = vpop.permute.xlu2 %5618 }
 0x773   : > { %16846 = vst [vmem:[#allocation21_spill] sm:$0xff] %v14931_v45  ;;  %v10579_v45 = vld [vmem:[#allocation3 + $0x80] sm:$0xf] }
 0x774   : > { %v14954_v49 = vor.u32 %v11621_v43, %v10579_v45 }
 0x776   : > { %6008 = vrot.lane.b32.xlu1 %v14954_v49, %s16843_s16 }
 0x779   : > { %v4803_v46 = vpop.f32.mrf.mxu0  ;;  %v4852_v36 = vpop.f32.mrf.mxu1 }
 0x77a   : > { %v14943_v60 = vadd.f32 %v4803_v46, %v4545_v53  ;;  %v14946_v55 = vadd.f32 %v4852_v36, %v14880_v1  ;;  %v14962_v1 = vpop.permute.xlu1 %5643  ;;  %v5186_v46 = vpop.f32.mrf.mxu2 }
 0x77b   : > { %v5235_v36 = vpop.f32.mrf.mxu3  ;;  %v5594_v59 = vpop.permute.xlu2 %5593 }
 0x77c   : > { %16848 = vst [vmem:[#allocation17_spill] sm:$0xff] %v14943_v60  ;;  %5488 = vmatmul.bf16.gmra.mxu0 %v11599_v8  ;;  %5537 = vmatmul.bf16.gmra.mxu1 %v11599_v8  ;;  %v10567_v8 = vld [vmem:[#allocation3 + $0x60] sm:$0xf]  ;;  %v5604_v60 = vpop.permute.xlu0 %5603  ;;  %v5275_v40 = vadd.f32 %v5235_v36, %v14844_v62 }
 0x77d   : > { %16849 = vst [vmem:[#allocation24_spill] sm:$0xff] %v14946_v55  ;;  %v11618_v55 = vld [vmem:[#allocation3 + $0x6c] sm:$0xf0] }
 0x77e   : > { %v14966_v45 = vor.u32 %v11618_v55, %v10567_v8  ;;  %v10555_v55 = vld [vmem:[#allocation3 + $0x40] sm:$0xf] }
 0x780   : > { %6002 = vrot.lane.b32.xlu1 %v14966_v45, %s16843_s16 }
 0x781   : > { %v14956_v51 = vpop.f32.mrf.mxu0  ;;  %v14958_v53 = vpop.f32.mrf.mxu1 }
 0x782   : > { %16850 = vst [vmem:[#allocation38_spill] sm:$0xff] %v14956_v51  ;;  %v14970_v63 = vpop.permute.xlu1 %5638  ;;  %v14972_v9 = vpop.f32.mrf.mxu2 }
 0x783   : > { %16851 = vst [vmem:[#allocation23_spill] sm:$0xff] %v14958_v53  ;;  %v14974_v15 = vpop.f32.mrf.mxu3  ;;  %v5276_v62 = vadd.f32 %v14972_v9, %v14852_v4 }
 0x789   : > { %v5454_v43 = vpop.f32.mrf.mxu0  ;;  %v5503_v51 = vpop.f32.mrf.mxu1 }
 0x78a   : > { %v5543_v61 = vadd.f32 %v5454_v43, %v5268_v38  ;;  %v5544_v53 = vadd.f32 %v5503_v51, %v5269_v34  ;;  %v5271_v34 = vadd.f32 %v5230_v30, %v14823_v56  ;;  %v14978_v38 = vor.u32 %v11615_v50, %v10555_v55  ;;  %v5599_v51 = vpop.permute.xlu0 %5598  ;;  %v5614_v24 = vpop.permute.xlu1 %5613  ;;  %v11612_v56 = vld [vmem:[#allocation3 + $0x2c] sm:$0xf0] }
 0x78b   : > { %v5273_v30 = vadd.f32 %v5233_v31, %v14833_v52  ;;  %v5191_v55 = vpop.f32.mrf.mxu2  ;;  %v5240_v50 = vpop.f32.mrf.mxu3  ;;  %v10531_v31 = vld [vmem:[#allocation3] sm:$0xf]  ;;  %v5274_v52 = vadd.f32 %v5186_v46, %v14841_v2  ;;  %v5277_v46 = vadd.f32 %v14974_v15, %v14855_v39 }
 0x78c   : > { %v5671_v44 = vadd.f32 %v5594_v59, %v5543_v61  ;;  %v5672_v23 = vadd.f32 %v5594_v59, %v5544_v53  ;;  %5996 = vrot.lane.b32.xlu1 %v14978_v38, %s16843_s16  ;;  %v5278_v4 = vadd.f32 %v5191_v55, %v14861_v18  ;;  %v5279_v39 = vadd.f32 %v5240_v50, %v14864_v0 }
 0x78e   : > { %12006 = vtanh.f32 %v5671_v44 }
 0x78f   : > { %12008 = vtanh.f32 %v5672_v23 }
 0x791   : > { %v5456_v12 = vpop.f32.mrf.mxu0  ;;  %v5505_v10 = vpop.f32.mrf.mxu1 }
 0x792   : > { %v5545_v61 = vadd.f32 %v5456_v12, %v5270_v25  ;;  %v5546_v59 = vadd.f32 %v5505_v10, %v5271_v34  ;;  %v14984_v25 = vor.u32 %v11612_v56, %v10543_v28 }
 0x793   : > { %v5194_v56 = vpop.f32.mrf.mxu2 }
 0x794   : > { %v12007_v53 = vpop.eup %12006  ;;  %v5673_v8 = vadd.f32 %v5599_v51, %v5545_v61  ;;  %v5674_v44 = vadd.f32 %v5599_v51, %v5546_v59  ;;  %5990 = vrot.lane.b32.xlu1 %v14984_v25, %s16843_s16  ;;  %v5280_v18 = vadd.f32 %v5194_v56, %v14872_v29 }
 0x795   : > { %v12009_v23 = vpop.eup %12008 }
 0x796   : > { %v5735_v43 = vpack.c.bf16 %v12009_v23, %v12007_v53  ;;  %12010 = vtanh.f32 %v5673_v8  ;;  %v14990_v23 = vor.u32 %v11609_v35, %v10531_v31 }
 0x797   : > { %12012 = vtanh.f32 %v5674_v44 }
 0x798   : > { %5751 = vst [vmem:[#allocation3 + $0x4] sm:$0xff] %v5735_v43 }
 0x799   : > { %v5459_v34 = vpop.f32.mrf.mxu0  ;;  %v5508_v12 = vpop.f32.mrf.mxu1 }
 0x79a   : > { %v5547_v10 = vadd.f32 %v5459_v34, %v5272_v58  ;;  %v5548_v61 = vadd.f32 %v5508_v12, %v5273_v30  ;;  %v5243_v58 = vpop.f32.mrf.mxu3 }
 0x79b   : > { %v5196_v31 = vpop.f32.mrf.mxu2  ;;  %v5281_v0 = vadd.f32 %v5243_v58, %v14875_v26 }
 0x79c   : > { %v12011_v59 = vpop.eup %12010  ;;  %v5675_v51 = vadd.f32 %v5604_v60, %v5547_v10  ;;  %v5676_v53 = vadd.f32 %v5604_v60, %v5548_v61  ;;  %5984 = vrot.lane.b32.xlu1 %v14990_v23, %s16843_s16  ;;  %v5609_v60 = vpop.permute.xlu1 %5608  ;;  %v5282_v29 = vadd.f32 %v5196_v31, %v14883_v5 }
 0x79d   : > { %v12013_v8 = vpop.eup %12012 }
 0x79e   : > { %v5736_v44 = vpack.c.bf16 %v12013_v8, %v12011_v59  ;;  %12014 = vtanh.f32 %v5675_v51 }
 0x79f   : > { %12016 = vtanh.f32 %v5676_v53 }
 0x7a0   : > { %5752 = vst [vmem:[#allocation3 + $0x14] sm:$0xff] %v5736_v44 }
 0x7a1   : > { %v5461_v43 = vpop.f32.mrf.mxu0  ;;  %v5510_v28 = vpop.f32.mrf.mxu1 }
 0x7a2   : > { %v5549_v30 = vadd.f32 %v5461_v43, %v5274_v52  ;;  %v5550_v34 = vadd.f32 %v5510_v28, %v5275_v40  ;;  %v5245_v35 = vpop.f32.mrf.mxu3 }
 0x7a3   : > { %v5283_v26 = vadd.f32 %v5245_v35, %v14886_v6 }
 0x7a4   : > { %v12015_v12 = vpop.eup %12014  ;;  %v5677_v10 = vadd.f32 %v5609_v60, %v5549_v30  ;;  %v5678_v61 = vadd.f32 %v5609_v60, %v5550_v34  ;;  %6252 = vrot.lane.b32.xlu1 %v14915_v21, %s16852_s30 }
 0x7a5   : > { %v12017_v59 = vpop.eup %12016 }
 0x7a6   : > { %v5737_v2 = vpack.c.bf16 %v12017_v59, %v12015_v12  ;;  %12018 = vtanh.f32 %v5677_v10  ;;  %v5199_v10 = vpop.f32.mrf.mxu2 }
 0x7a7   : > { %12020 = vtanh.f32 %v5678_v61  ;;  %v5284_v5 = vadd.f32 %v5199_v10, %v14889_v3 }
 0x7a8   : > { %5753 = vst [vmem:[#allocation3 + $0x24] sm:$0xff] %v5737_v2 }
 0x7a9   : > { %v5464_v36 = vpop.f32.mrf.mxu0  ;;  %v5513_v51 = vpop.f32.mrf.mxu1 }
 0x7aa   : > { %v5551_v53 = vadd.f32 %v5464_v36, %v5276_v62  ;;  %v5552_v8 = vadd.f32 %v5513_v51, %v5277_v46  ;;  %v5248_v61 = vpop.f32.mrf.mxu3 }
 0x7ab   : > { %v5285_v6 = vadd.f32 %v5248_v61, %v14892_v19 }
 0x7ac   : > { %v12019_v44 = vpop.eup %12018  ;;  %v5679_v52 = vadd.f32 %v5614_v24, %v5551_v53  ;;  %v5680_v40 = vadd.f32 %v5614_v24, %v5552_v8  ;;  %6246 = vrot.lane.b32.xlu1 %v14927_v37, %s16852_s30 }
 0x7ad   : > { %v12021_v43 = vpop.eup %12020 }
 0x7ae   : > { %v5738_v28 = vpack.c.bf16 %v12021_v43, %v12019_v44  ;;  %12022 = vtanh.f32 %v5679_v52  ;;  %v5201_v56 = vpop.f32.mrf.mxu2 }
 0x7af   : > { %12024 = vtanh.f32 %v5680_v40 }
 0x7b0   : > { %5754 = vst [vmem:[#allocation3 + $0x34] sm:$0xff] %v5738_v28 }
 0x7b1   : > { %v5466_v15 = vpop.f32.mrf.mxu0  ;;  %v5515_v9 = vpop.f32.mrf.mxu1 }
 0x7b2   : > { %v5553_v30 = vadd.f32 %v5466_v15, %v5278_v4  ;;  %v5554_v34 = vadd.f32 %v5515_v9, %v5279_v39  ;;  %v5250_v58 = vpop.f32.mrf.mxu3 }
 0x7b4   : > { %v12023_v21 = vpop.eup %12022  ;;  %v5681_v60 = vadd.f32 %v14952_v20, %v5553_v30  ;;  %v5682_v24 = vadd.f32 %v14952_v20, %v5554_v34  ;;  %6240 = vrot.lane.b32.xlu1 %v14941_v17, %s16852_s30  ;;  %v4581_v30 = vadd.f32 %v14825_v42, %v14751_v54 }
 0x7b5   : > { %v12025_v12 = vpop.eup %12024 }
 0x7b6   : > { %v5739_v59 = vpack.c.bf16 %v12025_v12, %v12023_v21  ;;  %12026 = vtanh.f32 %v5681_v60  ;;  %v5204_v4 = vpop.f32.mrf.mxu2  ;;  %v4876_v60 = vadd.f32 %v14896_v41, %v4581_v30 }
 0x7b7   : > { %12028 = vtanh.f32 %v5682_v24 }
 0x7b8   : > { %5755 = vst [vmem:[#allocation3 + $0x44] sm:$0xff] %v5739_v59  ;;  %v5287_v12 = vadd.f32 %v5250_v58, %v4876_v60  ;;  %v16859_v60 = vld [vmem:[#allocation26_spill] sm:$0xff] }
 0x7b9   : > { %v5469_v55 = vpop.f32.mrf.mxu0  ;;  %v5518_v50 = vpop.f32.mrf.mxu1 }
 0x7ba   : > { %v5555_v2 = vadd.f32 %v5469_v55, %v5280_v18  ;;  %v5556_v37 = vadd.f32 %v5518_v50, %v5281_v0  ;;  %v5253_v39 = vpop.f32.mrf.mxu3  ;;  %v5288_v0 = vadd.f32 %v5204_v4, %v14898_v27  ;;  %v16857_v4 = vld [vmem:[#allocation37_spill] sm:$0xff] }
 0x7bb   : > { %v5289_v55 = vadd.f32 %v5253_v39, %v14901_v47 }
 0x7bc   : > { %v12027_v62 = vpop.eup %12026  ;;  %v5683_v20 = vadd.f32 %v14937_v14, %v5555_v2  ;;  %v5684_v46 = vadd.f32 %v14937_v14, %v5556_v37  ;;  %6234 = vrot.lane.b32.xlu1 %v14954_v49, %s16852_s30 }
 0x7bd   : > { %v12029_v36 = vpop.eup %12028 }
 0x7be   : > { %v5740_v51 = vpack.c.bf16 %v12029_v36, %v12027_v62  ;;  %12030 = vtanh.f32 %v5683_v20  ;;  %v5206_v42 = vpop.f32.mrf.mxu2  ;;  %v4586_v20 = vadd.f32 %v14846_v22, %v14765_v33  ;;  %v16853_v36 = vld [vmem:[#allocation20_spill] sm:$0xff] }
 0x7bf   : > { %12032 = vtanh.f32 %v5684_v46 }
 0x7c0   : > { %5756 = vst [vmem:[#allocation3 + $0x54] sm:$0xff] %v5740_v51 }
 0x7c1   : > { %v5471_v53 = vpop.f32.mrf.mxu0  ;;  %v5520_v8 = vpop.f32.mrf.mxu1 }
 0x7c2   : > { %v5557_v44 = vadd.f32 %v5471_v53, %v5282_v29  ;;  %v5558_v17 = vadd.f32 %v5520_v8, %v5283_v26  ;;  %v16854_v29 = vld [vmem:[#allocation25_spill] sm:$0xff] }
 0x7c3   : > { %v4880_v26 = vadd.f32 %v16854_v29, %v4586_v20  ;;  %v16865_v20 = vld [vmem:[#allocation35_spill] sm:$0xff] }
 0x7c4   : > { %v12031_v52 = vpop.eup %12030  ;;  %v5685_v14 = vadd.f32 %v14950_v13, %v5557_v44  ;;  %v5686_v40 = vadd.f32 %v14950_v13, %v5558_v17  ;;  %6228 = vrot.lane.b32.xlu1 %v14966_v45, %s16852_s30  ;;  %v4532_v13 = vadd.f32 %v14828_v57, %v14749_v7  ;;  %v16855_v44 = vld [vmem:[#allocation28_spill] sm:$0xff] }
 0x7c5   : > { %v12033_v43 = vpop.eup %12032 }
 0x7c6   : > { %v5741_v28 = vpack.c.bf16 %v12033_v43, %v12031_v52  ;;  %12034 = vtanh.f32 %v5685_v14  ;;  %v4875_v21 = vadd.f32 %v14894_v32, %v4532_v13 }
 0x7c7   : > { %12036 = vtanh.f32 %v5686_v40 }
 0x7c8   : > { %5757 = vst [vmem:[#allocation3 + $0x64] sm:$0xff] %v5741_v28  ;;  %v5286_v45 = vadd.f32 %v5201_v56, %v4875_v21  ;;  %v5209_v56 = vpop.f32.mrf.mxu2  ;;  %v16858_v21 = vld [vmem:[#allocation31_spill] sm:$0xff] }
 0x7c9   : > { %v5474_v31 = vpop.f32.mrf.mxu0  ;;  %v5523_v35 = vpop.f32.mrf.mxu1 }
 0x7ca   : > { %v5559_v15 = vadd.f32 %v5474_v31, %v5284_v5  ;;  %v5560_v49 = vadd.f32 %v5523_v35, %v5285_v6  ;;  %v16856_v31 = vld [vmem:[#allocation36_spill] sm:$0xff] }
 0x7cb   : > { %v5292_v35 = vadd.f32 %v5209_v56, %v16856_v31 }
 0x7cc   : > { %v12035_v9 = vpop.eup %12034  ;;  %v5687_v3 = vadd.f32 %v14935_v11, %v5559_v15  ;;  %v5688_v19 = vadd.f32 %v14935_v11, %v5560_v49  ;;  %6222 = vrot.lane.b32.xlu1 %v14978_v38, %s16852_s30  ;;  %v5255_v11 = vpop.f32.mrf.mxu3 }
 0x7cd   : > { %v12037_v34 = vpop.eup %12036  ;;  %v5291_v8 = vadd.f32 %v5255_v11, %v4880_v26 }
 0x7ce   : > { %v5742_v24 = vpack.c.bf16 %v12037_v34, %v12035_v9  ;;  %12038 = vtanh.f32 %v5687_v3 }
 0x7cf   : > { %12040 = vtanh.f32 %v5688_v19 }
 0x7d0   : > { %5758 = vst [vmem:[#allocation3 + $0x74] sm:$0xff] %v5742_v24  ;;  %v5211_v15 = vpop.f32.mrf.mxu2  ;;  %v4542_v24 = vadd.f32 %v16859_v60, %v16858_v21 }
 0x7d1   : > { %v5476_v10 = vpop.f32.mrf.mxu0  ;;  %v5525_v7 = vpop.f32.mrf.mxu1 }
 0x7d2   : > { %v5561_v57 = vadd.f32 %v5476_v10, %v5286_v45  ;;  %v5562_v61 = vadd.f32 %v5525_v7, %v5287_v12  ;;  %v16860_v45 = vld [vmem:[#allocation32_spill] sm:$0xff]  ;;  %v16861_v12 = vld [vmem:[#allocation18_spill] sm:$0xff]  ;;  %v16862_v7 = vld [vmem:[#allocation19_spill] sm:$0xff] }
 0x7d3   : > { %v4591_v10 = vadd.f32 %v16861_v12, %v16860_v45 }
 0x7d4   : > { %v12039_v54 = vpop.eup %12038  ;;  %v5689_v32 = vadd.f32 %v14970_v63, %v5561_v57  ;;  %v5690_v41 = vadd.f32 %v14970_v63, %v5562_v61  ;;  %6216 = vrot.lane.b32.xlu1 %v14984_v25, %s16852_s30  ;;  %v4537_v63 = vadd.f32 %v14850_v16, %v14763_v48  ;;  %v5258_v58 = vpop.f32.mrf.mxu3 }
 0x7d5   : > { %v12041_v59 = vpop.eup %12040  ;;  %v5293_v39 = vadd.f32 %v5258_v58, %v16857_v4  ;;  %v16866_v58 = vld [vmem:[#allocation17_spill] sm:$0xff] }
 0x7d6   : > { %v5743_v18 = vpack.c.bf16 %v12041_v59, %v12039_v54  ;;  %12042 = vtanh.f32 %v5689_v32  ;;  %v4879_v51 = vadd.f32 %v16853_v36, %v4537_v63  ;;  %v16864_v32 = vld [vmem:[#allocation21_spill] sm:$0xff] }
 0x7d7   : > { %12044 = vtanh.f32 %v5690_v41  ;;  %v4884_v41 = vadd.f32 %v16864_v32, %v4591_v10 }
 0x7d8   : > { %5759 = vst [vmem:[#allocation3 + $0x84] sm:$0xff] %v5743_v18  ;;  %v5290_v25 = vadd.f32 %v5206_v42, %v4879_v51  ;;  %v16863_v42 = vld [vmem:[#allocation33_spill] sm:$0xff] }
 0x7d9   : > { %v5479_v50 = vpop.f32.mrf.mxu0  ;;  %v5528_v2 = vpop.f32.mrf.mxu1  ;;  %v4883_v11 = vadd.f32 %v16863_v42, %v4542_v24 }
 0x7da   : > { %v5563_v37 = vadd.f32 %v5479_v50, %v5288_v0  ;;  %v5564_v38 = vadd.f32 %v5528_v2, %v5289_v55 }
 0x7db   : > { %v5294_v18 = vadd.f32 %v5211_v15, %v4883_v11 }
 0x7dc   : > { %v12043_v62 = vpop.eup %12042  ;;  %v5691_v46 = vadd.f32 %v14962_v1, %v5563_v37  ;;  %v5692_v27 = vadd.f32 %v14962_v1, %v5564_v38  ;;  %6210 = vrot.lane.b32.xlu1 %v14990_v23, %s16852_s30  ;;  %v5260_v49 = vpop.f32.mrf.mxu3 }
 0x7dd   : > { %v12045_v47 = vpop.eup %12044  ;;  %v5295_v0 = vadd.f32 %v5260_v49, %v4884_v41  ;;  %v5214_v38 = vpop.f32.mrf.mxu2  ;;  %v16873_v49 = vld [vmem:[#allocation38_spill] sm:$0xff] }
 0x7de   : > { %v5744_v53 = vpack.c.bf16 %v12045_v47, %v12043_v62  ;;  %12046 = vtanh.f32 %v5691_v46 }
 0x7df   : > { %12048 = vtanh.f32 %v5692_v27  ;;  %v10587_v43 = vld [vmem:[#allocation3 + $0x88] sm:$0xf]  ;;  %v11620_v5 = vld [vmem:[#allocation3 + $0x84] sm:$0xf] }
 0x7e0   : > { %5760 = vst [vmem:[#allocation3 + $0x94] sm:$0xff] %v5744_v53  ;;  %v5296_v53 = vadd.f32 %v5214_v38, %v16866_v58  ;;  %v15109_v58 = vpop.permute.xlu1 %6026 }
 0x7e1   : > { %v5481_v48 = vpop.f32.mrf.mxu0  ;;  %v5530_v16 = vpop.f32.mrf.mxu1 }
 0x7e2   : > { %v5565_v33 = vadd.f32 %v5481_v48, %v5290_v25  ;;  %v5566_v22 = vadd.f32 %v5530_v16, %v5291_v8  ;;  %v16867_v25 = vld [vmem:[#allocation24_spill] sm:$0xff] }
 0x7e4   : > { %v12047_v1 = vpop.eup %12046  ;;  %v5693_v17 = vadd.f32 %v16855_v44, %v5565_v33  ;;  %v5694_v52 = vadd.f32 %v16855_v44, %v5566_v22  ;;  %v5263_v62 = vpop.f32.mrf.mxu3 }
 0x7e5   : > { %v12049_v14 = vpop.eup %12048  ;;  %v5297_v8 = vadd.f32 %v5263_v62, %v16867_v25  ;;  %v10575_v25 = vld [vmem:[#allocation3 + $0x68] sm:$0xf] }
 0x7e6   : > { %v5745_v40 = vpack.c.bf16 %v12049_v14, %v12047_v1  ;;  %12050 = vtanh.f32 %v5693_v17  ;;  %v16869_v14 = vld [vmem:[#allocation16_spill] sm:$0xff] }
 0x7e7   : > { %12052 = vtanh.f32 %v5694_v52  ;;  %v11622_v28 = vld [vmem:[#allocation3 + $0x94] sm:$0xf0]  ;;  %v10581_v6 = vld [vmem:[#allocation3 + $0x90] sm:$0xf0] }
 0x7e8   : > { %5761 = vst [vmem:[#allocation3 + $0xa4] sm:$0xff] %v5745_v40  ;;  %v15052_v23 = vor.u32 %v11622_v28, %v10587_v43  ;;  %v15054_v9 = vor.u32 %v11620_v5, %v10581_v6  ;;  %v16868_v52 = vld [vmem:[#allocation22_spill] sm:$0xff]  ;;  %v16871_v28 = vld [vmem:[#allocation27_spill] sm:$0xff] }
 0x7e9   : > { %v5484_v13 = vpop.f32.mrf.mxu0  ;;  %v5533_v30 = vpop.f32.mrf.mxu1  ;;  %v4547_v40 = vadd.f32 %v16869_v14, %v16868_v52  ;;  %v16870_v43 = vld [vmem:[#allocation34_spill] sm:$0xff]  ;;  %v10835_v52 = vld [vmem:[#allocation3 + $0x84] sm:$0xf]  ;;  %v10563_v14 = vld [vmem:[#allocation3 + $0x48] sm:$0xf] }
 0x7ea   : > { %v5567_v3 = vadd.f32 %v5484_v13, %v5292_v35  ;;  %v5568_v19 = vadd.f32 %v5533_v30, %v5293_v39  ;;  %6012 = vrot.lane.b32.xlu0 %v15052_v23, %s16843_s16  ;;  %6010 = vrot.lane.b32.xlu2 %v15054_v9, %s16843_s16  ;;  %v4596_v5 = vadd.f32 %v16871_v28, %v16870_v43  ;;  %v16872_v6 = vld [vmem:[#allocation30_spill] sm:$0xff]  ;;  %v5216_v39 = vpop.f32.mrf.mxu2  ;;  %v16874_v30 = vld [vmem:[#allocation23_spill] sm:$0xff] }
 0x7eb   : > { %v4887_v13 = vadd.f32 %v16873_v49, %v4547_v40  ;;  %v15120_v40 = vpop.permute.xlu1 %6020 }
 0x7ec   : > { %v12051_v34 = vpop.eup %12050  ;;  %v5695_v57 = vadd.f32 %v16862_v7, %v5567_v3  ;;  %v5696_v61 = vadd.f32 %v16862_v7, %v5568_v19  ;;  %v5265_v15 = vpop.f32.mrf.mxu3  ;;  %v4888_v3 = vadd.f32 %v16874_v30, %v4596_v5  ;;  %v16875_v7 = vld [vmem:[#allocation29_spill] sm:$0xff]  ;;  %v11614_v5 = vld [vmem:[#allocation3 + $0x44] sm:$0xf]  ;;  %v11682_v30 = vld [vmem:[#allocation3 + $0x70] sm:$0xf0] }
 0x7ed   : > { %v12053_v54 = vpop.eup %12052 }
 0x7ee   : > { %v5746_v59 = vpack.c.bf16 %v12053_v54, %v12051_v34  ;;  %12054 = vtanh.f32 %v5695_v57  ;;  %v5298_v34 = vadd.f32 %v5216_v39, %v4887_v13  ;;  %v5299_v21 = vadd.f32 %v5265_v15, %v4888_v3  ;;  %v11611_v15 = vld [vmem:[#allocation3 + $0x24] sm:$0xf]  ;;  %v11610_v3 = vld [vmem:[#allocation3 + $0x14] sm:$0xf0] }
 0x7ef   : > { %12056 = vtanh.f32 %v5696_v61  ;;  %v10599_v51 = vld [vmem:[#allocation3 + $0xa8] sm:$0xf]  ;;  %v11623_v26 = vld [vmem:[#allocation3 + $0xa4] sm:$0xf] }
 0x7f0   : > { %5762 = vst [vmem:[#allocation3 + $0xb4] sm:$0xff] %v5746_v59 }
 0x7f1   : > { %v5486_v55 = vpop.f32.mrf.mxu0  ;;  %v5535_v50 = vpop.f32.mrf.mxu1 }
 0x7f2   : > { %v5569_v2 = vadd.f32 %v5486_v55, %v5294_v18  ;;  %v5570_v37 = vadd.f32 %v5535_v50, %v5295_v0 }
 0x7f3   : > { %v15125_v13 = vpop.permute.xlu1 %6014 }
 0x7f4   : > { %v12055_v63 = vpop.eup %12054  ;;  %v5697_v46 = vadd.f32 %v16865_v20, %v5569_v2  ;;  %v5698_v27 = vadd.f32 %v16865_v20, %v5570_v37  ;;  %v10847_v20 = vld [vmem:[#allocation3 + $0xa4] sm:$0xf] }
 0x7f5   : > { %v12057_v47 = vpop.eup %12056 }
 0x7f6   : > { %v5747_v36 = vpack.c.bf16 %v12057_v47, %v12055_v63  ;;  %12058 = vtanh.f32 %v5697_v46 }
 0x7f7   : > { %12060 = vtanh.f32 %v5698_v27  ;;  %v11625_v29 = vld [vmem:[#allocation3 + $0xb4] sm:$0xf0]  ;;  %v10593_v56 = vld [vmem:[#allocation3 + $0xb0] sm:$0xf0] }
 0x7f8   : > { %5763 = vst [vmem:[#allocation3 + $0xc4] sm:$0xff] %v5747_v36  ;;  %v15072_v48 = vor.u32 %v11625_v29, %v10599_v51  ;;  %v15074_v16 = vor.u32 %v11623_v26, %v10593_v56  ;;  %v11688_v63 = vld [vmem:[#allocation3 + $0xb0] sm:$0xf0]  ;;  %v11619_v56 = vld [vmem:[#allocation3 + $0x74] sm:$0xf0] }
 0x7f9   : > { %v5489_v33 = vpop.f32.mrf.mxu0  ;;  %v5538_v22 = vpop.f32.mrf.mxu1  ;;  %v10848_v51 = vor.u32 %v11688_v63, %v10847_v20  ;;  %v10787_v63 = vld [vmem:[#allocation3 + $0x4] sm:$0xf] }
 0x7fa   : > { %v5571_v1 = vadd.f32 %v5489_v33, %v5296_v53  ;;  %v5572_v44 = vadd.f32 %v5538_v22, %v5297_v8  ;;  %6018 = vrot.lane.b32.xlu0 %v15072_v48, %s16843_s16  ;;  %6016 = vrot.lane.b32.xlu2 %v15074_v16, %s16843_s16  ;;  %v10569_v53 = vld [vmem:[#allocation3 + $0x70] sm:$0xf0]  ;;  %v15111_v8 = vor.u32 %v11619_v56, %v10575_v25  ;;  %v11617_v33 = vld [vmem:[#allocation3 + $0x64] sm:$0xf] }
 0x7fb   : > { %v15113_v22 = vor.u32 %v11617_v33, %v10569_v53 }
 0x7fc   : > { %v12059_v17 = vpop.eup %12058  ;;  %v5699_v31 = vadd.f32 %v16872_v6, %v5571_v1  ;;  %v5700_v35 = vadd.f32 %v16872_v6, %v5572_v44  ;;  %v11685_v1 = vld [vmem:[#allocation3 + $0x90] sm:$0xf0]  ;;  %v11616_v44 = vld [vmem:[#allocation3 + $0x54] sm:$0xf0] }
 0x7fd   : > { %v12061_v4 = vpop.eup %12060  ;;  %v10836_v43 = vor.u32 %v11685_v1, %v10835_v52  ;;  %v10564_v28 = vor.u32 %v11616_v44, %v10563_v14  ;;  %v10867_v14 = vld [vmem:[#allocation3 + $0xcc] sm:$0xf] }
 0x7fe   : > { %v5748_v19 = vpack.c.bf16 %v12061_v4, %v12059_v17  ;;  %12062 = vtanh.f32 %v5699_v31  ;;  %v10557_v17 = vld [vmem:[#allocation3 + $0x50] sm:$0xf0]  ;;  %v11613_v31 = vld [vmem:[#allocation3 + $0x34] sm:$0xf0]  ;;  %v10551_v4 = vld [vmem:[#allocation3 + $0x28] sm:$0xf] }
 0x7ff   : > { %12064 = vtanh.f32 %v5700_v35  ;;  %v10859_v11 = vld [vmem:[#allocation3 + $0xc4] sm:$0xf]  ;;  %v10611_v32 = vld [vmem:[#allocation3 + $0xc8] sm:$0xf]  ;;  %v10560_v6 = vor.u32 %v11614_v5, %v10557_v17  ;;  %v10545_v35 = vld [vmem:[#allocation3 + $0x30] sm:$0xf0]  ;;  %v10552_v39 = vor.u32 %v11613_v31, %v10551_v4 }
 0x800   : > { %5764 = vst [vmem:[#allocation3 + $0xd4] sm:$0xff] %v5748_v19  ;;  %v11626_v41 = vld [vmem:[#allocation3 + $0xc4] sm:$0xf]  ;;  %v10548_v49 = vor.u32 %v11611_v15, %v10545_v35  ;;  %v10533_v19 = vld [vmem:[#allocation3 + $0x10] sm:$0xf0] }
 0x801   : > { %v5491_v60 = vpop.f32.mrf.mxu0  ;;  %v5540_v24 = vpop.f32.mrf.mxu1  ;;  %v11690_v53 = vld [vmem:[#allocation3 + $0xc8] sm:$0xf]  ;;  %v7379_v17 = vld [vmem:[%s16692_s9 + $0x70] sm:$0xff]  ;;  %v10849_v4 = vld [vmem:[#allocation3 + $0xb4] sm:$0xf0] }
 0x802   : > { %v5573_v45 = vadd.f32 %v5491_v60, %v5298_v34  ;;  %v5574_v12 = vadd.f32 %v5540_v24, %v5299_v21  ;;  %v10823_v34 = vld [vmem:[#allocation3 + $0x64] sm:$0xf]  ;;  %v10539_v21 = vld [vmem:[#allocation3 + $0x8] sm:$0xf] }
 0x803   : > { %v10824_v60 = vor.u32 %v11682_v30, %v10823_v34  ;;  %v10540_v24 = vor.u32 %v11610_v3, %v10539_v21  ;;  %v11687_v15 = vld [vmem:[#allocation3 + $0xa8] sm:$0xf] }
 0x804   : > { %v12063_v10 = vpop.eup %12062  ;;  %v5701_v57 = vadd.f32 %v16875_v7, %v5573_v45  ;;  %v5702_v61 = vadd.f32 %v16875_v7, %v5574_v12  ;;  %v11608_v45 = vld [vmem:[#allocation3 + $0x4] sm:$0xf]  ;;  %v11679_v7 = vld [vmem:[#allocation3 + $0x50] sm:$0xf0] }
 0x805   : > { %v12065_v54 = vpop.eup %12064  ;;  %v10536_v12 = vor.u32 %v11608_v45, %v10533_v19 }
 0x806   : > { %v5749_v42 = vpack.c.bf16 %v12065_v54, %v12063_v10  ;;  %12066 = vtanh.f32 %v5701_v57  ;;  %v15133_v10 = vpop.permute.xlu1 %6008 }
 0x807   : > { %12068 = vtanh.f32 %v5702_v61  ;;  %v11691_v59 = vld [vmem:[#allocation3 + $0xd0] sm:$0xf0]  ;;  %v11628_v18 = vld [vmem:[#allocation3 + $0xd4] sm:$0xf0]  ;;  %v10811_v61 = vld [vmem:[#allocation3 + $0x44] sm:$0xf] }
 0x808   : > { %v10605_v0 = vld [vmem:[#allocation3 + $0xd0] sm:$0xf0]  ;;  %5765 = vst [vmem:[#allocation3 + $0xe4] sm:$0xff] %v5749_v42  ;;  %v10860_v55 = vor.u32 %v11691_v59, %v10859_v11  ;;  %v15090_v50 = vor.u32 %v11628_v18, %v10611_v32  ;;  %v10812_v54 = vor.u32 %v11679_v7, %v10811_v61  ;;  %v10799_v18 = vld [vmem:[#allocation3 + $0x24] sm:$0xf] }
 0x809   : > { %v15092_v2 = vor.u32 %v11626_v41, %v10605_v0  ;;  %v11661_v7 = vld [vmem:[#allocation3 + $0xd0] sm:$0xf0] }
 0x80a   : > { %7191 = vrot.lane.b32.xlu1 %v10860_v55, %s16827_s17  ;;  %6024 = vrot.lane.b32.xlu0 %v15090_v50, %s16843_s16 }
 0x80b   : > { %6022 = vrot.lane.b32.xlu2 %v15092_v2, %s16843_s16 }
 0x80c   : > { %v12067_v37 = vpop.eup %12066 }
 0x80d   : > { %v12069_v38 = vpop.eup %12068 }
 0x80e   : > { %v5750_v62 = vpack.c.bf16 %v12069_v38, %v12067_v37  ;;  %v15140_v57 = vpop.permute.xlu1 %6002  ;;  %v11673_v38 = vld [vmem:[#allocation3 + $0x10] sm:$0xf0] }
 0x80f   : > { %v10623_v46 = vld [vmem:[#allocation3 + $0xe8] sm:$0xf]  ;;  %v11629_v47 = vld [vmem:[#allocation3 + $0xe4] sm:$0xf] }
 0x810   : > { %5766 = vst [vmem:[#allocation3 + $0xf4] sm:$0xff] %v5750_v62  ;;  %v10871_v32 = vld [vmem:[#allocation3 + $0xe4] sm:$0xf] }
 0x811   : > { %v10747_v34 = vld [vmem:[#allocation3 + $0xe4] sm:$0xf] }
 0x812   : > { %6916 = vrot.lane.b32.xlu1 %v10860_v55, %s16826_s15 }
 0x816   : > { %v15147_v42 = vpop.permute.xlu1 %5996 }
 0x817   : > { %v11631_v27 = vld [vmem:[#allocation3 + $0xf4] sm:$0xf0]  ;;  %v10617_v36 = vld [vmem:[#allocation3 + $0xf0] sm:$0xf0] }
 0x818   : > { %v15100_v29 = vor.u32 %v11631_v27, %v10623_v46  ;;  %v15102_v26 = vor.u32 %v11629_v47, %v10617_v36  ;;  %v11694_v11 = vld [vmem:[#allocation3 + $0xf0] sm:$0xf0]  ;;  %v10788_v46 = vor.u32 %v11673_v38, %v10787_v63  ;;  %v10879_v47 = vld [vmem:[#allocation3 + $0xec] sm:$0xf]  ;;  %v11695_v36 = vld [vmem:[#allocation3 + $0xf8] sm:$0xf0] }
 0x819   : > { %v10872_v41 = vor.u32 %v11694_v11, %v10871_v32  ;;  %v10880_v56 = vor.u32 %v11695_v36, %v10879_v47  ;;  %v11663_v30 = vld [vmem:[#allocation3 + $0xf0] sm:$0xf0]  ;;  %v10855_v32 = vld [vmem:[#allocation3 + $0xac] sm:$0xf] }
 0x81a   : > { %7185 = vrot.lane.b32.xlu1 %v10848_v51, %s16827_s17  ;;  %6030 = vrot.lane.b32.xlu0 %v15100_v29, %s16843_s16  ;;  %v10748_v45 = vor.u32 %v11663_v30, %v10747_v34  ;;  %v11681_v30 = vld [vmem:[#allocation3 + $0x68] sm:$0xf]  ;;  %v10691_v34 = vld [vmem:[#allocation3 + $0x4] sm:$0xf] }
 0x81b   : > { %6028 = vrot.lane.b32.xlu2 %v15102_v26, %s16843_s16 }
 0x81e   : > { %v15154_v59 = vpop.permute.xlu1 %5990 }
 0x822   : > { %6910 = vrot.lane.b32.xlu1 %v10848_v51, %s16826_s15  ;;  %6006 = vrot.lane.b32.xlu0 %v15111_v8, %s16843_s16 }
 0x823   : > { %6004 = vrot.lane.b32.xlu2 %v15113_v22, %s16843_s16 }
 0x82a   : > { %7179 = vrot.lane.b32.xlu1 %v10836_v43, %s16827_s17  ;;  %6000 = vrot.lane.b32.xlu0 %v10564_v28, %s16843_s16 }
 0x82b   : > { %5998 = vrot.lane.b32.xlu2 %v10560_v6, %s16843_s16 }
 0x832   : > { %6904 = vrot.lane.b32.xlu1 %v10836_v43, %s16826_s15  ;;  %5994 = vrot.lane.b32.xlu0 %v10552_v39, %s16843_s16 }
 0x833   : > { %5992 = vrot.lane.b32.xlu2 %v10548_v49, %s16843_s16 }
 0x83a   : > { %7173 = vrot.lane.b32.xlu1 %v10824_v60, %s16827_s17  ;;  %5988 = vrot.lane.b32.xlu0 %v10540_v24, %s16843_s16 }
 0x83b   : > { %5986 = vrot.lane.b32.xlu2 %v10536_v12, %s16843_s16 }
 0x842   : > { %6898 = vrot.lane.b32.xlu1 %v10824_v60, %s16826_s15  ;;  %6250 = vrot.lane.b32.xlu0 %v15090_v50, %s16852_s30 }
 0x843   : > { %6248 = vrot.lane.b32.xlu2 %v15092_v2, %s16852_s30 }
 0x84a   : > { %7167 = vrot.lane.b32.xlu1 %v10812_v54, %s16827_s17  ;;  %6244 = vrot.lane.b32.xlu0 %v15072_v48, %s16852_s30  ;;  %v15161_v48 = vpop.permute.xlu2 %6010 }
 0x84b   : > { %6242 = vrot.lane.b32.xlu2 %v15074_v16, %s16852_s30  ;;  %v11676_v16 = vld [vmem:[#allocation3 + $0x30] sm:$0xf0]  ;;  %v6040_v33 = vsel %vm758_vm1, %v15133_v10, %v15161_v48  ;;  %v7373_v10 = vld [vmem:[%s16692_s9 + $0x40] sm:$0xff] }
 0x84c   : > { %v10800_v0 = vor.u32 %v11676_v16, %v10799_v18  ;;  %v10837_v16 = vld [vmem:[#allocation3 + $0x94] sm:$0xf0] }
 0x852   : > { %6892 = vrot.lane.b32.xlu1 %v10812_v54, %s16826_s15  ;;  %6238 = vrot.lane.b32.xlu0 %v15052_v23, %s16852_s30  ;;  %v15168_v23 = vpop.permute.xlu1 %5984 }
 0x853   : > { %6236 = vrot.lane.b32.xlu2 %v15054_v9, %s16852_s30 }
 0x854   : > { %v15170_v9 = vpop.permute.xlu2 %6016 }
 0x85a   : > { %7197 = vrot.lane.b32.xlu1 %v10872_v41, %s16827_s17  ;;  %6256 = vrot.lane.b32.xlu0 %v15100_v29, %s16852_s30  ;;  %v15175_v50 = vpop.permute.xlu1 %6252 }
 0x85b   : > { %6254 = vrot.lane.b32.xlu2 %v15102_v26, %s16852_s30  ;;  %v6042_v26 = vsel %vm758_vm1, %v15125_v13, %v15170_v9 }
 0x85c   : > { %v15180_v2 = vpop.permute.xlu0 %6012 }
 0x85d   : > { %v6041_v54 = vsel %vm758_vm1, %v15161_v48, %v15180_v2  ;;  %v11657_v48 = vld [vmem:[#allocation3 + $0x90] sm:$0xf0] }
 0x862   : > { %6922 = vrot.lane.b32.xlu1 %v10872_v41, %s16826_s15  ;;  %6232 = vrot.lane.b32.xlu0 %v15111_v8, %s16852_s30  ;;  %v15184_v20 = vpop.permute.xlu1 %6246  ;;  %v11689_v41 = vld [vmem:[#allocation3 + $0xb8] sm:$0xf0] }
 0x863   : > { %6230 = vrot.lane.b32.xlu2 %v15113_v22, %s16852_s30 }
 0x865   : > { %v6023_v55 = vpop.permute.xlu2 %6022 }
 0x866   : > { %v6044_v27 = vsel %vm758_vm1, %v15120_v40, %v6023_v55  ;;  %v11692_v40 = vld [vmem:[#allocation3 + $0xd8] sm:$0xf0] }
 0x867   : > { %v10868_v35 = vor.u32 %v11692_v40, %v10867_v14  ;;  %v10843_v14 = vld [vmem:[#allocation3 + $0x8c] sm:$0xf]  ;;  %v11686_v40 = vld [vmem:[#allocation3 + $0x98] sm:$0xf0] }
 0x86a   : > { %7161 = vrot.lane.b32.xlu1 %v10800_v0, %s16827_s17  ;;  %6226 = vrot.lane.b32.xlu0 %v10564_v28, %s16852_s30  ;;  %v15196_v8 = vpop.permute.xlu1 %6240 }
 0x86b   : > { %6224 = vrot.lane.b32.xlu2 %v10560_v6, %s16852_s30 }
 0x86c   : > { %v6019_v51 = vpop.permute.xlu0 %6018 }
 0x872   : > { %6886 = vrot.lane.b32.xlu1 %v10800_v0, %s16826_s15  ;;  %6220 = vrot.lane.b32.xlu0 %v10552_v39, %s16852_s30  ;;  %v15217_v43 = vpop.permute.xlu1 %6234  ;;  %v7378_v39 = vld [vmem:[%s16692_s9 + $0x68] sm:$0xff]  ;;  %v7372_v0 = vld [vmem:[%s16692_s9 + $0x38] sm:$0xff] }
 0x873   : > { %6218 = vrot.lane.b32.xlu2 %v10548_v49, %s16852_s30  ;;  %v10852_v49 = vor.u32 %v11687_v15, %v10849_v4  ;;  %v10825_v4 = vld [vmem:[#allocation3 + $0x74] sm:$0xf0]  ;;  %v10844_v15 = vor.u32 %v11686_v40, %v10843_v14  ;;  %v11680_v40 = vld [vmem:[#allocation3 + $0x58] sm:$0xf0] }
 0x875   : > { %v6029_v37 = vpop.permute.xlu2 %6028 }
 0x876   : > { %v6046_v62 = vsel %vm758_vm1, %v15109_v58, %v6029_v37  ;;  %v10861_v58 = vld [vmem:[#allocation3 + $0xd4] sm:$0xf0] }
 0x877   : > { %6064 = vmatpush.bf16.msra.mxu2 %v6046_v62  ;;  %v10864_v25 = vor.u32 %v11690_v53, %v10861_v58  ;;  %v10723_v62 = vld [vmem:[#allocation3 + $0x84] sm:$0xf]  ;;  %v7367_v58 = vld [vmem:[%s16692_s9 + $0x10] sm:$0xff] }
 0x878   : > { %v10724_v63 = vor.u32 %v11657_v48, %v10723_v62  ;;  %v11653_v53 = vld [vmem:[#allocation3 + $0x50] sm:$0xf0] }
 0x87a   : > { %7155 = vrot.lane.b32.xlu1 %v10788_v46, %s16827_s17  ;;  %6214 = vrot.lane.b32.xlu0 %v10540_v24, %s16852_s30  ;;  %v15233_v21 = vpop.permute.xlu1 %6228  ;;  %v6043_v24 = vsel %vm758_vm1, %v15170_v9, %v6019_v51 }
 0x87b   : > { %6065 = vmatpush.bf16.msra.mxu2 %v6044_v27  ;;  %6212 = vrot.lane.b32.xlu2 %v10536_v12, %s16852_s30  ;;  %v15240_v12 = vld [vmem:[#allocation7 + $0x40] sm:$0xff]  ;;  %v11655_v27 = vld [vmem:[#allocation3 + $0x70] sm:$0xf0] }
 0x87c   : > { %v6025_v22 = vpop.permute.xlu0 %6024 }
 0x87d   : > { %v15191_v29 = vpop.permute.xlu2 %6004  ;;  %v6045_v13 = vsel %vm758_vm1, %v6023_v55, %v6025_v22  ;;  %v10856_v55 = vor.u32 %v11689_v41, %v10855_v32  ;;  %v11656_v32 = vld [vmem:[#allocation3 + $0x88] sm:$0xf] }
 0x87e   : > { %v6038_v44 = vsel %vm758_vm1, %v15140_v57, %v15191_v29  ;;  %v10739_v57 = vld [vmem:[#allocation3 + $0xc4] sm:$0xf] }
 0x87f   : > { %6066 = vmatpush.bf16.msra.mxu2 %v6042_v26  ;;  %v10740_v61 = vor.u32 %v11661_v7, %v10739_v57 }
 0x882   : > { %6880 = vrot.lane.b32.xlu1 %v10788_v46, %s16826_s15  ;;  %7201 = vrot.lane.b32.xlu0 %v10880_v56, %s16827_s17  ;;  %v15258_v2 = vpop.permute.xlu1 %6222 }
 0x883   : > { %6067 = vmatpush.bf16.msra.mxu2 %v6040_v33  ;;  %7193 = vrot.lane.b32.xlu2 %v10864_v25, %s16827_s17 }
 0x885   : > { %v15204_v1 = vpop.permute.xlu2 %5998 }
 0x886   : > { %v6036_v52 = vsel %vm758_vm1, %v15147_v42, %v15204_v1  ;;  %v11659_v42 = vld [vmem:[#allocation3 + $0xb0] sm:$0xf0] }
 0x887   : > { %6068 = vmatpush.bf16.msra.mxu2 %v6038_v44  ;;  %v11651_v44 = vld [vmem:[#allocation3 + $0x30] sm:$0xf0] }
 0x88a   : > { %7453 = vperm.xlu1 %11876, %v7379_v17   ;;  %6926 = vrot.lane.b32.xlu0 %v10880_v56, %s16826_s15  ;;  %v15268_v56 = vld [vmem:[#allocation7 + $0x48] sm:$0xff]  ;;  %v15273_v33 = vpop.permute.xlu1 %6216 }
 0x88b   : > { %6069 = vmatpush.bf16.msra.mxu2 %v6036_v52  ;;  %6918 = vrot.lane.b32.xlu2 %v10864_v25, %s16826_s15  ;;  %v10707_v25 = vld [vmem:[#allocation3 + $0x44] sm:$0xf]  ;;  %v11662_v52 = vld [vmem:[#allocation3 + $0xe8] sm:$0xf] }
 0x88c   : > { %v6031_v28 = vpop.permute.xlu0 %6030  ;;  %v10708_v22 = vor.u32 %v11653_v53, %v10707_v25  ;;  %v11650_v53 = vld [vmem:[#allocation3 + $0x28] sm:$0xf] }
 0x88d   : > { %v15219_v5 = vpop.permute.xlu2 %5992  ;;  %v6047_v6 = vsel %vm758_vm1, %v6029_v37, %v6031_v28  ;;  %v11684_v37 = vld [vmem:[#allocation3 + $0x88] sm:$0xf] }
 0x88e   : > { %v6034_v31 = vsel %vm758_vm1, %v15154_v59, %v15219_v5  ;;  %6113 = vmatpush.bf16.msra.mxu3 %v6047_v6  ;;  %v10840_v38 = vor.u32 %v11684_v37, %v10837_v16  ;;  %v10699_v6 = vld [vmem:[#allocation3 + $0x24] sm:$0xf]  ;;  %v10831_v16 = vld [vmem:[#allocation3 + $0x6c] sm:$0xf] }
 0x88f   : > { %6070 = vmatpush.bf16.msra.mxu2 %v6034_v31 }
 0x892   : > { %7448 = vperm.xlu1 %11876, %v7378_v39   ;;  %7195 = vrot.lane.b32.xlu0 %v10868_v35, %s16827_s17  ;;  %v7366_v39 = vld [vmem:[%s16692_s9 + $0x8] sm:$0xff] }
 0x893   : > { %7187 = vrot.lane.b32.xlu2 %v10852_v49, %s16827_s17  ;;  %6114 = vmatpush.bf16.msra.mxu3 %v6045_v13  ;;  %v10741_v13 = vld [vmem:[#allocation3 + $0xd4] sm:$0xf0] }
 0x894   : > { %v6007_v3 = vpop.permute.xlu0 %6006 }
 0x895   : > { %v15231_v19 = vpop.permute.xlu2 %5986  ;;  %v6039_v18 = vsel %vm758_vm1, %v15191_v29, %v6007_v3  ;;  %v10715_v29 = vld [vmem:[#allocation3 + $0x64] sm:$0xf]  ;;  %v10828_v3 = vor.u32 %v11681_v30, %v10825_v4 }
 0x896   : > { %v6032_v60 = vsel %vm758_vm1, %v15168_v23, %v15231_v19  ;;  %v10731_v23 = vld [vmem:[#allocation3 + $0xa4] sm:$0xf]  ;;  %v10716_v26 = vor.u32 %v11655_v27, %v10715_v29 }
 0x897   : > { %6071 = vmatpush.bf16.msra.mxu2 %v6032_v60  ;;  %6115 = vmatpush.bf16.msra.mxu3 %v6043_v24  ;;  %v10732_v9 = vor.u32 %v11659_v42, %v10731_v23  ;;  %v15297_v42 = vld [vmem:[#allocation7 + $0x50] sm:$0xff] }
 0x89a   : > { %6072 = vmatmul.bf16.vlgmr.msra.gmra.mxu2 %v15240_v12  ;;  %7423 = vperm.xlu1 %11876, %v7373_v10   ;;  %v15288_v10 = vpop.permute.xlu1 %6210 }
 0x89b   : > { %6549 = vmatpush.bf16.msrb.mxu2 %v10748_v45  ;;  %6920 = vrot.lane.b32.xlu0 %v10868_v35, %s16826_s15  ;;  %v10700_v35 = vor.u32 %v11651_v44, %v10699_v6  ;;  %v10733_v45 = vld [vmem:[#allocation3 + $0xb4] sm:$0xf0] }
 0x89c   : > { %6912 = vrot.lane.b32.xlu2 %v10852_v49, %s16826_s15  ;;  %6116 = vmatpush.bf16.msra.mxu3 %v6041_v54  ;;  %v6001_v11 = vpop.permute.xlu0 %6000  ;;  %v11649_v49 = vld [vmem:[#allocation3 + $0x10] sm:$0xf0] }
 0x89d   : > { %v15251_v59 = vpop.permute.xlu2 %6248  ;;  %v6037_v46 = vsel %vm758_vm1, %v15204_v1, %v6001_v11  ;;  %v10749_v1 = vld [vmem:[#allocation3 + $0xf4] sm:$0xf0]  ;;  %v10692_v60 = vor.u32 %v11649_v49, %v10691_v34  ;;  %v11636_v34 = vld [vmem:[#allocation7 + $0x60] sm:$0xff] }
 0x89e   : > { %v10752_v31 = vor.u32 %v11662_v52, %v10749_v1  ;;  %v10725_v11 = vld [vmem:[#allocation3 + $0x94] sm:$0xf0]  ;;  %v6270_v23 = vsel %vm972_vm4, %v15184_v20, %v15251_v59 }
 0x89f   : > { %6550 = vmatpush.bf16.msrb.mxu2 %v10740_v61  ;;  %v10728_v41 = vor.u32 %v11656_v32, %v10725_v11  ;;  %v10709_v20 = vld [vmem:[#allocation3 + $0x54] sm:$0xf0] }
 0x8a0   : > { %6117 = vmatpush.bf16.msra.mxu3 %v6039_v18  ;;  %v11683_v18 = vld [vmem:[#allocation3 + $0x78] sm:$0xf0]  ;;  %v10693_v1 = vld [vmem:[#allocation3 + $0x14] sm:$0xf0] }
 0x8a2   : > { %7418 = vperm.xlu1 %11876, %v7372_v0   ;;  %v15309_v48 = vpop.permute.xlu1 %7191 }
 0x8a3   : > { %6551 = vmatpush.bf16.msrb.mxu2 %v10732_v9  ;;  %7189 = vrot.lane.b32.xlu0 %v10856_v55, %s16827_s17  ;;  %v10717_v9 = vld [vmem:[#allocation3 + $0x74] sm:$0xf0] }
 0x8a4   : > { %7181 = vrot.lane.b32.xlu2 %v10840_v38, %s16827_s17  ;;  %6118 = vmatpush.bf16.msra.mxu3 %v6037_v46  ;;  %v5995_v47 = vpop.permute.xlu0 %5994  ;;  %v11678_v46 = vld [vmem:[#allocation3 + $0x48] sm:$0xf] }
 0x8a5   : > { %v15264_v36 = vpop.permute.xlu2 %6242  ;;  %v6035_v51 = vsel %vm758_vm1, %v15219_v5, %v5995_v47  ;;  %v11652_v47 = vld [vmem:[#allocation3 + $0x48] sm:$0xf] }
 0x8a6   : > { %v6268_v62 = vsel %vm972_vm4, %v15196_v8, %v15264_v36 }
 0x8a7   : > { %6552 = vmatpush.bf16.msrb.mxu2 %v10724_v63  ;;  %v10832_v63 = vor.u32 %v11683_v18, %v10831_v16  ;;  %v10795_v16 = vld [vmem:[#allocation3 + $0xc] sm:$0xf]  ;;  %v11674_v18 = vld [vmem:[#allocation3 + $0x18] sm:$0xf0] }
 0x8a8   : > { %6119 = vmatpush.bf16.msra.mxu3 %v6035_v51  ;;  %v10712_v51 = vor.u32 %v11652_v47, %v10709_v20  ;;  %v11638_v47 = vld [vmem:[#allocation7 + $0x70] sm:$0xff] }
 0x8aa   : > { %6077 = vmatmul.bf16.gmra.mxu2 %v15268_v56  ;;  %7393 = vperm.xlu1 %11876, %v7367_v58   ;;  %v15325_v44 = vpop.permute.xlu1 %6916 }
 0x8ab   : > { %6553 = vmatpush.bf16.msrb.mxu2 %v10716_v26  ;;  %6914 = vrot.lane.b32.xlu0 %v10856_v55, %s16826_s15  ;;  %v11654_v55 = vld [vmem:[#allocation3 + $0x68] sm:$0xf]  ;;  %v10701_v26 = vld [vmem:[#allocation3 + $0x34] sm:$0xf0] }
 0x8ac   : > { %6906 = vrot.lane.b32.xlu2 %v10840_v38, %s16826_s15  ;;  %v5989_v17 = vpop.permute.xlu0 %5988  ;;  %v10720_v37 = vor.u32 %v11654_v55, %v10717_v9  ;;  %v10813_v38 = vld [vmem:[#allocation3 + $0x54] sm:$0xf0]  ;;  %v10704_v25 = vor.u32 %v11650_v53, %v10701_v26  ;;  %v11601_v9 = vld [vmem:[#allocation7 + $0x8] sm:$0xff] }
 0x8ad   : > { %v15278_v28 = vpop.permute.xlu2 %6236  ;;  %v6033_v5 = vsel %vm758_vm1, %v15231_v19, %v5989_v17  ;;  %v11660_v19 = vld [vmem:[#allocation3 + $0xc8] sm:$0xf]  ;;  %v10816_v27 = vor.u32 %v11678_v46, %v10813_v38  ;;  %v10796_v38 = vor.u32 %v11674_v18, %v10795_v16  ;;  %v7380_v53 = vld [vmem:[%s16692_s9 + $0x78] sm:$0xff] }
 0x8ae   : > { %6120 = vmatpush.bf16.msra.mxu3 %v6033_v5  ;;  %v10744_v24 = vor.u32 %v11660_v19, %v10741_v13  ;;  %v6266_v29 = vsel %vm972_vm4, %v15217_v43, %v15278_v28  ;;  %v11648_v17 = vld [vmem:[#allocation3 + $0x8] sm:$0xf]  ;;  %v11600_v19 = vld [vmem:[#allocation7] sm:$0xff] }
 0x8af   : > { %6554 = vmatpush.bf16.msrb.mxu2 %v10708_v22  ;;  %v10696_v43 = vor.u32 %v11648_v17, %v10693_v1  ;;  %v11639_v1 = vld [vmem:[#allocation7 + $0x78] sm:$0xff] }
 0x8b0   : > { %v11603_v17 = vld [vmem:[#allocation7 + $0x18] sm:$0xff] }
 0x8b1   : > { %6121 = vmatmul.bf16.vlgmr.msra.gmra.mxu3 %v15240_v12  ;;  %v11658_v12 = vld [vmem:[#allocation3 + $0xa8] sm:$0xf] }
 0x8b2   : > { %6598 = vmatpush.bf16.msrb.mxu3 %v10752_v31  ;;  %7388 = vperm.xlu1 %11876, %v7366_v39   ;;  %v10736_v54 = vor.u32 %v11658_v12, %v10733_v45  ;;  %v11693_v39 = vld [vmem:[#allocation3 + $0xe8] sm:$0xf]  ;;  %v15340_v49 = vpop.permute.xlu1 %7185  ;;  %v11677_v45 = vld [vmem:[#allocation3 + $0x38] sm:$0xf0] }
 0x8b3   : > { %6555 = vmatpush.bf16.msrb.mxu2 %v10700_v35  ;;  %7183 = vrot.lane.b32.xlu0 %v10844_v15, %s16827_s17  ;;  %v10873_v35 = vld [vmem:[#allocation3 + $0xf4] sm:$0xf0] }
 0x8b4   : > { %7175 = vrot.lane.b32.xlu2 %v10828_v3, %s16827_s17  ;;  %v15290_v7 = vpop.permute.xlu0 %6250 }
 0x8b5   : > { %v15292_v57 = vpop.permute.xlu2 %6254 }
 0x8b6   : > { %6599 = vmatpush.bf16.msrb.mxu3 %v10744_v24  ;;  %v6272_v61 = vsel %vm972_vm4, %v15175_v50, %v15292_v57  ;;  %v10807_v24 = vld [vmem:[#allocation3 + $0x2c] sm:$0xf] }
 0x8b7   : > { %6556 = vmatpush.bf16.msrb.mxu2 %v10692_v60  ;;  %6290 = vmatpush.bf16.msra.mxu0 %v6272_v61  ;;  %v10808_v12 = vor.u32 %v11677_v45, %v10807_v24  ;;  %v11675_v61 = vld [vmem:[#allocation3 + $0x28] sm:$0xf] }
 0x8ba   : > { %6600 = vmatpush.bf16.msrb.mxu3 %v10736_v54  ;;  %6082 = vmatmul.bf16.gmra.mxu2 %v15297_v42  ;;  %v15353_v60 = vpop.permute.xlu1 %6910 }
 0x8bb   : > { %6908 = vrot.lane.b32.xlu0 %v10844_v15, %s16826_s15  ;;  %6291 = vmatpush.bf16.msra.mxu0 %v6270_v23  ;;  %v6271_v15 = vsel %vm972_vm4, %v15251_v59, %v15290_v7  ;;  %v10801_v7 = vld [vmem:[#allocation3 + $0x34] sm:$0xf0]  ;;  %v11637_v23 = vld [vmem:[#allocation7 + $0x68] sm:$0xff] }
 0x8bc   : > { %6900 = vrot.lane.b32.xlu2 %v10828_v3, %s16826_s15  ;;  %v15305_v50 = vpop.permute.xlu0 %6244  ;;  %v10804_v54 = vor.u32 %v11675_v61, %v10801_v7  ;;  %v11605_v7 = vld [vmem:[#allocation7 + $0x28] sm:$0xff] }
 0x8bd   : > { %v15307_v0 = vpop.permute.xlu2 %6230  ;;  %v6269_v30 = vsel %vm972_vm4, %v15264_v36, %v15305_v50 }
 0x8be   : > { %6601 = vmatpush.bf16.msrb.mxu3 %v10728_v41  ;;  %v6264_v22 = vsel %vm972_vm4, %v15233_v21, %v15307_v0  ;;  %v10819_v21 = vld [vmem:[#allocation3 + $0x4c] sm:$0xf] }
 0x8bf   : > { %6292 = vmatpush.bf16.msra.mxu0 %v6268_v62  ;;  %v10820_v4 = vor.u32 %v11680_v40, %v10819_v21 }
 0x8c1   : > { %6126 = vmatmul.bf16.gmra.mxu3 %v15268_v56  ;;  %v11635_v56 = vld [vmem:[#allocation7 + $0x58] sm:$0xff] }
 0x8c2   : > { %6602 = vmatpush.bf16.msrb.mxu3 %v10720_v37  ;;  %v15366_v41 = vpop.permute.xlu1 %7179  ;;  %v10789_v37 = vld [vmem:[#allocation3 + $0x14] sm:$0xf0] }
 0x8c3   : > { %7177 = vrot.lane.b32.xlu0 %v10832_v63, %s16827_s17  ;;  %6293 = vmatpush.bf16.msra.mxu0 %v6266_v29 }
 0x8c4   : > { %7169 = vrot.lane.b32.xlu2 %v10816_v27, %s16827_s17  ;;  %v6239_v8 = vpop.permute.xlu0 %6238 }
 0x8c5   : > { %v15320_v58 = vpop.permute.xlu2 %6224  ;;  %v6267_v59 = vsel %vm972_vm4, %v15278_v28, %v6239_v8 }
 0x8c6   : > { %6603 = vmatpush.bf16.msrb.mxu3 %v10712_v51  ;;  %v6262_v52 = vsel %vm972_vm4, %v15258_v2, %v15320_v58  ;;  %v10876_v2 = vor.u32 %v11693_v39, %v10873_v35  ;;  %v11602_v51 = vld [vmem:[#allocation7 + $0x10] sm:$0xff]  ;;  %v11640_v39 = vld [vmem:[#allocation7 + $0x80] sm:$0xff] }
 0x8c7   : > { %6294 = vmatpush.bf16.msra.mxu0 %v6264_v22 }
 0x8ca   : > { %6604 = vmatpush.bf16.msrb.mxu3 %v10704_v25  ;;  %6087 = vmatmul.bf16.gmra.mxu2 %v11635_v56  ;;  %v15373_v62 = vpop.permute.xlu1 %6904 }
 0x8cb   : > { %6902 = vrot.lane.b32.xlu0 %v10832_v63, %s16826_s15  ;;  %6295 = vmatpush.bf16.msra.mxu0 %v6262_v52  ;;  %v11672_v63 = vld [vmem:[#allocation3 + $0x8] sm:$0xf]  ;;  %v7375_v52 = vld [vmem:[%s16692_s9 + $0x50] sm:$0xff] }
 0x8cc   : > { %6894 = vrot.lane.b32.xlu2 %v10816_v27, %s16826_s15  ;;  %v6257_v14 = vpop.permute.xlu0 %6256  ;;  %v10792_v20 = vor.u32 %v11672_v63, %v10789_v37 }
 0x8cd   : > { %v6219_v5 = vpop.permute.xlu2 %6218  ;;  %v6273_v6 = vsel %vm972_vm4, %v15292_v57, %v6257_v14 }
 0x8ce   : > { %6605 = vmatpush.bf16.msrb.mxu3 %v10696_v43  ;;  %v6260_v31 = vsel %vm972_vm4, %v15273_v33, %v6219_v5  ;;  %6339 = vmatpush.bf16.msra.mxu1 %v6273_v6  ;;  %v7376_v43 = vld [vmem:[%s16692_s9 + $0x58] sm:$0xff]  ;;  %v7374_v6 = vld [vmem:[%s16692_s9 + $0x48] sm:$0xff] }
 0x8cf   : > { %6296 = vmatpush.bf16.msra.mxu0 %v6260_v31 }
 0x8d1   : > { %6131 = vmatmul.bf16.gmra.mxu3 %v15297_v42 }
 0x8d2   : > { %6340 = vmatpush.bf16.msra.mxu1 %v6271_v15  ;;  %v15381_v29 = vpop.permute.xlu1 %7173  ;;  %v7370_v15 = vld [vmem:[%s16692_s9 + $0x28] sm:$0xff] }
 0x8d3   : > { %7171 = vrot.lane.b32.xlu0 %v10820_v4, %s16827_s17 }
 0x8d4   : > { %7199 = vrot.lane.b32.xlu2 %v10876_v2, %s16827_s17  ;;  %v6233_v33 = vpop.permute.xlu0 %6232 }
 0x8d5   : > { %v6213_v13 = vpop.permute.xlu2 %6212  ;;  %v6265_v57 = vsel %vm972_vm4, %v15307_v0, %v6233_v33  ;;  %v7369_v33 = vld [vmem:[%s16692_s9 + $0x20] sm:$0xff] }
 0x8d6   : > { %v6258_v3 = vsel %vm972_vm4, %v15288_v10, %v6213_v13  ;;  %6341 = vmatpush.bf16.msra.mxu1 %v6269_v30 }
 0x8d7   : > { %6297 = vmatpush.bf16.msra.mxu0 %v6258_v3 }
 0x8da   : > { %6092 = vmatmul.bf16.gmra.mxu2 %v11636_v34  ;;  %6298 = vmatmul.bf16.vlgmr.msra.gmra.mxu0 %v11600_v19  ;;  %v15395_v25 = vpop.permute.xlu1 %6898 }
 0x8db   : > { %6896 = vrot.lane.b32.xlu0 %v10820_v4, %s16826_s15  ;;  %6342 = vmatpush.bf16.msra.mxu1 %v6267_v59  ;;  %v11604_v4 = vld [vmem:[#allocation7 + $0x20] sm:$0xff] }
 0x8dc   : > { %6924 = vrot.lane.b32.xlu2 %v10876_v2, %s16826_s15  ;;  %v6227_v36 = vpop.permute.xlu0 %6226 }
 0x8dd   : > { %v15355_v10 = vpop.permute.xlu2 %7193  ;;  %v6263_v28 = vsel %vm972_vm4, %v15320_v58, %v6227_v36  ;;  %v7377_v58 = vld [vmem:[%s16692_s9 + $0x60] sm:$0xff] }
 0x8df   : > { %6343 = vmatpush.bf16.msra.mxu1 %v6265_v57  ;;  %v11641_v57 = vld [vmem:[#allocation7 + $0x88] sm:$0xff] }
 0x8e1   : > { %6136 = vmatmul.bf16.gmra.mxu3 %v11635_v56 }
 0x8e2   : > { %v15409_v40 = vpop.permute.xlu1 %7167 }
 0x8e3   : > { %7165 = vrot.lane.b32.xlu0 %v10808_v12, %s16827_s17  ;;  %6344 = vmatpush.bf16.msra.mxu1 %v6263_v28 }
 0x8e4   : > { %7163 = vrot.lane.b32.xlu2 %v10804_v54, %s16827_s17  ;;  %v6221_v42 = vpop.permute.xlu0 %6220 }
 0x8e5   : > { %v15363_v11 = vpop.permute.xlu2 %6918  ;;  %v6261_v32 = vsel %vm972_vm4, %v6219_v5, %v6221_v42  ;;  %v7371_v5 = vld [vmem:[%s16692_s9 + $0x30] sm:$0xff] }
 0x8e7   : > { %6345 = vmatpush.bf16.msra.mxu1 %v6261_v32 }
 0x8ea   : > { %6097 = vmatmul.bf16.gmra.mxu2 %v11637_v23  ;;  %6303 = vmatmul.bf16.gmra.mxu0 %v11601_v9  ;;  %v15419_v2 = vpop.permute.xlu1 %6892 }
 0x8eb   : > { %6890 = vrot.lane.b32.xlu0 %v10808_v12, %s16826_s15 }
 0x8ec   : > { %6888 = vrot.lane.b32.xlu2 %v10804_v54, %s16826_s15  ;;  %v6215_v50 = vpop.permute.xlu0 %6214 }
 0x8ed   : > { %v15370_v0 = vpop.permute.xlu2 %7187  ;;  %v6259_v55 = vsel %vm972_vm4, %v6213_v13, %v6215_v50 }
 0x8ee   : > { %6346 = vmatpush.bf16.msra.mxu1 %v6259_v55 }
 0x8f1   : > { %6141 = vmatmul.bf16.gmra.mxu3 %v11636_v34  ;;  %6347 = vmatmul.bf16.vlgmr.msra.gmra.mxu1 %v11600_v19  ;;  %v7365_v34 = vld [vmem:[%s16692_s9] sm:$0xff]  ;;  %v7368_v19 = vld [vmem:[%s16692_s9 + $0x18] sm:$0xff] }
 0x8f2   : > { %v7198_v59 = vpop.permute.xlu1 %7197 }
 0x8f3   : > { %7159 = vrot.lane.b32.xlu0 %v10796_v38, %s16827_s17 }
 0x8f4   : > { %7157 = vrot.lane.b32.xlu2 %v10792_v20, %s16827_s17  ;;  %v15377_v46 = vpop.permute.xlu0 %7201 }
 0x8f6   : > { %v15379_v27 = vpop.permute.xlu2 %6912 }
 0x8fa   : > { %6102 = vmatmul.bf16.gmra.mxu2 %v11638_v47  ;;  %6308 = vmatmul.bf16.gmra.mxu0 %v11602_v51  ;;  %v6923_v12 = vpop.permute.xlu1 %6922 }
 0x8fb   : > { %6884 = vrot.lane.b32.xlu0 %v10796_v38, %s16826_s15 }
 0x8fc   : > { %6882 = vrot.lane.b32.xlu2 %v10792_v20, %s16826_s15  ;;  %v15385_v26 = vpop.permute.xlu0 %6926  ;;  %v15458_v20 = vld [vmem:[#allocation7 + $0x30] sm:$0xff] }
 0x8fe   : > { %v15387_v8 = vpop.permute.xlu2 %7181 }
 0x901   : > { %6146 = vmatmul.bf16.gmra.mxu3 %v11637_v23  ;;  %6352 = vmatmul.bf16.gmra.mxu1 %v11601_v9  ;;  %v7215_v23 = vsel %vm1820_vm6, %v15309_v48, %v15355_v10  ;;  %v15460_v48 = vld [vmem:[#allocation7 + $0x90] sm:$0xff] }
 0x902   : > { %v7162_v55 = vpop.permute.xlu1 %7161 }
 0x903   : > { %7443 = vperm.xlu0 %11875, %v7377_v58  }
 0x904   : > { %7458 = vperm.xlu2 %11877, %v7380_v53   ;;  %v7196_v56 = vpop.permute.xlu0 %7195 }
 0x905   : > { %v7216_v9 = vsel %vm1820_vm6, %v15355_v10, %v7196_v56  ;;  %v7213_v10 = vsel %vm1820_vm6, %v15340_v49, %v15370_v0  ;;  %v7211_v49 = vsel %vm1820_vm6, %v15366_v41, %v15387_v8 }
 0x906   : > { %v15397_v22 = vpop.permute.xlu2 %6906 }
 0x90a   : > { %6107 = vmatmul.bf16.gmra.mxu2 %v11639_v1  ;;  %6313 = vmatmul.bf16.gmra.mxu0 %v11603_v17 }
 0x90b   : > { %7438 = vperm.xlu0 %11875, %v7376_v43  }
 0x90c   : > { %7433 = vperm.xlu2 %11877, %v7375_v52  }
 0x90d   : > { %v15407_v21 = vpop.permute.xlu0 %6920 }
 0x90e   : > { %v15405_v14 = vpop.permute.xlu2 %7175 }
 0x90f   : > { %v7209_v41 = vsel %vm1820_vm6, %v15381_v29, %v15405_v14 }
 0x911   : > { %6151 = vmatmul.bf16.gmra.mxu3 %v11638_v47  ;;  %6357 = vmatmul.bf16.gmra.mxu1 %v11602_v51  ;;  %v6940_v47 = vsel %vm1558_vm5, %v15325_v44, %v15363_v11  ;;  %v6941_v51 = vsel %vm1558_vm5, %v15363_v11, %v15407_v21  ;;  %v6938_v11 = vsel %vm1558_vm5, %v15353_v60, %v15379_v27  ;;  %v11607_v21 = vld [vmem:[#allocation7 + $0x38] sm:$0xff] }
 0x912   : > { %v6936_v60 = vsel %vm1558_vm5, %v15373_v62, %v15397_v22 }
 0x913   : > { %7413 = vperm.xlu0 %11875, %v7371_v5   ;;  %v11643_v5 = vld [vmem:[#allocation7 + $0x98] sm:$0xff] }
 0x914   : > { %7428 = vperm.xlu2 %11877, %v7374_v6  }
 0x915   : > { %v7190_v35 = vpop.permute.xlu0 %7189 }
 0x916   : > { %v15417_v31 = vpop.permute.xlu2 %6900 }
 0x917   : > { %v6934_v62 = vsel %vm1558_vm5, %v15395_v25, %v15417_v31 }
 0x91a   : > { %6318 = vmatmul.bf16.gmra.mxu0 %v11604_v4  ;;  %6557 = vmatmul.bf16.vlgmr.msrb.gmra.mxu2 %v11640_v39 }
 0x91b   : > { %7408 = vperm.xlu0 %11875, %v7370_v15  }
 0x91c   : > { %7403 = vperm.xlu2 %11877, %v7369_v33  }
 0x91d   : > { %v15427_v13 = vpop.f32.mrf.mxu2  ;;  %v6915_v3 = vpop.permute.xlu0 %6914 }
 0x91e   : > { %v15429_v30 = vpop.permute.xlu2 %7169  ;;  %v6939_v56 = vsel %vm1558_vm5, %v15379_v27, %v6915_v3 }
 0x91f   : > { %v7207_v29 = vsel %vm1820_vm6, %v15409_v40, %v15429_v30 }
 0x921   : > { %6156 = vmatmul.bf16.gmra.mxu3 %v11639_v1  ;;  %6362 = vmatmul.bf16.gmra.mxu1 %v11603_v17  ;;  %v6887_v1 = vpop.permute.xlu1 %6886 }
 0x923   : > { %7383 = vperm.xlu0 %11875, %v7365_v34  }
 0x924   : > { %7398 = vperm.xlu2 %11877, %v7368_v19  }
 0x925   : > { %v15437_v36 = vpop.f32.mrf.mxu2  ;;  %v7184_v45 = vpop.permute.xlu0 %7183 }
 0x926   : > { %v15439_v24 = vpop.permute.xlu2 %6894 }
 0x927   : > { %v6932_v25 = vsel %vm1558_vm5, %v15419_v2, %v15439_v24 }
 0x92a   : > { %6323 = vmatmul.bf16.gmra.mxu0 %v11605_v7  ;;  %6562 = vmatmul.bf16.gmra.mxu2 %v11641_v57 }
 0x92d   : > { %v15441_v61 = vpop.f32.mrf.mxu2  ;;  %v6909_v32 = vpop.permute.xlu0 %6908 }
 0x92e   : > { %v7200_v54 = vpop.permute.xlu2 %7199  ;;  %v6937_v27 = vsel %vm1558_vm5, %v15397_v22, %v6909_v32 }
 0x92f   : > { %v7217_v28 = vsel %vm1820_vm6, %v7198_v59, %v7200_v54  ;;  %v7218_v42 = vsel %vm1820_vm6, %v7200_v54, %v15377_v46  ;;  %v7214_v46 = vsel %vm1820_vm6, %v15370_v0, %v7190_v35  ;;  %v7212_v0 = vsel %vm1820_vm6, %v15387_v8, %v7184_v45  ;;  %v7156_v35 = vpop.permute.xlu1 %7155 }
 0x930   : > { %7235 = vmatpush.bf16.msra.mxu2 %v7217_v28  ;;  %7284 = vmatpush.bf16.msra.mxu3 %v7218_v42 }
 0x931   : > { %6367 = vmatmul.bf16.gmra.mxu1 %v11604_v4  ;;  %6606 = vmatmul.bf16.vlgmr.msrb.gmra.mxu3 %v11640_v39 }
 0x934   : > { %7236 = vmatpush.bf16.msra.mxu2 %v7215_v23  ;;  %7285 = vmatpush.bf16.msra.mxu3 %v7216_v9  ;;  %v15451_v50 = vpop.f32.mrf.mxu3 }
 0x935   : > { %v15453_v16 = vpop.f32.mrf.mxu2  ;;  %v7178_v63 = vpop.permute.xlu0 %7177 }
 0x936   : > { %v6925_v18 = vpop.permute.xlu2 %6924  ;;  %v7210_v8 = vsel %vm1820_vm6, %v15405_v14, %v7178_v63  ;;  %v11645_v63 = vld [vmem:[#allocation7 + $0xa8] sm:$0xff] }
 0x937   : > { %v6942_v37 = vsel %vm1558_vm5, %v6923_v12, %v6925_v18  ;;  %v6943_v38 = vsel %vm1558_vm5, %v6925_v18, %v15385_v26  ;;  %v6881_v2 = vpop.permute.xlu1 %6880  ;;  %v11664_v12 = vld [vmem:[#allocation7 + $0xc0] sm:$0xff] }
 0x938   : > { %6960 = vmatpush.bf16.msrb.mxu0 %v6942_v37  ;;  %7009 = vmatpush.bf16.msrb.mxu1 %v6943_v38 }
 0x939   : > { %7237 = vmatpush.bf16.msra.mxu2 %v7213_v10  ;;  %7286 = vmatpush.bf16.msra.mxu3 %v7214_v46 }
 0x93a   : > { %6328 = vmatmul.bf16.gmra.mxu0 %v15458_v20  ;;  %6567 = vmatmul.bf16.gmra.mxu2 %v15460_v48 }
 0x93c   : > { %6961 = vmatpush.bf16.msrb.mxu0 %v6940_v47  ;;  %7010 = vmatpush.bf16.msrb.mxu1 %v6941_v51  ;;  %v15480_v26 = vpop.f32.mrf.mxu3 }
 0x93d   : > { %7238 = vmatpush.bf16.msra.mxu2 %v7211_v49  ;;  %7287 = vmatpush.bf16.msra.mxu3 %v7212_v0  ;;  %v15482_v58 = vpop.f32.mrf.mxu2  ;;  %v6903_v53 = vpop.permute.xlu0 %6902 }
 0x93e   : > { %v7164_v44 = vpop.permute.xlu2 %7163  ;;  %v6935_v22 = vsel %vm1558_vm5, %v15417_v31, %v6903_v53 }
 0x93f   : > { %v7205_v40 = vsel %vm1820_vm6, %v7162_v55, %v7164_v44 }
 0x940   : > { %6962 = vmatpush.bf16.msrb.mxu0 %v6938_v11  ;;  %7011 = vmatpush.bf16.msrb.mxu1 %v6939_v56 }
 0x941   : > { %7239 = vmatpush.bf16.msra.mxu2 %v7209_v41  ;;  %7288 = vmatpush.bf16.msra.mxu3 %v7210_v8  ;;  %v11646_v8 = vld [vmem:[#allocation7 + $0xb0] sm:$0xff] }
 0x942   : > { %6372 = vmatmul.bf16.gmra.mxu1 %v11605_v7  ;;  %6611 = vmatmul.bf16.gmra.mxu3 %v11641_v57  ;;  %v11644_v57 = vld [vmem:[#allocation7 + $0xa0] sm:$0xff] }
 0x944   : > { %6963 = vmatpush.bf16.msrb.mxu0 %v6936_v60  ;;  %7012 = vmatpush.bf16.msrb.mxu1 %v6937_v27  ;;  %v15502_v17 = vpop.f32.mrf.mxu3 }
 0x945   : > { %7240 = vmatpush.bf16.msra.mxu2 %v7207_v29  ;;  %v15504_v43 = vpop.f32.mrf.mxu2  ;;  %v7172_v14 = vpop.permute.xlu0 %7171 }
 0x946   : > { %v6889_v52 = vpop.permute.xlu2 %6888  ;;  %v7208_v6 = vsel %vm1820_vm6, %v15429_v30, %v7172_v14 }
 0x947   : > { %7289 = vmatpush.bf16.msra.mxu3 %v7208_v6  ;;  %v6930_v33 = vsel %vm1558_vm5, %v6887_v1, %v6889_v52  ;;  %v11666_v1 = vld [vmem:[#allocation7 + $0xd0] sm:$0xff] }
 0x948   : > { %6964 = vmatpush.bf16.msrb.mxu0 %v6934_v62  ;;  %7013 = vmatpush.bf16.msrb.mxu1 %v6935_v22 }
 0x949   : > { %7241 = vmatpush.bf16.msra.mxu2 %v7205_v40  ;;  %v11667_v40 = vld [vmem:[#allocation7 + $0xd8] sm:$0xff] }
 0x94a   : > { %6333 = vmatmul.bf16.gmra.mxu0 %v11607_v21  ;;  %6572 = vmatmul.bf16.gmra.mxu2 %v11643_v5 }
 0x94c   : > { %6965 = vmatpush.bf16.msrb.mxu0 %v6932_v25  ;;  %v15517_v31 = vpop.f32.mrf.mxu3 }
 0x94d   : > { %v15519_v4 = vpop.f32.mrf.mxu2  ;;  %v6897_v15 = vpop.permute.xlu0 %6896 }
 0x94e   : > { %v7158_v39 = vpop.permute.xlu2 %7157  ;;  %v6933_v3 = vsel %vm1558_vm5, %v15439_v24, %v6897_v15 }
 0x94f   : > { %v7203_v30 = vsel %vm1820_vm6, %v7156_v35, %v7158_v39  ;;  %7014 = vmatpush.bf16.msrb.mxu1 %v6933_v3 }
 0x950   : > { %6966 = vmatpush.bf16.msrb.mxu0 %v6930_v33  ;;  %7242 = vmatpush.bf16.msra.mxu2 %v7203_v30 }
 0x952   : > { %6377 = vmatmul.bf16.gmra.mxu1 %v15458_v20  ;;  %6616 = vmatmul.bf16.gmra.mxu3 %v15460_v48  ;;  %v11665_v20 = vld [vmem:[#allocation7 + $0xc8] sm:$0xff] }
 0x954   : > { %v15527_v34 = vpop.f32.mrf.mxu3 }
 0x955   : > { %v15529_v19 = vpop.f32.mrf.mxu2  ;;  %v7166_v45 = vpop.permute.xlu0 %7165 }
 0x956   : > { %v6883_v59 = vpop.permute.xlu2 %6882  ;;  %v7206_v24 = vsel %vm1820_vm6, %v7164_v44, %v7166_v45 }
 0x957   : > { %v6928_v7 = vsel %vm1558_vm5, %v6881_v2, %v6883_v59  ;;  %v6299_v54 = vpop.f32.mrf.mxu0  ;;  %7290 = vmatpush.bf16.msra.mxu3 %v7206_v24  ;;  %v11668_v2 = vld [vmem:[#allocation7 + $0xe0] sm:$0xff] }
 0x958   : > { %6967 = vmatpush.bf16.msrb.mxu0 %v6928_v7  ;;  %v15534_v28 = vadd.f32 %v6299_v54, %v15427_v13 }
 0x95a   : > { %6577 = vmatmul.bf16.gmra.mxu2 %v11644_v57 }
 0x95b   : > { %6968 = vmatmul.bf16.vlgmr.msrb.gmra.mxu0 %v11664_v12 }
 0x95c   : > { %v15536_v42 = vpop.f32.mrf.mxu3 }
 0x95d   : > { %v15538_v32 = vpop.f32.mrf.mxu2  ;;  %v6891_v23 = vpop.permute.xlu0 %6890 }
 0x95e   : > { %v6931_v18 = vsel %vm1558_vm5, %v6889_v52, %v6891_v23 }
 0x95f   : > { %v6301_v9 = vpop.f32.mrf.mxu0  ;;  %7015 = vmatpush.bf16.msrb.mxu1 %v6931_v18 }
 0x960   : > { %v15542_v55 = vadd.f32 %v6301_v9, %v15437_v36 }
 0x962   : > { %6382 = vmatmul.bf16.gmra.mxu1 %v11607_v21  ;;  %6621 = vmatmul.bf16.gmra.mxu3 %v11643_v5  ;;  %v11647_v5 = vld [vmem:[#allocation7 + $0xb8] sm:$0xff] }
 0x964   : > { %v15544_v37 = vpop.f32.mrf.mxu3 }
 0x965   : > { %v15546_v13 = vpop.f32.mrf.mxu2  ;;  %v7160_v38 = vpop.permute.xlu0 %7159 }
 0x966   : > { %v7204_v10 = vsel %vm1820_vm6, %v7158_v39, %v7160_v38  ;;  %v11669_v38 = vld [vmem:[#allocation7 + $0xe8] sm:$0xff] }
 0x967   : > { %v6304_v48 = vpop.f32.mrf.mxu0  ;;  %7291 = vmatpush.bf16.msra.mxu3 %v7204_v10 }
 0x968   : > { %v15550_v46 = vadd.f32 %v6304_v48, %v15441_v61 }
 0x96a   : > { %6582 = vmatmul.bf16.gmra.mxu2 %v11645_v63 }
 0x96b   : > { %6973 = vmatmul.bf16.gmra.mxu0 %v11665_v20 }
 0x96c   : > { %v15552_v36 = vpop.f32.mrf.mxu3 }
 0x96d   : > { %v15554_v47 = vpop.f32.mrf.mxu2  ;;  %v6885_v51 = vpop.permute.xlu0 %6884 }
 0x96e   : > { %v6348_v49 = vpop.f32.mrf.mxu1  ;;  %v6929_v53 = vsel %vm1558_vm5, %v6883_v59, %v6885_v51  ;;  %v11696_v59 = vld [vmem:[#allocation7 + $0x100] sm:$0xff] }
 0x96f   : > { %v6306_v0 = vpop.f32.mrf.mxu0  ;;  %v15557_v44 = vadd.f32 %v6348_v49, %v15451_v50  ;;  %7016 = vmatpush.bf16.msrb.mxu1 %v6929_v53 }
 0x970   : > { %v15561_v11 = vadd.f32 %v6306_v0, %v15453_v16 }
 0x972   : > { %6626 = vmatmul.bf16.gmra.mxu3 %v11644_v57  ;;  %7017 = vmatmul.bf16.vlgmr.msrb.gmra.mxu1 %v11664_v12 }
 0x974   : > { %v15563_v61 = vpop.f32.mrf.mxu3 }
 0x975   : > { %v15565_v56 = vpop.f32.mrf.mxu2 }
 0x976   : > { %v6350_v41 = vpop.f32.mrf.mxu1 }
 0x977   : > { %v6309_v60 = vpop.f32.mrf.mxu0  ;;  %v15568_v27 = vadd.f32 %v6350_v41, %v15480_v26 }
 0x978   : > { %v15571_v50 = vadd.f32 %v6309_v60, %v15482_v58 }
 0x97a   : > { %6587 = vmatmul.bf16.gmra.mxu2 %v11646_v8 }
 0x97b   : > { %6978 = vmatmul.bf16.gmra.mxu0 %v11666_v1 }
 0x97c   : > { %v15573_v16 = vpop.f32.mrf.mxu3 }
 0x97d   : > { %v15575_v29 = vpop.f32.mrf.mxu2 }
 0x97e   : > { %v6353_v52 = vpop.f32.mrf.mxu1 }
 0x97f   : > { %v6311_v14 = vpop.f32.mrf.mxu0  ;;  %v15578_v62 = vadd.f32 %v6353_v52, %v15502_v17 }
 0x980   : > { %v15581_v22 = vadd.f32 %v6311_v14, %v15504_v43 }
 0x982   : > { %6631 = vmatmul.bf16.gmra.mxu3 %v11645_v63  ;;  %7022 = vmatmul.bf16.gmra.mxu1 %v11665_v20  ;;  %v11697_v63 = vld [vmem:[#allocation7 + $0x108] sm:$0xff] }
 0x984   : > { %v15583_v26 = vpop.f32.mrf.mxu3 }
 0x985   : > { %v15585_v58 = vpop.f32.mrf.mxu2 }
 0x986   : > { %16876 = vst [vmem:[#allocation20_spill] sm:$0xff] %v15585_v58  ;;  %v6355_v21 = vpop.f32.mrf.mxu1  ;;  %v10981_v58 = vld [vmem:[#allocation2 + $0x60] sm:$0xf] }
 0x987   : > { %v6314_v6 = vpop.f32.mrf.mxu0  ;;  %v15588_v35 = vadd.f32 %v6355_v21, %v15517_v31 }
 0x988   : > { %v15591_v25 = vadd.f32 %v6314_v6, %v15519_v4 }
 0x98a   : > { %6592 = vmatmul.bf16.gmra.mxu2 %v11647_v5 }
 0x98b   : > { %6983 = vmatmul.bf16.gmra.mxu0 %v11667_v40 }
 0x98c   : > { %v15593_v17 = vpop.f32.mrf.mxu3 }
 0x98d   : > { %16877 = vst [vmem:[#allocation25_spill] sm:$0xff] %v15593_v17  ;;  %v15595_v43 = vpop.f32.mrf.mxu2 }
 0x98e   : > { %v6358_v39 = vpop.f32.mrf.mxu1 }
 0x98f   : > { %v6316_v15 = vpop.f32.mrf.mxu0  ;;  %v15598_v33 = vadd.f32 %v6358_v39, %v15527_v34 }
 0x990   : > { %v15601_v30 = vadd.f32 %v6316_v15, %v15529_v19 }
 0x992   : > { %6636 = vmatmul.bf16.gmra.mxu3 %v11646_v8  ;;  %7027 = vmatmul.bf16.gmra.mxu1 %v11666_v1  ;;  %v11698_v1 = vld [vmem:[#allocation7 + $0x110] sm:$0xff] }
 0x994   : > { %v15603_v31 = vpop.f32.mrf.mxu3 }
 0x995   : > { %v15605_v4 = vpop.f32.mrf.mxu2 }
 0x996   : > { %16878 = vst [vmem:[#allocation28_spill] sm:$0xff] %v15605_v4  ;;  %v6360_v3 = vpop.f32.mrf.mxu1 }
 0x997   : > { %v6319_v45 = vpop.f32.mrf.mxu0  ;;  %v15608_v7 = vadd.f32 %v6360_v3, %v15536_v42  ;;  %v11671_v3 = vld [vmem:[#allocation7 + $0xf8] sm:$0xff] }
 0x998   : > { %v15611_v57 = vadd.f32 %v6319_v45, %v15538_v32 }
 0x99a   : > { %7243 = vmatmul.bf16.vlgmr.msra.gmra.mxu2 %v11696_v59 }
 0x99b   : > { %6988 = vmatmul.bf16.gmra.mxu0 %v11668_v2 }
 0x99c   : > { %v15613_v34 = vpop.f32.mrf.mxu3 }
 0x99d   : > { %16879 = vst [vmem:[#allocation36_spill] sm:$0xff] %v15613_v34  ;;  %v6558_v19 = vpop.f32.mrf.mxu2 }
 0x99e   : > { %v15616_v12 = vadd.f32 %v6558_v19, %v15534_v28  ;;  %v6363_v54 = vpop.f32.mrf.mxu1 }
 0x99f   : > { %v15618_v24 = vpop.f32.mrf.mxu0  ;;  %v15621_v23 = vadd.f32 %v6363_v54, %v15544_v37 }
 0x9a2   : > { %6641 = vmatmul.bf16.gmra.mxu3 %v11647_v5  ;;  %7032 = vmatmul.bf16.gmra.mxu1 %v11667_v40 }
 0x9a4   : > { %v15623_v42 = vpop.f32.mrf.mxu3 }
 0x9a5   : > { %v6560_v32 = vpop.f32.mrf.mxu2 }
 0x9a6   : > { %v15626_v9 = vadd.f32 %v6560_v32, %v15542_v55  ;;  %v6365_v18 = vpop.f32.mrf.mxu1 }
 0x9a7   : > { %v6324_v20 = vpop.f32.mrf.mxu0  ;;  %v15629_v28 = vadd.f32 %v6365_v18, %v15552_v36 }
 0x9a8   : > { %v15632_v48 = vadd.f32 %v6324_v20, %v15554_v47 }
 0x9aa   : > { %7248 = vmatmul.bf16.gmra.mxu2 %v11697_v63 }
 0x9ab   : > { %6993 = vmatmul.bf16.gmra.mxu0 %v11669_v38 }
 0x9ac   : > { %v15634_v37 = vpop.f32.mrf.mxu3 }
 0x9ad   : > { %16880 = vst [vmem:[#allocation37_spill] sm:$0xff] %v15634_v37  ;;  %v6563_v10 = vpop.f32.mrf.mxu2  ;;  %v11005_v37 = vld [vmem:[#allocation2 + $0xa0] sm:$0xf] }
 0x9ae   : > { %v15637_v51 = vadd.f32 %v6563_v10, %v15550_v46  ;;  %v6368_v55 = vpop.f32.mrf.mxu1  ;;  %v11670_v46 = vld [vmem:[#allocation7 + $0xf0] sm:$0xff] }
 0x9af   : > { %v15639_v49 = vpop.f32.mrf.mxu0  ;;  %v15642_v0 = vadd.f32 %v6368_v55, %v15563_v61 }
 0x9b2   : > { %7292 = vmatmul.bf16.vlgmr.msra.gmra.mxu3 %v11696_v59  ;;  %7037 = vmatmul.bf16.gmra.mxu1 %v11668_v2 }
 0x9b4   : > { %v6607_v36 = vpop.f32.mrf.mxu3 }
 0x9b5   : > { %v6565_v53 = vpop.f32.mrf.mxu2  ;;  %v15645_v47 = vadd.f32 %v6607_v36, %v15557_v44 }
 0x9b6   : > { %v15648_v41 = vadd.f32 %v6565_v53, %v15561_v11  ;;  %v15650_v8 = vpop.f32.mrf.mxu1 }
 0x9b7   : > { %v6329_v60 = vpop.f32.mrf.mxu0 }
 0x9b8   : > { %v15653_v52 = vadd.f32 %v6329_v60, %v15575_v29 }
 0x9ba   : > { %7253 = vmatmul.bf16.gmra.mxu2 %v11698_v1 }
 0x9bb   : > { %6998 = vmatmul.bf16.gmra.mxu0 %v11670_v46 }
 0x9bc   : > { %v6609_v61 = vpop.f32.mrf.mxu3 }
 0x9bd   : > { %v6568_v14 = vpop.f32.mrf.mxu2  ;;  %v15656_v21 = vadd.f32 %v6609_v61, %v15568_v27 }
 0x9be   : > { %v15659_v44 = vadd.f32 %v6568_v14, %v15571_v50  ;;  %v11699_v50 = vld [vmem:[#allocation7 + $0x118] sm:$0xff] }
 0x9bf   : > { %v6373_v11 = vpop.f32.mrf.mxu1  ;;  %v15661_v5 = vpop.f32.mrf.mxu0 }
 0x9c0   : > { %16881 = vst [vmem:[#allocation31_spill] sm:$0xff] %v15661_v5  ;;  %v6374_v40 = vadd.f32 %v6373_v11, %v15583_v26  ;;  %v11702_v11 = vld [vmem:[#allocation7 + $0x130] sm:$0xff] }
 0x9c2   : > { %7297 = vmatmul.bf16.gmra.mxu3 %v11697_v63  ;;  %7042 = vmatmul.bf16.gmra.mxu1 %v11669_v38 }
 0x9c5   : > { %v6612_v6 = vpop.f32.mrf.mxu3  ;;  %v6570_v29 = vpop.f32.mrf.mxu2 }
 0x9c6   : > { %v15665_v39 = vadd.f32 %v6612_v6, %v15578_v62  ;;  %v15668_v15 = vadd.f32 %v6570_v29, %v15581_v22 }
 0x9c7   : > { %v15670_v27 = vpop.f32.mrf.mxu1  ;;  %v6334_v2 = vpop.f32.mrf.mxu0 }
 0x9c8   : > { %16882 = vst [vmem:[#allocation26_spill] sm:$0xff] %v15670_v27  ;;  %v6335_v59 = vadd.f32 %v6334_v2, %v15595_v43  ;;  %v11703_v2 = vld [vmem:[#allocation7 + $0x138] sm:$0xff] }
 0x9ca   : > { %7258 = vmatmul.bf16.gmra.mxu2 %v11699_v50 }
 0x9cb   : > { %7003 = vmatmul.bf16.gmra.mxu0 %v11671_v3 }
 0x9cd   : > { %v6614_v26 = vpop.f32.mrf.mxu3  ;;  %v6573_v45 = vpop.f32.mrf.mxu2 }
 0x9ce   : > { %v15674_v19 = vadd.f32 %v6614_v26, %v15588_v35  ;;  %v15677_v62 = vadd.f32 %v6573_v45, %v15591_v25  ;;  %v11700_v35 = vld [vmem:[#allocation7 + $0x120] sm:$0xff]  ;;  %v15726_v45 = vpop.permute.xlu1 %7453 }
 0x9cf   : > { %v6378_v54 = vpop.f32.mrf.mxu1  ;;  %v15715_v6 = vpop.f32.mrf.mxu0  ;;  %16888 = vst [vmem:[#allocation35_spill] sm:$0xff] %v15726_v45  ;;  %v11725_v45 = vld [vmem:[#allocation2 + $0xac] sm:$0xf0] }
 0x9d0   : > { %v6379_v22 = vadd.f32 %v6378_v54, %v15603_v31  ;;  %16884 = vst [vmem:[#allocation18_spill] sm:$0xff] %v15715_v6  ;;  %v15728_v54 = vpop.permute.xlu0 %7443  ;;  %v15760_v6 = vor.u32 %v11725_v45, %v11005_v37 }
 0x9d1   : > { %16889 = vst [vmem:[#allocation17_spill] sm:$0xff] %v15728_v54 }
 0x9d2   : > { %7302 = vmatmul.bf16.gmra.mxu3 %v11698_v1  ;;  %7047 = vmatmul.bf16.gmra.mxu1 %v11670_v46  ;;  %v11701_v46 = vld [vmem:[#allocation7 + $0x128] sm:$0xff] }
 0x9d5   : > { %v6617_v32 = vpop.f32.mrf.mxu3  ;;  %v6575_v18 = vpop.f32.mrf.mxu2 }
 0x9d6   : > { %v15681_v38 = vadd.f32 %v6617_v32, %v15598_v33  ;;  %v15684_v43 = vadd.f32 %v6575_v18, %v15601_v30 }
 0x9d7   : > { %v15686_v63 = vpop.f32.mrf.mxu1 }
 0x9d8   : > { %16883 = vst [vmem:[#allocation32_spill] sm:$0xff] %v15686_v63  ;;  %v6969_v26 = vpop.f32.mrf.mxu0 }
 0x9da   : > { %7263 = vmatmul.bf16.gmra.mxu2 %v11700_v35 }
 0x9dd   : > { %v6619_v20 = vpop.f32.mrf.mxu3  ;;  %v6578_v25 = vpop.f32.mrf.mxu2 }
 0x9de   : > { %v15689_v10 = vadd.f32 %v6619_v20, %v15608_v7  ;;  %v15692_v31 = vadd.f32 %v6578_v25, %v15611_v57  ;;  %v11029_v25 = vld [vmem:[#allocation2 + $0xe0] sm:$0xf] }
 0x9df   : > { %v6383_v55 = vpop.f32.mrf.mxu1 }
 0x9e0   : > { %v15695_v36 = vadd.f32 %v6383_v55, %v15623_v42  ;;  %v15734_v55 = vpop.permute.xlu1 %7448 }
 0x9e1   : > { %16892 = vst [vmem:[#allocation16_spill] sm:$0xff] %v15734_v55 }
 0x9e2   : > { %7307 = vmatmul.bf16.gmra.mxu3 %v11699_v50  ;;  %7052 = vmatmul.bf16.gmra.mxu1 %v11671_v3 }
 0x9e5   : > { %v6622_v33 = vpop.f32.mrf.mxu3  ;;  %v15697_v30 = vpop.f32.mrf.mxu2 }
 0x9e6   : > { %v15700_v53 = vadd.f32 %v6622_v33, %v15621_v23 }
 0x9ea   : > { %7268 = vmatmul.bf16.gmra.mxu2 %v11701_v46 }
 0x9ed   : > { %v6624_v1 = vpop.f32.mrf.mxu3  ;;  %v6583_v7 = vpop.f32.mrf.mxu2 }
 0x9ee   : > { %v15703_v60 = vadd.f32 %v6624_v1, %v15629_v28  ;;  %v15706_v57 = vadd.f32 %v6583_v7, %v15632_v48  ;;  %v15738_v1 = vpop.permute.xlu0 %7438 }
 0x9ef   : > { %16893 = vst [vmem:[#allocation34_spill] sm:$0xff] %v15738_v1 }
 0x9f2   : > { %7312 = vmatmul.bf16.gmra.mxu3 %v11700_v35  ;;  %v6971_v35 = vpop.f32.mrf.mxu0 }
 0x9f5   : > { %v6627_v42 = vpop.f32.mrf.mxu3  ;;  %v15708_v61 = vpop.f32.mrf.mxu2 }
 0x9f6   : > { %v15711_v14 = vadd.f32 %v6627_v42, %v15642_v0  ;;  %v15724_v0 = vpop.f32.mrf.mxu1 }
 0x9f7   : > { %16887 = vst [vmem:[#allocation21_spill] sm:$0xff] %v15724_v0 }
 0x9fa   : > { %7273 = vmatmul.bf16.gmra.mxu2 %v11702_v11 }
 0x9fd   : > { %v15713_v23 = vpop.f32.mrf.mxu3  ;;  %v6588_v29 = vpop.f32.mrf.mxu2 }
 0x9fe   : > { %v15718_v28 = vadd.f32 %v6588_v29, %v15653_v52  ;;  %v7018_v20 = vpop.f32.mrf.mxu1  ;;  %v11728_v29 = vld [vmem:[#allocation2 + $0xcc] sm:$0xf0] }
 0x9ff   : > { %v7059_v5 = vadd.f32 %v7018_v20, %v15645_v47 }
 0xa00   : > { %16885 = vst [vmem:[#allocation19_spill] sm:$0xff] %v15718_v28 }
 0xa02   : > { %7317 = vmatmul.bf16.gmra.mxu3 %v11701_v46 }
 0xa05   : > { %v6632_v48 = vpop.f32.mrf.mxu3  ;;  %v15720_v3 = vpop.f32.mrf.mxu2 }
 0xa06   : > { %16886 = vst [vmem:[#allocation33_spill] sm:$0xff] %v15720_v3  ;;  %v15722_v50 = vadd.f32 %v6632_v48, %v6374_v40  ;;  %v11731_v40 = vld [vmem:[#allocation2 + $0xec] sm:$0xf0]  ;;  %v7020_v48 = vpop.f32.mrf.mxu1 }
 0xa07   : > { %v15736_v33 = vor.u32 %v11731_v40, %v11029_v25  ;;  %v15752_v25 = vpop.permute.xlu1 %7423 }
 0xa09   : > { %7786 = vrot.lane.b32.xlu2 %v15736_v33, %s16843_s16 }
 0xa0a   : > { %7278 = vmatmul.bf16.gmra.mxu2 %v11703_v2 }
 0xa0d   : > { %v15730_v32 = vpop.f32.mrf.mxu3  ;;  %v6593_v18 = vpop.f32.mrf.mxu2 }
 0xa0e   : > { %16890 = vst [vmem:[#allocation24_spill] sm:$0xff] %v15730_v32  ;;  %v15732_v52 = vadd.f32 %v6593_v18, %v6335_v59  ;;  %v15746_v59 = vpop.f32.mrf.mxu0 }
 0xa0f   : > { %v15769_v55 = vpop.permute.xlu1 %7418 }
 0xa10   : > { %16891 = vst [vmem:[#allocation22_spill] sm:$0xff] %v15732_v52  ;;  %v7023_v52 = vpop.f32.mrf.mxu1 }
 0xa12   : > { %7322 = vmatmul.bf16.gmra.mxu3 %v11702_v11  ;;  %v11017_v11 = vld [vmem:[#allocation2 + $0xc0] sm:$0xf] }
 0xa13   : > { %v15750_v0 = vor.u32 %v11728_v29, %v11017_v11 }
 0xa15   : > { %v6637_v46 = vpop.f32.mrf.mxu3  ;;  %v15740_v7 = vpop.f32.mrf.mxu2  ;;  %7780 = vrot.lane.b32.xlu2 %v15750_v0, %s16843_s16 }
 0xa16   : > { %16894 = vst [vmem:[#allocation27_spill] sm:$0xff] %v15740_v7  ;;  %v15742_v42 = vadd.f32 %v6637_v46, %v6379_v22  ;;  %v15756_v22 = vpop.permute.xlu0 %7413  ;;  %v15758_v46 = vpop.permute.xlu2 %7458 }
 0xa17   : > { %16897 = vst [vmem:[#allocation23_spill] sm:$0xff] %v15758_v46  ;;  %v15762_v4 = vpop.f32.mrf.mxu0  ;;  %v10993_v46 = vld [vmem:[#allocation2 + $0x80] sm:$0xf]  ;;  %v7394_v3 = vpop.permute.xlu1 %7393 }
 0xa18   : > { %16895 = vst [vmem:[#allocation30_spill] sm:$0xff] %v15742_v42 }
 0xa1d   : > { %v15748_v18 = vpop.f32.mrf.mxu3  ;;  %v7244_v40 = vpop.f32.mrf.mxu2  ;;  %7774 = vrot.lane.b32.xlu2 %v15760_v6, %s16843_s16 }
 0xa1e   : > { %16896 = vst [vmem:[#allocation38_spill] sm:$0xff] %v15748_v18  ;;  %v11722_v18 = vld [vmem:[#allocation2 + $0x8c] sm:$0xf0]  ;;  %v15777_v45 = vpop.permute.xlu2 %7433 }
 0xa1f   : > { %v15775_v37 = vor.u32 %v11722_v18, %v10993_v46  ;;  %16900 = vst [vmem:[#allocation40_spill] sm:$0xff] %v15777_v45 }
 0xa22   : > { %7327 = vmatmul.bf16.gmra.mxu3 %v11703_v2  ;;  %v15771_v2 = vpop.permute.xlu0 %7408 }
 0xa25   : > { %v6642_v7 = vpop.f32.mrf.mxu3  ;;  %v7246_v29 = vpop.f32.mrf.mxu2  ;;  %7768 = vrot.lane.b32.xlu2 %v15775_v37, %s16843_s16 }
 0xa26   : > { %v15765_v11 = vadd.f32 %v6642_v7, %v15695_v36  ;;  %v7058_v36 = vadd.f32 %v6969_v26, %v15616_v12  ;;  %v15782_v7 = vpop.f32.mrf.mxu0  ;;  %v7060_v12 = vadd.f32 %v6971_v35, %v15626_v9  ;;  %v15790_v26 = vpop.permute.xlu2 %7428 }
 0xa28   : > { %16898 = vst [vmem:[#allocation29_spill] sm:$0xff] %v15765_v11  ;;  %v7025_v11 = vpop.f32.mrf.mxu1  ;;  %v7333_v54 = vadd.f32 %v7244_v40, %v7058_v36  ;;  %v7335_v36 = vadd.f32 %v7246_v29, %v7060_v12  ;;  %v7063_v12 = vadd.f32 %v7023_v52, %v15665_v39 }
 0xa2a   : > { %v7384_v42 = vpop.permute.xlu0 %7383 }
 0xa2b   : > { %v7461_v18 = vadd.f32 %v7384_v42, %v7333_v54  ;;  %v7389_v54 = vpop.permute.xlu1 %7388 }
 0xa2c   : > { %v7463_v20 = vadd.f32 %v7389_v54, %v7335_v36  ;;  %v10957_v36 = vld [vmem:[#allocation2 + $0x20] sm:$0xf] }
 0xa2d   : > { %v15773_v63 = vpop.f32.mrf.mxu3  ;;  %v7249_v34 = vpop.f32.mrf.mxu2  ;;  %12070 = vtanh.f32 %v7461_v18 }
 0xa2e   : > { %16899 = vst [vmem:[#allocation39_spill] sm:$0xff] %v15773_v63  ;;  %v11719_v63 = vld [vmem:[#allocation2 + $0x6c] sm:$0xf0]  ;;  %v15792_v27 = vpop.f32.mrf.mxu0 }
 0xa2f   : > { %v15785_v28 = vor.u32 %v11719_v63, %v10981_v58  ;;  %v7061_v58 = vadd.f32 %v7020_v48, %v15656_v21  ;;  %v10969_v63 = vld [vmem:[#allocation2 + $0x40] sm:$0xf]  ;;  %v15803_v48 = vpop.permute.xlu2 %7403 }
 0xa30   : > { %v15794_v47 = vpop.f32.mrf.mxu1 }
 0xa31   : > { %7762 = vrot.lane.b32.xlu2 %v15785_v28, %s16843_s16 }
 0xa33   : > { %v12071_v45 = vpop.eup %12070 }
 0xa35   : > { %v7293_v46 = vpop.f32.mrf.mxu3  ;;  %v7251_v1 = vpop.f32.mrf.mxu2 }
 0xa36   : > { %v7334_v32 = vadd.f32 %v7293_v46, %v7059_v5  ;;  %v11716_v5 = vld [vmem:[#allocation2 + $0x4c] sm:$0xf0] }
 0xa37   : > { %v15797_v35 = vor.u32 %v11716_v5, %v10969_v63 }
 0xa38   : > { %v7462_v40 = vadd.f32 %v7384_v42, %v7334_v32  ;;  %v7062_v32 = vadd.f32 %v15746_v59, %v15637_v51  ;;  %v15806_v63 = vpop.f32.mrf.mxu1 }
 0xa39   : > { %7756 = vrot.lane.b32.xlu2 %v15797_v35, %s16843_s16 }
 0xa3a   : > { %12072 = vtanh.f32 %v7462_v40  ;;  %v7337_v18 = vadd.f32 %v7249_v34, %v7062_v32  ;;  %v6984_v40 = vpop.f32.mrf.mxu0  ;;  %v7064_v34 = vadd.f32 %v15762_v4, %v15648_v41  ;;  %v7399_v32 = vpop.permute.xlu2 %7398 }
 0xa3b   : > { %12074 = vtanh.f32 %v7463_v20 }
 0xa3c   : > { %v7465_v51 = vadd.f32 %v7394_v3, %v7337_v18  ;;  %v7339_v52 = vadd.f32 %v7251_v1, %v7064_v34  ;;  %v11710_v18 = vld [vmem:[#allocation2 + $0xc] sm:$0xf0]  ;;  %v7066_v1 = vadd.f32 %v15782_v7, %v15659_v44 }
 0xa3d   : > { %v7295_v9 = vpop.f32.mrf.mxu3  ;;  %v7254_v46 = vpop.f32.mrf.mxu2 }
 0xa3e   : > { %v7336_v17 = vadd.f32 %v7295_v9, %v7061_v58  ;;  %v11713_v58 = vld [vmem:[#allocation2 + $0x2c] sm:$0xf0] }
 0xa3f   : > { %v15808_v5 = vor.u32 %v11713_v58, %v10957_v36 }
 0xa40   : > { %v12073_v42 = vpop.eup %12072  ;;  %v7464_v29 = vadd.f32 %v7389_v54, %v7336_v17 }
 0xa41   : > { %v7525_v21 = vpack.c.bf16 %v12073_v42, %v12071_v45  ;;  %v12075_v54 = vpop.eup %12074  ;;  %7750 = vrot.lane.b32.xlu2 %v15808_v5, %s16843_s16  ;;  %v7065_v42 = vadd.f32 %v7025_v11, %v15674_v19 }
 0xa42   : > { %12076 = vtanh.f32 %v7464_v29  ;;  %v10945_v29 = vld [vmem:[#allocation2] sm:$0xf]  ;;  %v6986_v41 = vpop.f32.mrf.mxu0 }
 0xa43   : > { %7541 = vst [vmem:[#allocation2 + $0x4] sm:$0xff] %v7525_v21  ;;  %12078 = vtanh.f32 %v7465_v51  ;;  %v7070_v21 = vadd.f32 %v6984_v40, %v15677_v62  ;;  %v15816_v4 = vor.u32 %v11710_v18, %v10945_v29  ;;  %v7033_v51 = vpop.f32.mrf.mxu1  ;;  %v7341_v62 = vadd.f32 %v7254_v46, %v7066_v1 }
 0xa44   : > { %v7069_v1 = vadd.f32 %v15806_v63, %v15689_v10 }
 0xa45   : > { %v7298_v59 = vpop.f32.mrf.mxu3  ;;  %v7256_v9 = vpop.f32.mrf.mxu2  ;;  %v7469_v46 = vadd.f32 %v15803_v48, %v7341_v62 }
 0xa46   : > { %v7338_v17 = vadd.f32 %v7298_v59, %v7063_v12  ;;  %v7467_v12 = vadd.f32 %v7399_v32, %v7339_v52 }
 0xa48   : > { %v12077_v45 = vpop.eup %12076  ;;  %v7466_v39 = vadd.f32 %v7394_v3, %v7338_v17 }
 0xa49   : > { %v7526_v20 = vpack.c.bf16 %v12077_v45, %v12075_v54  ;;  %v12079_v3 = vpop.eup %12078  ;;  %7744 = vrot.lane.b32.xlu2 %v15816_v4, %s16843_s16 }
 0xa4a   : > { %12080 = vtanh.f32 %v7466_v39  ;;  %v10953_v34 = vld [vmem:[#allocation2 + $0x8] sm:$0xf]  ;;  %v11709_v39 = vld [vmem:[#allocation2 + $0x4] sm:$0xf] }
 0xa4b   : > { %7542 = vst [vmem:[#allocation2 + $0x14] sm:$0xff] %v7526_v20  ;;  %12082 = vtanh.f32 %v7467_v12  ;;  %v7067_v20 = vadd.f32 %v15794_v47, %v15681_v38  ;;  %v7068_v12 = vadd.f32 %v15792_v27, %v15668_v15 }
 0xa4d   : > { %v7300_v36 = vpop.f32.mrf.mxu3  ;;  %v7259_v58 = vpop.f32.mrf.mxu2 }
 0xa4e   : > { %v7340_v59 = vadd.f32 %v7300_v36, %v7065_v42  ;;  %v7345_v17 = vadd.f32 %v7259_v58, %v7070_v21  ;;  %v7343_v58 = vadd.f32 %v7256_v9, %v7068_v12 }
 0xa50   : > { %v12081_v19 = vpop.eup %12080  ;;  %v7468_v11 = vadd.f32 %v7399_v32, %v7340_v59  ;;  %v15823_v54 = vadd.f32 %v15756_v22, %v7345_v17  ;;  %v7072_v32 = vadd.f32 %v6986_v41, %v15684_v43  ;;  %v6989_v43 = vpop.f32.mrf.mxu0  ;;  %v7471_v15 = vadd.f32 %v15771_v2, %v7343_v58 }
 0xa51   : > { %v7527_v40 = vpack.c.bf16 %v12081_v19, %v12079_v3  ;;  %v12083_v21 = vpop.eup %12082  ;;  %7964 = vrot.lane.b32.xlu2 %v15736_v33, %s16852_s30  ;;  %v7035_v41 = vpop.f32.mrf.mxu1  ;;  %v7074_v58 = vadd.f32 %v6989_v43, %v15692_v31 }
 0xa52   : > { %12084 = vtanh.f32 %v7468_v11  ;;  %v11711_v45 = vld [vmem:[#allocation2 + $0x14] sm:$0xf0]  ;;  %v10947_v52 = vld [vmem:[#allocation2 + $0x10] sm:$0xf0]  ;;  %v6322_v11 = vadd.f32 %v15618_v24, %v15546_v13 }
 0xa53   : > { %7543 = vst [vmem:[#allocation2 + $0x24] sm:$0xff] %v7527_v40  ;;  %v15825_v44 = vor.u32 %v11711_v45, %v10953_v34  ;;  %v15827_v7 = vor.u32 %v11709_v39, %v10947_v52  ;;  %12086 = vtanh.f32 %v7469_v46 }
 0xa54   : > { %v6665_v39 = vadd.f32 %v15697_v30, %v6322_v11 }
 0xa55   : > { %v7303_v42 = vpop.f32.mrf.mxu3  ;;  %7748 = vrot.lane.b32.xlu1 %v15825_v44, %s16843_s16  ;;  %7746 = vrot.lane.b32.xlu0 %v15827_v7, %s16843_s16  ;;  %v7261_v29 = vpop.f32.mrf.mxu2 }
 0xa56   : > { %v7342_v18 = vadd.f32 %v7303_v42, %v7067_v20  ;;  %v7347_v36 = vadd.f32 %v7261_v29, %v7072_v32 }
 0xa58   : > { %v12085_v38 = vpop.eup %12084  ;;  %v7470_v47 = vadd.f32 %v15803_v48, %v7342_v18  ;;  %v7475_v3 = vadd.f32 %v15769_v55, %v7347_v36  ;;  %v6991_v34 = vpop.f32.mrf.mxu0 }
 0xa59   : > { %v7528_v59 = vpack.c.bf16 %v12085_v38, %v12083_v21  ;;  %v12087_v19 = vpop.eup %12086  ;;  %7958 = vrot.lane.b32.xlu2 %v15750_v0, %s16852_s30  ;;  %v7038_v52 = vpop.f32.mrf.mxu1  ;;  %v7076_v32 = vadd.f32 %v6991_v34, %v6665_v39  ;;  %v7073_v21 = vadd.f32 %v7035_v41, %v15703_v60 }
 0xa5a   : > { %12088 = vtanh.f32 %v7470_v47  ;;  %v10965_v40 = vld [vmem:[#allocation2 + $0x28] sm:$0xf]  ;;  %v11712_v63 = vld [vmem:[#allocation2 + $0x24] sm:$0xf]  ;;  %v7075_v31 = vadd.f32 %v7038_v52, %v15711_v14  ;;  %v6371_v14 = vadd.f32 %v15650_v8, %v15573_v16 }
 0xa5b   : > { %7544 = vst [vmem:[#allocation2 + $0x34] sm:$0xff] %v7528_v59  ;;  %12090 = vtanh.f32 %v7471_v15 }
 0xa5d   : > { %v7305_v27 = vpop.f32.mrf.mxu3  ;;  %v7264_v17 = vpop.f32.mrf.mxu2 }
 0xa5e   : > { %v7344_v33 = vadd.f32 %v7305_v27, %v7069_v1 }
 0xa60   : > { %v12089_v48 = vpop.eup %12088  ;;  %v7472_v9 = vadd.f32 %v15771_v2, %v7344_v33  ;;  %v7071_v2 = vadd.f32 %v7033_v51, %v15700_v53  ;;  %v6994_v15 = vpop.f32.mrf.mxu0 }
 0xa61   : > { %v7529_v62 = vpack.c.bf16 %v12089_v48, %v12087_v19  ;;  %v12091_v42 = vpop.eup %12090  ;;  %7952 = vrot.lane.b32.xlu2 %v15760_v6, %s16852_s30  ;;  %v7040_v12 = vpop.f32.mrf.mxu1 }
 0xa62   : > { %12092 = vtanh.f32 %v7472_v9  ;;  %v11714_v10 = vld [vmem:[#allocation2 + $0x34] sm:$0xf0]  ;;  %v10959_v45 = vld [vmem:[#allocation2 + $0x30] sm:$0xf0] }
 0xa63   : > { %7545 = vst [vmem:[#allocation2 + $0x44] sm:$0xff] %v7529_v62  ;;  %v15852_v20 = vor.u32 %v11714_v10, %v10965_v40  ;;  %v15854_v0 = vor.u32 %v11712_v63, %v10959_v45  ;;  %12094 = vtanh.f32 %v15823_v54  ;;  %v7349_v54 = vadd.f32 %v7264_v17, %v7074_v58 }
 0xa64   : > { %v6666_v40 = vadd.f32 %v15713_v23, %v6371_v14 }
 0xa65   : > { %v7308_v13 = vpop.f32.mrf.mxu3  ;;  %7754 = vrot.lane.b32.xlu1 %v15852_v20, %s16843_s16  ;;  %7752 = vrot.lane.b32.xlu0 %v15854_v0, %s16843_s16  ;;  %v7266_v24 = vpop.f32.mrf.mxu2  ;;  %v7477_v43 = vadd.f32 %v15752_v25, %v7349_v54 }
 0xa66   : > { %v7346_v46 = vadd.f32 %v7308_v13, %v7071_v2  ;;  %v7351_v30 = vadd.f32 %v7266_v24, %v7076_v32  ;;  %v7077_v10 = vadd.f32 %v7040_v12, %v6666_v40 }
 0xa68   : > { %v12093_v29 = vpop.eup %12092  ;;  %v7474_v18 = vadd.f32 %v15756_v22, %v7346_v46  ;;  %v7479_v51 = vadd.f32 %v15790_v26, %v7351_v30  ;;  %v6996_v34 = vpop.f32.mrf.mxu0 }
 0xa69   : > { %v7530_v53 = vpack.c.bf16 %v12093_v29, %v12091_v42  ;;  %v12095_v47 = vpop.eup %12094  ;;  %7946 = vrot.lane.b32.xlu2 %v15775_v37, %s16852_s30  ;;  %v7043_v48 = vpop.f32.mrf.mxu1  ;;  %v6327_v42 = vadd.f32 %v15639_v49, %v15565_v56  ;;  %v16901_v29 = vld [vmem:[#allocation40_spill] sm:$0xff] }
 0xa6a   : > { %12096 = vtanh.f32 %v7474_v18  ;;  %v10977_v1 = vld [vmem:[#allocation2 + $0x48] sm:$0xf]  ;;  %v11715_v60 = vld [vmem:[#allocation2 + $0x44] sm:$0xf] }
 0xa6b   : > { %7546 = vst [vmem:[#allocation2 + $0x54] sm:$0xff] %v7530_v53  ;;  %12098 = vtanh.f32 %v7475_v3 }
 0xa6d   : > { %v7310_v36 = vpop.f32.mrf.mxu3  ;;  %v7269_v37 = vpop.f32.mrf.mxu2 }
 0xa6e   : > { %v7348_v38 = vadd.f32 %v7310_v36, %v7073_v21  ;;  %v16903_v36 = vld [vmem:[#allocation26_spill] sm:$0xff] }
 0xa70   : > { %v12097_v6 = vpop.eup %12096  ;;  %v7476_v22 = vadd.f32 %v15769_v55, %v7348_v38 }
 0xa71   : > { %v7531_v59 = vpack.c.bf16 %v12097_v6, %v12095_v47  ;;  %v12099_v17 = vpop.eup %12098  ;;  %7940 = vrot.lane.b32.xlu2 %v15785_v28, %s16852_s30  ;;  %v7078_v28 = vadd.f32 %v6994_v15, %v15706_v57  ;;  %v16905_v15 = vld [vmem:[#allocation34_spill] sm:$0xff] }
 0xa72   : > { %12100 = vtanh.f32 %v7476_v22  ;;  %v11717_v27 = vld [vmem:[#allocation2 + $0x54] sm:$0xf0]  ;;  %v10971_v41 = vld [vmem:[#allocation2 + $0x50] sm:$0xf0]  ;;  %v16904_v22 = vld [vmem:[#allocation24_spill] sm:$0xff] }
 0xa73   : > { %7547 = vst [vmem:[#allocation2 + $0x64] sm:$0xff] %v7531_v59  ;;  %v15871_v33 = vor.u32 %v11717_v27, %v10977_v1  ;;  %v15873_v19 = vor.u32 %v11715_v60, %v10971_v41  ;;  %12102 = vtanh.f32 %v7477_v43  ;;  %v7353_v2 = vadd.f32 %v7269_v37, %v7078_v28  ;;  %v16910_v28 = vld [vmem:[#allocation33_spill] sm:$0xff] }
 0xa75   : > { %v7313_v55 = vpop.f32.mrf.mxu3  ;;  %7760 = vrot.lane.b32.xlu1 %v15871_v33, %s16843_s16  ;;  %7758 = vrot.lane.b32.xlu0 %v15873_v19, %s16843_s16  ;;  %v7271_v45 = vpop.f32.mrf.mxu2  ;;  %v7481_v18 = vadd.f32 %v16901_v29, %v7353_v2 }
 0xa76   : > { %v7350_v3 = vadd.f32 %v7313_v55, %v7075_v31  ;;  %v16906_v31 = vld [vmem:[#allocation19_spill] sm:$0xff] }
 0xa78   : > { %v12101_v9 = vpop.eup %12100  ;;  %v7478_v11 = vadd.f32 %v15752_v25, %v7350_v3  ;;  %v7045_v25 = vpop.f32.mrf.mxu1 }
 0xa79   : > { %v7532_v62 = vpack.c.bf16 %v12101_v9, %v12099_v17  ;;  %v12103_v52 = vpop.eup %12102  ;;  %7934 = vrot.lane.b32.xlu2 %v15797_v35, %s16852_s30  ;;  %v7079_v35 = vadd.f32 %v7043_v48, %v15722_v50  ;;  %v16902_v50 = vld [vmem:[#allocation25_spill] sm:$0xff] }
 0xa7a   : > { %12104 = vtanh.f32 %v7478_v11  ;;  %v10989_v32 = vld [vmem:[#allocation2 + $0x68] sm:$0xf]  ;;  %v11718_v24 = vld [vmem:[#allocation2 + $0x64] sm:$0xf] }
 0xa7b   : > { %7548 = vst [vmem:[#allocation2 + $0x74] sm:$0xff] %v7532_v62  ;;  %12106 = vtanh.f32 %v7479_v51  ;;  %v6999_v51 = vpop.f32.mrf.mxu0 }
 0xa7c   : > { %v7082_v37 = vadd.f32 %v6999_v51, %v16906_v31  ;;  %v16914_v51 = vld [vmem:[#allocation38_spill] sm:$0xff]  ;;  %v16917_v31 = vld [vmem:[#allocation28_spill] sm:$0xff] }
 0xa7d   : > { %v7315_v63 = vpop.f32.mrf.mxu3  ;;  %v7274_v38 = vpop.f32.mrf.mxu2 }
 0xa7e   : > { %v7352_v39 = vadd.f32 %v7315_v63, %v7077_v10  ;;  %v7357_v17 = vadd.f32 %v7274_v38, %v7082_v37  ;;  %v16908_v10 = vld [vmem:[#allocation31_spill] sm:$0xff]  ;;  %v16918_v37 = vld [vmem:[#allocation18_spill] sm:$0xff] }
 0xa80   : > { %v12105_v16 = vpop.eup %12104  ;;  %v7480_v8 = vadd.f32 %v15790_v26, %v7352_v39  ;;  %v6669_v26 = vadd.f32 %v15708_v61, %v6327_v42  ;;  %v6376_v61 = vadd.f32 %v16903_v36, %v16902_v50  ;;  %v7048_v59 = vpop.f32.mrf.mxu1  ;;  %v16909_v39 = vld [vmem:[#allocation30_spill] sm:$0xff]  ;;  %v16912_v42 = vld [vmem:[#allocation36_spill] sm:$0xff] }
 0xa81   : > { %v7533_v23 = vpack.c.bf16 %v12105_v16, %v12103_v52  ;;  %v12107_v49 = vpop.eup %12106  ;;  %7928 = vrot.lane.b32.xlu2 %v15808_v5, %s16852_s30  ;;  %v7083_v52 = vadd.f32 %v7048_v59, %v16909_v39  ;;  %v16915_v50 = vld [vmem:[#allocation16_spill] sm:$0xff] }
 0xa82   : > { %12108 = vtanh.f32 %v7480_v8  ;;  %v11720_v13 = vld [vmem:[#allocation2 + $0x74] sm:$0xf0]  ;;  %v10983_v46 = vld [vmem:[#allocation2 + $0x70] sm:$0xf0]  ;;  %v7080_v21 = vadd.f32 %v6996_v34, %v6669_v26  ;;  %v6670_v54 = vadd.f32 %v16904_v22, %v6376_v61  ;;  %v16907_v34 = vld [vmem:[#allocation20_spill] sm:$0xff] }
 0xa83   : > { %7549 = vst [vmem:[#allocation2 + $0x84] sm:$0xff] %v7533_v23  ;;  %v15893_v57 = vor.u32 %v11720_v13, %v10989_v32  ;;  %v15895_v30 = vor.u32 %v11718_v24, %v10983_v46  ;;  %12110 = vtanh.f32 %v7481_v18  ;;  %v7001_v55 = vpop.f32.mrf.mxu0  ;;  %v6332_v63 = vadd.f32 %v16908_v10, %v16907_v34 }
 0xa84   : > { %v7355_v58 = vadd.f32 %v7271_v45, %v7080_v21  ;;  %v7081_v1 = vadd.f32 %v7045_v25, %v6670_v54  ;;  %v16911_v25 = vld [vmem:[#allocation17_spill] sm:$0xff] }
 0xa85   : > { %v7318_v53 = vpop.f32.mrf.mxu3  ;;  %7766 = vrot.lane.b32.xlu1 %v15893_v57, %s16843_s16  ;;  %7764 = vrot.lane.b32.xlu0 %v15895_v30, %s16843_s16  ;;  %v7276_v14 = vpop.f32.mrf.mxu2  ;;  %v6673_v16 = vadd.f32 %v16910_v28, %v6332_v63  ;;  %v7485_v2 = vadd.f32 %v16911_v25, %v7357_v17 }
 0xa86   : > { %v7354_v56 = vadd.f32 %v7318_v53, %v7079_v35  ;;  %v7483_v27 = vadd.f32 %v16905_v15, %v7355_v58  ;;  %v16913_v35 = vld [vmem:[#allocation32_spill] sm:$0xff]  ;;  %v16916_v58 = vld [vmem:[#allocation22_spill] sm:$0xff] }
 0xa87   : > { %v7084_v24 = vadd.f32 %v7001_v55, %v6673_v16  ;;  %v6381_v26 = vadd.f32 %v16913_v35, %v16912_v42  ;;  %v16922_v16 = vld [vmem:[#allocation37_spill] sm:$0xff]  ;;  %v16925_v35 = vld [vmem:[#allocation23_spill] sm:$0xff] }
 0xa88   : > { %v12109_v12 = vpop.eup %12108  ;;  %v7482_v47 = vadd.f32 %v16901_v29, %v7354_v56  ;;  %v7050_v8 = vpop.f32.mrf.mxu1 }
 0xa89   : > { %v7534_v6 = vpack.c.bf16 %v12109_v12, %v12107_v49  ;;  %v12111_v41 = vpop.eup %12110  ;;  %7922 = vrot.lane.b32.xlu2 %v15816_v4, %s16852_s30  ;;  %v7359_v18 = vadd.f32 %v7276_v14, %v7084_v24  ;;  %v6674_v56 = vadd.f32 %v16914_v51, %v6381_v26  ;;  %v16920_v14 = vld [vmem:[#allocation27_spill] sm:$0xff] }
 0xa8a   : > { %12112 = vtanh.f32 %v7482_v47  ;;  %v11001_v9 = vld [vmem:[#allocation2 + $0x88] sm:$0xf]  ;;  %v11721_v62 = vld [vmem:[#allocation2 + $0x84] sm:$0xf]  ;;  %v16924_v24 = vld [vmem:[#allocation39_spill] sm:$0xff] }
 0xa8b   : > { %7550 = vst [vmem:[#allocation2 + $0x94] sm:$0xff] %v7534_v6  ;;  %12114 = vtanh.f32 %v7483_v27  ;;  %v7004_v49 = vpop.f32.mrf.mxu0  ;;  %v7085_v21 = vadd.f32 %v7050_v8, %v6674_v56  ;;  %v7487_v36 = vadd.f32 %v16915_v50, %v7359_v18  ;;  %v16923_v8 = vld [vmem:[#allocation21_spill] sm:$0xff] }
 0xa8c   : > { %v7086_v6 = vadd.f32 %v7004_v49, %v16916_v58 }
 0xa8d   : > { %v7320_v60 = vpop.f32.mrf.mxu3  ;;  %v7279_v12 = vpop.f32.mrf.mxu2 }
 0xa8e   : > { %v7356_v5 = vadd.f32 %v7320_v60, %v7081_v1  ;;  %v7361_v1 = vadd.f32 %v7279_v12, %v7086_v6 }
 0xa90   : > { %v12113_v43 = vpop.eup %12112  ;;  %v7484_v3 = vadd.f32 %v16905_v15, %v7356_v5  ;;  %v7053_v22 = vpop.f32.mrf.mxu1 }
 0xa91   : > { %v7535_v48 = vpack.c.bf16 %v12113_v43, %v12111_v41  ;;  %v12115_v13 = vpop.eup %12114  ;;  %v6337_v43 = vadd.f32 %v16918_v37, %v16917_v31  ;;  %v15958_v31 = vpop.permute.xlu2 %7786 }
 0xa92   : > { %12116 = vtanh.f32 %v7484_v3  ;;  %v11723_v11 = vld [vmem:[#allocation2 + $0x94] sm:$0xf0]  ;;  %v10995_v40 = vld [vmem:[#allocation2 + $0x90] sm:$0xf0] }
 0xa93   : > { %7551 = vst [vmem:[#allocation2 + $0xa4] sm:$0xff] %v7535_v48  ;;  %v15917_v45 = vor.u32 %v11723_v11, %v11001_v9  ;;  %v15919_v4 = vor.u32 %v11721_v62, %v10995_v40  ;;  %12118 = vtanh.f32 %v7485_v2  ;;  %v7006_v17 = vpop.f32.mrf.mxu0  ;;  %v16919_v48 = vld [vmem:[#allocation29_spill] sm:$0xff]  ;;  %v6677_v11 = vadd.f32 %v16920_v14, %v6337_v43  ;;  %v16921_v62 = vld [vmem:[#allocation35_spill] sm:$0xff] }
 0xa94   : > { %v7087_v9 = vadd.f32 %v7053_v22, %v16919_v48  ;;  %v7489_v40 = vadd.f32 %v16921_v62, %v7361_v1 }
 0xa95   : > { %v7323_v23 = vpop.f32.mrf.mxu3  ;;  %7772 = vrot.lane.b32.xlu1 %v15917_v45, %s16843_s16  ;;  %7770 = vrot.lane.b32.xlu0 %v15919_v4, %s16843_s16  ;;  %v7281_v10 = vpop.f32.mrf.mxu2 }
 0xa96   : > { %v7358_v32 = vadd.f32 %v7323_v23, %v7083_v52  ;;  %v7088_v52 = vadd.f32 %v7006_v17, %v6677_v11 }
 0xa98   : > { %v12117_v46 = vpop.eup %12116  ;;  %v7486_v29 = vadd.f32 %v16911_v25, %v7358_v32  ;;  %v6386_v25 = vadd.f32 %v16923_v8, %v16922_v16  ;;  %v7055_v23 = vpop.f32.mrf.mxu1  ;;  %v7363_v32 = vadd.f32 %v7281_v10, %v7088_v52  ;;  %v11774_v10 = vld [vmem:[#allocation2 + $0x70] sm:$0xf0] }
 0xa99   : > { %v7536_v53 = vpack.c.bf16 %v12117_v46, %v12115_v13  ;;  %v12119_v47 = vpop.eup %12118 }
 0xa9a   : > { %12120 = vtanh.f32 %v7486_v29  ;;  %v11013_v27 = vld [vmem:[#allocation2 + $0xa8] sm:$0xf]  ;;  %v11724_v5 = vld [vmem:[#allocation2 + $0xa4] sm:$0xf]  ;;  %v6678_v46 = vadd.f32 %v16924_v24, %v6386_v25  ;;  %v7491_v26 = vadd.f32 %v16925_v35, %v7363_v32  ;;  %v11771_v25 = vld [vmem:[#allocation2 + $0x50] sm:$0xf0] }
 0xa9b   : > { %7552 = vst [vmem:[#allocation2 + $0xb4] sm:$0xff] %v7536_v53  ;;  %12122 = vtanh.f32 %v7487_v36 }
 0xa9c   : > { %v7089_v42 = vadd.f32 %v7055_v23, %v6678_v46 }
 0xa9d   : > { %v7325_v61 = vpop.f32.mrf.mxu3 }
 0xa9e   : > { %v7360_v38 = vadd.f32 %v7325_v61, %v7085_v21 }
 0xaa0   : > { %v12121_v54 = vpop.eup %12120  ;;  %v7488_v59 = vadd.f32 %v16915_v50, %v7360_v38 }
 0xaa1   : > { %v7537_v15 = vpack.c.bf16 %v12121_v54, %v12119_v47  ;;  %v12123_v39 = vpop.eup %12122 }
 0xaa2   : > { %12124 = vtanh.f32 %v7488_v59  ;;  %v11726_v60 = vld [vmem:[#allocation2 + $0xb4] sm:$0xf0]  ;;  %v11007_v41 = vld [vmem:[#allocation2 + $0xb0] sm:$0xf0] }
 0xaa3   : > { %7553 = vst [vmem:[#allocation2 + $0xc4] sm:$0xff] %v7537_v15  ;;  %v15937_v55 = vor.u32 %v11726_v60, %v11013_v27  ;;  %v15939_v3 = vor.u32 %v11724_v5, %v11007_v41  ;;  %12126 = vtanh.f32 %v7489_v40  ;;  %v11780_v59 = vld [vmem:[#allocation2 + $0xb0] sm:$0xf0]  ;;  %v11245_v15 = vld [vmem:[#allocation2 + $0xa4] sm:$0xf] }
 0xaa4   : > { %v11246_v27 = vor.u32 %v11780_v59, %v11245_v15  ;;  %v11777_v60 = vld [vmem:[#allocation2 + $0x90] sm:$0xf0]  ;;  %v11233_v5 = vld [vmem:[#allocation2 + $0x84] sm:$0xf] }
 0xaa5   : > { %v7328_v34 = vpop.f32.mrf.mxu3  ;;  %7778 = vrot.lane.b32.xlu1 %v15937_v55, %s16843_s16  ;;  %7776 = vrot.lane.b32.xlu0 %v15939_v3, %s16843_s16  ;;  %v11234_v48 = vor.u32 %v11777_v60, %v11233_v5  ;;  %v11241_v5 = vld [vmem:[#allocation2 + $0x8c] sm:$0xf] }
 0xaa6   : > { %v7362_v63 = vadd.f32 %v7328_v34, %v7087_v9  ;;  %v15969_v34 = vpop.permute.xlu2 %7780 }
 0xaa8   : > { %v12125_v28 = vpop.eup %12124  ;;  %v7490_v2 = vadd.f32 %v16921_v62, %v7362_v63  ;;  %v11221_v63 = vld [vmem:[#allocation2 + $0x64] sm:$0xf] }
 0xaa9   : > { %v7538_v13 = vpack.c.bf16 %v12125_v28, %v12123_v39  ;;  %v12127_v53 = vpop.eup %12126  ;;  %v11222_v39 = vor.u32 %v11774_v10, %v11221_v63 }
 0xaaa   : > { %12128 = vtanh.f32 %v7490_v2  ;;  %v11257_v21 = vld [vmem:[#allocation2 + $0xc4] sm:$0xf]  ;;  %v11025_v12 = vld [vmem:[#allocation2 + $0xc8] sm:$0xf] }
 0xaab   : > { %7554 = vst [vmem:[#allocation2 + $0xd4] sm:$0xff] %v7538_v13  ;;  %12130 = vtanh.f32 %v7491_v26  ;;  %v11727_v50 = vld [vmem:[#allocation2 + $0xc4] sm:$0xf] }
 0xaac   : > { %v11209_v2 = vld [vmem:[#allocation2 + $0x44] sm:$0xf] }
 0xaad   : > { %v7330_v29 = vpop.f32.mrf.mxu3 }
 0xaae   : > { %v7364_v18 = vadd.f32 %v7330_v29, %v7089_v42  ;;  %v15977_v52 = vpop.permute.xlu2 %7774 }
 0xab0   : > { %v12129_v51 = vpop.eup %12128  ;;  %v7492_v56 = vadd.f32 %v16925_v35, %v7364_v18  ;;  %v11782_v35 = vld [vmem:[#allocation2 + $0xc8] sm:$0xf] }
 0xab1   : > { %v7539_v49 = vpack.c.bf16 %v12129_v51, %v12127_v53  ;;  %v12131_v22 = vpop.eup %12130  ;;  %v11765_v53 = vld [vmem:[#allocation2 + $0x10] sm:$0xf0] }
 0xab2   : > { %12132 = vtanh.f32 %v7492_v56  ;;  %v11783_v36 = vld [vmem:[#allocation2 + $0xd0] sm:$0xf0]  ;;  %v11729_v61 = vld [vmem:[#allocation2 + $0xd4] sm:$0xf0] }
 0xab3   : > { %v11019_v38 = vld [vmem:[#allocation2 + $0xd0] sm:$0xf0]  ;;  %7555 = vst [vmem:[#allocation2 + $0xe4] sm:$0xff] %v7539_v49  ;;  %v11258_v47 = vor.u32 %v11783_v36, %v11257_v21  ;;  %v11026_v58 = vor.u32 %v11729_v61, %v11025_v12  ;;  %v11259_v46 = vld [vmem:[#allocation2 + $0xd4] sm:$0xf0] }
 0xab4   : > { %v11022_v6 = vor.u32 %v11727_v50, %v11019_v38  ;;  %v11262_v26 = vor.u32 %v11782_v35, %v11259_v46  ;;  %v11247_v56 = vld [vmem:[#allocation2 + $0xb4] sm:$0xf0]  ;;  %v11185_v21 = vld [vmem:[#allocation2 + $0x4] sm:$0xf]  ;;  %v11779_v50 = vld [vmem:[#allocation2 + $0xa8] sm:$0xf] }
 0xab5   : > { %8508 = vrot.lane.b32.xlu2 %v11258_v47, %s16826_s15  ;;  %7784 = vrot.lane.b32.xlu1 %v11026_v58, %s16843_s16  ;;  %v11186_v12 = vor.u32 %v11765_v53, %v11185_v21  ;;  %v11250_v36 = vor.u32 %v11779_v50, %v11247_v56  ;;  %v11253_v61 = vld [vmem:[#allocation2 + $0xac] sm:$0xf]  ;;  %v11781_v38 = vld [vmem:[#allocation2 + $0xb8] sm:$0xf0] }
 0xab6   : > { %7782 = vrot.lane.b32.xlu0 %v11022_v6, %s16843_s16  ;;  %v11217_v56 = vld [vmem:[#allocation2 + $0x4c] sm:$0xf]  ;;  %v11772_v21 = vld [vmem:[#allocation2 + $0x58] sm:$0xf0] }
 0xab8   : > { %v12133_v54 = vpop.eup %12132 }
 0xab9   : > { %v7540_v1 = vpack.c.bf16 %v12133_v54, %v12131_v22  ;;  %v11235_v22 = vld [vmem:[#allocation2 + $0x94] sm:$0xf0]  ;;  %v11776_v54 = vld [vmem:[#allocation2 + $0x88] sm:$0xf] }
 0xaba   : > { %v11037_v41 = vld [vmem:[#allocation2 + $0xe8] sm:$0xf]  ;;  %v11730_v43 = vld [vmem:[#allocation2 + $0xe4] sm:$0xf] }
 0xabb   : > { %7556 = vst [vmem:[#allocation2 + $0xf4] sm:$0xff] %v7540_v1  ;;  %v11269_v42 = vld [vmem:[#allocation2 + $0xe4] sm:$0xf]  ;;  %v11238_v1 = vor.u32 %v11776_v54, %v11235_v22  ;;  %v8858_v22 = vld [vmem:[%s16694_s11 + $0x48] sm:$0xff] }
 0xabc   : > { %v11767_v54 = vld [vmem:[#allocation2 + $0x28] sm:$0xf] }
 0xabd   : > { %8502 = vrot.lane.b32.xlu2 %v11246_v27, %s16826_s15 }
 0xac2   : > { %v11732_v37 = vld [vmem:[#allocation2 + $0xf4] sm:$0xf0]  ;;  %v11031_v17 = vld [vmem:[#allocation2 + $0xf0] sm:$0xf0] }
 0xac3   : > { %v11038_v9 = vor.u32 %v11732_v37, %v11037_v41  ;;  %v11034_v14 = vor.u32 %v11730_v43, %v11031_v17  ;;  %v11778_v41 = vld [vmem:[#allocation2 + $0x98] sm:$0xf0] }
 0xac4   : > { %v16051_v17 = vor.u32 %v11778_v41, %v11241_v5  ;;  %v11149_v41 = vld [vmem:[#allocation2 + $0xf4] sm:$0xf0] }
 0xac5   : > { %8496 = vrot.lane.b32.xlu2 %v11234_v48, %s16826_s15  ;;  %7790 = vrot.lane.b32.xlu1 %v11038_v9, %s16843_s16 }
 0xac6   : > { %7788 = vrot.lane.b32.xlu0 %v11034_v14, %s16843_s16  ;;  %s11805_s16 = smul.u32 160, %s12363_s25 }
 0xac7   : > { %v7749_v11 = vpop.permute.xlu1 %7748  ;;  %v15963_v62 = vpop.permute.xlu0 %7746 }
 0xac8   : > { %v15967_v40 = vsel %vm758_vm1, %v15963_v62, %v7749_v11  ;;  %s9027_s25 = scalar_lea.hbm %s16695_s12, %s11805_s16 }
 0xac9   : > { %s9030_s23 = sshll.u32 %s9027_s25, 4  ;;  %s9031_s23 = int_to_ptr.hbm [resolvable:$true] %s9030_s23 }
 0xaca   : > { %s12208_s20 = sshra.s32 %s9031_s23, 4  ;;  %s12209_s20 = int_to_ptr.hbm [resolvable:$true] %s12208_s20 }
 0xacb   : > { %p12215_p3 = scmp.lt.s32.totalorder %s12209_s20, %s16695_s12 }
 0xacd   : > { %8717 = vrot.lane.b32.xlu2 %v11258_v47, %s16827_s17  ;;  %7962 = vrot.lane.b32.xlu1 %v11026_v58, %s16852_s30 }
 0xace   : > { %7960 = vrot.lane.b32.xlu0 %v11022_v6, %s16852_s30  ;;  %v11254_v6 = vor.u32 %v11781_v38, %v11253_v61  ;;  %v16110_v61 = vor.u32 %v11772_v21, %v11217_v56  ;;  %v11199_v38 = vld [vmem:[#allocation2 + $0x34] sm:$0xf0] }
 0xad5   : > { %8490 = vrot.lane.b32.xlu2 %v11222_v39, %s16826_s15  ;;  %7956 = vrot.lane.b32.xlu1 %v15937_v55, %s16852_s30  ;;  %v15992_v55 = vpop.permute.xlu2 %7768 }
 0xad6   : > { %7954 = vrot.lane.b32.xlu0 %v15939_v3, %s16852_s30  ;;  %v11210_v3 = vor.u32 %v11771_v25, %v11209_v2  ;;  %v11775_v25 = vld [vmem:[#allocation2 + $0x78] sm:$0xf0] }
 0xad7   : > { %v7755_v28 = vpop.permute.xlu1 %7754  ;;  %v15981_v16 = vpop.permute.xlu0 %7752 }
 0xad8   : > { %v15985_v8 = vsel %vm758_vm1, %v15981_v16, %v7755_v28  ;;  %v11229_v28 = vld [vmem:[#allocation2 + $0x6c] sm:$0xf] }
 0xadd   : > { %8711 = vrot.lane.b32.xlu2 %v11246_v27, %s16827_s17  ;;  %7950 = vrot.lane.b32.xlu1 %v15917_v45, %s16852_s30  ;;  %v15999_v23 = vpop.permute.xlu2 %7762  ;;  %v11768_v45 = vld [vmem:[#allocation2 + $0x30] sm:$0xf0] }
 0xade   : > { %7948 = vrot.lane.b32.xlu0 %v15919_v4, %s16852_s30  ;;  %v11197_v4 = vld [vmem:[#allocation2 + $0x24] sm:$0xf] }
 0xadf   : > { %v11198_v32 = vor.u32 %v11768_v45, %v11197_v4 }
 0xae5   : > { %8484 = vrot.lane.b32.xlu2 %v11210_v3, %s16826_s15  ;;  %7944 = vrot.lane.b32.xlu1 %v15893_v57, %s16852_s30  ;;  %v16006_v13 = vpop.permute.xlu2 %7756  ;;  %v11787_v57 = vld [vmem:[#allocation2 + $0xf8] sm:$0xf0] }
 0xae6   : > { %7942 = vrot.lane.b32.xlu0 %v15895_v30, %s16852_s30  ;;  %v11786_v30 = vld [vmem:[#allocation2 + $0xf0] sm:$0xf0] }
 0xae7   : > { %v16028_v29 = vpop.permute.xlu1 %7760  ;;  %v16030_v18 = vpop.permute.xlu0 %7758 }
 0xaed   : > { %8705 = vrot.lane.b32.xlu2 %v11234_v48, %s16827_s17  ;;  %7938 = vrot.lane.b32.xlu1 %v15871_v33, %s16852_s30  ;;  %v16016_v33 = vpop.permute.xlu2 %7750  ;;  %v11223_v48 = vld [vmem:[#allocation2 + $0x74] sm:$0xf0] }
 0xaee   : > { %7936 = vrot.lane.b32.xlu0 %v15873_v19, %s16852_s30  ;;  %v11277_v19 = vld [vmem:[#allocation2 + $0xec] sm:$0xf]  ;;  %v7794_v5 = vsel %vm758_vm1, %v16016_v33, %v15981_v16 }
 0xaef   : > { %v11278_v24 = vor.u32 %v11787_v57, %v11277_v19  ;;  %v11211_v19 = vld [vmem:[#allocation2 + $0x54] sm:$0xf0]  ;;  %v11205_v33 = vld [vmem:[#allocation2 + $0x2c] sm:$0xf] }
 0xaf5   : > { %8478 = vrot.lane.b32.xlu2 %v11198_v32, %s16826_s15  ;;  %7932 = vrot.lane.b32.xlu1 %v15852_v20, %s16852_s30  ;;  %v11270_v20 = vor.u32 %v11786_v30, %v11269_v42  ;;  %v8852_v30 = vld [vmem:[%s16694_s11 + $0x18] sm:$0xff] }
 0xaf6   : > { %7930 = vrot.lane.b32.xlu0 %v15854_v0, %s16852_s30  ;;  %v11784_v0 = vld [vmem:[#allocation2 + $0xd8] sm:$0xf0] }
 0xaf7   : > { %v16037_v47 = vpop.permute.xlu1 %7766  ;;  %v16039_v58 = vpop.permute.xlu0 %7764 }
 0xafd   : > { %8699 = vrot.lane.b32.xlu2 %v11222_v39, %s16827_s17  ;;  %7926 = vrot.lane.b32.xlu1 %v15825_v44, %s16852_s30  ;;  %v16023_v44 = vpop.permute.xlu2 %7744  ;;  %v8849_v39 = vld [vmem:[%s16694_s11] sm:$0xff] }
 0xafe   : > { %7924 = vrot.lane.b32.xlu0 %v15827_v7, %s16852_s30  ;;  %v11265_v7 = vld [vmem:[#allocation2 + $0xcc] sm:$0xf] }
 0xaff   : > { %v11266_v51 = vor.u32 %v11784_v0, %v11265_v7  ;;  %v8855_v0 = vld [vmem:[%s16694_s11 + $0x30] sm:$0xff] }
 0xb05   : > { %8514 = vrot.lane.b32.xlu2 %v11270_v20, %s16826_s15  ;;  %8518 = vrot.lane.b32.xlu1 %v11278_v24, %s16826_s15  ;;  %v16032_v49 = vpop.permute.xlu2 %7964 }
 0xb06   : > { %8510 = vrot.lane.b32.xlu0 %v11262_v26, %s16826_s15 }
 0xb07   : > { %v7773_v15 = vpop.permute.xlu1 %7772  ;;  %v7771_v27 = vpop.permute.xlu0 %7770 }
 0xb0d   : > { %8723 = vrot.lane.b32.xlu2 %v11270_v20, %s16827_s17  ;;  %7968 = vrot.lane.b32.xlu1 %v11038_v9, %s16852_s30  ;;  %v16041_v59 = vpop.permute.xlu2 %7958  ;;  %v11773_v9 = vld [vmem:[#allocation2 + $0x68] sm:$0xf] }
 0xb0e   : > { %7966 = vrot.lane.b32.xlu0 %v11034_v14, %s16852_s30  ;;  %v16053_v14 = vor.u32 %v11773_v9, %v11223_v48  ;;  %v11733_v48 = vld [vmem:[%s16693_s10 + $0x28] sm:$0xff]  ;;  %v11769_v9 = vld [vmem:[#allocation2 + $0x38] sm:$0xf0] }
 0xb15   : > { %8472 = vrot.lane.b32.xlu2 %v11186_v12, %s16826_s15  ;;  %8512 = vrot.lane.b32.xlu1 %v11266_v51, %s16826_s15  ;;  %v16048_v60 = vpop.permute.xlu2 %7952 }
 0xb16   : > { %8504 = vrot.lane.b32.xlu0 %v11250_v36, %s16826_s15 }
 0xb17   : > { %v7779_v37 = vpop.permute.xlu1 %7778  ;;  %v7777_v43 = vpop.permute.xlu0 %7776 }
 0xb1d   : > { %8693 = vrot.lane.b32.xlu2 %v11210_v3, %s16827_s17  ;;  %8506 = vrot.lane.b32.xlu1 %v11254_v6, %s16826_s15  ;;  %v16060_v10 = vpop.permute.xlu2 %7946 }
 0xb1e   : > { %8498 = vrot.lane.b32.xlu0 %v11238_v1, %s16826_s15 }
 0xb25   : > { %8687 = vrot.lane.b32.xlu2 %v11198_v32, %s16827_s17  ;;  %8727 = vrot.lane.b32.xlu1 %v11278_v24, %s16827_s17  ;;  %v16070_v32 = vor.u32 %v11775_v25, %v11229_v28  ;;  %v16072_v57 = vpop.permute.xlu2 %7940  ;;  %v11770_v24 = vld [vmem:[#allocation2 + $0x48] sm:$0xf]  ;;  %v11271_v25 = vld [vmem:[#allocation2 + $0xf4] sm:$0xf0] }
 0xb26   : > { %8719 = vrot.lane.b32.xlu0 %v11262_v26, %s16827_s17  ;;  %v16077_v46 = vor.u32 %v11770_v24, %v11211_v19  ;;  %v7802_v26 = vsel %vm758_vm1, %v15977_v52, %v7777_v43  ;;  %v7800_v52 = vsel %vm758_vm1, %v15992_v55, %v7771_v27  ;;  %v11755_v28 = vld [vmem:[#allocation2 + $0xc8] sm:$0xf]  ;;  %v11131_v19 = vld [vmem:[#allocation2 + $0xa4] sm:$0xf] }
 0xb27   : > { %v7785_v11 = vpop.permute.xlu1 %7784  ;;  %v11753_v24 = vld [vmem:[#allocation2 + $0xa8] sm:$0xf] }
 0xb28   : > { %v7783_v63 = vpop.permute.xlu0 %7782 }
 0xb29   : > { %v7805_v42 = vsel %vm758_vm1, %v7783_v63, %v7785_v11 }
 0xb2d   : > { %8681 = vrot.lane.b32.xlu2 %v11186_v12, %s16827_s17  ;;  %8500 = vrot.lane.b32.xlu1 %v16051_v17, %s16826_s15  ;;  %v16098_v53 = vpop.permute.xlu2 %7934 }
 0xb2e   : > { %8492 = vrot.lane.b32.xlu0 %v16053_v14, %s16826_s15 }
 0xb35   : > { %8861 = vperm.xlu2 %11877, %v8849_v39   ;;  %8721 = vrot.lane.b32.xlu1 %v11266_v51, %s16827_s17  ;;  %v7801_v51 = vsel %vm758_vm1, %v7771_v27, %v7773_v15  ;;  %v16129_v15 = vpop.permute.xlu2 %7928 }
 0xb36   : > { %8713 = vrot.lane.b32.xlu0 %v11250_v36, %s16827_s17  ;;  %v7798_v36 = vsel %vm758_vm1, %v15999_v23, %v16039_v58  ;;  %v7796_v23 = vsel %vm758_vm1, %v16006_v13, %v16030_v18  ;;  %v11758_v13 = vld [vmem:[#allocation2 + $0xf0] sm:$0xf0] }
 0xb37   : > { %v7791_v2 = vpop.permute.xlu1 %7790 }
 0xb38   : > { %v7789_v3 = vpop.permute.xlu0 %7788 }
 0xb39   : > { %v7806_v45 = vsel %vm758_vm1, %v15958_v31, %v7789_v3  ;;  %v7807_v4 = vsel %vm758_vm1, %v7789_v3, %v7791_v2  ;;  %v7804_v31 = vsel %vm758_vm1, %v15969_v34, %v7783_v63  ;;  %v7803_v34 = vsel %vm758_vm1, %v7777_v43, %v7779_v37  ;;  %v11147_v37 = vld [vmem:[#allocation2 + $0xe4] sm:$0xf]  ;;  %v11757_v43 = vld [vmem:[#allocation2 + $0xe8] sm:$0xf]  ;;  %v11754_v3 = vld [vmem:[#allocation2 + $0xb0] sm:$0xf0] }
 0xb3a   : > { %7824 = vmatpush.bf16.msra.mxu0 %v7806_v45  ;;  %7858 = vmatpush.bf16.msra.mxu1 %v7807_v4  ;;  %v11152_v16 = vor.u32 %v11757_v43, %v11149_v41  ;;  %v11139_v63 = vld [vmem:[#allocation2 + $0xc4] sm:$0xf]  ;;  %v11133_v45 = vld [vmem:[#allocation2 + $0xb4] sm:$0xf0]  ;;  %v11747_v43 = vld [vmem:[#allocation2 + $0x48] sm:$0xf] }
 0xb3d   : > { %8876 = vperm.xlu2 %11877, %v8852_v30   ;;  %8494 = vrot.lane.b32.xlu1 %v16070_v32, %s16826_s15  ;;  %v11132_v30 = vor.u32 %v11754_v3, %v11131_v19 }
 0xb3e   : > { %8486 = vrot.lane.b32.xlu0 %v16077_v46, %s16826_s15  ;;  %7825 = vmatpush.bf16.msra.mxu0 %v7804_v31  ;;  %v11136_v31 = vor.u32 %v11753_v24, %v11133_v45 }
 0xb3f   : > { %7859 = vmatpush.bf16.msra.mxu1 %v7805_v42  ;;  %v7963_v20 = vpop.permute.xlu1 %7962  ;;  %v11752_v42 = vld [vmem:[#allocation2 + $0x90] sm:$0xf0] }
 0xb40   : > { %v16086_v35 = vpop.permute.xlu0 %7960 }
 0xb41   : > { %v16092_v7 = vsel %vm972_vm4, %v16086_v35, %v7963_v20 }
 0xb42   : > { %7826 = vmatpush.bf16.msra.mxu0 %v7802_v26  ;;  %v11125_v26 = vld [vmem:[#allocation2 + $0x94] sm:$0xf0] }
 0xb43   : > { %7860 = vmatpush.bf16.msra.mxu1 %v7803_v34 }
 0xb45   : > { %8891 = vperm.xlu2 %11877, %v8855_v0   ;;  %8715 = vrot.lane.b32.xlu1 %v11254_v6, %s16827_s17  ;;  %v7799_v6 = vsel %vm758_vm1, %v16039_v58, %v16037_v47  ;;  %v7797_v47 = vsel %vm758_vm1, %v16030_v18, %v16028_v29  ;;  %v7792_v29 = vsel %vm758_vm1, %v16023_v44, %v15963_v62  ;;  %v11141_v62 = vld [vmem:[#allocation2 + $0xd4] sm:$0xf0]  ;;  %v16157_v44 = vpop.permute.xlu2 %7922  ;;  %v11123_v0 = vld [vmem:[#allocation2 + $0x84] sm:$0xf] }
 0xb46   : > { %8707 = vrot.lane.b32.xlu0 %v11238_v1, %s16827_s17  ;;  %7827 = vmatpush.bf16.msra.mxu0 %v7800_v52  ;;  %v16122_v1 = vor.u32 %v11767_v54, %v11199_v38  ;;  %v11148_v18 = vor.u32 %v11758_v13, %v11147_v37  ;;  %v11144_v2 = vor.u32 %v11755_v28, %v11141_v62  ;;  %v11115_v38 = vld [vmem:[#allocation2 + $0x64] sm:$0xf]  ;;  %v11734_v54 = vld [vmem:[%s16693_s10 + $0x30] sm:$0xff]  ;;  %v11766_v13 = vld [vmem:[#allocation2 + $0x18] sm:$0xf0] }
 0xb47   : > { %7861 = vmatpush.bf16.msra.mxu1 %v7801_v51  ;;  %v7957_v12 = vpop.permute.xlu1 %7956  ;;  %v11124_v52 = vor.u32 %v11752_v42, %v11123_v0  ;;  %v11751_v51 = vld [vmem:[#allocation2 + $0x88] sm:$0xf]  ;;  %v11109_v37 = vld [vmem:[#allocation2 + $0x54] sm:$0xf0]  ;;  %v11099_v28 = vld [vmem:[#allocation2 + $0x24] sm:$0xf] }
 0xb48   : > { %v16105_v50 = vpop.permute.xlu0 %7954  ;;  %v11128_v21 = vor.u32 %v11751_v51, %v11125_v26  ;;  %v11101_v62 = vld [vmem:[#allocation2 + $0x34] sm:$0xf0] }
 0xb49   : > { %v16114_v55 = vsel %vm972_vm4, %v16105_v50, %v7957_v12  ;;  %v11750_v12 = vld [vmem:[#allocation2 + $0x70] sm:$0xf0]  ;;  %v11735_v26 = vld [vmem:[%s16693_s10 + $0x38] sm:$0xff] }
 0xb4a   : > { %7828 = vmatpush.bf16.msra.mxu0 %v7798_v36  ;;  %v11117_v36 = vld [vmem:[#allocation2 + $0x74] sm:$0xf0] }
 0xb4b   : > { %7862 = vmatpush.bf16.msra.mxu1 %v7799_v6  ;;  %v11116_v6 = vor.u32 %v11750_v12, %v11115_v38  ;;  %v7982_v38 = vsel %vm972_vm4, %v16041_v59, %v16086_v35  ;;  %v7980_v59 = vsel %vm972_vm4, %v16048_v60, %v16105_v50 }
 0xb4d   : > { %8906 = vperm.xlu2 %11877, %v8858_v22   ;;  %8488 = vrot.lane.b32.xlu1 %v16110_v61, %s16826_s15  ;;  %v16170_v56 = vpop.permute.xlu2 %8508  ;;  %v11749_v22 = vld [vmem:[#allocation2 + $0x68] sm:$0xf] }
 0xb4e   : > { %8480 = vrot.lane.b32.xlu0 %v16122_v1, %s16826_s15  ;;  %7829 = vmatpush.bf16.msra.mxu0 %v7796_v23  ;;  %v11120_v23 = vor.u32 %v11749_v22, %v11117_v36  ;;  %v8851_v22 = vld [vmem:[%s16694_s11 + $0x10] sm:$0xff] }
 0xb4f   : > { %7863 = vmatpush.bf16.msra.mxu1 %v7797_v47  ;;  %v16136_v58 = vpop.permute.xlu1 %7950  ;;  %v11748_v47 = vld [vmem:[#allocation2 + $0x50] sm:$0xf0] }
 0xb50   : > { %v16138_v27 = vpop.permute.xlu0 %7948 }
 0xb51   : > { %v7979_v60 = vsel %vm972_vm4, %v16138_v27, %v16136_v58  ;;  %v8854_v58 = vld [vmem:[%s16694_s11 + $0x28] sm:$0xff] }
 0xb52   : > { %7830 = vmatpush.bf16.msra.mxu0 %v7794_v5  ;;  %v11193_v5 = vld [vmem:[#allocation2 + $0xc] sm:$0xf] }
 0xb53   : > { %7864 = vmatpush.bf16.msra.mxu1 %v15985_v8  ;;  %v11756_v8 = vld [vmem:[#allocation2 + $0xd0] sm:$0xf0] }
 0xb54   : > { %v11140_v39 = vor.u32 %v11756_v8, %v11139_v63  ;;  %v11112_v8 = vor.u32 %v11747_v43, %v11109_v37  ;;  %v11704_v43 = vld [vmem:[%s16693_s10] sm:$0xff] }
 0xb55   : > { %8709 = vrot.lane.b32.xlu1 %v16051_v17, %s16827_s17  ;;  %v16182_v63 = vpop.permute.xlu2 %8502 }
 0xb56   : > { %8701 = vrot.lane.b32.xlu0 %v16053_v14, %s16827_s17  ;;  %7831 = vmatpush.bf16.msra.mxu0 %v7792_v29  ;;  %v16161_v14 = vor.u32 %v11769_v9, %v11205_v33  ;;  %v11746_v33 = vld [vmem:[#allocation2 + $0x30] sm:$0xf0]  ;;  %v11764_v9 = vld [vmem:[#allocation2 + $0x8] sm:$0xf] }
 0xb57   : > { %7865 = vmatpush.bf16.msra.mxu1 %v15967_v40  ;;  %v16155_v17 = vpop.permute.xlu1 %7944  ;;  %v11785_v40 = vld [vmem:[#allocation2 + $0xe8] sm:$0xf] }
 0xb58   : > { %v16159_v11 = vpop.permute.xlu0 %7942  ;;  %v11274_v4 = vor.u32 %v11785_v40, %v11271_v25  ;;  %v11100_v25 = vor.u32 %v11746_v33, %v11099_v28  ;;  %v11744_v40 = vld [vmem:[#allocation2 + $0x10] sm:$0xf0] }
 0xb59   : > { %7832 = vmatmul.bf16.vlgmr.msra.gmra.mxu0 %v11733_v48 }
 0xb5a   : > { %8207 = vmatpush.bf16.msrb.mxu0 %v11148_v18  ;;  %7866 = vmatmul.bf16.vlgmr.msra.gmra.mxu1 %v11733_v48  ;;  %v11194_v48 = vor.u32 %v11766_v13, %v11193_v5 }
 0xb5b   : > { %8241 = vmatpush.bf16.msrb.mxu1 %v11152_v16  ;;  %v11187_v16 = vld [vmem:[#allocation2 + $0x14] sm:$0xf0] }
 0xb5d   : > { %8482 = vrot.lane.b32.xlu1 %v16161_v14, %s16826_s15  ;;  %v16195_v0 = vpop.permute.xlu2 %8496 }
 0xb5e   : > { %8208 = vmatpush.bf16.msrb.mxu0 %v11140_v39  ;;  %8516 = vrot.lane.b32.xlu0 %v11274_v4, %s16826_s15  ;;  %v11190_v39 = vor.u32 %v11764_v9, %v11187_v16 }
 0xb5f   : > { %8242 = vmatpush.bf16.msrb.mxu1 %v11144_v2  ;;  %v16166_v20 = vpop.permute.xlu1 %7938  ;;  %v11745_v2 = vld [vmem:[#allocation2 + $0x28] sm:$0xf] }
 0xb60   : > { %v16168_v34 = vpop.permute.xlu0 %7936  ;;  %v11104_v3 = vor.u32 %v11745_v2, %v11101_v62 }
 0xb62   : > { %8209 = vmatpush.bf16.msrb.mxu0 %v11132_v30  ;;  %v11091_v30 = vld [vmem:[#allocation2 + $0x4] sm:$0xf] }
 0xb63   : > { %8243 = vmatpush.bf16.msrb.mxu1 %v11136_v31  ;;  %v11092_v24 = vor.u32 %v11744_v40, %v11091_v30  ;;  %v11743_v31 = vld [vmem:[#allocation2 + $0x8] sm:$0xf] }
 0xb65   : > { %8703 = vrot.lane.b32.xlu1 %v16070_v32, %s16827_s17  ;;  %v11107_v32 = vld [vmem:[#allocation2 + $0x44] sm:$0xf] }
 0xb66   : > { %8210 = vmatpush.bf16.msrb.mxu0 %v11124_v52  ;;  %8725 = vrot.lane.b32.xlu0 %v11274_v4, %s16827_s17  ;;  %v11108_v18 = vor.u32 %v11748_v47, %v11107_v32  ;;  %v11093_v4 = vld [vmem:[#allocation2 + $0x14] sm:$0xf0]  ;;  %v7976_v47 = vsel %vm972_vm4, %v16072_v57, %v16159_v11  ;;  %v7974_v57 = vsel %vm972_vm4, %v16098_v53, %v16168_v34 }
 0xb67   : > { %8244 = vmatpush.bf16.msrb.mxu1 %v11128_v21  ;;  %v16178_v41 = vpop.permute.xlu1 %7932  ;;  %v11096_v42 = vor.u32 %v11743_v31, %v11093_v4  ;;  %v8718_v21 = vpop.permute.xlu2 %8717  ;;  %v11740_v31 = vld [vmem:[%s16693_s10 + $0x60] sm:$0xff] }
 0xb68   : > { %v16180_v29 = vpop.permute.xlu0 %7930 }
 0xb69   : > { %7837 = vmatmul.bf16.gmra.mxu0 %v11734_v54  ;;  %v7972_v32 = vsel %vm972_vm4, %v16129_v15, %v16180_v29  ;;  %v8856_v15 = vld [vmem:[%s16694_s11 + $0x38] sm:$0xff] }
 0xb6a   : > { %8211 = vmatpush.bf16.msrb.mxu0 %v11116_v6  ;;  %7871 = vmatmul.bf16.gmra.mxu1 %v11734_v54  ;;  %v7978_v54 = vsel %vm972_vm4, %v16060_v10, %v16138_v27  ;;  %v7977_v10 = vsel %vm972_vm4, %v16159_v11, %v16155_v17  ;;  %v8853_v27 = vld [vmem:[%s16694_s11 + $0x20] sm:$0xff]  ;;  %v11737_v17 = vld [vmem:[%s16693_s10 + $0x48] sm:$0xff]  ;;  %v7975_v11 = vsel %vm972_vm4, %v16168_v34, %v16166_v20 }
 0xb6b   : > { %8245 = vmatpush.bf16.msrb.mxu1 %v11120_v23  ;;  %v8857_v20 = vld [vmem:[%s16694_s11 + $0x40] sm:$0xff] }
 0xb6d   : > { %8476 = vrot.lane.b32.xlu1 %v11194_v48, %s16826_s15 }
 0xb6e   : > { %8212 = vmatpush.bf16.msrb.mxu0 %v11108_v18  ;;  %8474 = vrot.lane.b32.xlu0 %v11190_v39, %s16826_s15  ;;  %v7973_v18 = vsel %vm972_vm4, %v16180_v29, %v16178_v41  ;;  %s9028_s15 = sshll.u32 %s16575_s0, 4  ;;  %s9029_s15 = int_to_ptr.vmem [resolvable:$true] %s9028_s15 }
 0xb6f   : > { %8246 = vmatpush.bf16.msrb.mxu1 %v11112_v8  ;;  %v16186_v45 = vpop.permute.xlu1 %7926  ;;  %v8491_v35 = vpop.permute.xlu2 %8490  ;;  %v11738_v8 = vld [vmem:[%s16693_s10 + $0x50] sm:$0xff] }
 0xb70   : > { %v16188_v19 = vpop.permute.xlu0 %7924 }
 0xb71   : > { %v7970_v34 = vsel %vm972_vm4, %v16157_v44, %v16188_v19  ;;  %v7971_v29 = vsel %vm972_vm4, %v16188_v19, %v16186_v45  ;;  %v11706_v19 = vld [vmem:[%s16693_s10 + $0x10] sm:$0xff] }
 0xb72   : > { %8213 = vmatpush.bf16.msrb.mxu0 %v11100_v25 }
 0xb73   : > { %8247 = vmatpush.bf16.msrb.mxu1 %v11104_v3  ;;  %v11739_v3 = vld [vmem:[%s16693_s10 + $0x58] sm:$0xff] }
 0xb75   : > { %8697 = vrot.lane.b32.xlu1 %v16110_v61, %s16827_s17 }
 0xb76   : > { %8214 = vmatpush.bf16.msrb.mxu0 %v11092_v24  ;;  %8695 = vrot.lane.b32.xlu0 %v16077_v46, %s16827_s17 }
 0xb77   : > { %8248 = vmatpush.bf16.msrb.mxu1 %v11096_v42  ;;  %v16199_v52 = vpop.permute.xlu1 %8518  ;;  %v16259_v5 = vpop.permute.xlu2 %8711 }
 0xb78   : > { %v16201_v51 = vpop.permute.xlu0 %8510 }
 0xb79   : > { %7842 = vmatmul.bf16.gmra.mxu0 %v11735_v26 }
 0xb7a   : > { %7876 = vmatmul.bf16.gmra.mxu1 %v11735_v26 }
 0xb7d   : > { %8691 = vrot.lane.b32.xlu1 %v16161_v14, %s16827_s17 }
 0xb7e   : > { %8689 = vrot.lane.b32.xlu0 %v16122_v1, %s16827_s17  ;;  %v11736_v1 = vld [vmem:[%s16693_s10 + $0x40] sm:$0xff] }
 0xb7f   : > { %v7969_v61 = vpop.permute.xlu1 %7968  ;;  %v16296_v41 = vpop.permute.xlu2 %8484 }
 0xb80   : > { %v7967_v12 = vpop.permute.xlu0 %7966 }
 0xb81   : > { %v7984_v36 = vsel %vm972_vm4, %v16032_v49, %v7967_v12  ;;  %v7985_v46 = vsel %vm972_vm4, %v7967_v12, %v7969_v61 }
 0xb82   : > { %8002 = vmatpush.bf16.msrb.mxu2 %v7984_v36  ;;  %8036 = vmatpush.bf16.msrb.mxu3 %v7985_v46 }
 0xb85   : > { %8685 = vrot.lane.b32.xlu1 %v11194_v48, %s16827_s17 }
 0xb86   : > { %8683 = vrot.lane.b32.xlu0 %v11190_v39, %s16827_s17  ;;  %8003 = vmatpush.bf16.msrb.mxu2 %v7982_v38  ;;  %v11705_v39 = vld [vmem:[%s16693_s10 + $0x8] sm:$0xff]  ;;  %s12210_s17 = scalar_lea.hbm %s12209_s20, 160 }
 0xb87   : > { %8037 = vmatpush.bf16.msrb.mxu3 %v16092_v7  ;;  %v8513_v49 = vpop.permute.xlu1 %8512  ;;  %v8850_v7 = vld [vmem:[%s16694_s11 + $0x8] sm:$0xff]  ;;  %v16312_v9 = vpop.permute.xlu2 %8705  ;;  %p12211_p0 = scmp.ne.s32.totalorder %s12209_s20, %s12210_s17  ;;  %p12216_p4 = scmp.lt.s32.totalorder %s12214_s27, %s12210_s17 }
 0xb88   : > { %v16219_v14 = vpop.permute.xlu0 %8504  ;;  %v16223_v6 = vsel %vm1558_vm5, %v16201_v51, %v8513_v49  ;;  %v8532_v49 = vsel %vm1558_vm5, %v16170_v56, %v16201_v51 }
 0xb89   : > { %7847 = vmatmul.bf16.gmra.mxu0 %v11736_v1  ;;  %v8530_v56 = vsel %vm1558_vm5, %v16182_v63, %v16219_v14  ;;  %p12212_p1 = pnand %p12211_p0, %p12380_p5  ;;  %p12217_p7 = por %p12216_p4, %p12215_p3 }
 0xb8a   : > { %8004 = vmatpush.bf16.msrb.mxu2 %v7980_v59  ;;  %7881 = vmatmul.bf16.gmra.mxu1 %v11736_v1  ;;  %v11741_v59 = vld [vmem:[%s16693_s10 + $0x68] sm:$0xff] }
 0xb8b   : > { %8038 = vmatpush.bf16.msrb.mxu3 %v16114_v55  ;;  %p12213_p2 = pneg %p12212_p1 }
 0xb8d   : > { %8871 = vperm.xlu1 %11876, %v8851_v22   ;;  %p12218_p8 = pnand %p12217_p7, %p12213_p2 }
 0xb8e   : > { %8866 = vperm.xlu0 %11875, %v8850_v7   ;;  %8005 = vmatpush.bf16.msrb.mxu2 %v7978_v54 }
 0xb8f   : > { %8039 = vmatpush.bf16.msrb.mxu3 %v7979_v60  ;;  %v8507_v50 = vpop.permute.xlu1 %8506  ;;  %v16323_v2 = vpop.permute.xlu2 %8478 }
 0xb90   : > { %v16241_v23 = vpop.permute.xlu0 %8498  ;;  %v16245_v55 = vsel %vm1558_vm5, %v16219_v14, %v8507_v50  ;;  %v11708_v50 = vld [vmem:[%s16693_s10 + $0x20] sm:$0xff] }
 0xb92   : > { %8006 = vmatpush.bf16.msrb.mxu2 %v7976_v47 }
 0xb93   : > { %8040 = vmatpush.bf16.msrb.mxu3 %v7977_v10 }
 0xb95   : > { %8886 = vperm.xlu1 %11876, %v8854_v58  }
 0xb96   : > { %8881 = vperm.xlu0 %11875, %v8853_v27   ;;  %8007 = vmatpush.bf16.msrb.mxu2 %v7974_v57 }
 0xb97   : > { %8041 = vmatpush.bf16.msrb.mxu3 %v7975_v11  ;;  %v16270_v13 = vpop.permute.xlu1 %8727  ;;  %v16332_v4 = vpop.permute.xlu2 %8699  ;;  %v11742_v11 = vld [vmem:[%s16693_s10 + $0x70] sm:$0xff] }
 0xb98   : > { %v16272_v37 = vpop.permute.xlu0 %8719 }
 0xb99   : > { %7852 = vmatmul.bf16.gmra.mxu0 %v11737_v17  ;;  %v16279_v53 = vsel %vm1820_vm6, %v8718_v21, %v16272_v37  ;;  %v11707_v21 = vld [vmem:[%s16693_s10 + $0x18] sm:$0xff] }
 0xb9a   : > { %8008 = vmatpush.bf16.msrb.mxu2 %v7972_v32  ;;  %7886 = vmatmul.bf16.gmra.mxu1 %v11737_v17 }
 0xb9b   : > { %8042 = vmatpush.bf16.msrb.mxu3 %v7973_v18 }
 0xb9d   : > { %8901 = vperm.xlu1 %11876, %v8857_v20  }
 0xb9e   : > { %8896 = vperm.xlu0 %11875, %v8856_v15   ;;  %8009 = vmatpush.bf16.msrb.mxu2 %v7970_v34 }
 0xb9f   : > { %8043 = vmatpush.bf16.msrb.mxu3 %v7971_v29  ;;  %v16301_v48 = vpop.permute.xlu1 %8500  ;;  %v8515_v42 = vpop.permute.xlu2 %8514 }
 0xba0   : > { %v16303_v16 = vpop.permute.xlu0 %8492  ;;  %v8529_v63 = vsel %vm1558_vm5, %v16241_v23, %v16301_v48  ;;  %v11759_v48 = vld [vmem:[%s16693_s10 + $0x78] sm:$0xff] }
 0xba1   : > { %8010 = vmatmul.bf16.vlgmr.msrb.gmra.mxu2 %v11704_v43  ;;  %v16307_v44 = vsel %vm1558_vm5, %v8491_v35, %v16303_v16 }
 0xba2   : > { %8044 = vmatmul.bf16.vlgmr.msrb.gmra.mxu3 %v11704_v43 }
 0xba7   : > { %v8722_v33 = vpop.permute.xlu1 %8721  ;;  %v8724_v36 = vpop.permute.xlu2 %8723 }
 0xba8   : > { %v16314_v62 = vpop.permute.xlu0 %8713  ;;  %v8742_v14 = vsel %vm1820_vm6, %v16272_v37, %v8722_v33 }
 0xba9   : > { %8215 = vmatmul.bf16.vlgmr.msrb.gmra.mxu0 %v11738_v8  ;;  %v8739_v58 = vsel %vm1820_vm6, %v16259_v5, %v16314_v62 }
 0xbaa   : > { %8249 = vmatmul.bf16.vlgmr.msrb.gmra.mxu1 %v11738_v8 }
 0xbaf   : > { %v16319_v28 = vpop.permute.xlu1 %8494  ;;  %v8473_v51 = vpop.permute.xlu2 %8472 }
 0xbb0   : > { %v16321_v25 = vpop.permute.xlu0 %8486 }
 0xbb1   : > { %8015 = vmatmul.bf16.gmra.mxu2 %v11705_v39  ;;  %v8524_v17 = vsel %vm1558_vm5, %v16296_v41, %v16321_v25 }
 0xbb2   : > { %8049 = vmatmul.bf16.gmra.mxu3 %v11705_v39 }
 0xbb7   : > { %v16328_v40 = vpop.permute.xlu1 %8715  ;;  %v8694_v57 = vpop.permute.xlu2 %8693 }
 0xbb8   : > { %v16330_v45 = vpop.permute.xlu0 %8707  ;;  %v8740_v27 = vsel %vm1820_vm6, %v16314_v62, %v16328_v40 }
 0xbb9   : > { %8220 = vmatmul.bf16.gmra.mxu0 %v11739_v3 }
 0xbba   : > { %8254 = vmatmul.bf16.gmra.mxu1 %v11739_v3 }
 0xbbf   : > { %v16337_v30 = vpop.permute.xlu1 %8488 }
 0xbc0   : > { %v16339_v24 = vpop.permute.xlu0 %8480  ;;  %v8525_v5 = vsel %vm1558_vm5, %v16321_v25, %v16337_v30 }
 0xbc1   : > { %8020 = vmatmul.bf16.gmra.mxu2 %v11706_v19  ;;  %v8522_v15 = vsel %vm1558_vm5, %v16323_v2, %v16339_v24 }
 0xbc2   : > { %8054 = vmatmul.bf16.gmra.mxu3 %v11706_v19 }
 0xbc7   : > { %v16344_v26 = vpop.permute.xlu1 %8709 }
 0xbc8   : > { %v16346_v61 = vpop.permute.xlu0 %8701  ;;  %v8738_v32 = vsel %vm1820_vm6, %v16330_v45, %v16344_v26 }
 0xbc9   : > { %8225 = vmatmul.bf16.gmra.mxu0 %v11740_v31  ;;  %v8735_v43 = vsel %vm1820_vm6, %v16332_v4, %v16346_v61 }
 0xbca   : > { %8259 = vmatmul.bf16.gmra.mxu1 %v11740_v31  ;;  %v11788_v31 = vld [vmem:[%s16693_s10 + $0xa0] sm:$0xff] }
 0xbcf   : > { %v16351_v12 = vpop.permute.xlu1 %8482 }
 0xbd0   : > { %v8517_v46 = vpop.permute.xlu0 %8516  ;;  %v8523_v34 = vsel %vm1558_vm5, %v16339_v24, %v16351_v12 }
 0xbd1   : > { %v8534_v38 = vsel %vm1558_vm5, %v8515_v42, %v8517_v46  ;;  %v8535_v1 = vsel %vm1558_vm5, %v8517_v46, %v16199_v52  ;;  %8025 = vmatmul.bf16.gmra.mxu2 %v11707_v21  ;;  %v11760_v42 = vld [vmem:[%s16693_s10 + $0x80] sm:$0xff]  ;;  %v11761_v46 = vld [vmem:[%s16693_s10 + $0x88] sm:$0xff] }
 0xbd2   : > { %8059 = vmatmul.bf16.gmra.mxu3 %v11707_v21  ;;  %8552 = vmatpush.bf16.msra.mxu2 %v8534_v38 }
 0xbd3   : > { %8586 = vmatpush.bf16.msra.mxu3 %v8535_v1 }
 0xbd6   : > { %8553 = vmatpush.bf16.msra.mxu2 %v8532_v49  ;;  %v16362_v35 = vpop.f32.mrf.mxu0 }
 0xbd7   : > { %8587 = vmatpush.bf16.msra.mxu3 %v16223_v6  ;;  %v8704_v22 = vpop.permute.xlu1 %8703  ;;  %v16365_v7 = vpop.f32.mrf.mxu1  ;;  %v8528_v6 = vsel %vm1558_vm5, %v16195_v0, %v16241_v23  ;;  %v8527_v23 = vsel %vm1558_vm5, %v16303_v16, %v16319_v28 }
 0xbd8   : > { %v8726_v52 = vpop.permute.xlu0 %8725  ;;  %v8736_v41 = vsel %vm1820_vm6, %v16346_v61, %v8704_v22  ;;  %v8688_v16 = vpop.permute.xlu2 %8687  ;;  %v11790_v22 = vld [vmem:[%s16693_s10 + $0xb0] sm:$0xff] }
 0xbd9   : > { %v8743_v54 = vsel %vm1820_vm6, %v8724_v36, %v8726_v52  ;;  %v8744_v60 = vsel %vm1820_vm6, %v8726_v52, %v16270_v13  ;;  %8230 = vmatmul.bf16.gmra.mxu0 %v11741_v59  ;;  %v8737_v13 = vsel %vm1820_vm6, %v16312_v9, %v16330_v45  ;;  %v11789_v36 = vld [vmem:[%s16693_s10 + $0xa8] sm:$0xff]  ;;  %v11762_v52 = vld [vmem:[%s16693_s10 + $0x90] sm:$0xff] }
 0xbda   : > { %8554 = vmatpush.bf16.msra.mxu2 %v8530_v56  ;;  %8761 = vmatpush.bf16.msra.mxu0 %v8743_v54 }
 0xbdb   : > { %8588 = vmatpush.bf16.msra.mxu3 %v16245_v55  ;;  %8795 = vmatpush.bf16.msra.mxu1 %v8744_v60 }
 0xbdc   : > { %8264 = vmatmul.bf16.gmra.mxu1 %v11741_v59 }
 0xbde   : > { %8555 = vmatpush.bf16.msra.mxu2 %v8528_v6  ;;  %8762 = vmatpush.bf16.msra.mxu0 %v16279_v53  ;;  %v16386_v55 = vpop.f32.mrf.mxu0 }
 0xbdf   : > { %8589 = vmatpush.bf16.msra.mxu3 %v8529_v63  ;;  %8796 = vmatpush.bf16.msra.mxu1 %v8742_v14  ;;  %v8477_v47 = vpop.permute.xlu1 %8476  ;;  %v16388_v0 = vpop.f32.mrf.mxu1 }
 0xbe0   : > { %v8475_v10 = vpop.permute.xlu0 %8474  ;;  %v8682_v4 = vpop.permute.xlu2 %8681 }
 0xbe1   : > { %8030 = vmatmul.bf16.gmra.mxu2 %v11708_v50  ;;  %v8520_v29 = vsel %vm1558_vm5, %v8473_v51, %v8475_v10 }
 0xbe2   : > { %8064 = vmatmul.bf16.gmra.mxu3 %v11708_v50  ;;  %8556 = vmatpush.bf16.msra.mxu2 %v16307_v44  ;;  %v8521_v44 = vsel %vm1558_vm5, %v8475_v10, %v8477_v47 }
 0xbe3   : > { %8590 = vmatpush.bf16.msra.mxu3 %v8527_v23  ;;  %8763 = vmatpush.bf16.msra.mxu0 %v8739_v58  ;;  %v11791_v23 = vld [vmem:[%s16693_s10 + $0xb8] sm:$0xff] }
 0xbe4   : > { %8797 = vmatpush.bf16.msra.mxu1 %v8740_v27 }
 0xbe6   : > { %8557 = vmatpush.bf16.msra.mxu2 %v8524_v17  ;;  %v16412_v37 = vpop.f32.mrf.mxu0 }
 0xbe7   : > { %8591 = vmatpush.bf16.msra.mxu3 %v8525_v5  ;;  %8764 = vmatpush.bf16.msra.mxu0 %v8737_v13  ;;  %v8698_v53 = vpop.permute.xlu1 %8697  ;;  %v16417_v18 = vpop.f32.mrf.mxu1 }
 0xbe8   : > { %8798 = vmatpush.bf16.msra.mxu1 %v8738_v32  ;;  %v8696_v20 = vpop.permute.xlu0 %8695 }
 0xbe9   : > { %8235 = vmatmul.bf16.gmra.mxu0 %v11742_v11  ;;  %v8733_v8 = vsel %vm1820_vm6, %v8694_v57, %v8696_v20  ;;  %v8734_v9 = vsel %vm1820_vm6, %v8696_v20, %v8698_v53 }
 0xbea   : > { %8558 = vmatpush.bf16.msra.mxu2 %v8522_v15 }
 0xbeb   : > { %8592 = vmatpush.bf16.msra.mxu3 %v8523_v34  ;;  %8765 = vmatpush.bf16.msra.mxu0 %v8735_v43 }
 0xbec   : > { %8799 = vmatpush.bf16.msra.mxu1 %v8736_v41 }
 0xbed   : > { %8269 = vmatmul.bf16.gmra.mxu1 %v11742_v11 }
 0xbee   : > { %8559 = vmatpush.bf16.msra.mxu2 %v8520_v29  ;;  %v16436_v33 = vpop.f32.mrf.mxu0 }
 0xbef   : > { %8593 = vmatpush.bf16.msra.mxu3 %v8521_v44  ;;  %8766 = vmatpush.bf16.msra.mxu0 %v8733_v8  ;;  %v8692_v62 = vpop.permute.xlu1 %8691  ;;  %v16439_v39 = vpop.f32.mrf.mxu1 }
 0xbf0   : > { %8800 = vmatpush.bf16.msra.mxu1 %v8734_v9  ;;  %v8690_v28 = vpop.permute.xlu0 %8689 }
 0xbf1   : > { %8560 = vmatmul.bf16.vlgmr.msra.gmra.mxu2 %v11759_v48  ;;  %v8731_v25 = vsel %vm1820_vm6, %v8688_v16, %v8690_v28  ;;  %v8732_v2 = vsel %vm1820_vm6, %v8690_v28, %v8692_v62 }
 0xbf2   : > { %8594 = vmatmul.bf16.vlgmr.msra.gmra.mxu3 %v11759_v48 }
 0xbf3   : > { %8767 = vmatpush.bf16.msra.mxu0 %v8731_v25 }
 0xbf4   : > { %8801 = vmatpush.bf16.msra.mxu1 %v8732_v2 }
 0xbf6   : > { %v16443_v3 = vpop.f32.mrf.mxu0 }
 0xbf7   : > { %v8686_v40 = vpop.permute.xlu1 %8685  ;;  %v16445_v45 = vpop.f32.mrf.mxu1 }
 0xbf8   : > { %v8684_v19 = vpop.permute.xlu0 %8683 }
 0xbf9   : > { %v8729_v30 = vsel %vm1820_vm6, %v8682_v4, %v8684_v19  ;;  %v8730_v24 = vsel %vm1820_vm6, %v8684_v19, %v8686_v40 }
 0xbfa   : > { %8768 = vmatpush.bf16.msra.mxu0 %v8729_v30  ;;  %8802 = vmatpush.bf16.msra.mxu1 %v8730_v24 }
 0xbfd   : > { %8769 = vmatmul.bf16.vlgmr.msra.gmra.mxu0 %v11788_v31  ;;  %8803 = vmatmul.bf16.vlgmr.msra.gmra.mxu1 %v11788_v31 }
 0xbfe   : > { %v16455_v26 = vpop.f32.mrf.mxu0 }
 0xbff   : > { %v16457_v61 = vpop.f32.mrf.mxu1 }
 0xc01   : > { %8565 = vmatmul.bf16.gmra.mxu2 %v11760_v42 }
 0xc02   : > { %8599 = vmatmul.bf16.gmra.mxu3 %v11760_v42 }
 0xc06   : > { %v16459_v21 = vpop.f32.mrf.mxu0 }
 0xc07   : > { %v16461_v12 = vpop.f32.mrf.mxu1 }
 0xc0d   : > { %8774 = vmatmul.bf16.gmra.mxu0 %v11789_v36  ;;  %8808 = vmatmul.bf16.gmra.mxu1 %v11789_v36 }
 0xc0e   : > { %v16469_v38 = vpop.f32.mrf.mxu0 }
 0xc0f   : > { %v16471_v1 = vpop.f32.mrf.mxu1 }
 0xc11   : > { %8570 = vmatmul.bf16.gmra.mxu2 %v11761_v46 }
 0xc12   : > { %8604 = vmatmul.bf16.gmra.mxu3 %v11761_v46 }
 0xc16   : > { %v16473_v49 = vpop.f32.mrf.mxu0 }
 0xc17   : > { %v16475_v59 = vpop.f32.mrf.mxu1 }
 0xc1d   : > { %8779 = vmatmul.bf16.gmra.mxu0 %v11790_v22  ;;  %8813 = vmatmul.bf16.gmra.mxu1 %v11790_v22 }
 0xc1e   : > { %v16483_v54 = vpop.f32.mrf.mxu0 }
 0xc1f   : > { %v16485_v60 = vpop.f32.mrf.mxu1 }
 0xc21   : > { %8575 = vmatmul.bf16.gmra.mxu2 %v11762_v52 }
 0xc22   : > { %8609 = vmatmul.bf16.gmra.mxu3 %v11762_v52 }
 0xc24   : > { %v8011_v56 = vpop.f32.mrf.mxu2 }
 0xc25   : > { %v8012_v51 = vadd.f32 %v8011_v56, %v16362_v35  ;;  %v8045_v6 = vpop.f32.mrf.mxu3  ;;  %v11763_v35 = vld [vmem:[%s16693_s10 + $0x98] sm:$0xff] }
 0xc26   : > { %v8046_v50 = vadd.f32 %v8045_v6, %v16365_v7  ;;  %v8216_v63 = vpop.f32.mrf.mxu0 }
 0xc27   : > { %v16489_v14 = vadd.f32 %v8216_v63, %v8012_v51  ;;  %v8250_v47 = vpop.f32.mrf.mxu1 }
 0xc28   : > { %v16491_v10 = vadd.f32 %v8250_v47, %v8046_v50 }
 0xc2c   : > { %v8013_v58 = vpop.f32.mrf.mxu2 }
 0xc2d   : > { %v8014_v27 = vadd.f32 %v8013_v58, %v16386_v55  ;;  %v8047_v57 = vpop.f32.mrf.mxu3  ;;  %8784 = vmatmul.bf16.gmra.mxu0 %v11791_v23  ;;  %8818 = vmatmul.bf16.gmra.mxu1 %v11791_v23 }
 0xc2e   : > { %v8048_v7 = vadd.f32 %v8047_v57, %v16388_v0  ;;  %v8218_v17 = vpop.f32.mrf.mxu0  ;;  %v11792_v0 = vld [vmem:[%s16693_s10 + $0xc0] sm:$0xff] }
 0xc2f   : > { %v16501_v11 = vadd.f32 %v8218_v17, %v8014_v27  ;;  %v8252_v5 = vpop.f32.mrf.mxu1 }
 0xc30   : > { %v16503_v13 = vadd.f32 %v8252_v5, %v8048_v7 }
 0xc31   : > { %8580 = vmatmul.bf16.gmra.mxu2 %v11763_v35 }
 0xc32   : > { %8614 = vmatmul.bf16.gmra.mxu3 %v11763_v35 }
 0xc34   : > { %v8016_v32 = vpop.f32.mrf.mxu2 }
 0xc35   : > { %v8017_v55 = vadd.f32 %v8016_v32, %v16412_v37  ;;  %v8050_v53 = vpop.f32.mrf.mxu3 }
 0xc36   : > { %v8051_v20 = vadd.f32 %v8050_v53, %v16417_v18  ;;  %v8221_v15 = vpop.f32.mrf.mxu0 }
 0xc37   : > { %v16507_v34 = vadd.f32 %v8221_v15, %v8017_v55  ;;  %v8255_v43 = vpop.f32.mrf.mxu1 }
 0xc38   : > { %v16509_v41 = vadd.f32 %v8255_v43, %v8051_v20 }
 0xc3c   : > { %v8018_v29 = vpop.f32.mrf.mxu2 }
 0xc3d   : > { %v8019_v48 = vadd.f32 %v8018_v29, %v16436_v33  ;;  %v8052_v16 = vpop.f32.mrf.mxu3  ;;  %8789 = vmatmul.bf16.gmra.mxu0 %v11792_v0  ;;  %8823 = vmatmul.bf16.gmra.mxu1 %v11792_v0 }
 0xc3e   : > { %v8053_v37 = vadd.f32 %v8052_v16, %v16439_v39  ;;  %v8223_v44 = vpop.f32.mrf.mxu0  ;;  %v8949_v16 = vld [vmem:[%s462_s26] sm:$0x3] }
 0xc3f   : > { %v16516_v18 = vadd.f32 %v8223_v44, %v8019_v48  ;;  %v8257_v8 = vpop.f32.mrf.mxu1 }
 0xc40   : > { %v16518_v9 = vadd.f32 %v8257_v8, %v8053_v37 }
 0xc44   : > { %v8021_v62 = vpop.f32.mrf.mxu2 }
 0xc45   : > { %v8022_v28 = vadd.f32 %v8021_v62, %v16443_v3  ;;  %v8055_v25 = vpop.f32.mrf.mxu3  ;;  %v16563_v62 = vperm.slane %v8949_v16, 0 }
 0xc46   : > { %v8056_v2 = vadd.f32 %v8055_v25, %v16445_v45  ;;  %v8226_v40 = vpop.f32.mrf.mxu0  ;;  %v16565_v25 = vperm.slane %v8949_v16, 1  ;;  %v8933_v16 = vld [vmem:[%s12484_s18 + $0x20] sm:$0xff] }
 0xc47   : > { %v16522_v4 = vadd.f32 %v8226_v40, %v8022_v28  ;;  %v8260_v33 = vpop.f32.mrf.mxu1 }
 0xc48   : > { %v16524_v19 = vadd.f32 %v8260_v33, %v8056_v2  ;;  %v8862_v2 = vpop.permute.xlu2 %8861 }
 0xc4c   : > { %v8023_v30 = vpop.f32.mrf.mxu2 }
 0xc4d   : > { %v8024_v39 = vadd.f32 %v8023_v30, %v16455_v26  ;;  %v8057_v24 = vpop.f32.mrf.mxu3 }
 0xc4e   : > { %v8058_v31 = vadd.f32 %v8057_v24, %v16457_v61  ;;  %v8228_v42 = vpop.f32.mrf.mxu0  ;;  %v8930_v24 = vld [vmem:[%s12484_s18 + $0x8] sm:$0xff] }
 0xc4f   : > { %v16528_v36 = vadd.f32 %v8228_v42, %v8024_v39  ;;  %v8262_v46 = vpop.f32.mrf.mxu1 }
 0xc50   : > { %v16530_v3 = vadd.f32 %v8262_v46, %v8058_v31 }
 0xc54   : > { %v8026_v22 = vpop.f32.mrf.mxu2 }
 0xc55   : > { %v8027_v45 = vadd.f32 %v8026_v22, %v16459_v21  ;;  %v8060_v52 = vpop.f32.mrf.mxu3 }
 0xc56   : > { %v8061_v56 = vadd.f32 %v8060_v52, %v16461_v12  ;;  %v8231_v51 = vpop.f32.mrf.mxu0 }
 0xc57   : > { %v16534_v6 = vadd.f32 %v8231_v51, %v8027_v45 }
 0xc59   : > { %v8265_v50 = vpop.f32.mrf.mxu1 }
 0xc5a   : > { %v16536_v26 = vadd.f32 %v8265_v50, %v8061_v56 }
 0xc5c   : > { %v8028_v63 = vpop.f32.mrf.mxu2 }
 0xc5d   : > { %v8029_v61 = vadd.f32 %v8028_v63, %v16469_v38  ;;  %v8062_v47 = vpop.f32.mrf.mxu3  ;;  %v8867_v63 = vpop.permute.xlu0 %8866 }
 0xc5e   : > { %v8063_v23 = vadd.f32 %v8062_v47, %v16471_v1  ;;  %v8233_v58 = vpop.f32.mrf.mxu0 }
 0xc5f   : > { %v16540_v27 = vadd.f32 %v8233_v58, %v8029_v61 }
 0xc61   : > { %v8267_v57 = vpop.f32.mrf.mxu1 }
 0xc62   : > { %v16542_v21 = vadd.f32 %v8267_v57, %v8063_v23  ;;  %v8932_v57 = vld [vmem:[%s12484_s18 + $0x18] sm:$0xff] }
 0xc64   : > { %v8031_v12 = vpop.f32.mrf.mxu2 }
 0xc65   : > { %v8032_v35 = vadd.f32 %v8031_v12, %v16473_v49  ;;  %v8065_v7 = vpop.f32.mrf.mxu3 }
 0xc66   : > { %v8236_v17 = vpop.f32.mrf.mxu0  ;;  %v8066_v5 = vadd.f32 %v8065_v7, %v16475_v59 }
 0xc67   : > { %v16546_v32 = vadd.f32 %v8236_v17, %v8032_v35 }
 0xc6a   : > { %v8270_v38 = vpop.f32.mrf.mxu1 }
 0xc6b   : > { %v16548_v55 = vadd.f32 %v8270_v38, %v8066_v5 }
 0xc6c   : > { %v8033_v1 = vpop.f32.mrf.mxu2 }
 0xc6d   : > { %v8034_v53 = vadd.f32 %v8033_v1, %v16483_v54  ;;  %v8067_v20 = vpop.f32.mrf.mxu3 }
 0xc6e   : > { %v8238_v15 = vpop.f32.mrf.mxu0  ;;  %v8068_v43 = vadd.f32 %v8067_v20, %v16485_v60 }
 0xc6f   : > { %v16552_v0 = vadd.f32 %v8238_v15, %v8034_v53  ;;  %v8872_v15 = vpop.permute.xlu1 %8871 }
 0xc72   : > { %v8272_v49 = vpop.f32.mrf.mxu1 }
 0xc73   : > { %v16555_v29 = vadd.f32 %v8272_v49, %v8068_v43 }
 0xc74   : > { %v8561_v59 = vpop.f32.mrf.mxu2 }
 0xc75   : > { %v8595_v48 = vpop.f32.mrf.mxu3  ;;  %v8620_v54 = vadd.f32 %v8561_v59, %v16489_v14  ;;  %v8929_v14 = vld [vmem:[%s12484_s18] sm:$0xff] }
 0xc76   : > { %v8621_v60 = vadd.f32 %v8595_v48, %v16491_v10 }
 0xc7a   : > { %v8770_v37 = vpop.f32.mrf.mxu0  ;;  %v8804_v44 = vpop.f32.mrf.mxu1 }
 0xc7b   : > { %v8829_v8 = vadd.f32 %v8770_v37, %v8620_v54  ;;  %v8830_v28 = vadd.f32 %v8804_v44, %v8621_v60  ;;  %v8934_v54 = vld [vmem:[%s12484_s18 + $0x28] sm:$0xff] }
 0xc7c   : > { %v8563_v40 = vpop.f32.mrf.mxu2 }
 0xc7d   : > { %v8909_v33 = vadd.f32 %v8862_v2, %v8829_v8  ;;  %v8910_v30 = vadd.f32 %v8862_v2, %v8830_v28  ;;  %v8597_v39 = vpop.f32.mrf.mxu3  ;;  %v8622_v22 = vadd.f32 %v8563_v40, %v16501_v11  ;;  %v8931_v11 = vld [vmem:[%s12484_s18 + $0x10] sm:$0xff] }
 0xc7e   : > { %v8623_v45 = vadd.f32 %v8597_v39, %v16503_v13 }
 0xc7f   : > { %v8955_v10 = vmul.f32 %v16563_v62, %v8909_v33  ;;  %v8956_v31 = vmul.f32 %v16565_v25, %v8910_v30  ;;  %v8877_v30 = vpop.permute.xlu2 %8876 }
 0xc81   : > { %v8975_v42 = vadd.f32 %v8955_v10, %v8929_v14  ;;  %v8976_v46 = vadd.f32 %v8956_v31, %v8930_v24  ;;  %v8935_v31 = vld [vmem:[%s12484_s18 + $0x30] sm:$0xff] }
 0xc82   : > { %v8772_v52 = vpop.f32.mrf.mxu0  ;;  %v8806_v56 = vpop.f32.mrf.mxu1 }
 0xc83   : > { %8995 = vst [vmem:[%s16575_s0] sm:$0xff] %v8975_v42  ;;  %v8831_v51 = vadd.f32 %v8772_v52, %v8622_v22  ;;  %v8832_v50 = vadd.f32 %v8806_v56, %v8623_v45  ;;  %v8936_v42 = vld [vmem:[%s12484_s18 + $0x38] sm:$0xff] }
 0xc84   : > { %8996 = vst [vmem:[%s16575_s0 + $0x8] sm:$0xff] %v8976_v46  ;;  %v8566_v61 = vpop.f32.mrf.mxu2 }
 0xc85   : > { %v8911_v47 = vadd.f32 %v8867_v63, %v8831_v51  ;;  %v8912_v23 = vadd.f32 %v8867_v63, %v8832_v50  ;;  %v8600_v58 = vpop.f32.mrf.mxu3  ;;  %v8624_v17 = vadd.f32 %v8566_v61, %v16507_v34  ;;  %v8882_v61 = vpop.permute.xlu0 %8881 }
 0xc86   : > { %v8625_v5 = vadd.f32 %v8600_v58, %v16509_v41 }
 0xc87   : > { %v8957_v13 = vmul.f32 %v16563_v62, %v8911_v47  ;;  %v8958_v12 = vmul.f32 %v16565_v25, %v8912_v23 }
 0xc89   : > { %v8977_v35 = vadd.f32 %v8957_v13, %v8931_v11  ;;  %v8978_v7 = vadd.f32 %v8958_v12, %v8932_v57  ;;  %v8937_v57 = vld [vmem:[%s12484_s18 + $0x40] sm:$0xff]  ;;  %v8938_v13 = vld [vmem:[%s12484_s18 + $0x48] sm:$0xff] }
 0xc8a   : > { %v8775_v38 = vpop.f32.mrf.mxu0  ;;  %v8809_v1 = vpop.f32.mrf.mxu1 }
 0xc8b   : > { %8997 = vst [vmem:[%s16575_s0 + $0x10] sm:$0xff] %v8977_v35  ;;  %v8833_v53 = vadd.f32 %v8775_v38, %v8624_v17  ;;  %v8834_v20 = vadd.f32 %v8809_v1, %v8625_v5 }
 0xc8c   : > { %8998 = vst [vmem:[%s16575_s0 + $0x18] sm:$0xff] %v8978_v7  ;;  %v8568_v43 = vpop.f32.mrf.mxu2 }
 0xc8d   : > { %v8913_v49 = vadd.f32 %v8872_v15, %v8833_v53  ;;  %v8914_v59 = vadd.f32 %v8872_v15, %v8834_v20  ;;  %v8602_v48 = vpop.f32.mrf.mxu3  ;;  %v8626_v44 = vadd.f32 %v8568_v43, %v16516_v18  ;;  %v8887_v20 = vpop.permute.xlu1 %8886 }
 0xc8e   : > { %v8627_v8 = vadd.f32 %v8602_v48, %v16518_v9  ;;  %v8939_v48 = vld [vmem:[%s12484_s18 + $0x50] sm:$0xff] }
 0xc8f   : > { %v8959_v60 = vmul.f32 %v16563_v62, %v8913_v49  ;;  %v8960_v34 = vmul.f32 %v16565_v25, %v8914_v59 }
 0xc91   : > { %v8979_v41 = vadd.f32 %v8959_v60, %v8933_v16  ;;  %v8980_v37 = vadd.f32 %v8960_v34, %v8934_v54  ;;  %v8940_v16 = vld [vmem:[%s12484_s18 + $0x58] sm:$0xff] }
 0xc92   : > { %v8777_v28 = vpop.f32.mrf.mxu0  ;;  %v8811_v2 = vpop.f32.mrf.mxu1 }
 0xc93   : > { %8999 = vst [vmem:[%s16575_s0 + $0x20] sm:$0xff] %v8979_v41  ;;  %v8835_v40 = vadd.f32 %v8777_v28, %v8626_v44  ;;  %v8836_v33 = vadd.f32 %v8811_v2, %v8627_v8  ;;  %v8892_v2 = vpop.permute.xlu2 %8891 }
 0xc94   : > { %9000 = vst [vmem:[%s16575_s0 + $0x28] sm:$0xff] %v8980_v37  ;;  %v8571_v39 = vpop.f32.mrf.mxu2 }
 0xc95   : > { %v8915_v14 = vadd.f32 %v8877_v30, %v8835_v40  ;;  %v8916_v24 = vadd.f32 %v8877_v30, %v8836_v33  ;;  %v8605_v10 = vpop.f32.mrf.mxu3  ;;  %v8628_v45 = vadd.f32 %v8571_v39, %v16522_v4 }
 0xc96   : > { %v8629_v52 = vadd.f32 %v8605_v10, %v16524_v19 }
 0xc97   : > { %v8961_v46 = vmul.f32 %v16563_v62, %v8915_v14  ;;  %v8962_v18 = vmul.f32 %v16565_v25, %v8916_v24  ;;  %v8941_v14 = vld [vmem:[%s12484_s18 + $0x60] sm:$0xff]  ;;  %v8942_v24 = vld [vmem:[%s12484_s18 + $0x68] sm:$0xff] }
 0xc99   : > { %v8981_v9 = vadd.f32 %v8961_v46, %v8935_v31  ;;  %v8982_v22 = vadd.f32 %v8962_v18, %v8936_v42 }
 0xc9a   : > { %v8780_v56 = vpop.f32.mrf.mxu0  ;;  %v8814_v51 = vpop.f32.mrf.mxu1 }
 0xc9b   : > { %9001 = vst [vmem:[%s16575_s0 + $0x30] sm:$0xff] %v8981_v9  ;;  %v8837_v50 = vadd.f32 %v8780_v56, %v8628_v45  ;;  %v8838_v63 = vadd.f32 %v8814_v51, %v8629_v52  ;;  %v8897_v52 = vpop.permute.xlu0 %8896 }
 0xc9c   : > { %9002 = vst [vmem:[%s16575_s0 + $0x38] sm:$0xff] %v8982_v22  ;;  %v8573_v47 = vpop.f32.mrf.mxu2 }
 0xc9d   : > { %v8917_v23 = vadd.f32 %v8882_v61, %v8837_v50  ;;  %v8918_v58 = vadd.f32 %v8882_v61, %v8838_v63  ;;  %v8607_v11 = vpop.f32.mrf.mxu3  ;;  %v8630_v7 = vadd.f32 %v8573_v47, %v16528_v36  ;;  %v8943_v61 = vld [vmem:[%s12484_s18 + $0x70] sm:$0xff]  ;;  %v8944_v47 = vld [vmem:[%s12484_s18 + $0x78] sm:$0xff] }
 0xc9e   : > { %v8631_v17 = vadd.f32 %v8607_v11, %v16530_v3 }
 0xc9f   : > { %v8963_v12 = vmul.f32 %v16563_v62, %v8917_v23  ;;  %v8964_v4 = vmul.f32 %v16565_v25, %v8918_v58 }
 0xca1   : > { %v8983_v19 = vadd.f32 %v8963_v12, %v8937_v57  ;;  %v8984_v35 = vadd.f32 %v8964_v4, %v8938_v13 }
 0xca2   : > { %v8782_v5 = vpop.f32.mrf.mxu0  ;;  %v8816_v38 = vpop.f32.mrf.mxu1 }
 0xca3   : > { %9003 = vst [vmem:[%s16575_s0 + $0x40] sm:$0xff] %v8983_v19  ;;  %v8839_v1 = vadd.f32 %v8782_v5, %v8630_v7  ;;  %v8840_v53 = vadd.f32 %v8816_v38, %v8631_v17  ;;  %v8945_v5 = vld [vmem:[%s12484_s18 + $0x80] sm:$0xff]  ;;  %v8946_v38 = vld [vmem:[%s12484_s18 + $0x88] sm:$0xff] }
 0xca4   : > { %9004 = vst [vmem:[%s16575_s0 + $0x48] sm:$0xff] %v8984_v35  ;;  %v8576_v15 = vpop.f32.mrf.mxu2  ;;  %v8902_v35 = vpop.permute.xlu1 %8901 }
 0xca5   : > { %v8919_v43 = vadd.f32 %v8887_v20, %v8839_v1  ;;  %v8920_v49 = vadd.f32 %v8887_v20, %v8840_v53  ;;  %v8610_v59 = vpop.f32.mrf.mxu3  ;;  %v8632_v34 = vadd.f32 %v8576_v15, %v16534_v6 }
 0xca6   : > { %v8633_v41 = vadd.f32 %v8610_v59, %v16536_v26 }
 0xca7   : > { %v8965_v54 = vmul.f32 %v16563_v62, %v8919_v43  ;;  %v8966_v36 = vmul.f32 %v16565_v25, %v8920_v49 }
 0xca9   : > { %v8985_v3 = vadd.f32 %v8965_v54, %v8939_v48  ;;  %v8986_v60 = vadd.f32 %v8966_v36, %v8940_v16  ;;  %v8907_v36 = vpop.permute.xlu2 %8906 }
 0xcaa   : > { %v8785_v37 = vpop.f32.mrf.mxu0  ;;  %v8819_v44 = vpop.f32.mrf.mxu1 }
 0xcab   : > { %9005 = vst [vmem:[%s16575_s0 + $0x50] sm:$0xff] %v8985_v3  ;;  %v8841_v8 = vadd.f32 %v8785_v37, %v8632_v34  ;;  %v8842_v28 = vadd.f32 %v8819_v44, %v8633_v41  ;;  %v8947_v34 = vld [vmem:[%s12484_s18 + $0x90] sm:$0xff] }
 0xcac   : > { %9006 = vst [vmem:[%s16575_s0 + $0x58] sm:$0xff] %v8986_v60  ;;  %v8578_v40 = vpop.f32.mrf.mxu2 }
 0xcad   : > { %v8921_v33 = vadd.f32 %v8892_v2, %v8841_v8  ;;  %v8922_v30 = vadd.f32 %v8892_v2, %v8842_v28  ;;  %v8612_v39 = vpop.f32.mrf.mxu3  ;;  %v8634_v42 = vadd.f32 %v8578_v40, %v16540_v27 }
 0xcae   : > { %v8635_v46 = vadd.f32 %v8612_v39, %v16542_v21 }
 0xcaf   : > { %v8967_v10 = vmul.f32 %v16563_v62, %v8921_v33  ;;  %v8968_v6 = vmul.f32 %v16565_v25, %v8922_v30 }
 0xcb1   : > { %v8987_v26 = vadd.f32 %v8967_v10, %v8941_v14  ;;  %v8988_v31 = vadd.f32 %v8968_v6, %v8942_v24 }
 0xcb2   : > { %v8787_v18 = vpop.f32.mrf.mxu0  ;;  %v8821_v9 = vpop.f32.mrf.mxu1 }
 0xcb3   : > { %9007 = vst [vmem:[%s16575_s0 + $0x60] sm:$0xff] %v8987_v26  ;;  %v8843_v22 = vadd.f32 %v8787_v18, %v8634_v42  ;;  %v8844_v45 = vadd.f32 %v8821_v9, %v8635_v46 }
 0xcb4   : > { %9008 = vst [vmem:[%s16575_s0 + $0x68] sm:$0xff] %v8988_v31  ;;  %v8581_v56 = vpop.f32.mrf.mxu2 }
 0xcb5   : > { %v8923_v51 = vadd.f32 %v8897_v52, %v8843_v22  ;;  %v8924_v50 = vadd.f32 %v8897_v52, %v8844_v45  ;;  %v8615_v63 = vpop.f32.mrf.mxu3  ;;  %v8636_v11 = vadd.f32 %v8581_v56, %v16546_v32 }
 0xcb6   : > { %v8637_v57 = vadd.f32 %v8615_v63, %v16548_v55 }
 0xcb7   : > { %v8969_v27 = vmul.f32 %v16563_v62, %v8923_v51  ;;  %v8970_v21 = vmul.f32 %v16565_v25, %v8924_v50 }
 0xcb9   : > { %v8989_v23 = vadd.f32 %v8969_v27, %v8943_v61  ;;  %v8990_v58 = vadd.f32 %v8970_v21, %v8944_v47 }
 0xcba   : > { %v8790_v13 = vpop.f32.mrf.mxu0  ;;  %v8824_v12 = vpop.f32.mrf.mxu1 }
 0xcbb   : > { %9009 = vst [vmem:[%s16575_s0 + $0x70] sm:$0xff] %v8989_v23  ;;  %v8845_v4 = vadd.f32 %v8790_v13, %v8636_v11  ;;  %v8846_v19 = vadd.f32 %v8824_v12, %v8637_v57 }
 0xcbc   : > { %9010 = vst [vmem:[%s16575_s0 + $0x78] sm:$0xff] %v8990_v58  ;;  %v8583_v1 = vpop.f32.mrf.mxu2 }
 0xcbd   : > { %v8925_v7 = vadd.f32 %v8902_v35, %v8845_v4  ;;  %v8926_v17 = vadd.f32 %v8902_v35, %v8846_v19  ;;  %v8617_v53 = vpop.f32.mrf.mxu3  ;;  %v8638_v43 = vadd.f32 %v8583_v1, %v16552_v0  ;;  %v8948_v0 = vld [vmem:[%s12484_s18 + $0x98] sm:$0xff] }
 0xcbe   : > { %v8639_v49 = vadd.f32 %v8617_v53, %v16555_v29 }
 0xcbf   : > { %v8971_v32 = vmul.f32 %v16563_v62, %v8925_v7  ;;  %v8972_v55 = vmul.f32 %v16565_v25, %v8926_v17 }
 0xcc1   : > { %v8991_v20 = vadd.f32 %v8971_v32, %v8945_v5  ;;  %v8992_v15 = vadd.f32 %v8972_v55, %v8946_v38 }
 0xcc2   : > { %v8792_v59 = vpop.f32.mrf.mxu0  ;;  %v8826_v48 = vpop.f32.mrf.mxu1 }
 0xcc3   : > { %9011 = vst [vmem:[%s16575_s0 + $0x80] sm:$0xff] %v8991_v20  ;;  %v8847_v16 = vadd.f32 %v8792_v59, %v8638_v43  ;;  %v8848_v54 = vadd.f32 %v8826_v48, %v8639_v49 }
 0xcc4   : > { %9012 = vst [vmem:[%s16575_s0 + $0x88] sm:$0xff] %v8992_v15 }
 0xcc5   : > { %v8927_v3 = vadd.f32 %v8907_v36, %v8847_v16  ;;  %v8928_v60 = vadd.f32 %v8907_v36, %v8848_v54 }
 0xcc7   : > { %v8973_v29 = vmul.f32 %v16563_v62, %v8927_v3  ;;  %v8974_v41 = vmul.f32 %v16565_v25, %v8928_v60 }
 0xcc9   : > { %v8993_v37 = vadd.f32 %v8973_v29, %v8947_v34  ;;  %v8994_v44 = vadd.f32 %v8974_v41, %v8948_v0 }
 0xccb   : > { %9013 = vst [vmem:[%s16575_s0 + $0x90] sm:$0xff] %v8993_v37 }
 0xccc   : > { %9014 = vst [vmem:[%s16575_s0 + $0x98] sm:$0xff] %v8994_v44 }
 0xccd   : > { %12221 = shalt.err (!%p12218_p8)
}
 0xcce   : > { %s12275_s28 = smov 256   ;;  %s12276_s0 = smov 16  }
 0xccf   : > { %11814 = dma.vmem_to_hbm [thread:$0]  (%p12380_p5), %s9029_s15, 2560, %s9031_s23, %s9016_s19, %s12275_s28, %s12275_s28, %s12276_s0  }
 0xcd0 PF: > { %p11831_p9 = scmp.ge.s32.totalorder %s12264_s24, 2  ;;  %s9045_s29 = sand.u32 1, %s12252_s21  }
 0xcd1   : > { %s9046_s25 = scalar_lea.sflag [#allocation6], %s9045_s29 }
 0xcd2   : > { %p11824_p10 = pnand %p11831_p9, %p12384_p6 }
 0xcd4   : > { %p11825_p11 = pneg %p11824_p10 }
 0xcd6   : > { %12247 = dma.done.wait (%p11825_p11), %s9046_s25, 2560  }
 0xcd7   : > { %12249 = vsyncadd (%p11825_p11), %s9046_s25, 4294964736  ;;  %s16926_s24 = sld [smem:[#allocation14_spill]]  ;;  %s16929_s21 = smov %s12256_s22 }
 0xcd8   : > { %s16927_s20 = sld [smem:[#allocation13_spill]] }
 0xcd9   : > { %s16928_s23 = sld [smem:[#allocation15_spill]] }
 0xcdd   : > { %p24_p12 = scmp.ge.s32.totalorder %s16926_s24, 4  }
 0xcde   : > { %s16930_s22 = smov %s16927_s20 }
 0xcdf   :  { %26 = sbr.rel (!%p24_p12) target bundleno = 7 (0x7), region = 135 }
 0xce4   :  { %9052 = vsyncpa [#allocation5], 1 }
 0xce5   :  { %9054 = vsyncpa [#allocation5 + $0x1], 1 }
 0xce6   :  { %9055 = vsyncpa [#allocation8], 1 }
 0xce7   :  { %9056 = vsyncpa [#allocation6], 1 }
 0xce8   :  { %9058 = vsyncpa [#allocation6 + $0x1], 1 }

</bundles_post_ra>
